<compile_context>
chip_gen: v7x
topology: tpu7x:2x2x1
jax: 0.10.0
libtpu: 0.0.40
codegen_flags: <defaults>
</compile_context>

<pallas_src>
import jax
import jax.numpy as jnp
from jax import lax
from jax.experimental import pallas as pl
from jax.experimental.pallas import tpu as pltpu


# ---------------------------------------------------------------------------
# In-kernel helpers
# ---------------------------------------------------------------------------
def _conv3x3_stage(u, w9, b2d, crop):
    """One 3x3 conv stage on a zero-extended tile.

    u:   (R, Wu, C)   input (rows include +1 halo on each side, width is extended)
    w9:  (9*C, Cout)  im2col weights, rows ordered (ky, kx, cin)
    b2d: (1, Cout) or None
    Returns (R-2, Wu-2*crop, Cout): 'valid' along rows, crops `crop` columns/side so
    every stage keeps an 8-aligned width (layout-trivial reshapes).
    Output (i, j) gathers u[i+ky, j+crop-1+kx, :].
    """
    R, Wu, C = u.shape
    Ro, Wo = R - 2, Wu - 2 * crop
    taps = []
    for ky in range(3):
        rows = u[ky:ky + Ro]                       # major-dim slice (free)
        for kx in range(3):
            c0 = crop - 1 + kx
            taps.append(rows[:, c0:c0 + Wo, :])    # small sublane-offset slice
    patches = jnp.concatenate(taps, axis=-1)       # (Ro, Wo, 9*C), lane concat
    out = jnp.dot(patches.reshape(Ro * Wo, 9 * C), w9,
                  preferred_element_type=jnp.float32)
    if b2d is not None:
        out = out + b2d
    return out.reshape(Ro, Wo, w9.shape[1])


def _make_kernel(TH, H, W, W0):
    """Kernel closure. Image columns sit at offset 12 in the width-W0 extended frame;
    each conv stage crops 4 columns/side, so offsets are 8 / 4 / 0 after conv1/2/3."""
    CROP = 4

    def kernel(xc_ref, xh_ref, w1_ref, b1_ref, w2_ref, b2_ref, w3_ref, b3_ref,
               out_ref):
        r0 = pl.program_id(1) * TH                 # first output row of this tile
        x_tile = xc_ref[0]                         # (TH, W0, Cin)
        halo = xh_ref[0]                           # (6, W0, Cin): 3 above, 3 below
        xw = jnp.concatenate([halo[0:3], x_tile, halo[3:6]], axis=0)   # (TH+6, W0, Cin)

        def mask_outside_image(v, row_base, col_img_off):
            # Zero everything outside the true image: that is exactly the zero
            # padding the next conv stage expects for this intermediate.
            R, Wv, _ = v.shape
            ri = lax.broadcasted_iota(jnp.int32, (R, Wv, 1), 0) + row_base
            ci = lax.broadcasted_iota(jnp.int32, (R, Wv, 1), 1) - col_img_off
            ok = (ri >= 0) & (ri < H) & (ci >= 0) & (ci < W)
            return jnp.where(ok, v, 0.0)

        # conv1: rows cover global [r0-2, r0+TH+2), image cols at offset 8
        v1 = _conv3x3_stage(xw, w1_ref[...], b1_ref[...], CROP)
        v1 = mask_outside_image(v1, r0 - 2, 8)

        # conv2: rows cover global [r0-1, r0+TH+1), image cols at offset 4
        v2 = _conv3x3_stage(v1, w2_ref[...], b2_ref[...], CROP)
        v2 = mask_outside_image(v2, r0 - 1, 4)

        # conv3 on cat([y2, x], channel): build channel-concatenated tile once and
        # run a single im2col matmul against the unsplit conv3 weight.
        x_mid = xw[2:2 + TH + 2, 8:8 + (W0 - 16), :]      # same frame as v2 (already 0 outside image)
        u3 = jnp.concatenate([v2, x_mid], axis=-1)        # (TH+2, W0-16, Cout+Cin)
        y = _conv3x3_stage(u3, w3_ref[...], b3_ref[...], CROP)
        y = jnp.maximum(y, 0.0)                    # (TH, W0-24, Cout), image cols at 0
        out_ref[0] = y[:, 0:W, :].astype(out_ref.dtype)

    return kernel


# ---------------------------------------------------------------------------
# Wrapper
# ---------------------------------------------------------------------------
def _vmem_capacity_bytes():
    try:
        return int(pltpu.get_tpu_info().vmem_capacity_bytes)
    except Exception:
        return 64 * 1024 * 1024


def _rup(v, m):
    return -(-v // m) * m


def _arr_bytes(major, sub, lane):
    # f32 array as stored with (8, 128) tiling on the last two dims.
    return 4 * major * _rup(sub, 8) * _rup(lane, 128)


def _pick_row_tile(H, W, W0, Cin, Cout, budget):
    Ccat = Cin + Cout

    def est(th):
        b = 0
        # double-buffered pipeline blocks (center, halo, output)
        b += 2 * _arr_bytes(th, W0, Cin) + 2 * _arr_bytes(6, W0, Cin)
        b += 2 * _arr_bytes(th, W, Cout)
        # in-kernel temporaries (rough upper bound: assume coexistence)
        b += _arr_bytes(th + 6, W0, Cin)
        b += _arr_bytes(th + 4, W0 - 8, 9 * Cin) + _arr_bytes(th + 4, W0 - 8, Cout)
        b += _arr_bytes(th + 2, W0 - 16, 9 * Cout) + _arr_bytes(th + 2, W0 - 16, Cout)
        b += _arr_bytes(th + 2, W0 - 16, Ccat)
        b += _arr_bytes(th, W0 - 24, 9 * Ccat) + 2 * _arr_bytes(th, W0 - 24, Cout)
        # resident weights + biases
        b += _arr_bytes(1, 9 * Cin, Cout) + _arr_bytes(1, 9 * Cout, Cout)
        b += _arr_bytes(1, 9 * Ccat, Cout) + 3 * _arr_bytes(1, 1, Cout)
        return b

    for th in (128, 64, 32, 16, 8, 4, 2, 1):
        if H % th == 0 and est(th) <= budget:
            return th
    return 1


def conv_layers_pallas(x, w1, b1, w2, b2, w3, b3, row_tile=None):
    """x: (N, Cin, H, W) NCHW; weights in torch Conv2d layout (O, I, 3, 3); biases (O,)."""
    N, Cin, H, W = x.shape
    Cout = w1.shape[0]
    assert w1.shape == (Cout, Cin, 3, 3)
    assert w2.shape == (Cout, Cout, 3, 3)
    assert w3.shape == (Cout, Cout + Cin, 3, 3), "conv3 must take cat([y2, x]) channels"

    # ---- weights to im2col matmul form: rows ordered (ky, kx, cin) ----
    def to_mm(w):                                  # (O, I, 3, 3) -> (9*I, O)
        return jnp.transpose(w, (2, 3, 1, 0)).reshape(9 * w.shape[1], w.shape[0])

    w1m, w2m, w3m = to_mm(w1), to_mm(w2), to_mm(w3)
    b1m = b1.reshape(1, Cout).astype(jnp.float32)
    b2m = b2.reshape(1, Cout).astype(jnp.float32)
    b3m = b3.reshape(1, Cout).astype(jnp.float32)

    # ---- layout glue: NHWC + zero-extended columns (8-aligned total width) ----
    pL = 12
    W0 = _rup(W + 21, 8)                           # >= pL + W + 9, multiple of 8
    pR = W0 - W - pL
    x_nhwc = jnp.transpose(x, (0, 2, 3, 1)).astype(jnp.float32)
    xpc = jnp.pad(x_nhwc, ((0, 0), (0, 0), (pL, pR), (0, 0)))   # (N, H, W0, Cin)

    # ---- per-generation VMEM budget + row tile ----
    cap = _vmem_capacity_bytes()
    vmem_limit = int(min(cap * 3 // 4, 96 * 1024 * 1024))
    if row_tile is None:
        TH = _pick_row_tile(H, W, W0, Cin, Cout, vmem_limit // 3)
    else:
        TH = int(row_tile)
    assert H % TH == 0, "row tile must divide H"
    nt = H // TH

    # ---- 3-row halos above/below each tile (zeros outside the image) ----
    xpr = jnp.pad(xpc, ((0, 0), (3, 3), (0, 0), (0, 0)))        # (N, H+6, W0, Cin)
    starts = jnp.arange(nt) * TH
    idx = jnp.concatenate(
        [starts[:, None] + jnp.arange(3)[None, :],
         starts[:, None] + TH + 3 + jnp.arange(3)[None, :]], axis=1)   # (nt, 6)
    xh = xpr[:, idx].reshape(N, nt * 6, W0, Cin)                # (N, nt*6, W0, Cin)

    kernel = _make_kernel(TH, H, W, W0)
    grid = (N, nt)

    out_nhwc = pl.pallas_call(
        kernel,
        out_shape=jax.ShapeDtypeStruct((N, H, W, Cout), jnp.float32),
        grid_spec=pltpu.PrefetchScalarGridSpec(
            num_scalar_prefetch=0,
            grid=grid,
            in_specs=[
                pl.BlockSpec((1, TH, W0, Cin), lambda n, t: (n, t, 0, 0)),   # center rows
                pl.BlockSpec((1, 6, W0, Cin), lambda n, t: (n, t, 0, 0)),    # halo rows
                pl.BlockSpec((9 * Cin, Cout), lambda n, t: (0, 0)),          # w1
                pl.BlockSpec((1, Cout), lambda n, t: (0, 0)),                # b1
                pl.BlockSpec((9 * Cout, Cout), lambda n, t: (0, 0)),         # w2
                pl.BlockSpec((1, Cout), lambda n, t: (0, 0)),                # b2
                pl.BlockSpec((9 * (Cout + Cin), Cout), lambda n, t: (0, 0)), # w3 (unsplit)
                pl.BlockSpec((1, Cout), lambda n, t: (0, 0)),                # b3
            ],
            out_specs=pl.BlockSpec((1, TH, W, Cout), lambda n, t: (n, t, 0, 0)),
        ),
        compiler_params=pltpu.CompilerParams(
            dimension_semantics=("parallel", "parallel"),
            vmem_limit_bytes=vmem_limit),
    )(xpc, xh, w1m, b1m, w2m, b2m, w3m, b3m)

    return jnp.transpose(out_nhwc, (0, 3, 1, 2))                # back to NCHW


# ---------------------------------------------------------------------------
# Pure-JAX reference (matches the torch module semantics, NCHW)
# ---------------------------------------------------------------------------
def conv_layers_ref(x, w1, b1, w2, b2, w3, b3):
    def conv(t, w, b):
        return lax.conv_general_dilated(
            t, w, window_strides=(1, 1), padding=((1, 1), (1, 1)),
            dimension_numbers=("NCHW", "OIHW", "NCHW"),
            precision=lax.Precision.HIGHEST) + b[None, :, None, None]

    y = conv(x, w1, b1)
    y = conv(y, w2, b2)
    y = jnp.concatenate([y, x], axis=1)
    y = conv(y, w3, b3)
    return jnp.maximum(y, 0.0)


if __name__ == "__main__":
    N, in_c, out_c = 2, 4, 8
    H = W = 16

    key = jax.random.PRNGKey(0)
    ks = jax.random.split(key, 7)
    x = jax.random.normal(ks[0], (N, in_c, H, W), jnp.float32)
    w1 = jax.random.normal(ks[1], (out_c, in_c, 3, 3), jnp.float32) * 0.2
    b1 = jax.random.normal(ks[2], (out_c,), jnp.float32) * 0.1
    w2 = jax.random.normal(ks[3], (out_c, out_c, 3, 3), jnp.float32) * 0.2
    b2 = jax.random.normal(ks[4], (out_c,), jnp.float32) * 0.1
    w3 = jax.random.normal(ks[5], (out_c, out_c + in_c, 3, 3), jnp.float32) * 0.2
    b3 = jax.random.normal(ks[6], (out_c,), jnp.float32) * 0.1

    ref = conv_layers_ref(x, w1, b1, w2, b2, w3, b3)

    # Explicit row_tile=8 exercises the multi-tile halo/masking path (grid = (2, 2)).
    out = conv_layers_pallas(x, w1, b1, w2, b2, w3, b3, row_tile=8)
    out = jax.block_until_ready(out)
    assert out.shape == ref.shape
    assert jnp.allclose(out, ref, atol=1e-3, rtol=1e-3), "mismatch vs reference (tiled)"

    # Auto tile-selection path (VMEM-budgeted).
    out2 = conv_layers_pallas(x, w1, b1, w2, b2, w3, b3)
    out2 = jax.block_until_ready(out2)
    assert jnp.allclose(out2, ref, atol=1e-3, rtol=1e-3), "mismatch vs reference (auto)"

    print("KERNEL_OK")
</pallas_src>

<mosaic_0001>
module attributes {stable_mosaic.version = 11 : i64} {
  func.func @kernel(%arg0: i32, %arg1: i32, %arg2: memref<1x8x40x4xf32, #tpu.memory_space<vmem>>, %arg3: memref<1x6x40x4xf32, #tpu.memory_space<vmem>>, %arg4: memref<36x8xf32, #tpu.memory_space<vmem>>, %arg5: memref<1x8xf32, #tpu.memory_space<vmem>>, %arg6: memref<72x8xf32, #tpu.memory_space<vmem>>, %arg7: memref<1x8xf32, #tpu.memory_space<vmem>>, %arg8: memref<108x8xf32, #tpu.memory_space<vmem>>, %arg9: memref<1x8xf32, #tpu.memory_space<vmem>>, %arg10: memref<1x8x16x8xf32, #tpu.memory_space<vmem>>) attributes {dimension_semantics = [#tpu.dimension_semantics<parallel>, #tpu.dimension_semantics<parallel>], iteration_bounds = array<i64: 2, 2>, scalar_prefetch = 0 : i64, scratch_operands = 0 : i64, tpu.core_type = #tpu.core_type<tc>, window_params = [{transform_indices = @transform_0, window_bounds = array<i64: 1, 8, 40, 4>}, {transform_indices = @transform_1, window_bounds = array<i64: 1, 6, 40, 4>}, {pipeline_mode = #tpu.pipeline_mode<synchronous>, transform_indices = @transform_2, window_bounds = array<i64: 36, 8>}, {pipeline_mode = #tpu.pipeline_mode<synchronous>, transform_indices = @transform_3, window_bounds = array<i64: 1, 8>}, {pipeline_mode = #tpu.pipeline_mode<synchronous>, transform_indices = @transform_4, window_bounds = array<i64: 72, 8>}, {pipeline_mode = #tpu.pipeline_mode<synchronous>, transform_indices = @transform_5, window_bounds = array<i64: 1, 8>}, {pipeline_mode = #tpu.pipeline_mode<synchronous>, transform_indices = @transform_6, window_bounds = array<i64: 108, 8>}, {pipeline_mode = #tpu.pipeline_mode<synchronous>, transform_indices = @transform_7, window_bounds = array<i64: 1, 8>}, {transform_indices = @transform_8, window_bounds = array<i64: 1, 8, 16, 8>}]} {
    %c8_i32 = arith.constant 8 : i32
    %0 = arith.muli %arg1, %c8_i32 : i32
    %c0 = arith.constant 0 : index
    %c0_0 = arith.constant 0 : index
    %c0_1 = arith.constant 0 : index
    %c0_2 = arith.constant 0 : index
    %1 = vector.load %arg2[%c0, %c0_0, %c0_1, %c0_2] : memref<1x8x40x4xf32, #tpu.memory_space<vmem>>, vector<1x8x40x4xf32>
    %2 = vector.shape_cast %1 : vector<1x8x40x4xf32> to vector<8x40x4xf32>
    %c0_3 = arith.constant 0 : index
    %c0_4 = arith.constant 0 : index
    %c0_5 = arith.constant 0 : index
    %c0_6 = arith.constant 0 : index
    %3 = vector.load %arg3[%c0_3, %c0_4, %c0_5, %c0_6] : memref<1x6x40x4xf32, #tpu.memory_space<vmem>>, vector<1x6x40x4xf32>
    %4 = vector.shape_cast %3 : vector<1x6x40x4xf32> to vector<6x40x4xf32>
    %5 = vector.extract_strided_slice %4 {offsets = [0, 0, 0], sizes = [3, 40, 4], strides = [1, 1, 1]} : vector<6x40x4xf32> to vector<3x40x4xf32>
    %6 = vector.extract_strided_slice %4 {offsets = [3, 0, 0], sizes = [3, 40, 4], strides = [1, 1, 1]} : vector<6x40x4xf32> to vector<3x40x4xf32>
    %7 = tpu.concatenate %5, %2, %6 in 0 : vector<3x40x4xf32>, vector<8x40x4xf32>, vector<3x40x4xf32> -> vector<14x40x4xf32>
    %c0_7 = arith.constant 0 : index
    %c0_8 = arith.constant 0 : index
    %8 = vector.load %arg4[%c0_7, %c0_8] : memref<36x8xf32, #tpu.memory_space<vmem>>, vector<36x8xf32>
    %c0_9 = arith.constant 0 : index
    %c0_10 = arith.constant 0 : index
    %9 = vector.load %arg5[%c0_9, %c0_10] : memref<1x8xf32, #tpu.memory_space<vmem>>, vector<1x8xf32>
    %10 = vector.extract_strided_slice %7 {offsets = [0, 0, 0], sizes = [12, 40, 4], strides = [1, 1, 1]} : vector<14x40x4xf32> to vector<12x40x4xf32>
    %11 = vector.extract_strided_slice %10 {offsets = [0, 3, 0], sizes = [12, 32, 4], strides = [1, 1, 1]} : vector<12x40x4xf32> to vector<12x32x4xf32>
    %12 = vector.extract_strided_slice %10 {offsets = [0, 4, 0], sizes = [12, 32, 4], strides = [1, 1, 1]} : vector<12x40x4xf32> to vector<12x32x4xf32>
    %13 = vector.extract_strided_slice %10 {offsets = [0, 5, 0], sizes = [12, 32, 4], strides = [1, 1, 1]} : vector<12x40x4xf32> to vector<12x32x4xf32>
    %14 = vector.extract_strided_slice %7 {offsets = [1, 0, 0], sizes = [12, 40, 4], strides = [1, 1, 1]} : vector<14x40x4xf32> to vector<12x40x4xf32>
    %15 = vector.extract_strided_slice %14 {offsets = [0, 3, 0], sizes = [12, 32, 4], strides = [1, 1, 1]} : vector<12x40x4xf32> to vector<12x32x4xf32>
    %16 = vector.extract_strided_slice %14 {offsets = [0, 4, 0], sizes = [12, 32, 4], strides = [1, 1, 1]} : vector<12x40x4xf32> to vector<12x32x4xf32>
    %17 = vector.extract_strided_slice %14 {offsets = [0, 5, 0], sizes = [12, 32, 4], strides = [1, 1, 1]} : vector<12x40x4xf32> to vector<12x32x4xf32>
    %18 = vector.extract_strided_slice %7 {offsets = [2, 0, 0], sizes = [12, 40, 4], strides = [1, 1, 1]} : vector<14x40x4xf32> to vector<12x40x4xf32>
    %19 = vector.extract_strided_slice %18 {offsets = [0, 3, 0], sizes = [12, 32, 4], strides = [1, 1, 1]} : vector<12x40x4xf32> to vector<12x32x4xf32>
    %20 = vector.extract_strided_slice %18 {offsets = [0, 4, 0], sizes = [12, 32, 4], strides = [1, 1, 1]} : vector<12x40x4xf32> to vector<12x32x4xf32>
    %21 = vector.extract_strided_slice %18 {offsets = [0, 5, 0], sizes = [12, 32, 4], strides = [1, 1, 1]} : vector<12x40x4xf32> to vector<12x32x4xf32>
    %22 = tpu.concatenate %11, %12, %13, %15, %16, %17, %19, %20, %21 in 2 : vector<12x32x4xf32>, vector<12x32x4xf32>, vector<12x32x4xf32>, vector<12x32x4xf32>, vector<12x32x4xf32>, vector<12x32x4xf32>, vector<12x32x4xf32>, vector<12x32x4xf32>, vector<12x32x4xf32> -> vector<12x32x36xf32>
    %23 = vector.shape_cast %22 : vector<12x32x36xf32> to vector<384x36xf32>
    %cst = arith.constant dense<0.000000e+00> : vector<384x8xf32>
    %24 = tpu.matmul %23, %8, %cst {dimension_numbers = #tpu.dot_dimension_numbers<[1], [0], [0], [1], [0, 0, 1, 1], [], []>} : vector<384x36xf32>, vector<36x8xf32>, vector<384x8xf32> -> vector<384x8xf32>
    %25 = vector.broadcast %9 : vector<1x8xf32> to vector<384x8xf32>
    %26 = arith.addf %24, %25 : vector<384x8xf32>
    %27 = vector.shape_cast %26 : vector<384x8xf32> to vector<12x32x8xf32>
    %c2_i32 = arith.constant 2 : i32
    %28 = arith.subi %0, %c2_i32 : i32
    %29 = tpu.iota {dimensions = array<i32: 0>} : vector<12x32x1xi32>
    %30 = vector.broadcast %28 : i32 to vector<12x32x1xi32>
    %31 = arith.addi %29, %30 : vector<12x32x1xi32>
    %32 = tpu.iota {dimensions = array<i32: 1>} : vector<12x32x1xi32>
    %c8_i32_11 = arith.constant 8 : i32
    %33 = vector.broadcast %c8_i32_11 : i32 to vector<12x32x1xi32>
    %34 = arith.subi %32, %33 : vector<12x32x1xi32>
    %c0_i32 = arith.constant 0 : i32
    %35 = vector.broadcast %c0_i32 : i32 to vector<12x32x1xi32>
    %36 = arith.cmpi sge, %31, %35 : vector<12x32x1xi32>
    %c16_i32 = arith.constant 16 : i32
    %37 = vector.broadcast %c16_i32 : i32 to vector<12x32x1xi32>
    %38 = arith.cmpi slt, %31, %37 : vector<12x32x1xi32>
    %39 = arith.andi %36, %38 : vector<12x32x1xi1>
    %c0_i32_12 = arith.constant 0 : i32
    %40 = vector.broadcast %c0_i32_12 : i32 to vector<12x32x1xi32>
    %41 = arith.cmpi sge, %34, %40 : vector<12x32x1xi32>
    %42 = arith.andi %39, %41 : vector<12x32x1xi1>
    %c16_i32_13 = arith.constant 16 : i32
    %43 = vector.broadcast %c16_i32_13 : i32 to vector<12x32x1xi32>
    %44 = arith.cmpi slt, %34, %43 : vector<12x32x1xi32>
    %45 = arith.andi %42, %44 : vector<12x32x1xi1>
    %cst_14 = arith.constant 0.000000e+00 : f32
    %46 = vector.shape_cast %45 : vector<12x32x1xi1> to vector<12x32x1xi1>
    %47 = vector.broadcast %46 : vector<12x32x1xi1> to vector<12x32x8xi1>
    %48 = vector.broadcast %cst_14 : f32 to vector<12x32x8xf32>
    %49 = arith.select %47, %27, %48 : vector<12x32x8xi1>, vector<12x32x8xf32>
    %c0_15 = arith.constant 0 : index
    %c0_16 = arith.constant 0 : index
    %50 = vector.load %arg6[%c0_15, %c0_16] : memref<72x8xf32, #tpu.memory_space<vmem>>, vector<72x8xf32>
    %c0_17 = arith.constant 0 : index
    %c0_18 = arith.constant 0 : index
    %51 = vector.load %arg7[%c0_17, %c0_18] : memref<1x8xf32, #tpu.memory_space<vmem>>, vector<1x8xf32>
    %52 = vector.extract_strided_slice %49 {offsets = [0, 0, 0], sizes = [10, 32, 8], strides = [1, 1, 1]} : vector<12x32x8xf32> to vector<10x32x8xf32>
    %53 = vector.extract_strided_slice %52 {offsets = [0, 3, 0], sizes = [10, 24, 8], strides = [1, 1, 1]} : vector<10x32x8xf32> to vector<10x24x8xf32>
    %54 = vector.extract_strided_slice %52 {offsets = [0, 4, 0], sizes = [10, 24, 8], strides = [1, 1, 1]} : vector<10x32x8xf32> to vector<10x24x8xf32>
    %55 = vector.extract_strided_slice %52 {offsets = [0, 5, 0], sizes = [10, 24, 8], strides = [1, 1, 1]} : vector<10x32x8xf32> to vector<10x24x8xf32>
    %56 = vector.extract_strided_slice %49 {offsets = [1, 0, 0], sizes = [10, 32, 8], strides = [1, 1, 1]} : vector<12x32x8xf32> to vector<10x32x8xf32>
    %57 = vector.extract_strided_slice %56 {offsets = [0, 3, 0], sizes = [10, 24, 8], strides = [1, 1, 1]} : vector<10x32x8xf32> to vector<10x24x8xf32>
    %58 = vector.extract_strided_slice %56 {offsets = [0, 4, 0], sizes = [10, 24, 8], strides = [1, 1, 1]} : vector<10x32x8xf32> to vector<10x24x8xf32>
    %59 = vector.extract_strided_slice %56 {offsets = [0, 5, 0], sizes = [10, 24, 8], strides = [1, 1, 1]} : vector<10x32x8xf32> to vector<10x24x8xf32>
    %60 = vector.extract_strided_slice %49 {offsets = [2, 0, 0], sizes = [10, 32, 8], strides = [1, 1, 1]} : vector<12x32x8xf32> to vector<10x32x8xf32>
    %61 = vector.extract_strided_slice %60 {offsets = [0, 3, 0], sizes = [10, 24, 8], strides = [1, 1, 1]} : vector<10x32x8xf32> to vector<10x24x8xf32>
    %62 = vector.extract_strided_slice %60 {offsets = [0, 4, 0], sizes = [10, 24, 8], strides = [1, 1, 1]} : vector<10x32x8xf32> to vector<10x24x8xf32>
    %63 = vector.extract_strided_slice %60 {offsets = [0, 5, 0], sizes = [10, 24, 8], strides = [1, 1, 1]} : vector<10x32x8xf32> to vector<10x24x8xf32>
    %64 = tpu.concatenate %53, %54, %55, %57, %58, %59, %61, %62, %63 in 2 : vector<10x24x8xf32>, vector<10x24x8xf32>, vector<10x24x8xf32>, vector<10x24x8xf32>, vector<10x24x8xf32>, vector<10x24x8xf32>, vector<10x24x8xf32>, vector<10x24x8xf32>, vector<10x24x8xf32> -> vector<10x24x72xf32>
    %65 = vector.shape_cast %64 : vector<10x24x72xf32> to vector<240x72xf32>
    %cst_19 = arith.constant dense<0.000000e+00> : vector<240x8xf32>
    %66 = tpu.matmul %65, %50, %cst_19 {dimension_numbers = #tpu.dot_dimension_numbers<[1], [0], [0], [1], [0, 0, 1, 1], [], []>} : vector<240x72xf32>, vector<72x8xf32>, vector<240x8xf32> -> vector<240x8xf32>
    %67 = vector.broadcast %51 : vector<1x8xf32> to vector<240x8xf32>
    %68 = arith.addf %66, %67 : vector<240x8xf32>
    %69 = vector.shape_cast %68 : vector<240x8xf32> to vector<10x24x8xf32>
    %c1_i32 = arith.constant 1 : i32
    %70 = arith.subi %0, %c1_i32 : i32
    %71 = tpu.iota {dimensions = array<i32: 0>} : vector<10x24x1xi32>
    %72 = vector.broadcast %70 : i32 to vector<10x24x1xi32>
    %73 = arith.addi %71, %72 : vector<10x24x1xi32>
    %74 = tpu.iota {dimensions = array<i32: 1>} : vector<10x24x1xi32>
    %c4_i32 = arith.constant 4 : i32
    %75 = vector.broadcast %c4_i32 : i32 to vector<10x24x1xi32>
    %76 = arith.subi %74, %75 : vector<10x24x1xi32>
    %c0_i32_20 = arith.constant 0 : i32
    %77 = vector.broadcast %c0_i32_20 : i32 to vector<10x24x1xi32>
    %78 = arith.cmpi sge, %73, %77 : vector<10x24x1xi32>
    %c16_i32_21 = arith.constant 16 : i32
    %79 = vector.broadcast %c16_i32_21 : i32 to vector<10x24x1xi32>
    %80 = arith.cmpi slt, %73, %79 : vector<10x24x1xi32>
    %81 = arith.andi %78, %80 : vector<10x24x1xi1>
    %c0_i32_22 = arith.constant 0 : i32
    %82 = vector.broadcast %c0_i32_22 : i32 to vector<10x24x1xi32>
    %83 = arith.cmpi sge, %76, %82 : vector<10x24x1xi32>
    %84 = arith.andi %81, %83 : vector<10x24x1xi1>
    %c16_i32_23 = arith.constant 16 : i32
    %85 = vector.broadcast %c16_i32_23 : i32 to vector<10x24x1xi32>
    %86 = arith.cmpi slt, %76, %85 : vector<10x24x1xi32>
    %87 = arith.andi %84, %86 : vector<10x24x1xi1>
    %cst_24 = arith.constant 0.000000e+00 : f32
    %88 = vector.shape_cast %87 : vector<10x24x1xi1> to vector<10x24x1xi1>
    %89 = vector.broadcast %88 : vector<10x24x1xi1> to vector<10x24x8xi1>
    %90 = vector.broadcast %cst_24 : f32 to vector<10x24x8xf32>
    %91 = arith.select %89, %69, %90 : vector<10x24x8xi1>, vector<10x24x8xf32>
    %92 = vector.extract_strided_slice %7 {offsets = [2, 8, 0], sizes = [10, 24, 4], strides = [1, 1, 1]} : vector<14x40x4xf32> to vector<10x24x4xf32>
    %93 = tpu.concatenate %91, %92 in 2 : vector<10x24x8xf32>, vector<10x24x4xf32> -> vector<10x24x12xf32>
    %c0_25 = arith.constant 0 : index
    %c0_26 = arith.constant 0 : index
    %94 = vector.load %arg8[%c0_25, %c0_26] : memref<108x8xf32, #tpu.memory_space<vmem>>, vector<108x8xf32>
    %c0_27 = arith.constant 0 : index
    %c0_28 = arith.constant 0 : index
    %95 = vector.load %arg9[%c0_27, %c0_28] : memref<1x8xf32, #tpu.memory_space<vmem>>, vector<1x8xf32>
    %96 = vector.extract_strided_slice %93 {offsets = [0, 0, 0], sizes = [8, 24, 12], strides = [1, 1, 1]} : vector<10x24x12xf32> to vector<8x24x12xf32>
    %97 = vector.extract_strided_slice %96 {offsets = [0, 3, 0], sizes = [8, 16, 12], strides = [1, 1, 1]} : vector<8x24x12xf32> to vector<8x16x12xf32>
    %98 = vector.extract_strided_slice %96 {offsets = [0, 4, 0], sizes = [8, 16, 12], strides = [1, 1, 1]} : vector<8x24x12xf32> to vector<8x16x12xf32>
    %99 = vector.extract_strided_slice %96 {offsets = [0, 5, 0], sizes = [8, 16, 12], strides = [1, 1, 1]} : vector<8x24x12xf32> to vector<8x16x12xf32>
    %100 = vector.extract_strided_slice %93 {offsets = [1, 0, 0], sizes = [8, 24, 12], strides = [1, 1, 1]} : vector<10x24x12xf32> to vector<8x24x12xf32>
    %101 = vector.extract_strided_slice %100 {offsets = [0, 3, 0], sizes = [8, 16, 12], strides = [1, 1, 1]} : vector<8x24x12xf32> to vector<8x16x12xf32>
    %102 = vector.extract_strided_slice %100 {offsets = [0, 4, 0], sizes = [8, 16, 12], strides = [1, 1, 1]} : vector<8x24x12xf32> to vector<8x16x12xf32>
    %103 = vector.extract_strided_slice %100 {offsets = [0, 5, 0], sizes = [8, 16, 12], strides = [1, 1, 1]} : vector<8x24x12xf32> to vector<8x16x12xf32>
    %104 = vector.extract_strided_slice %93 {offsets = [2, 0, 0], sizes = [8, 24, 12], strides = [1, 1, 1]} : vector<10x24x12xf32> to vector<8x24x12xf32>
    %105 = vector.extract_strided_slice %104 {offsets = [0, 3, 0], sizes = [8, 16, 12], strides = [1, 1, 1]} : vector<8x24x12xf32> to vector<8x16x12xf32>
    %106 = vector.extract_strided_slice %104 {offsets = [0, 4, 0], sizes = [8, 16, 12], strides = [1, 1, 1]} : vector<8x24x12xf32> to vector<8x16x12xf32>
    %107 = vector.extract_strided_slice %104 {offsets = [0, 5, 0], sizes = [8, 16, 12], strides = [1, 1, 1]} : vector<8x24x12xf32> to vector<8x16x12xf32>
    %108 = tpu.concatenate %97, %98, %99, %101, %102, %103, %105, %106, %107 in 2 : vector<8x16x12xf32>, vector<8x16x12xf32>, vector<8x16x12xf32>, vector<8x16x12xf32>, vector<8x16x12xf32>, vector<8x16x12xf32>, vector<8x16x12xf32>, vector<8x16x12xf32>, vector<8x16x12xf32> -> vector<8x16x108xf32>
    %109 = vector.shape_cast %108 : vector<8x16x108xf32> to vector<128x108xf32>
    %cst_29 = arith.constant dense<0.000000e+00> : vector<128x8xf32>
    %110 = tpu.matmul %109, %94, %cst_29 {dimension_numbers = #tpu.dot_dimension_numbers<[1], [0], [0], [1], [0, 0, 1, 1], [], []>} : vector<128x108xf32>, vector<108x8xf32>, vector<128x8xf32> -> vector<128x8xf32>
    %111 = vector.broadcast %95 : vector<1x8xf32> to vector<128x8xf32>
    %112 = arith.addf %110, %111 : vector<128x8xf32>
    %113 = vector.shape_cast %112 : vector<128x8xf32> to vector<8x16x8xf32>
    %cst_30 = arith.constant 0.000000e+00 : f32
    %114 = vector.broadcast %cst_30 : f32 to vector<8x16x8xf32>
    %115 = arith.maximumf %113, %114 : vector<8x16x8xf32>
    %c0_31 = arith.constant 0 : index
    %c0_32 = arith.constant 0 : index
    %c0_33 = arith.constant 0 : index
    %c0_34 = arith.constant 0 : index
    %116 = vector.load %arg10[%c0_31, %c0_32, %c0_33, %c0_34] : memref<1x8x16x8xf32, #tpu.memory_space<vmem>>, vector<1x8x16x8xf32>
    %117 = vector.shape_cast %116 : vector<1x8x16x8xf32> to vector<8x16x8xf32>
    %118 = vector.shape_cast %115 : vector<8x16x8xf32> to vector<1x8x16x8xf32>
    tpu.vector_store %arg10[%c0_31, %c0_32, %c0_33, %c0_34], %118 {strides = array<i32>} : memref<1x8x16x8xf32, #tpu.memory_space<vmem>>, vector<1x8x16x8xf32>,
    return
  }
  func.func @transform_0(%arg0: i32, %arg1: i32) -> (i32, i32, i32, i32) {
    %c0_i32 = arith.constant 0 : i32
    %c0_i32_0 = arith.constant 0 : i32
    %c0_i32_1 = arith.constant 0 : i32
    return %arg0, %arg1, %c0_i32, %c0_i32_0 : i32, i32, i32, i32
  }
  func.func @transform_1(%arg0: i32, %arg1: i32) -> (i32, i32, i32, i32) {
    %c0_i32 = arith.constant 0 : i32
    %c0_i32_0 = arith.constant 0 : i32
    %c0_i32_1 = arith.constant 0 : i32
    return %arg0, %arg1, %c0_i32, %c0_i32_0 : i32, i32, i32, i32
  }
  func.func @transform_2(%arg0: i32, %arg1: i32) -> (i32, i32) {
    %c0_i32 = arith.constant 0 : i32
    %c0_i32_0 = arith.constant 0 : i32
    %c0_i32_1 = arith.constant 0 : i32
    return %c0_i32, %c0_i32_0 : i32, i32
  }
  func.func @transform_3(%arg0: i32, %arg1: i32) -> (i32, i32) {
    %c0_i32 = arith.constant 0 : i32
    %c0_i32_0 = arith.constant 0 : i32
    %c0_i32_1 = arith.constant 0 : i32
    return %c0_i32, %c0_i32_0 : i32, i32
  }
  func.func @transform_4(%arg0: i32, %arg1: i32) -> (i32, i32) {
    %c0_i32 = arith.constant 0 : i32
    %c0_i32_0 = arith.constant 0 : i32
    %c0_i32_1 = arith.constant 0 : i32
    return %c0_i32, %c0_i32_0 : i32, i32
  }
  func.func @transform_5(%arg0: i32, %arg1: i32) -> (i32, i32) {
    %c0_i32 = arith.constant 0 : i32
    %c0_i32_0 = arith.constant 0 : i32
    %c0_i32_1 = arith.constant 0 : i32
    return %c0_i32, %c0_i32_0 : i32, i32
  }
  func.func @transform_6(%arg0: i32, %arg1: i32) -> (i32, i32) {
    %c0_i32 = arith.constant 0 : i32
    %c0_i32_0 = arith.constant 0 : i32
    %c0_i32_1 = arith.constant 0 : i32
    return %c0_i32, %c0_i32_0 : i32, i32
  }
  func.func @transform_7(%arg0: i32, %arg1: i32) -> (i32, i32) {
    %c0_i32 = arith.constant 0 : i32
    %c0_i32_0 = arith.constant 0 : i32
    %c0_i32_1 = arith.constant 0 : i32
    return %c0_i32, %c0_i32_0 : i32, i32
  }
  func.func @transform_8(%arg0: i32, %arg1: i32) -> (i32, i32, i32, i32) {
    %c0_i32 = arith.constant 0 : i32
    %c0_i32_0 = arith.constant 0 : i32
    %c0_i32_1 = arith.constant 0 : i32
    return %arg0, %arg1, %c0_i32, %c0_i32_0 : i32, i32, i32, i32
  }
}

</mosaic_0001>

<bundles_post_ra>
// kernel: tpu_custom_call.1
= control target key start
LH: loop header
LB: loop body
LE: loop exit
PB: predicated region body
PF: predicated region fallthrough
CT: control target
= control target key end

     0   :  { %s8147_s27 = smov 0   ;;  %s8149_s28 = smov 0   ;;  %s15946_s0 = inlined_call_operand.vmem [shape: f32[2,16,40,4], index: 0, kind: input, shape index: {}]   ;;  %s15947_s1 = inlined_call_operand.vmem [shape: f32[2,12,40,4], index: 1, kind: input, shape index: {}]   ;;  %s15948_s2 = inlined_call_operand.vmem [shape: f32[36,8], index: 2, kind: input, shape index: {}]   ;;  %s15949_s3 = inlined_call_operand.vmem [shape: f32[1,8], index: 3, kind: input, shape index: {}]   ;;  %s15950_s4 = inlined_call_operand.vmem [shape: f32[72,8], index: 4, kind: input, shape index: {}]   ;;  %s15951_s5 = inlined_call_operand.vmem [shape: f32[1,8], index: 5, kind: input, shape index: {}]   ;;  %s15952_s6 = inlined_call_operand.vmem [shape: f32[108,8], index: 6, kind: input, shape index: {}]   ;;  %s15953_s7 = inlined_call_operand.vmem [shape: f32[1,8], index: 7, kind: input, shape index: {}]   ;;  %s15954_s8 = inlined_call_operand.vmem [shape: f32[2,16,16,8], index: 8, kind: output, shape index: {}]  }
   0x1   :  { %s8151_s29 = smov 0   ;;  %s8153_s30 = smov 0  }
   0x2   :  { %s8155_s9 = smov 0  }
   0x3 LB: > { %s27_s10 = sadd.s32 1, %s8073_s29  ;;  %s30_s11 = sadd.s32 1, %s8077_s30  ;;  %s8081_s9 = sphi %s8155_s9, %s18_s9   ;;  %s8077_s30 = sphi %s8153_s30, %s18272_s30   ;;  %s8073_s29 = sphi %s8151_s29, %s18271_s29   ;;  %s8069_s28 = sphi %s8149_s28, %s18270_s28   ;;  %s8065_s27 = sphi %s8147_s27, %s18269_s27  }
   0x4   : > { %p28_p0 = scmp.ge.s32.totalorder %s27_s10, 2  ;;  %p7149_p1 = scmp.ge.s32.totalorder %s8081_s9, 1 }
   0x5   : > { %p302_p2 = scmp.lt.s32.totalorder %s8081_s9, 5 }
   0x6   : > { %s18274_s10 = smov (%p28_p0, %s27_s10), 0  ;;  %s18276_s11 = smov (!%p28_p0, %s30_s11), %s8077_s30 }
   0x7   : > { %p303_p3 = pnand %p7149_p1, %p302_p2  ;;  %p32_p4 = scmp.ge.s32.totalorder %s18276_s11, 2 }
   0x9   : > { %s18278_s11 = smov (%p32_p4, %s18276_s11), 0  ;;  %306 = sbr.rel (%p303_p3) target bundleno = 2779 (0xadb), region = 52 }
  0x10   : > { %p357_p5 = scmp.lt.s32.totalorder %s8069_s28, 1  ;;  %s367_s12 = smul.u32 6, %s8065_s27  ;;  %vm526_vm0 = vcmask 1046528   ;;  %vm815_vm1 = vcmask 1045504   ;;  %vm2990_vm2 = vcmask 1043456   ;;  %vm2230_vm3 = vcmask 31744  }
  0x11   : > { %s8180_s16 = sshll.u32 %s8065_s27, 3  ;;  %s8083_s21 = smov 4   ;;  %vm2291_vm4 = vcmask 64512   ;;  %vm2352_vm5 = vcmask 97280   ;;  %vm2413_vm6 = vcmask 130048   ;;  %vm2474_vm7 = vcmask 162816  }
  0x12   : > { %s18280_s28 = smov (!%p357_p5, %s8069_s28), 1  ;;  %p370_p6 = scmp.lt.s32.totalorder %s367_s12, 11  ;;  %vm2535_vm8 = vcmask 195584   ;;  %vm2596_vm9 = vcmask 228352   ;;  %vm2657_vm10 = vcmask 261120   ;;  %vm16337_vm11 = vcmask 1044480  }
  0x13   : > { %s7643_s13 = smul.u32 60, %s18280_s28  ;;  %p359_p7 = scmp.lt.s32.totalorder %s8180_s16, 15  ;;  %vm2893_vm12 = vcmask 293888  }
  0x14   : > { %s18282_s12 = smov (!%p370_p6, %s367_s12), 11  ;;  %s7641_s24 = smul.u32 80, %s18280_s28 }
  0x15   : > { %s7642_s14 = smul.u32 5, %s18282_s12  ;;  %s8087_s18 = smov 20  }
  0x16   : > { %s8219_s22 = scalar_select %p359_p7, %s8180_s16, 15 }
  0x17   : > { %s374_s15 = sadd.s32 %s7643_s13, %s7642_s14  ;;  %s8084_s14 = smov 8  }
  0x18   : > { %s7152_s17 = sshll.u32 %s374_s15, 3  ;;  %s7640_s23 = smul.u32 5, %s8219_s22 }
  0x19   : > { %s8185_s20 = scalar_lea.vmem %s15947_s1, %s7152_s17  ;;  %s8085_s15 = smov 12  }
  0x1a   : > { %v8188_v0 = vld [vmem:[%s8185_s20 + $0x20] sm:$0xff]  ;;  %v8192_v1 = vld [vmem:[%s8185_s20 + $0x10] sm:$0xff]  ;;  %v8195_v2 = vld [vmem:[%s8185_s20 + $0x18] sm:$0xff]  ;;  %s363_s25 = sadd.s32 %s7641_s24, %s7640_s23  ;;  %s8086_s17 = smov 16  }
  0x1b   : > { %v534_v3 = vrot.slane %v8188_v0, 1  ;;  %v530_v4 = vrot.slane %v8192_v1, 1  ;;  %v532_v5 = vrot.slane %v8195_v2, 1  ;;  %v8201_v6 = vld [vmem:[%s8185_s20] sm:$0xff]  ;;  %v8204_v7 = vld [vmem:[%s8185_s20 + $0x8] sm:$0xff]  ;;  %v8212_v11 = vld [vmem:[%s8185_s20 + $0x30] sm:$0xff] }
  0x1c   : > { %v527_v8 = vrot.slane %v8201_v6, 1  ;;  %v528_v9 = vrot.slane %v8204_v7, 1  ;;  %v8209_v10 = vld [vmem:[%s8185_s20 + $0x28] sm:$0xff]  ;;  %v537_v16 = vrot.slane %v8212_v11, 1  ;;  %v8227_v17 = vld [vmem:[%s8185_s20 + $0x38] sm:$0xff]  ;;  %v8230_v18 = vld [vmem:[%s8185_s20 + $0x40] sm:$0xff] }
  0x1d   : > { %643 = vrot.lane.b32.xlu0 %v534_v3, %s8083_s21  ;;  %v533_v12 = vsel %vm526_vm0, %v530_v4, %v532_v5  ;;  %v535_v14 = vsel %vm526_vm0, %v532_v5, %v534_v3  ;;  %v536_v15 = vrot.slane %v8209_v10, 1  ;;  %v539_v20 = vrot.slane %v8227_v17, 1  ;;  %v8243_v23 = vld [vmem:[%s8185_s20 + $0x48] sm:$0xff]  ;;  %v8258_v27 = vld [vmem:[%s8185_s20 + $0x50] sm:$0xff]  ;;  %v8261_v28 = vld [vmem:[%s8185_s20 + $0x58] sm:$0xff]  ;;  %s7151_s26 = sshll.u32 %s363_s25, 3 }
  0x1e   : > { %639 = vrot.lane.b32.xlu1 %v533_v12, %s8083_s21  ;;  %v529_v13 = vsel %vm526_vm0, %v527_v8, %v528_v9  ;;  %v531_v19 = vsel %vm526_vm0, %v528_v9, %v530_v4  ;;  %v541_v22 = vrot.slane %v8230_v18, 1  ;;  %v8252_v25 = vrot.slane %v8243_v23, 1  ;;  %v8264_v29 = vld [vmem:[%s8185_s20 + $0x60] sm:$0xff]  ;;  %v8278_v34 = vld [vmem:[%s8185_s20 + $0x68] sm:$0xff]  ;;  %v8281_v35 = vld [vmem:[%s8185_s20 + $0x70] sm:$0xff]  ;;  %s8286_s13 = scalar_lea.vmem %s15946_s0, %s7151_s26  ;;  %s8088_s19 = smov 24  }
  0x1f   : > { %v8239_v21 = vsel %vm526_vm0, %v536_v15, %v537_v16  ;;  %v8249_v24 = vsel %vm526_vm0, %v537_v16, %v539_v20  ;;  %v545_v31 = vrot.slane %v8258_v27, 1  ;;  %v546_v32 = vrot.slane %v8261_v28, 1  ;;  %v8303_v40 = vld [vmem:[%s8286_s13] sm:$0xff]  ;;  %v8306_v41 = vld [vmem:[%s8286_s13 + $0x8] sm:$0xff]  ;;  %v8322_v46 = vld [vmem:[%s8286_s13 + $0x10] sm:$0xff]  ;;  %s8090_s26 = smov 32  }
  0x20   : > { %16376 = vst [vmem:[#allocation2_spill] sm:$0xff] %v8239_v21  ;;  %16377 = vst [vmem:[#allocation3_spill] sm:$0xff] %v8249_v24  ;;  %v8255_v26 = vsel %vm526_vm0, %v539_v20, %v541_v22  ;;  %v8272_v30 = vsel %vm526_vm0, %v541_v22, %v8252_v25  ;;  %v548_v33 = vrot.slane %v8264_v29, 1  ;;  %v550_v37 = vrot.slane %v8278_v34, 1  ;;  %v8325_v47 = vld [vmem:[%s8286_s13 + $0x18] sm:$0xff]  ;;  %v8337_v51 = vld [vmem:[%s8286_s13 + $0x20] sm:$0xff] }
  0x21   : > { %635 = vrot.lane.b32.xlu0 %v529_v13, %s8083_s21  ;;  %16378 = vst [vmem:[#allocation4_spill] sm:$0xff] %v8252_v25  ;;  %16379 = vst [vmem:[#allocation5_spill] sm:$0xff] %v8255_v26  ;;  %v8293_v36 = vsel %vm526_vm0, %v545_v31, %v546_v32  ;;  %v8300_v39 = vrot.slane %v8281_v35, 1  ;;  %v554_v44 = vrot.slane %v8303_v40, 1  ;;  %v555_v45 = vrot.slane %v8306_v41, 1  ;;  %v8353_v55 = vld [vmem:[%s8286_s13 + $0x28] sm:$0xff] }
  0x22   : > { %641 = vrot.lane.b32.xlu1 %v535_v14, %s8083_s21  ;;  %16380 = vst [vmem:[#allocation6_spill] sm:$0xff] %v8272_v30  ;;  %16381 = vst [vmem:[#allocation7_spill] sm:$0xff] %v8293_v36  ;;  %v8297_v38 = vsel %vm526_vm0, %v546_v32, %v548_v33  ;;  %v8313_v42 = vsel %vm526_vm0, %v548_v33, %v550_v37  ;;  %v557_v48 = vrot.slane %v8322_v46, 1  ;;  %v559_v50 = vrot.slane %v8325_v47, 1  ;;  %v8356_v56 = vld [vmem:[%s8286_s13 + $0x30] sm:$0xff]  ;;  %v8359_v57 = vld [vmem:[%s8286_s13 + $0x38] sm:$0xff] }
  0x23   : > { %16382 = vst [vmem:[#allocation8_spill] sm:$0xff] %v8297_v38  ;;  %16383 = vst [vmem:[#allocation9_spill] sm:$0xff] %v8300_v39  ;;  %v8317_v43 = vsel %vm526_vm0, %v550_v37, %v8300_v39  ;;  %v8333_v49 = vsel %vm526_vm0, %v554_v44, %v555_v45  ;;  %v8347_v53 = vrot.slane %v8337_v51, 1  ;;  %v563_v59 = vrot.slane %v8353_v55, 1  ;;  %v8373_v62 = vld [vmem:[%s8286_s13 + $0x40] sm:$0xff]  ;;  %v8376_v63 = vld [vmem:[%s8286_s13 + $0x48] sm:$0xff] }
  0x24   : > { %16384 = vst [vmem:[#allocation10_spill] sm:$0xff] %v8313_v42  ;;  %16385 = vst [vmem:[#allocation11_spill] sm:$0xff] %v8317_v43  ;;  %v8344_v52 = vsel %vm526_vm0, %v555_v45, %v557_v48  ;;  %v8350_v54 = vsel %vm526_vm0, %v557_v48, %v559_v50  ;;  %v564_v60 = vrot.slane %v8356_v56, 1  ;;  %v566_v61 = vrot.slane %v8359_v57, 1  ;;  %v8393_v9 = vld [vmem:[%s8286_s13 + $0x50] sm:$0xff]  ;;  %v8396_v12 = vld [vmem:[%s8286_s13 + $0x58] sm:$0xff] }
  0x25   : > { %637 = vrot.lane.b32.xlu0 %v531_v19, %s8083_s21  ;;  %16386 = vst [vmem:[#allocation12_spill] sm:$0xff] %v8333_v49  ;;  %16387 = vst [vmem:[#allocation13_spill] sm:$0xff] %v8344_v52  ;;  %v8367_v58 = vsel %vm526_vm0, %v559_v50, %v8347_v53  ;;  %v568_v4 = vrot.slane %v8373_v62, 1  ;;  %v8390_v8 = vrot.slane %v8376_v63, 1  ;;  %v572_v15 = vrot.slane %v8393_v9, 1  ;;  %v8412_v19 = vld [vmem:[%s8286_s13 + $0x60] sm:$0xff] }
  0x26   : > { %645 = vrot.lane.b32.xlu1 %v8239_v21, %s8083_s21  ;;  %16388 = vst [vmem:[#allocation14_spill] sm:$0xff] %v8347_v53  ;;  %16389 = vst [vmem:[#allocation15_spill] sm:$0xff] %v8350_v54  ;;  %v8383_v3 = vsel %vm526_vm0, %v563_v59, %v564_v60  ;;  %v8387_v5 = vsel %vm526_vm0, %v564_v60, %v566_v61  ;;  %v573_v16 = vrot.slane %v8396_v12, 1  ;;  %v8415_v20 = vld [vmem:[%s8286_s13 + $0x68] sm:$0xff]  ;;  %v575_v22 = vrot.slane %v8412_v19, 1  ;;  %v8427_v33 = vld [vmem:[%s8286_s13 + $0x70] sm:$0xff] }
  0x27   : > { %16390 = vst [vmem:[#allocation16_spill] sm:$0xff] %v8367_v58  ;;  %16391 = vst [vmem:[#allocation17_spill] sm:$0xff] %v8383_v3  ;;  %v8403_v13 = vsel %vm526_vm0, %v566_v61, %v568_v4  ;;  %v8407_v14 = vsel %vm526_vm0, %v568_v4, %v8390_v8  ;;  %v577_v32 = vrot.slane %v8415_v20, 1  ;;  %v8437_v44 = vrot.slane %v8427_v33, 1  ;;  %v8443_v48 = vld [vmem:[%s8286_s13 + $0x78] sm:$0xff]  ;;  %v8446_v50 = vld [vmem:[%s8286_s13 + $0x80] sm:$0xff] }
  0x28   : > { %16392 = vst [vmem:[#allocation18_spill] sm:$0xff] %v8387_v5  ;;  %16393 = vst [vmem:[#allocation19_spill] sm:$0xff] %v8390_v8  ;;  %v8423_v31 = vsel %vm526_vm0, %v572_v15, %v573_v16  ;;  %v8434_v37 = vsel %vm526_vm0, %v573_v16, %v575_v22  ;;  %v8449_v59 = vld [vmem:[%s8286_s13 + $0x88] sm:$0xff]  ;;  %v581_v61 = vrot.slane %v8443_v48, 1  ;;  %v582_v4 = vrot.slane %v8446_v50, 1  ;;  %v8463_v16 = vld [vmem:[%s8286_s13 + $0x90] sm:$0xff] }
  0x29   : > { %647 = vrot.lane.b32.xlu0 %v8249_v24, %s8083_s21  ;;  %16394 = vst [vmem:[#allocation20_spill] sm:$0xff] %v8403_v13  ;;  %16395 = vst [vmem:[#allocation21_spill] sm:$0xff] %v8407_v14  ;;  %v8440_v45 = vsel %vm526_vm0, %v575_v22, %v577_v32  ;;  %v8457_v60 = vsel %vm526_vm0, %v577_v32, %v8437_v44  ;;  %v584_v15 = vrot.slane %v8449_v59, 1  ;;  %v8466_v22 = vld [vmem:[%s8286_s13 + $0x98] sm:$0xff]  ;;  %s8094_s23 = smov 56   ;;  %s8099_s25 = smov 84  }
  0x2a   : > { %649 = vrot.lane.b32.xlu1 %v8255_v26, %s8083_s21  ;;  %16396 = vst [vmem:[#allocation22_spill] sm:$0xff] %v8423_v31  ;;  %16397 = vst [vmem:[#allocation23_spill] sm:$0xff] %v8434_v37  ;;  %v8473_v32 = vsel %vm526_vm0, %v581_v61, %v582_v4  ;;  %v8643_v26 = vld [vmem:[%s8286_s13 + $0x130] sm:$0xff]  ;;  %v8646_v24 = vld [vmem:[%s8286_s13 + $0x138] sm:$0xff] }
  0x2b   : > { %16398 = vst [vmem:[#allocation24_spill] sm:$0xff] %v8437_v44  ;;  %16399 = vst [vmem:[#allocation25_spill] sm:$0xff] %v8440_v45  ;;  %v8660_v21 = vrot.slane %v8646_v24, 1 }
  0x2c   : > { %16400 = vst [vmem:[#allocation26_spill] sm:$0xff] %v8457_v60  ;;  %16401 = vst [vmem:[#allocation27_spill] sm:$0xff] %v8473_v32 }
  0x2d   : > { %651 = vrot.lane.b32.xlu0 %v8272_v30, %s8083_s21  ;;  %v8629_v30 = vld [vmem:[%s8286_s13 + $0x128] sm:$0xff]  ;;  %16423 = vst [vmem:[#allocation49_spill] sm:$0xff] %v8643_v26  ;;  %16424 = vst [vmem:[#allocation50_spill] sm:$0xff] %v8646_v24 }
  0x2e   : > { %653 = vrot.lane.b32.xlu1 %v8252_v25, %s8083_s21  ;;  %v8626_v25 = vld [vmem:[%s8286_s13 + $0x120] sm:$0xff]  ;;  %16421 = vst [vmem:[#allocation47_spill] sm:$0xff] %v8629_v30  ;;  %16427 = vst [vmem:[#allocation53_spill] sm:$0xff] %v8660_v21  ;;  %v8682_v24 = vld [vmem:[%s8185_s20 + $0x88] sm:$0xff] }
  0x2f   : > { %16420 = vst [vmem:[#allocation46_spill] sm:$0xff] %v8626_v25  ;;  %16431 = vst [vmem:[#allocation57_spill] sm:$0xff] %v8682_v24 }
  0x31   : > { %655 = vrot.lane.b32.xlu0 %v8293_v36, %s8083_s21  ;;  %v8623_v36 = vld [vmem:[%s8286_s13 + $0x118] sm:$0xff] }
  0x32   : > { %657 = vrot.lane.b32.xlu1 %v8297_v38, %s8083_s21  ;;  %v8607_v38 = vld [vmem:[%s8286_s13 + $0x110] sm:$0xff] }
  0x35   : > { %659 = vrot.lane.b32.xlu0 %v8313_v42, %s8083_s21  ;;  %v8592_v42 = vld [vmem:[%s8286_s13 + $0x100] sm:$0xff] }
  0x36   : > { %661 = vrot.lane.b32.xlu1 %v8317_v43, %s8083_s21  ;;  %v8576_v43 = vld [vmem:[%s8286_s13 + $0xf8] sm:$0xff] }
  0x39   : > { %663 = vrot.lane.b32.xlu0 %v8300_v39, %s8083_s21  ;;  %v8573_v39 = vld [vmem:[%s8286_s13 + $0xf0] sm:$0xff] }
  0x3a   : > { %665 = vrot.lane.b32.xlu1 %v8333_v49, %s8083_s21 }
  0x3d   : > { %667 = vrot.lane.b32.xlu0 %v8344_v52, %s8083_s21  ;;  %v8556_v52 = vld [vmem:[%s8286_s13 + $0xe8] sm:$0xff] }
  0x3e   : > { %669 = vrot.lane.b32.xlu1 %v8350_v54, %s8083_s21  ;;  %v8553_v54 = vld [vmem:[%s8286_s13 + $0xe0] sm:$0xff]  ;;  %v8570_v49 = vrot.slane %v8556_v52, 1 }
  0x40   : > { %16413 = vst [vmem:[#allocation39_spill] sm:$0xff] %v8570_v49 }
  0x41   : > { %671 = vrot.lane.b32.xlu0 %v8367_v58, %s8083_s21  ;;  %v8539_v58 = vld [vmem:[%s8286_s13 + $0xd8] sm:$0xff] }
  0x42   : > { %673 = vrot.lane.b32.xlu1 %v8347_v53, %s8083_s21  ;;  %v8536_v53 = vld [vmem:[%s8286_s13 + $0xd0] sm:$0xff] }
  0x45   : > { %675 = vrot.lane.b32.xlu0 %v8383_v3, %s8083_s21  ;;  %v8533_v3 = vld [vmem:[%s8286_s13 + $0xc8] sm:$0xff] }
  0x46   : > { %677 = vrot.lane.b32.xlu1 %v8387_v5, %s8083_s21  ;;  %v8517_v5 = vld [vmem:[%s8286_s13 + $0xc0] sm:$0xff] }
  0x49   : > { %679 = vrot.lane.b32.xlu0 %v8403_v13, %s8083_s21  ;;  %v8502_v13 = vld [vmem:[%s8286_s13 + $0xb0] sm:$0xff] }
  0x4a   : > { %681 = vrot.lane.b32.xlu1 %v8407_v14, %s8083_s21  ;;  %v8486_v14 = vld [vmem:[%s8286_s13 + $0xa8] sm:$0xff] }
  0x4d   : > { %683 = vrot.lane.b32.xlu0 %v8390_v8, %s8083_s21  ;;  %v8483_v8 = vld [vmem:[%s8286_s13 + $0xa0] sm:$0xff] }
  0x4e   : > { %685 = vrot.lane.b32.xlu1 %v8423_v31, %s8083_s21  ;;  %v8480_v31 = vrot.slane %v8466_v22, 1 }
  0x50   : > { %16403 = vst [vmem:[#allocation29_spill] sm:$0xff] %v8480_v31 }
  0x51   : > { %687 = vrot.lane.b32.xlu0 %v8434_v37, %s8083_s21  ;;  %v8477_v37 = vsel %vm526_vm0, %v582_v4, %v584_v15 }
  0x52   : > { %689 = vrot.lane.b32.xlu1 %v8440_v45, %s8083_s21  ;;  %v586_v45 = vrot.slane %v8463_v16, 1  ;;  %16402 = vst [vmem:[#allocation28_spill] sm:$0xff] %v8477_v37 }
  0x54   : > { %v8493_v61 = vsel %vm526_vm0, %v584_v15, %v586_v45  ;;  %v8497_v4 = vsel %vm526_vm0, %v586_v45, %v8480_v31  ;;  %v593_v45 = vrot.slane %v8502_v13, 1 }
  0x55   : > { %691 = vrot.lane.b32.xlu0 %v8457_v60, %s8083_s21  ;;  %16404 = vst [vmem:[#allocation30_spill] sm:$0xff] %v8493_v61  ;;  %16405 = vst [vmem:[#allocation31_spill] sm:$0xff] %v8497_v4  ;;  %v591_v60 = vrot.slane %v8486_v14, 1 }
  0x56   : > { %693 = vrot.lane.b32.xlu1 %v8437_v44, %s8083_s21  ;;  %v590_v44 = vrot.slane %v8483_v8, 1 }
  0x58   : > { %v8513_v15 = vsel %vm526_vm0, %v590_v44, %v591_v60 }
  0x59   : > { %695 = vrot.lane.b32.xlu0 %v8473_v32, %s8083_s21  ;;  %v8505_v32 = vld [vmem:[%s8286_s13 + $0xb8] sm:$0xff]  ;;  %16406 = vst [vmem:[#allocation32_spill] sm:$0xff] %v8513_v15 }
  0x5a   : > { %697 = vrot.lane.b32.xlu1 %v8477_v37, %s8083_s21  ;;  %v595_v37 = vrot.slane %v8505_v32, 1 }
  0x5c   : > { %v8530_v44 = vsel %vm526_vm0, %v593_v45, %v595_v37 }
  0x5d   : > { %699 = vrot.lane.b32.xlu0 %v8493_v61, %s8083_s21  ;;  %v8524_v61 = vsel %vm526_vm0, %v591_v60, %v593_v45  ;;  %16409 = vst [vmem:[#allocation35_spill] sm:$0xff] %v8530_v44  ;;  %v599_v45 = vrot.slane %v8533_v3, 1 }
  0x5e   : > { %701 = vrot.lane.b32.xlu1 %v8497_v4, %s8083_s21  ;;  %16407 = vst [vmem:[#allocation33_spill] sm:$0xff] %v8524_v61  ;;  %v8527_v4 = vrot.slane %v8517_v5, 1 }
  0x60   : > { %16408 = vst [vmem:[#allocation34_spill] sm:$0xff] %v8527_v4  ;;  %v8547_v60 = vsel %vm526_vm0, %v595_v37, %v8527_v4 }
  0x61   : > { %703 = vrot.lane.b32.xlu0 %v8480_v31, %s8083_s21  ;;  %16410 = vst [vmem:[#allocation36_spill] sm:$0xff] %v8547_v60  ;;  %v602_v31 = vrot.slane %v8539_v58, 1 }
  0x62   : > { %705 = vrot.lane.b32.xlu1 %v8513_v15, %s8083_s21  ;;  %v600_v15 = vrot.slane %v8536_v53, 1 }
  0x64   : > { %v8563_v37 = vsel %vm526_vm0, %v599_v45, %v600_v15 }
  0x65   : > { %707 = vrot.lane.b32.xlu0 %v8524_v61, %s8083_s21  ;;  %16411 = vst [vmem:[#allocation37_spill] sm:$0xff] %v8563_v37  ;;  %v8567_v61 = vsel %vm526_vm0, %v600_v15, %v602_v31 }
  0x66   : > { %709 = vrot.lane.b32.xlu1 %v8530_v44, %s8083_s21  ;;  %v604_v44 = vrot.slane %v8553_v54, 1  ;;  %16412 = vst [vmem:[#allocation38_spill] sm:$0xff] %v8567_v61 }
  0x68   : > { %v8583_v45 = vsel %vm526_vm0, %v602_v31, %v604_v44  ;;  %v8587_v15 = vsel %vm526_vm0, %v604_v44, %v8570_v49  ;;  %v611_v31 = vrot.slane %v8592_v42, 1 }
  0x69   : > { %711 = vrot.lane.b32.xlu0 %v8547_v60, %s8083_s21  ;;  %16414 = vst [vmem:[#allocation40_spill] sm:$0xff] %v8583_v45  ;;  %16415 = vst [vmem:[#allocation41_spill] sm:$0xff] %v8587_v15  ;;  %v609_v60 = vrot.slane %v8576_v43, 1 }
  0x6a   : > { %713 = vrot.lane.b32.xlu1 %v8527_v4, %s8083_s21  ;;  %v608_v4 = vrot.slane %v8573_v39, 1 }
  0x6c   : > { %v8603_v44 = vsel %vm526_vm0, %v608_v4, %v609_v60 }
  0x6d   : > { %715 = vrot.lane.b32.xlu0 %v8563_v37, %s8083_s21  ;;  %v8595_v37 = vld [vmem:[%s8286_s13 + $0x108] sm:$0xff]  ;;  %16416 = vst [vmem:[#allocation42_spill] sm:$0xff] %v8603_v44 }
  0x6e   : > { %717 = vrot.lane.b32.xlu1 %v8567_v61, %s8083_s21  ;;  %v613_v61 = vrot.slane %v8595_v37, 1 }
  0x70   : > { %v8620_v4 = vsel %vm526_vm0, %v611_v31, %v613_v61 }
  0x71   : > { %719 = vrot.lane.b32.xlu0 %v8583_v45, %s8083_s21  ;;  %v8614_v45 = vsel %vm526_vm0, %v609_v60, %v611_v31  ;;  %16419 = vst [vmem:[#allocation45_spill] sm:$0xff] %v8620_v4  ;;  %v617_v31 = vrot.slane %v8623_v36, 1 }
  0x72   : > { %721 = vrot.lane.b32.xlu1 %v8587_v15, %s8083_s21  ;;  %16417 = vst [vmem:[#allocation43_spill] sm:$0xff] %v8614_v45  ;;  %v8617_v15 = vrot.slane %v8607_v38, 1 }
  0x74   : > { %16418 = vst [vmem:[#allocation44_spill] sm:$0xff] %v8617_v15  ;;  %v8637_v60 = vsel %vm526_vm0, %v613_v61, %v8617_v15 }
  0x75   : > { %723 = vrot.lane.b32.xlu0 %v8570_v49, %s8083_s21  ;;  %16422 = vst [vmem:[#allocation48_spill] sm:$0xff] %v8637_v60  ;;  %v620_v49 = vrot.slane %v8629_v30, 1  ;;  %v8663_v30 = vld [vmem:[%s8185_s20 + $0x78] sm:$0xff] }
  0x76   : > { %725 = vrot.lane.b32.xlu1 %v8603_v44, %s8083_s21  ;;  %v618_v44 = vrot.slane %v8626_v25, 1  ;;  %16428 = vst [vmem:[#allocation54_spill] sm:$0xff] %v8663_v30  ;;  %v8666_v25 = vld [vmem:[%s8185_s20 + $0x80] sm:$0xff] }
  0x78   : > { %v8653_v61 = vsel %vm526_vm0, %v617_v31, %v618_v44 }
  0x79   : > { %727 = vrot.lane.b32.xlu0 %v8614_v45, %s8083_s21  ;;  %16425 = vst [vmem:[#allocation51_spill] sm:$0xff] %v8653_v61  ;;  %v8657_v45 = vsel %vm526_vm0, %v618_v44, %v620_v49 }
  0x7a   : > { %729 = vrot.lane.b32.xlu1 %v8620_v4, %s8083_s21  ;;  %v622_v4 = vrot.slane %v8643_v26, 1  ;;  %16426 = vst [vmem:[#allocation52_spill] sm:$0xff] %v8657_v45  ;;  %v8685_v26 = vld [vmem:[%s8185_s20 + $0x90] sm:$0xff] }
  0x7b   : > { %16432 = vst [vmem:[#allocation58_spill] sm:$0xff] %v8685_v26 }
  0x7c   : > { %v8673_v31 = vsel %vm526_vm0, %v620_v49, %v622_v4  ;;  %v8677_v44 = vsel %vm526_vm0, %v622_v4, %v8660_v21  ;;  %v629_v49 = vrot.slane %v8682_v24, 1  ;;  %v631_v4 = vrot.slane %v8685_v26, 1 }
  0x7d   : > { %731 = vrot.lane.b32.xlu0 %v8637_v60, %s8083_s21  ;;  %16429 = vst [vmem:[#allocation55_spill] sm:$0xff] %v8673_v31  ;;  %16430 = vst [vmem:[#allocation56_spill] sm:$0xff] %v8677_v44  ;;  %v627_v60 = vrot.slane %v8666_v25, 1 }
  0x7e   : > { %733 = vrot.lane.b32.xlu1 %v8617_v15, %s8083_s21  ;;  %v626_v15 = vrot.slane %v8663_v30, 1  ;;  %v8710_v24 = vsel %vm526_vm0, %v629_v49, %v631_v4 }
  0x7f   : > { %16437 = vst [vmem:[#allocation63_spill] sm:$0xff] %v8710_v24 }
  0x81   : > { %735 = vrot.lane.b32.xlu0 %v8653_v61, %s8083_s21  ;;  %v8697_v61 = vld [vmem:[%s8185_s20 + $0x98] sm:$0xff] }
  0x82   : > { %737 = vrot.lane.b32.xlu1 %v8657_v45, %s8083_s21  ;;  %v8693_v45 = vsel %vm526_vm0, %v626_v15, %v627_v60  ;;  %16434 = vst [vmem:[#allocation60_spill] sm:$0xff] %v8697_v61 }
  0x83   : > { %16433 = vst [vmem:[#allocation59_spill] sm:$0xff] %v8693_v45 }
  0x85   : > { %739 = vrot.lane.b32.xlu0 %v8673_v31, %s8083_s21  ;;  %v8704_v31 = vsel %vm526_vm0, %v627_v60, %v629_v49  ;;  %v817_v60 = vrot.slane %v8204_v7, 2  ;;  %v819_v49 = vrot.slane %v8192_v1, 2 }
  0x86   : > { %741 = vrot.lane.b32.xlu1 %v8677_v44, %s8083_s21  ;;  %16435 = vst [vmem:[#allocation61_spill] sm:$0xff] %v8704_v31  ;;  %v8707_v44 = vrot.slane %v8697_v61, 1 }
  0x88   : > { %16436 = vst [vmem:[#allocation62_spill] sm:$0xff] %v8707_v44  ;;  %v8718_v15 = vsel %vm526_vm0, %v631_v4, %v8707_v44 }
  0x89   : > { %743 = vrot.lane.b32.xlu0 %v8660_v21, %s8083_s21  ;;  %16438 = vst [vmem:[#allocation64_spill] sm:$0xff] %v8718_v15 }
  0x8a   : > { %745 = vrot.lane.b32.xlu1 %v8693_v45, %s8083_s21  ;;  %v816_v45 = vrot.slane %v8201_v6, 2  ;;  %v823_v6 = vrot.slane %v8188_v0, 2  ;;  %v826_v0 = vrot.slane %v8212_v11, 2 }
  0x8c   : > { %v818_v4 = vsel %vm815_vm1, %v816_v45, %v817_v60 }
  0x8d   : > { %747 = vrot.lane.b32.xlu0 %v8704_v31, %s8083_s21 }
  0x8e   : > { %749 = vrot.lane.b32.xlu1 %v8710_v24, %s8083_s21  ;;  %v821_v24 = vrot.slane %v8195_v2, 2  ;;  %v825_v2 = vrot.slane %v8209_v10, 2 }
  0x8f   : > { %v8722_v21 = vpop.permute.xlu0 %643 }
  0x90   : > { %16439 = vst [vmem:[#allocation65_spill] sm:$0xff] %v8722_v21  ;;  %v8725_v61 = vpop.permute.xlu1 %639  ;;  %v820_v21 = vsel %vm815_vm1, %v817_v60, %v819_v49  ;;  %v822_v1 = vsel %vm815_vm1, %v819_v49, %v821_v24  ;;  %v824_v45 = vsel %vm815_vm1, %v821_v24, %v823_v6  ;;  %v828_v60 = vrot.slane %v8227_v17, 2 }
  0x91   : > { %16440 = vst [vmem:[#allocation66_spill] sm:$0xff] %v8725_v61  ;;  %751 = vrot.lane.b32.xlu0 %v8718_v15, %s8083_s21  ;;  %v830_v49 = vrot.slane %v8230_v18, 2 }
  0x92   : > { %753 = vrot.lane.b32.xlu1 %v8707_v44, %s8083_s21  ;;  %s8089_s21 = smov 28  }
  0x93   : > { %v8734_v7 = vpop.permute.xlu0 %635 }
  0x94   : > { %16441 = vst [vmem:[#allocation67_spill] sm:$0xff] %v8734_v7  ;;  %v8737_v31 = vpop.permute.xlu1 %641 }
  0x95   : > { %16442 = vst [vmem:[#allocation68_spill] sm:$0xff] %v8737_v31  ;;  %924 = vrot.lane.b32.xlu0 %v818_v4, %s8084_s14 }
  0x96   : > { %926 = vrot.lane.b32.xlu1 %v820_v21, %s8084_s14  ;;  %v8755_v21 = vsel %vm815_vm1, %v825_v2, %v826_v0  ;;  %v8772_v2 = vsel %vm815_vm1, %v828_v60, %v830_v49 }
  0x97   : > { %v8742_v61 = vpop.permute.xlu0 %637  ;;  %16446 = vst [vmem:[#allocation72_spill] sm:$0xff] %v8755_v21  ;;  %16451 = vst [vmem:[#allocation77_spill] sm:$0xff] %v8772_v2 }
  0x98   : > { %16443 = vst [vmem:[#allocation69_spill] sm:$0xff] %v8742_v61  ;;  %v8747_v7 = vpop.permute.xlu1 %645 }
  0x99   : > { %16444 = vst [vmem:[#allocation70_spill] sm:$0xff] %v8747_v7  ;;  %928 = vrot.lane.b32.xlu0 %v822_v1, %s8084_s14  ;;  %v8764_v1 = vsel %vm815_vm1, %v826_v0, %v828_v60  ;;  %v834_v0 = vrot.slane %v8258_v27, 2  ;;  %v837_v60 = vrot.slane %v8264_v29, 2 }
  0x9a   : > { %930 = vrot.lane.b32.xlu1 %v824_v45, %s8084_s14  ;;  %16448 = vst [vmem:[#allocation74_spill] sm:$0xff] %v8764_v1  ;;  %v8767_v45 = vrot.slane %v8243_v23, 2 }
  0x9b   : > { %v8752_v4 = vpop.permute.xlu0 %647 }
  0x9c   : > { %16445 = vst [vmem:[#allocation71_spill] sm:$0xff] %v8752_v4  ;;  %v8758_v24 = vpop.permute.xlu1 %649  ;;  %16449 = vst [vmem:[#allocation75_spill] sm:$0xff] %v8767_v45 }
  0x9d   : > { %16447 = vst [vmem:[#allocation73_spill] sm:$0xff] %v8758_v24  ;;  %932 = vrot.lane.b32.xlu0 %v823_v6, %s8084_s14  ;;  %v8782_v6 = vsel %vm815_vm1, %v830_v49, %v8767_v45  ;;  %v835_v24 = vrot.slane %v8261_v28, 2  ;;  %v839_v49 = vrot.slane %v8278_v34, 2 }
  0x9e   : > { %934 = vrot.lane.b32.xlu1 %v8755_v21, %s8084_s14  ;;  %16453 = vst [vmem:[#allocation79_spill] sm:$0xff] %v8782_v6 }
  0x9f   : > { %v8769_v7 = vpop.permute.xlu0 %651 }
  0xa0   : > { %16450 = vst [vmem:[#allocation76_spill] sm:$0xff] %v8769_v7  ;;  %v8774_v4 = vpop.permute.xlu1 %653 }
  0xa1   : > { %16452 = vst [vmem:[#allocation78_spill] sm:$0xff] %v8774_v4  ;;  %936 = vrot.lane.b32.xlu0 %v8764_v1, %s8084_s14  ;;  %v8796_v4 = vsel %vm815_vm1, %v834_v0, %v835_v24  ;;  %v8814_v0 = vsel %vm815_vm1, %v837_v60, %v839_v49 }
  0xa2   : > { %938 = vrot.lane.b32.xlu1 %v8772_v2, %s8084_s14  ;;  %16456 = vst [vmem:[#allocation82_spill] sm:$0xff] %v8796_v4  ;;  %v8802_v2 = vsel %vm815_vm1, %v835_v24, %v837_v60  ;;  %16461 = vst [vmem:[#allocation87_spill] sm:$0xff] %v8814_v0  ;;  %v846_v60 = vrot.slane %v8322_v46, 2 }
  0xa3   : > { %v8786_v7 = vpop.permute.xlu0 %655  ;;  %16458 = vst [vmem:[#allocation84_spill] sm:$0xff] %v8802_v2 }
  0xa4   : > { %16454 = vst [vmem:[#allocation80_spill] sm:$0xff] %v8786_v7  ;;  %v8789_v61 = vpop.permute.xlu1 %657  ;;  %v8805_v7 = vrot.slane %v8281_v35, 2 }
  0xa5   : > { %16455 = vst [vmem:[#allocation81_spill] sm:$0xff] %v8789_v61  ;;  %940 = vrot.lane.b32.xlu0 %v8782_v6, %s8084_s14  ;;  %v844_v6 = vrot.slane %v8306_v41, 2 }
  0xa6   : > { %942 = vrot.lane.b32.xlu1 %v8767_v45, %s8084_s14  ;;  %16459 = vst [vmem:[#allocation85_spill] sm:$0xff] %v8805_v7  ;;  %v8820_v24 = vsel %vm815_vm1, %v839_v49, %v8805_v7  ;;  %v848_v49 = vrot.slane %v8325_v47, 2 }
  0xa7   : > { %v8799_v31 = vpop.permute.xlu0 %659  ;;  %16463 = vst [vmem:[#allocation89_spill] sm:$0xff] %v8820_v24 }
  0xa8   : > { %16457 = vst [vmem:[#allocation83_spill] sm:$0xff] %v8799_v31  ;;  %v8807_v61 = vpop.permute.xlu1 %661  ;;  %v843_v31 = vrot.slane %v8303_v40, 2 }
  0xa9   : > { %16460 = vst [vmem:[#allocation86_spill] sm:$0xff] %v8807_v61  ;;  %944 = vrot.lane.b32.xlu0 %v8796_v4, %s8084_s14 }
  0xaa   : > { %946 = vrot.lane.b32.xlu1 %v8802_v2, %s8084_s14 }
  0xab   : > { %v8816_v45 = vpop.permute.xlu0 %663 }
  0xac   : > { %16462 = vst [vmem:[#allocation88_spill] sm:$0xff] %v8816_v45  ;;  %v8824_v61 = vpop.permute.xlu1 %665  ;;  %v8834_v45 = vsel %vm815_vm1, %v843_v31, %v844_v6  ;;  %v8852_v31 = vsel %vm815_vm1, %v846_v60, %v848_v49 }
  0xad   : > { %16464 = vst [vmem:[#allocation90_spill] sm:$0xff] %v8824_v61  ;;  %948 = vrot.lane.b32.xlu0 %v8814_v0, %s8084_s14  ;;  %16466 = vst [vmem:[#allocation92_spill] sm:$0xff] %v8834_v45  ;;  %v8844_v61 = vsel %vm815_vm1, %v844_v6, %v846_v60  ;;  %v855_v60 = vrot.slane %v8359_v57, 2 }
  0xae   : > { %950 = vrot.lane.b32.xlu1 %v8820_v24, %s8084_s14  ;;  %16468 = vst [vmem:[#allocation94_spill] sm:$0xff] %v8844_v61  ;;  %v8847_v24 = vrot.slane %v8337_v51, 2  ;;  %16471 = vst [vmem:[#allocation97_spill] sm:$0xff] %v8852_v31 }
  0xaf   : > { %v8831_v2 = vpop.permute.xlu0 %667 }
  0xb0   : > { %16465 = vst [vmem:[#allocation91_spill] sm:$0xff] %v8831_v2  ;;  %v8837_v4 = vpop.permute.xlu1 %669  ;;  %16469 = vst [vmem:[#allocation95_spill] sm:$0xff] %v8847_v24  ;;  %v8862_v6 = vsel %vm815_vm1, %v848_v49, %v8847_v24  ;;  %v857_v49 = vrot.slane %v8373_v62, 2 }
  0xb1   : > { %16467 = vst [vmem:[#allocation93_spill] sm:$0xff] %v8837_v4  ;;  %952 = vrot.lane.b32.xlu0 %v8805_v7, %s8084_s14  ;;  %16473 = vst [vmem:[#allocation99_spill] sm:$0xff] %v8862_v6  ;;  %v852_v4 = vrot.slane %v8353_v55, 2 }
  0xb2   : > { %954 = vrot.lane.b32.xlu1 %v8834_v45, %s8084_s14  ;;  %v853_v45 = vrot.slane %v8356_v56, 2 }
  0xb3   : > { %v8849_v2 = vpop.permute.xlu0 %671 }
  0xb4   : > { %16470 = vst [vmem:[#allocation96_spill] sm:$0xff] %v8849_v2  ;;  %v8854_v0 = vpop.permute.xlu1 %673 }
  0xb5   : > { %16472 = vst [vmem:[#allocation98_spill] sm:$0xff] %v8854_v0  ;;  %956 = vrot.lane.b32.xlu0 %v8844_v61, %s8084_s14  ;;  %v8876_v0 = vsel %vm815_vm1, %v852_v4, %v853_v45  ;;  %v8882_v61 = vsel %vm815_vm1, %v853_v45, %v855_v60  ;;  %v8894_v4 = vsel %vm815_vm1, %v855_v60, %v857_v49  ;;  %v864_v60 = vrot.slane %v8412_v19, 2 }
  0xb6   : > { %958 = vrot.lane.b32.xlu1 %v8852_v31, %s8084_s14  ;;  %16476 = vst [vmem:[#allocation102_spill] sm:$0xff] %v8876_v0  ;;  %16478 = vst [vmem:[#allocation104_spill] sm:$0xff] %v8882_v61 }
  0xb7   : > { %v8866_v2 = vpop.permute.xlu0 %675  ;;  %16481 = vst [vmem:[#allocation107_spill] sm:$0xff] %v8894_v4 }
  0xb8   : > { %16474 = vst [vmem:[#allocation100_spill] sm:$0xff] %v8866_v2  ;;  %v8869_v7 = vpop.permute.xlu1 %677  ;;  %v8885_v2 = vrot.slane %v8376_v63, 2 }
  0xb9   : > { %16475 = vst [vmem:[#allocation101_spill] sm:$0xff] %v8869_v7  ;;  %960 = vrot.lane.b32.xlu0 %v8862_v6, %s8084_s14  ;;  %v862_v6 = vrot.slane %v8396_v12, 2 }
  0xba   : > { %962 = vrot.lane.b32.xlu1 %v8847_v24, %s8084_s14  ;;  %16479 = vst [vmem:[#allocation105_spill] sm:$0xff] %v8885_v2  ;;  %v8900_v45 = vsel %vm815_vm1, %v857_v49, %v8885_v2  ;;  %v866_v49 = vrot.slane %v8415_v20, 2 }
  0xbb   : > { %v8879_v31 = vpop.permute.xlu0 %679  ;;  %16483 = vst [vmem:[#allocation109_spill] sm:$0xff] %v8900_v45 }
  0xbc   : > { %16477 = vst [vmem:[#allocation103_spill] sm:$0xff] %v8879_v31  ;;  %v8887_v7 = vpop.permute.xlu1 %681  ;;  %v861_v31 = vrot.slane %v8393_v9, 2 }
  0xbd   : > { %16480 = vst [vmem:[#allocation106_spill] sm:$0xff] %v8887_v7  ;;  %964 = vrot.lane.b32.xlu0 %v8876_v0, %s8084_s14 }
  0xbe   : > { %966 = vrot.lane.b32.xlu1 %v8882_v61, %s8084_s14 }
  0xbf   : > { %v8896_v24 = vpop.permute.xlu0 %683 }
  0xc0   : > { %16482 = vst [vmem:[#allocation108_spill] sm:$0xff] %v8896_v24  ;;  %v8904_v7 = vpop.permute.xlu1 %685  ;;  %v8914_v24 = vsel %vm815_vm1, %v861_v31, %v862_v6  ;;  %v8932_v31 = vsel %vm815_vm1, %v864_v60, %v866_v49 }
  0xc1   : > { %16484 = vst [vmem:[#allocation110_spill] sm:$0xff] %v8904_v7  ;;  %968 = vrot.lane.b32.xlu0 %v8894_v4, %s8084_s14  ;;  %16486 = vst [vmem:[#allocation112_spill] sm:$0xff] %v8914_v24  ;;  %v8924_v7 = vsel %vm815_vm1, %v862_v6, %v864_v60  ;;  %v873_v60 = vrot.slane %v8449_v59, 2 }
  0xc2   : > { %970 = vrot.lane.b32.xlu1 %v8900_v45, %s8084_s14  ;;  %16488 = vst [vmem:[#allocation114_spill] sm:$0xff] %v8924_v7  ;;  %v8927_v45 = vrot.slane %v8427_v33, 2  ;;  %16491 = vst [vmem:[#allocation117_spill] sm:$0xff] %v8932_v31 }
  0xc3   : > { %v8911_v61 = vpop.permute.xlu0 %687 }
  0xc4   : > { %16485 = vst [vmem:[#allocation111_spill] sm:$0xff] %v8911_v61  ;;  %v8917_v0 = vpop.permute.xlu1 %689  ;;  %16489 = vst [vmem:[#allocation115_spill] sm:$0xff] %v8927_v45  ;;  %v8942_v6 = vsel %vm815_vm1, %v866_v49, %v8927_v45  ;;  %v875_v49 = vrot.slane %v8463_v16, 2 }
  0xc5   : > { %16487 = vst [vmem:[#allocation113_spill] sm:$0xff] %v8917_v0  ;;  %972 = vrot.lane.b32.xlu0 %v8885_v2, %s8084_s14  ;;  %16493 = vst [vmem:[#allocation119_spill] sm:$0xff] %v8942_v6  ;;  %v870_v0 = vrot.slane %v8443_v48, 2 }
  0xc6   : > { %974 = vrot.lane.b32.xlu1 %v8914_v24, %s8084_s14  ;;  %v871_v24 = vrot.slane %v8446_v50, 2 }
  0xc7   : > { %v8929_v61 = vpop.permute.xlu0 %691 }
  0xc8   : > { %16490 = vst [vmem:[#allocation116_spill] sm:$0xff] %v8929_v61  ;;  %v8934_v4 = vpop.permute.xlu1 %693 }
  0xc9   : > { %16492 = vst [vmem:[#allocation118_spill] sm:$0xff] %v8934_v4  ;;  %976 = vrot.lane.b32.xlu0 %v8924_v7, %s8084_s14  ;;  %v8956_v4 = vsel %vm815_vm1, %v870_v0, %v871_v24  ;;  %v8962_v7 = vsel %vm815_vm1, %v871_v24, %v873_v60  ;;  %v8974_v0 = vsel %vm815_vm1, %v873_v60, %v875_v49  ;;  %v882_v60 = vrot.slane %v8502_v13, 2 }
  0xca   : > { %978 = vrot.lane.b32.xlu1 %v8932_v31, %s8084_s14  ;;  %16496 = vst [vmem:[#allocation122_spill] sm:$0xff] %v8956_v4  ;;  %16498 = vst [vmem:[#allocation124_spill] sm:$0xff] %v8962_v7 }
  0xcb   : > { %v8946_v61 = vpop.permute.xlu0 %695  ;;  %16501 = vst [vmem:[#allocation127_spill] sm:$0xff] %v8974_v0 }
  0xcc   : > { %16494 = vst [vmem:[#allocation120_spill] sm:$0xff] %v8946_v61  ;;  %v8949_v2 = vpop.permute.xlu1 %697  ;;  %v8965_v61 = vrot.slane %v8466_v22, 2 }
  0xcd   : > { %16495 = vst [vmem:[#allocation121_spill] sm:$0xff] %v8949_v2  ;;  %980 = vrot.lane.b32.xlu0 %v8942_v6, %s8084_s14  ;;  %v880_v6 = vrot.slane %v8486_v14, 2 }
  0xce   : > { %982 = vrot.lane.b32.xlu1 %v8927_v45, %s8084_s14  ;;  %16499 = vst [vmem:[#allocation125_spill] sm:$0xff] %v8965_v61  ;;  %v8980_v24 = vsel %vm815_vm1, %v875_v49, %v8965_v61  ;;  %v884_v49 = vrot.slane %v8505_v32, 2 }
  0xcf   : > { %v8959_v31 = vpop.permute.xlu0 %699  ;;  %16503 = vst [vmem:[#allocation129_spill] sm:$0xff] %v8980_v24 }
  0xd0   : > { %16497 = vst [vmem:[#allocation123_spill] sm:$0xff] %v8959_v31  ;;  %v8967_v2 = vpop.permute.xlu1 %701  ;;  %v879_v31 = vrot.slane %v8483_v8, 2 }
  0xd1   : > { %16500 = vst [vmem:[#allocation126_spill] sm:$0xff] %v8967_v2  ;;  %984 = vrot.lane.b32.xlu0 %v8956_v4, %s8084_s14 }
  0xd2   : > { %986 = vrot.lane.b32.xlu1 %v8962_v7, %s8084_s14 }
  0xd3   : > { %v8976_v45 = vpop.permute.xlu0 %703 }
  0xd4   : > { %16502 = vst [vmem:[#allocation128_spill] sm:$0xff] %v8976_v45  ;;  %v8984_v2 = vpop.permute.xlu1 %705  ;;  %v8994_v45 = vsel %vm815_vm1, %v879_v31, %v880_v6  ;;  %v9012_v31 = vsel %vm815_vm1, %v882_v60, %v884_v49 }
  0xd5   : > { %16504 = vst [vmem:[#allocation130_spill] sm:$0xff] %v8984_v2  ;;  %988 = vrot.lane.b32.xlu0 %v8974_v0, %s8084_s14  ;;  %16506 = vst [vmem:[#allocation132_spill] sm:$0xff] %v8994_v45  ;;  %v9004_v2 = vsel %vm815_vm1, %v880_v6, %v882_v60  ;;  %v891_v60 = vrot.slane %v8539_v58, 2 }
  0xd6   : > { %990 = vrot.lane.b32.xlu1 %v8980_v24, %s8084_s14  ;;  %16508 = vst [vmem:[#allocation134_spill] sm:$0xff] %v9004_v2  ;;  %v9007_v24 = vrot.slane %v8517_v5, 2  ;;  %16511 = vst [vmem:[#allocation137_spill] sm:$0xff] %v9012_v31 }
  0xd7   : > { %v8991_v7 = vpop.permute.xlu0 %707 }
  0xd8   : > { %16505 = vst [vmem:[#allocation131_spill] sm:$0xff] %v8991_v7  ;;  %v8997_v4 = vpop.permute.xlu1 %709  ;;  %16509 = vst [vmem:[#allocation135_spill] sm:$0xff] %v9007_v24  ;;  %v9022_v6 = vsel %vm815_vm1, %v884_v49, %v9007_v24  ;;  %v893_v49 = vrot.slane %v8553_v54, 2 }
  0xd9   : > { %16507 = vst [vmem:[#allocation133_spill] sm:$0xff] %v8997_v4  ;;  %992 = vrot.lane.b32.xlu0 %v8965_v61, %s8084_s14  ;;  %16513 = vst [vmem:[#allocation139_spill] sm:$0xff] %v9022_v6  ;;  %v888_v4 = vrot.slane %v8533_v3, 2 }
  0xda   : > { %994 = vrot.lane.b32.xlu1 %v8994_v45, %s8084_s14  ;;  %v889_v45 = vrot.slane %v8536_v53, 2 }
  0xdb   : > { %v9009_v7 = vpop.permute.xlu0 %711 }
  0xdc   : > { %16510 = vst [vmem:[#allocation136_spill] sm:$0xff] %v9009_v7  ;;  %v9014_v0 = vpop.permute.xlu1 %713 }
  0xdd   : > { %16512 = vst [vmem:[#allocation138_spill] sm:$0xff] %v9014_v0  ;;  %996 = vrot.lane.b32.xlu0 %v9004_v2, %s8084_s14  ;;  %v9036_v0 = vsel %vm815_vm1, %v888_v4, %v889_v45  ;;  %v9042_v2 = vsel %vm815_vm1, %v889_v45, %v891_v60  ;;  %v9054_v4 = vsel %vm815_vm1, %v891_v60, %v893_v49  ;;  %v900_v60 = vrot.slane %v8592_v42, 2 }
  0xde   : > { %998 = vrot.lane.b32.xlu1 %v9012_v31, %s8084_s14  ;;  %16516 = vst [vmem:[#allocation142_spill] sm:$0xff] %v9036_v0  ;;  %16518 = vst [vmem:[#allocation144_spill] sm:$0xff] %v9042_v2 }
  0xdf   : > { %v9026_v7 = vpop.permute.xlu0 %715  ;;  %16521 = vst [vmem:[#allocation147_spill] sm:$0xff] %v9054_v4 }
  0xe0   : > { %16514 = vst [vmem:[#allocation140_spill] sm:$0xff] %v9026_v7  ;;  %v9029_v61 = vpop.permute.xlu1 %717  ;;  %v9045_v7 = vrot.slane %v8556_v52, 2 }
  0xe1   : > { %16515 = vst [vmem:[#allocation141_spill] sm:$0xff] %v9029_v61  ;;  %1000 = vrot.lane.b32.xlu0 %v9022_v6, %s8084_s14  ;;  %v898_v6 = vrot.slane %v8576_v43, 2 }
  0xe2   : > { %1002 = vrot.lane.b32.xlu1 %v9007_v24, %s8084_s14  ;;  %16519 = vst [vmem:[#allocation145_spill] sm:$0xff] %v9045_v7  ;;  %v9060_v45 = vsel %vm815_vm1, %v893_v49, %v9045_v7  ;;  %v902_v49 = vrot.slane %v8595_v37, 2 }
  0xe3   : > { %v9039_v31 = vpop.permute.xlu0 %719  ;;  %16523 = vst [vmem:[#allocation149_spill] sm:$0xff] %v9060_v45 }
  0xe4   : > { %16517 = vst [vmem:[#allocation143_spill] sm:$0xff] %v9039_v31  ;;  %v9047_v61 = vpop.permute.xlu1 %721  ;;  %v897_v31 = vrot.slane %v8573_v39, 2 }
  0xe5   : > { %16520 = vst [vmem:[#allocation146_spill] sm:$0xff] %v9047_v61  ;;  %1004 = vrot.lane.b32.xlu0 %v9036_v0, %s8084_s14 }
  0xe6   : > { %1006 = vrot.lane.b32.xlu1 %v9042_v2, %s8084_s14 }
  0xe7   : > { %v9056_v24 = vpop.permute.xlu0 %723 }
  0xe8   : > { %16522 = vst [vmem:[#allocation148_spill] sm:$0xff] %v9056_v24  ;;  %v9064_v61 = vpop.permute.xlu1 %725  ;;  %v9074_v24 = vsel %vm815_vm1, %v897_v31, %v898_v6  ;;  %v9092_v31 = vsel %vm815_vm1, %v900_v60, %v902_v49 }
  0xe9   : > { %16524 = vst [vmem:[#allocation150_spill] sm:$0xff] %v9064_v61  ;;  %1008 = vrot.lane.b32.xlu0 %v9054_v4, %s8084_s14  ;;  %16526 = vst [vmem:[#allocation152_spill] sm:$0xff] %v9074_v24  ;;  %v9084_v61 = vsel %vm815_vm1, %v898_v6, %v900_v60  ;;  %v16536_v60 = vld [vmem:[#allocation47_spill] sm:$0xff] }
  0xea   : > { %1010 = vrot.lane.b32.xlu1 %v9060_v45, %s8084_s14  ;;  %16528 = vst [vmem:[#allocation154_spill] sm:$0xff] %v9084_v61  ;;  %v9087_v45 = vrot.slane %v8607_v38, 2  ;;  %16531 = vst [vmem:[#allocation157_spill] sm:$0xff] %v9092_v31  ;;  %v909_v1 = vrot.slane %v16536_v60, 2 }
  0xeb   : > { %v9071_v2 = vpop.permute.xlu0 %727 }
  0xec   : > { %16525 = vst [vmem:[#allocation151_spill] sm:$0xff] %v9071_v2  ;;  %v9077_v0 = vpop.permute.xlu1 %729  ;;  %16529 = vst [vmem:[#allocation155_spill] sm:$0xff] %v9087_v45  ;;  %v9102_v6 = vsel %vm815_vm1, %v902_v49, %v9087_v45  ;;  %v16539_v49 = vld [vmem:[#allocation49_spill] sm:$0xff] }
  0xed   : > { %16527 = vst [vmem:[#allocation153_spill] sm:$0xff] %v9077_v0  ;;  %1012 = vrot.lane.b32.xlu0 %v9045_v7, %s8084_s14  ;;  %16533 = vst [vmem:[#allocation159_spill] sm:$0xff] %v9102_v6  ;;  %v906_v0 = vrot.slane %v8623_v36, 2 }
  0xee   : > { %1014 = vrot.lane.b32.xlu1 %v9074_v24, %s8084_s14  ;;  %v16534_v24 = vld [vmem:[#allocation46_spill] sm:$0xff] }
  0xef   : > { %v9089_v2 = vpop.permute.xlu0 %731  ;;  %v907_v7 = vrot.slane %v16534_v24, 2 }
  0xf0   : > { %16530 = vst [vmem:[#allocation156_spill] sm:$0xff] %v9089_v2  ;;  %v9094_v4 = vpop.permute.xlu1 %733 }
  0xf1   : > { %16532 = vst [vmem:[#allocation158_spill] sm:$0xff] %v9094_v4  ;;  %1016 = vrot.lane.b32.xlu0 %v9084_v61, %s8084_s14  ;;  %v9116_v4 = vsel %vm815_vm1, %v906_v0, %v907_v7  ;;  %v9122_v44 = vsel %vm815_vm1, %v907_v7, %v909_v1 }
  0xf2   : > { %1018 = vrot.lane.b32.xlu1 %v9092_v31, %s8084_s14  ;;  %16538 = vst [vmem:[#allocation160_spill] sm:$0xff] %v9116_v4  ;;  %v911_v31 = vrot.slane %v16539_v49, 2  ;;  %16541 = vst [vmem:[#allocation161_spill] sm:$0xff] %v9122_v44 }
  0xf3   : > { %v9106_v2 = vpop.permute.xlu0 %735 }
  0xf4   : > { %16535 = vst [vmem:[#allocation46_spill] sm:$0xff] %v9106_v2  ;;  %v9109_v21 = vpop.permute.xlu1 %737  ;;  %v16542_v2 = vld [vmem:[#allocation50_spill] sm:$0xff]  ;;  %v9134_v0 = vsel %vm815_vm1, %v909_v1, %v911_v31  ;;  %v16549_v1 = vld [vmem:[#allocation57_spill] sm:$0xff] }
  0xf5   : > { %16537 = vst [vmem:[#allocation47_spill] sm:$0xff] %v9109_v21  ;;  %1020 = vrot.lane.b32.xlu0 %v9102_v6, %s8084_s14  ;;  %v9125_v15 = vrot.slane %v16542_v2, 2  ;;  %16545 = vst [vmem:[#allocation163_spill] sm:$0xff] %v9134_v0  ;;  %v916_v6 = vrot.slane %v8666_v25, 2 }
  0xf6   : > { %1022 = vrot.lane.b32.xlu1 %v9087_v45, %s8084_s14 }
  0xf7   : > { %v9119_v61 = vpop.permute.xlu0 %739  ;;  %16543 = vst [vmem:[#allocation50_spill] sm:$0xff] %v9125_v15  ;;  %v9140_v7 = vsel %vm815_vm1, %v911_v31, %v9125_v15  ;;  %v920_v31 = vrot.slane %v8685_v26, 2 }
  0xf8   : > { %16540 = vst [vmem:[#allocation49_spill] sm:$0xff] %v9119_v61  ;;  %v9127_v21 = vpop.permute.xlu1 %741  ;;  %16547 = vst [vmem:[#allocation165_spill] sm:$0xff] %v9140_v7  ;;  %v915_v61 = vrot.slane %v8663_v30, 2 }
  0xf9   : > { %16544 = vst [vmem:[#allocation162_spill] sm:$0xff] %v9127_v21  ;;  %1024 = vrot.lane.b32.xlu0 %v9116_v4, %s8084_s14 }
  0xfa   : > { %1026 = vrot.lane.b32.xlu1 %v9122_v44, %s8084_s14  ;;  %v918_v44 = vrot.slane %v16549_v1, 2 }
  0xfb   : > { %v9136_v45 = vpop.permute.xlu0 %743 }
  0xfc   : > { %16546 = vst [vmem:[#allocation164_spill] sm:$0xff] %v9136_v45  ;;  %v9144_v21 = vpop.permute.xlu1 %745  ;;  %v9154_v45 = vsel %vm815_vm1, %v915_v61, %v916_v6  ;;  %v9172_v61 = vsel %vm815_vm1, %v918_v44, %v920_v31 }
  0xfd   : > { %16548 = vst [vmem:[#allocation166_spill] sm:$0xff] %v9144_v21  ;;  %1028 = vrot.lane.b32.xlu0 %v9134_v0, %s8084_s14  ;;  %16551 = vst [vmem:[#allocation167_spill] sm:$0xff] %v9154_v45  ;;  %v9164_v21 = vsel %vm815_vm1, %v916_v6, %v918_v44 }
  0xfe   : > { %1030 = vrot.lane.b32.xlu1 %v9140_v7, %s8084_s14  ;;  %16553 = vst [vmem:[#allocation169_spill] sm:$0xff] %v9164_v21  ;;  %v16554_v7 = vld [vmem:[#allocation60_spill] sm:$0xff]  ;;  %16557 = vst [vmem:[#allocation171_spill] sm:$0xff] %v9172_v61 }
  0xff   : > { %v9151_v4 = vpop.permute.xlu0 %747  ;;  %v9167_v0 = vrot.slane %v16554_v7, 2 }
 0x100   : > { %16550 = vst [vmem:[#allocation57_spill] sm:$0xff] %v9151_v4  ;;  %v9157_v30 = vpop.permute.xlu1 %749 }
 0x101   : > { %16552 = vst [vmem:[#allocation168_spill] sm:$0xff] %v9157_v30  ;;  %1032 = vrot.lane.b32.xlu0 %v9125_v15, %s8084_s14  ;;  %16555 = vst [vmem:[#allocation60_spill] sm:$0xff] %v9167_v0  ;;  %v9182_v6 = vsel %vm815_vm1, %v920_v31, %v9167_v0 }
 0x102   : > { %1034 = vrot.lane.b32.xlu1 %v9154_v45, %s8084_s14  ;;  %16559 = vst [vmem:[#allocation173_spill] sm:$0xff] %v9182_v6 }
 0x103   : > { %v9169_v4 = vpop.permute.xlu0 %751 }
 0x104   : > { %16556 = vst [vmem:[#allocation170_spill] sm:$0xff] %v9169_v4  ;;  %v9174_v26 = vpop.permute.xlu1 %753  ;;  %v16730_v4 = vld [vmem:[#allocation63_spill] sm:$0xff] }
 0x105   : > { %16558 = vst [vmem:[#allocation172_spill] sm:$0xff] %v9174_v26  ;;  %1036 = vrot.lane.b32.xlu0 %v9164_v21, %s8084_s14 }
 0x106   : > { %1038 = vrot.lane.b32.xlu1 %v9172_v61, %s8084_s14 }
 0x107   : > { %v9184_v30 = vpop.permute.xlu0 %924 }
 0x108   : > { %16560 = vst [vmem:[#allocation174_spill] sm:$0xff] %v9184_v30  ;;  %v9186_v45 = vpop.permute.xlu1 %926 }
 0x109   : > { %16561 = vst [vmem:[#allocation175_spill] sm:$0xff] %v9186_v45  ;;  %1040 = vrot.lane.b32.xlu0 %v9182_v6, %s8084_s14 }
 0x10a   : > { %1042 = vrot.lane.b32.xlu1 %v9167_v0, %s8084_s14 }
 0x10b   : > { %v9192_v44 = vpop.permute.xlu0 %928 }
 0x10c   : > { %16562 = vst [vmem:[#allocation176_spill] sm:$0xff] %v9192_v44  ;;  %v9194_v26 = vpop.permute.xlu1 %930 }
 0x10d   : > { %16563 = vst [vmem:[#allocation177_spill] sm:$0xff] %v9194_v26  ;;  %1109 = vrot.lane.b32.xlu0 %v8209_v10, %s8085_s15 }
 0x10e   : > { %1111 = vrot.lane.b32.xlu1 %v8212_v11, %s8085_s15 }
 0x10f   : > { %v9200_v31 = vpop.permute.xlu0 %932 }
 0x110   : > { %16564 = vst [vmem:[#allocation178_spill] sm:$0xff] %v9200_v31  ;;  %v9202_v45 = vpop.permute.xlu1 %934 }
 0x111   : > { %16565 = vst [vmem:[#allocation179_spill] sm:$0xff] %v9202_v45  ;;  %1113 = vrot.lane.b32.xlu0 %v8227_v17, %s8085_s15  ;;  %v16727_v45 = vld [vmem:[#allocation61_spill] sm:$0xff] }
 0x112   : > { %1115 = vrot.lane.b32.xlu1 %v8230_v18, %s8085_s15 }
 0x113   : > { %v9208_v44 = vpop.permute.xlu0 %936 }
 0x114   : > { %16566 = vst [vmem:[#allocation180_spill] sm:$0xff] %v9208_v44  ;;  %v9210_v26 = vpop.permute.xlu1 %938 }
 0x115   : > { %16567 = vst [vmem:[#allocation181_spill] sm:$0xff] %v9210_v26  ;;  %1117 = vrot.lane.b32.xlu0 %v8243_v23, %s8085_s15  ;;  %v16723_v26 = vld [vmem:[#allocation53_spill] sm:$0xff] }
 0x116   : > { %1119 = vrot.lane.b32.xlu1 %v8258_v27, %s8085_s15 }
 0x117   : > { %v9216_v10 = vpop.permute.xlu0 %940 }
 0x118   : > { %16568 = vst [vmem:[#allocation182_spill] sm:$0xff] %v9216_v10  ;;  %v9218_v11 = vpop.permute.xlu1 %942 }
 0x119   : > { %16569 = vst [vmem:[#allocation183_spill] sm:$0xff] %v9218_v11  ;;  %1121 = vrot.lane.b32.xlu0 %v8261_v28, %s8085_s15  ;;  %v16719_v11 = vld [vmem:[#allocation55_spill] sm:$0xff] }
 0x11a   : > { %1123 = vrot.lane.b32.xlu1 %v8264_v29, %s8085_s15 }
 0x11b   : > { %v9224_v17 = vpop.permute.xlu0 %944 }
 0x11c   : > { %16570 = vst [vmem:[#allocation184_spill] sm:$0xff] %v9224_v17  ;;  %v9226_v18 = vpop.permute.xlu1 %946 }
 0x11d   : > { %16571 = vst [vmem:[#allocation185_spill] sm:$0xff] %v9226_v18  ;;  %1125 = vrot.lane.b32.xlu0 %v8278_v34, %s8085_s15  ;;  %v16715_v18 = vld [vmem:[#allocation51_spill] sm:$0xff] }
 0x11e   : > { %1127 = vrot.lane.b32.xlu1 %v8281_v35, %s8085_s15 }
 0x11f   : > { %v9232_v23 = vpop.permute.xlu0 %948 }
 0x120   : > { %16572 = vst [vmem:[#allocation186_spill] sm:$0xff] %v9232_v23  ;;  %v9234_v27 = vpop.permute.xlu1 %950 }
 0x121   : > { %16573 = vst [vmem:[#allocation187_spill] sm:$0xff] %v9234_v27  ;;  %1129 = vrot.lane.b32.xlu0 %v8303_v40, %s8085_s15  ;;  %v16711_v27 = vld [vmem:[#allocation48_spill] sm:$0xff] }
 0x122   : > { %1131 = vrot.lane.b32.xlu1 %v8306_v41, %s8085_s15 }
 0x123   : > { %v9240_v28 = vpop.permute.xlu0 %952 }
 0x124   : > { %16574 = vst [vmem:[#allocation188_spill] sm:$0xff] %v9240_v28  ;;  %v9242_v29 = vpop.permute.xlu1 %954 }
 0x125   : > { %16575 = vst [vmem:[#allocation189_spill] sm:$0xff] %v9242_v29  ;;  %1133 = vrot.lane.b32.xlu0 %v8322_v46, %s8085_s15  ;;  %v16707_v29 = vld [vmem:[#allocation43_spill] sm:$0xff] }
 0x126   : > { %1135 = vrot.lane.b32.xlu1 %v8325_v47, %s8085_s15 }
 0x127   : > { %v9248_v34 = vpop.permute.xlu0 %956 }
 0x128   : > { %16576 = vst [vmem:[#allocation190_spill] sm:$0xff] %v9248_v34  ;;  %v9250_v35 = vpop.permute.xlu1 %958 }
 0x129   : > { %16577 = vst [vmem:[#allocation191_spill] sm:$0xff] %v9250_v35  ;;  %1137 = vrot.lane.b32.xlu0 %v8337_v51, %s8085_s15  ;;  %v16703_v35 = vld [vmem:[#allocation39_spill] sm:$0xff] }
 0x12a   : > { %1139 = vrot.lane.b32.xlu1 %v8353_v55, %s8085_s15 }
 0x12b   : > { %v9256_v40 = vpop.permute.xlu0 %960 }
 0x12c   : > { %16578 = vst [vmem:[#allocation192_spill] sm:$0xff] %v9256_v40  ;;  %v9258_v41 = vpop.permute.xlu1 %962 }
 0x12d   : > { %16579 = vst [vmem:[#allocation193_spill] sm:$0xff] %v9258_v41  ;;  %1141 = vrot.lane.b32.xlu0 %v8356_v56, %s8085_s15  ;;  %v16699_v41 = vld [vmem:[#allocation40_spill] sm:$0xff] }
 0x12e   : > { %1143 = vrot.lane.b32.xlu1 %v8359_v57, %s8085_s15 }
 0x12f   : > { %v9264_v46 = vpop.permute.xlu0 %964 }
 0x130   : > { %16580 = vst [vmem:[#allocation194_spill] sm:$0xff] %v9264_v46  ;;  %v9266_v47 = vpop.permute.xlu1 %966 }
 0x131   : > { %16581 = vst [vmem:[#allocation195_spill] sm:$0xff] %v9266_v47  ;;  %1145 = vrot.lane.b32.xlu0 %v8373_v62, %s8085_s15  ;;  %v16695_v47 = vld [vmem:[#allocation37_spill] sm:$0xff] }
 0x132   : > { %1147 = vrot.lane.b32.xlu1 %v8376_v63, %s8085_s15 }
 0x133   : > { %v9272_v51 = vpop.permute.xlu0 %968 }
 0x134   : > { %16582 = vst [vmem:[#allocation196_spill] sm:$0xff] %v9272_v51  ;;  %v9274_v55 = vpop.permute.xlu1 %970 }
 0x135   : > { %16583 = vst [vmem:[#allocation197_spill] sm:$0xff] %v9274_v55  ;;  %1149 = vrot.lane.b32.xlu0 %v8393_v9, %s8085_s15  ;;  %v16691_v55 = vld [vmem:[#allocation36_spill] sm:$0xff] }
 0x136   : > { %1151 = vrot.lane.b32.xlu1 %v8396_v12, %s8085_s15 }
 0x137   : > { %v9280_v56 = vpop.permute.xlu0 %972 }
 0x138   : > { %16584 = vst [vmem:[#allocation198_spill] sm:$0xff] %v9280_v56  ;;  %v9282_v57 = vpop.permute.xlu1 %974 }
 0x139   : > { %16585 = vst [vmem:[#allocation199_spill] sm:$0xff] %v9282_v57  ;;  %1153 = vrot.lane.b32.xlu0 %v8412_v19, %s8085_s15  ;;  %v16687_v57 = vld [vmem:[#allocation33_spill] sm:$0xff] }
 0x13a   : > { %1155 = vrot.lane.b32.xlu1 %v8415_v20, %s8085_s15 }
 0x13b   : > { %v9288_v62 = vpop.permute.xlu0 %976 }
 0x13c   : > { %16586 = vst [vmem:[#allocation200_spill] sm:$0xff] %v9288_v62  ;;  %v9290_v63 = vpop.permute.xlu1 %978 }
 0x13d   : > { %16587 = vst [vmem:[#allocation201_spill] sm:$0xff] %v9290_v63  ;;  %1157 = vrot.lane.b32.xlu0 %v8427_v33, %s8085_s15  ;;  %v16683_v63 = vld [vmem:[#allocation29_spill] sm:$0xff] }
 0x13e   : > { %1159 = vrot.lane.b32.xlu1 %v8443_v48, %s8085_s15 }
 0x13f   : > { %v9296_v9 = vpop.permute.xlu0 %980 }
 0x140   : > { %16588 = vst [vmem:[#allocation202_spill] sm:$0xff] %v9296_v9  ;;  %v9298_v12 = vpop.permute.xlu1 %982 }
 0x141   : > { %16589 = vst [vmem:[#allocation203_spill] sm:$0xff] %v9298_v12  ;;  %1161 = vrot.lane.b32.xlu0 %v8446_v50, %s8085_s15  ;;  %v16679_v12 = vld [vmem:[#allocation30_spill] sm:$0xff] }
 0x142   : > { %1163 = vrot.lane.b32.xlu1 %v8449_v59, %s8085_s15 }
 0x143   : > { %v9304_v19 = vpop.permute.xlu0 %984 }
 0x144   : > { %16590 = vst [vmem:[#allocation204_spill] sm:$0xff] %v9304_v19  ;;  %v9306_v20 = vpop.permute.xlu1 %986 }
 0x145   : > { %16591 = vst [vmem:[#allocation205_spill] sm:$0xff] %v9306_v20  ;;  %1165 = vrot.lane.b32.xlu0 %v8463_v16, %s8085_s15  ;;  %v16675_v20 = vld [vmem:[#allocation27_spill] sm:$0xff] }
 0x146   : > { %1167 = vrot.lane.b32.xlu1 %v8466_v22, %s8085_s15 }
 0x147   : > { %v9312_v33 = vpop.permute.xlu0 %988 }
 0x148   : > { %16592 = vst [vmem:[#allocation206_spill] sm:$0xff] %v9312_v33  ;;  %v9314_v48 = vpop.permute.xlu1 %990 }
 0x149   : > { %16593 = vst [vmem:[#allocation207_spill] sm:$0xff] %v9314_v48  ;;  %1169 = vrot.lane.b32.xlu0 %v8483_v8, %s8085_s15  ;;  %v16671_v48 = vld [vmem:[#allocation26_spill] sm:$0xff] }
 0x14a   : > { %1171 = vrot.lane.b32.xlu1 %v8486_v14, %s8085_s15 }
 0x14b   : > { %v9320_v50 = vpop.permute.xlu0 %992 }
 0x14c   : > { %16594 = vst [vmem:[#allocation208_spill] sm:$0xff] %v9320_v50  ;;  %v9322_v59 = vpop.permute.xlu1 %994 }
 0x14d   : > { %16595 = vst [vmem:[#allocation209_spill] sm:$0xff] %v9322_v59  ;;  %1173 = vrot.lane.b32.xlu0 %v8502_v13, %s8085_s15  ;;  %v16667_v59 = vld [vmem:[#allocation23_spill] sm:$0xff] }
 0x14e   : > { %1175 = vrot.lane.b32.xlu1 %v8505_v32, %s8085_s15 }
 0x14f   : > { %v9328_v16 = vpop.permute.xlu0 %996 }
 0x150   : > { %16596 = vst [vmem:[#allocation210_spill] sm:$0xff] %v9328_v16  ;;  %v9330_v22 = vpop.permute.xlu1 %998 }
 0x151   : > { %16597 = vst [vmem:[#allocation211_spill] sm:$0xff] %v9330_v22  ;;  %1177 = vrot.lane.b32.xlu0 %v8517_v5, %s8085_s15  ;;  %v16663_v22 = vld [vmem:[#allocation19_spill] sm:$0xff] }
 0x152   : > { %1179 = vrot.lane.b32.xlu1 %v8533_v3, %s8085_s15 }
 0x153   : > { %v9336_v8 = vpop.permute.xlu0 %1000 }
 0x154   : > { %16598 = vst [vmem:[#allocation212_spill] sm:$0xff] %v9336_v8  ;;  %v9338_v14 = vpop.permute.xlu1 %1002 }
 0x155   : > { %16599 = vst [vmem:[#allocation213_spill] sm:$0xff] %v9338_v14  ;;  %1181 = vrot.lane.b32.xlu0 %v8536_v53, %s8085_s15  ;;  %v16659_v14 = vld [vmem:[#allocation20_spill] sm:$0xff] }
 0x156   : > { %1183 = vrot.lane.b32.xlu1 %v8539_v58, %s8085_s15 }
 0x157   : > { %v9344_v13 = vpop.permute.xlu0 %1004 }
 0x158   : > { %16600 = vst [vmem:[#allocation214_spill] sm:$0xff] %v9344_v13  ;;  %v9346_v32 = vpop.permute.xlu1 %1006 }
 0x159   : > { %16601 = vst [vmem:[#allocation215_spill] sm:$0xff] %v9346_v32  ;;  %1185 = vrot.lane.b32.xlu0 %v8553_v54, %s8085_s15  ;;  %v16655_v32 = vld [vmem:[#allocation17_spill] sm:$0xff] }
 0x15a   : > { %1187 = vrot.lane.b32.xlu1 %v8556_v52, %s8085_s15 }
 0x15b   : > { %v9352_v3 = vpop.permute.xlu0 %1008 }
 0x15c   : > { %16602 = vst [vmem:[#allocation216_spill] sm:$0xff] %v9352_v3  ;;  %v9354_v5 = vpop.permute.xlu1 %1010 }
 0x15d   : > { %16603 = vst [vmem:[#allocation217_spill] sm:$0xff] %v9354_v5  ;;  %1189 = vrot.lane.b32.xlu0 %v8573_v39, %s8085_s15  ;;  %v16651_v5 = vld [vmem:[#allocation16_spill] sm:$0xff] }
 0x15e   : > { %1191 = vrot.lane.b32.xlu1 %v8576_v43, %s8085_s15 }
 0x15f   : > { %v9360_v53 = vpop.permute.xlu0 %1012 }
 0x160   : > { %16604 = vst [vmem:[#allocation218_spill] sm:$0xff] %v9360_v53  ;;  %v9362_v58 = vpop.permute.xlu1 %1014 }
 0x161   : > { %16605 = vst [vmem:[#allocation219_spill] sm:$0xff] %v9362_v58  ;;  %1193 = vrot.lane.b32.xlu0 %v8592_v42, %s8085_s15  ;;  %v16647_v58 = vld [vmem:[#allocation13_spill] sm:$0xff] }
 0x162   : > { %1195 = vrot.lane.b32.xlu1 %v8595_v37, %s8085_s15 }
 0x163   : > { %v9368_v52 = vpop.permute.xlu0 %1016 }
 0x164   : > { %16606 = vst [vmem:[#allocation220_spill] sm:$0xff] %v9368_v52  ;;  %v9370_v54 = vpop.permute.xlu1 %1018  ;;  %v16634_v52 = vld [vmem:[#allocation4_spill] sm:$0xff] }
 0x165   : > { %16607 = vst [vmem:[#allocation221_spill] sm:$0xff] %v9370_v54  ;;  %1197 = vrot.lane.b32.xlu0 %v8607_v38, %s8085_s15  ;;  %v16630_v54 = vld [vmem:[#allocation5_spill] sm:$0xff] }
 0x166   : > { %1199 = vrot.lane.b32.xlu1 %v8623_v36, %s8085_s15 }
 0x167   : > { %v9376_v39 = vpop.permute.xlu0 %1020 }
 0x168   : > { %16608 = vst [vmem:[#allocation222_spill] sm:$0xff] %v9376_v39  ;;  %v9378_v43 = vpop.permute.xlu1 %1022 }
 0x169   : > { %16609 = vst [vmem:[#allocation223_spill] sm:$0xff] %v9378_v43  ;;  %1201 = vrot.lane.b32.xlu0 %v16534_v24, %s8085_s15  ;;  %v16614_v24 = vld [vmem:[#allocation54_spill] sm:$0xff] }
 0x16a   : > { %1203 = vrot.lane.b32.xlu1 %v16536_v60, %s8085_s15 }
 0x16b   : > { %v9384_v42 = vpop.permute.xlu0 %1024 }
 0x16c   : > { %16610 = vst [vmem:[#allocation224_spill] sm:$0xff] %v9384_v42  ;;  %v9386_v37 = vpop.permute.xlu1 %1026  ;;  %v16627_v42 = vld [vmem:[#allocation3_spill] sm:$0xff] }
 0x16d   : > { %16611 = vst [vmem:[#allocation225_spill] sm:$0xff] %v9386_v37  ;;  %1205 = vrot.lane.b32.xlu0 %v16539_v49, %s8085_s15 }
 0x16e   : > { %1207 = vrot.lane.b32.xlu1 %v16542_v2, %s8085_s15  ;;  %v16617_v2 = vld [vmem:[#allocation58_spill] sm:$0xff] }
 0x16f   : > { %v9392_v36 = vpop.permute.xlu0 %1028 }
 0x170   : > { %16612 = vst [vmem:[#allocation226_spill] sm:$0xff] %v9392_v36  ;;  %v9394_v38 = vpop.permute.xlu1 %1030  ;;  %v16626_v36 = vld [vmem:[#allocation2_spill] sm:$0xff] }
 0x171   : > { %16613 = vst [vmem:[#allocation227_spill] sm:$0xff] %v9394_v38  ;;  %1209 = vrot.lane.b32.xlu0 %v16614_v24, %s8085_s15  ;;  %v9411_v38 = vld [vmem:[%s8185_s20 + $0xa0] sm:$0xff] }
 0x172   : > { %1211 = vrot.lane.b32.xlu1 %v8666_v25, %s8085_s15  ;;  %v9420_v25 = vld [vmem:[%s8185_s20 + $0xa8] sm:$0xff] }
 0x173   : > { %v9400_v60 = vpop.permute.xlu0 %1032 }
 0x174   : > { %16615 = vst [vmem:[#allocation54_spill] sm:$0xff] %v9400_v60  ;;  %v9402_v37 = vpop.permute.xlu1 %1034 }
 0x175   : > { %16616 = vst [vmem:[#allocation228_spill] sm:$0xff] %v9402_v37  ;;  %1213 = vrot.lane.b32.xlu0 %v16549_v1, %s8085_s15  ;;  %v9425_v1 = vld [vmem:[%s8185_s20 + $0xb0] sm:$0xff] }
 0x176   : > { %1215 = vrot.lane.b32.xlu1 %v16617_v2, %s8085_s15  ;;  %v9434_v2 = vld [vmem:[%s8185_s20 + $0xb8] sm:$0xff] }
 0x177   : > { %v9408_v49 = vpop.permute.xlu0 %1036 }
 0x178   : > { %16618 = vst [vmem:[#allocation58_spill] sm:$0xff] %v9408_v49  ;;  %v9413_v24 = vpop.permute.xlu1 %1038 }
 0x179   : > { %16619 = vst [vmem:[#allocation229_spill] sm:$0xff] %v9413_v24  ;;  %1217 = vrot.lane.b32.xlu0 %v16554_v7, %s8085_s15  ;;  %v9439_v24 = vld [vmem:[%s8185_s20 + $0xc0] sm:$0xff] }
 0x17a   : > { %1219 = vrot.lane.b32.xlu1 %v9411_v38, %s8085_s15 }
 0x17b   : > { %v9422_v37 = vpop.permute.xlu0 %1040 }
 0x17c   : > { %16620 = vst [vmem:[#allocation230_spill] sm:$0xff] %v9422_v37  ;;  %v9427_v60 = vpop.permute.xlu1 %1042 }
 0x17d   : > { %16621 = vst [vmem:[#allocation231_spill] sm:$0xff] %v9427_v60  ;;  %1221 = vrot.lane.b32.xlu0 %v9420_v25, %s8085_s15 }
 0x17e   : > { %1223 = vrot.lane.b32.xlu1 %v9425_v1, %s8085_s15 }
 0x17f   : > { %v9436_v7 = vpop.permute.xlu0 %1109 }
 0x180   : > { %16622 = vst [vmem:[#allocation232_spill] sm:$0xff] %v9436_v7  ;;  %v9441_v49 = vpop.permute.xlu1 %1111 }
 0x181   : > { %16623 = vst [vmem:[#allocation233_spill] sm:$0xff] %v9441_v49  ;;  %1225 = vrot.lane.b32.xlu0 %v9434_v2, %s8085_s15  ;;  %v16631_v49 = vld [vmem:[#allocation6_spill] sm:$0xff] }
 0x182   : > { %1227 = vrot.lane.b32.xlu1 %v9439_v24, %s8085_s15 }
 0x183   : > { %v9447_v60 = vpop.permute.xlu0 %1113 }
 0x184   : > { %16624 = vst [vmem:[#allocation234_spill] sm:$0xff] %v9447_v60  ;;  %v9449_v37 = vpop.permute.xlu1 %1115 }
 0x185   : > { %16625 = vst [vmem:[#allocation235_spill] sm:$0xff] %v9449_v37  ;;  %1298 = vrot.lane.b32.xlu0 %v16626_v36, %s8086_s17  ;;  %v16635_v36 = vld [vmem:[#allocation7_spill] sm:$0xff] }
 0x186   : > { %1300 = vrot.lane.b32.xlu1 %v16627_v42, %s8086_s17 }
 0x187   : > { %v9455_v43 = vpop.permute.xlu0 %1117 }
 0x188   : > { %16628 = vst [vmem:[#allocation2_spill] sm:$0xff] %v9455_v43  ;;  %v9457_v39 = vpop.permute.xlu1 %1119 }
 0x189   : > { %16629 = vst [vmem:[#allocation3_spill] sm:$0xff] %v9457_v39  ;;  %1302 = vrot.lane.b32.xlu0 %v16630_v54, %s8086_s17  ;;  %v16638_v39 = vld [vmem:[#allocation8_spill] sm:$0xff]  ;;  %v16639_v54 = vld [vmem:[#allocation10_spill] sm:$0xff] }
 0x18a   : > { %1304 = vrot.lane.b32.xlu1 %v16631_v49, %s8086_s17 }
 0x18b   : > { %v9463_v60 = vpop.permute.xlu0 %1121 }
 0x18c   : > { %16632 = vst [vmem:[#allocation5_spill] sm:$0xff] %v9463_v60  ;;  %v9465_v37 = vpop.permute.xlu1 %1123 }
 0x18d   : > { %16633 = vst [vmem:[#allocation6_spill] sm:$0xff] %v9465_v37  ;;  %1306 = vrot.lane.b32.xlu0 %v16634_v52, %s8086_s17  ;;  %v16642_v37 = vld [vmem:[#allocation11_spill] sm:$0xff]  ;;  %v16643_v52 = vld [vmem:[#allocation9_spill] sm:$0xff] }
 0x18e   : > { %1308 = vrot.lane.b32.xlu1 %v16635_v36, %s8086_s17 }
 0x18f   : > { %v9471_v42 = vpop.permute.xlu0 %1125 }
 0x190   : > { %16636 = vst [vmem:[#allocation4_spill] sm:$0xff] %v9471_v42  ;;  %v9473_v43 = vpop.permute.xlu1 %1127 }
 0x191   : > { %16637 = vst [vmem:[#allocation7_spill] sm:$0xff] %v9473_v43  ;;  %1310 = vrot.lane.b32.xlu0 %v16638_v39, %s8086_s17  ;;  %v16646_v43 = vld [vmem:[#allocation12_spill] sm:$0xff] }
 0x192   : > { %1312 = vrot.lane.b32.xlu1 %v16639_v54, %s8086_s17 }
 0x193   : > { %v9479_v49 = vpop.permute.xlu0 %1129 }
 0x194   : > { %16640 = vst [vmem:[#allocation8_spill] sm:$0xff] %v9479_v49  ;;  %v9481_v60 = vpop.permute.xlu1 %1131 }
 0x195   : > { %16641 = vst [vmem:[#allocation10_spill] sm:$0xff] %v9481_v60  ;;  %1314 = vrot.lane.b32.xlu0 %v16642_v37, %s8086_s17  ;;  %v16650_v60 = vld [vmem:[#allocation15_spill] sm:$0xff] }
 0x196   : > { %1316 = vrot.lane.b32.xlu1 %v16643_v52, %s8086_s17 }
 0x197   : > { %v9487_v7 = vpop.permute.xlu0 %1133 }
 0x198   : > { %16644 = vst [vmem:[#allocation11_spill] sm:$0xff] %v9487_v7  ;;  %v9489_v42 = vpop.permute.xlu1 %1135 }
 0x199   : > { %16645 = vst [vmem:[#allocation9_spill] sm:$0xff] %v9489_v42  ;;  %1318 = vrot.lane.b32.xlu0 %v16646_v43, %s8086_s17  ;;  %v16654_v42 = vld [vmem:[#allocation14_spill] sm:$0xff] }
 0x19a   : > { %1320 = vrot.lane.b32.xlu1 %v16647_v58, %s8086_s17 }
 0x19b   : > { %v9495_v53 = vpop.permute.xlu0 %1137 }
 0x19c   : > { %16648 = vst [vmem:[#allocation12_spill] sm:$0xff] %v9495_v53  ;;  %v9497_v49 = vpop.permute.xlu1 %1139 }
 0x19d   : > { %16649 = vst [vmem:[#allocation13_spill] sm:$0xff] %v9497_v49  ;;  %1322 = vrot.lane.b32.xlu0 %v16650_v60, %s8086_s17  ;;  %v16658_v49 = vld [vmem:[#allocation18_spill] sm:$0xff] }
 0x19e   : > { %1324 = vrot.lane.b32.xlu1 %v16651_v5, %s8086_s17 }
 0x19f   : > { %v9503_v3 = vpop.permute.xlu0 %1141 }
 0x1a0   : > { %16652 = vst [vmem:[#allocation15_spill] sm:$0xff] %v9503_v3  ;;  %v9505_v7 = vpop.permute.xlu1 %1143 }
 0x1a1   : > { %16653 = vst [vmem:[#allocation16_spill] sm:$0xff] %v9505_v7  ;;  %1326 = vrot.lane.b32.xlu0 %v16654_v42, %s8086_s17  ;;  %v16662_v7 = vld [vmem:[#allocation21_spill] sm:$0xff] }
 0x1a2   : > { %1328 = vrot.lane.b32.xlu1 %v16655_v32, %s8086_s17 }
 0x1a3   : > { %v9511_v13 = vpop.permute.xlu0 %1145 }
 0x1a4   : > { %16656 = vst [vmem:[#allocation14_spill] sm:$0xff] %v9511_v13  ;;  %v9513_v53 = vpop.permute.xlu1 %1147 }
 0x1a5   : > { %16657 = vst [vmem:[#allocation17_spill] sm:$0xff] %v9513_v53  ;;  %1330 = vrot.lane.b32.xlu0 %v16658_v49, %s8086_s17  ;;  %v16666_v53 = vld [vmem:[#allocation22_spill] sm:$0xff] }
 0x1a6   : > { %1332 = vrot.lane.b32.xlu1 %v16659_v14, %s8086_s17 }
 0x1a7   : > { %v9519_v8 = vpop.permute.xlu0 %1149 }
 0x1a8   : > { %16660 = vst [vmem:[#allocation18_spill] sm:$0xff] %v9519_v8  ;;  %v9521_v3 = vpop.permute.xlu1 %1151 }
 0x1a9   : > { %16661 = vst [vmem:[#allocation20_spill] sm:$0xff] %v9521_v3  ;;  %1334 = vrot.lane.b32.xlu0 %v16662_v7, %s8086_s17  ;;  %v16670_v3 = vld [vmem:[#allocation25_spill] sm:$0xff] }
 0x1aa   : > { %1336 = vrot.lane.b32.xlu1 %v16663_v22, %s8086_s17 }
 0x1ab   : > { %v9527_v16 = vpop.permute.xlu0 %1153 }
 0x1ac   : > { %16664 = vst [vmem:[#allocation21_spill] sm:$0xff] %v9527_v16  ;;  %v9529_v13 = vpop.permute.xlu1 %1155 }
 0x1ad   : > { %16665 = vst [vmem:[#allocation19_spill] sm:$0xff] %v9529_v13  ;;  %1338 = vrot.lane.b32.xlu0 %v16666_v53, %s8086_s17  ;;  %v16674_v13 = vld [vmem:[#allocation24_spill] sm:$0xff] }
 0x1ae   : > { %1340 = vrot.lane.b32.xlu1 %v16667_v59, %s8086_s17 }
 0x1af   : > { %v9535_v50 = vpop.permute.xlu0 %1157 }
 0x1b0   : > { %16668 = vst [vmem:[#allocation22_spill] sm:$0xff] %v9535_v50  ;;  %v9537_v8 = vpop.permute.xlu1 %1159 }
 0x1b1   : > { %16669 = vst [vmem:[#allocation23_spill] sm:$0xff] %v9537_v8  ;;  %1342 = vrot.lane.b32.xlu0 %v16670_v3, %s8086_s17  ;;  %v16678_v8 = vld [vmem:[#allocation28_spill] sm:$0xff] }
 0x1b2   : > { %1344 = vrot.lane.b32.xlu1 %v16671_v48, %s8086_s17 }
 0x1b3   : > { %v9543_v33 = vpop.permute.xlu0 %1161 }
 0x1b4   : > { %16672 = vst [vmem:[#allocation25_spill] sm:$0xff] %v9543_v33  ;;  %v9545_v16 = vpop.permute.xlu1 %1163 }
 0x1b5   : > { %16673 = vst [vmem:[#allocation26_spill] sm:$0xff] %v9545_v16  ;;  %1346 = vrot.lane.b32.xlu0 %v16674_v13, %s8086_s17  ;;  %v16682_v16 = vld [vmem:[#allocation31_spill] sm:$0xff] }
 0x1b6   : > { %1348 = vrot.lane.b32.xlu1 %v16675_v20, %s8086_s17 }
 0x1b7   : > { %v9551_v19 = vpop.permute.xlu0 %1165 }
 0x1b8   : > { %16676 = vst [vmem:[#allocation24_spill] sm:$0xff] %v9551_v19  ;;  %v9553_v50 = vpop.permute.xlu1 %1167 }
 0x1b9   : > { %16677 = vst [vmem:[#allocation27_spill] sm:$0xff] %v9553_v50  ;;  %1350 = vrot.lane.b32.xlu0 %v16678_v8, %s8086_s17  ;;  %v16686_v50 = vld [vmem:[#allocation32_spill] sm:$0xff] }
 0x1ba   : > { %1352 = vrot.lane.b32.xlu1 %v16679_v12, %s8086_s17 }
 0x1bb   : > { %v9559_v9 = vpop.permute.xlu0 %1169 }
 0x1bc   : > { %16680 = vst [vmem:[#allocation28_spill] sm:$0xff] %v9559_v9  ;;  %v9561_v33 = vpop.permute.xlu1 %1171 }
 0x1bd   : > { %16681 = vst [vmem:[#allocation30_spill] sm:$0xff] %v9561_v33  ;;  %1354 = vrot.lane.b32.xlu0 %v16682_v16, %s8086_s17  ;;  %v16690_v33 = vld [vmem:[#allocation35_spill] sm:$0xff] }
 0x1be   : > { %1356 = vrot.lane.b32.xlu1 %v16683_v63, %s8086_s17 }
 0x1bf   : > { %v9567_v62 = vpop.permute.xlu0 %1173 }
 0x1c0   : > { %16684 = vst [vmem:[#allocation31_spill] sm:$0xff] %v9567_v62  ;;  %v9569_v19 = vpop.permute.xlu1 %1175 }
 0x1c1   : > { %16685 = vst [vmem:[#allocation29_spill] sm:$0xff] %v9569_v19  ;;  %1358 = vrot.lane.b32.xlu0 %v16686_v50, %s8086_s17  ;;  %v16694_v19 = vld [vmem:[#allocation34_spill] sm:$0xff] }
 0x1c2   : > { %1360 = vrot.lane.b32.xlu1 %v16687_v57, %s8086_s17 }
 0x1c3   : > { %v9575_v56 = vpop.permute.xlu0 %1177 }
 0x1c4   : > { %16688 = vst [vmem:[#allocation32_spill] sm:$0xff] %v9575_v56  ;;  %v9577_v9 = vpop.permute.xlu1 %1179 }
 0x1c5   : > { %16689 = vst [vmem:[#allocation33_spill] sm:$0xff] %v9577_v9  ;;  %1362 = vrot.lane.b32.xlu0 %v16690_v33, %s8086_s17  ;;  %v16698_v9 = vld [vmem:[#allocation38_spill] sm:$0xff] }
 0x1c6   : > { %1364 = vrot.lane.b32.xlu1 %v16691_v55, %s8086_s17 }
 0x1c7   : > { %v9583_v51 = vpop.permute.xlu0 %1181 }
 0x1c8   : > { %16692 = vst [vmem:[#allocation35_spill] sm:$0xff] %v9583_v51  ;;  %v9585_v62 = vpop.permute.xlu1 %1183 }
 0x1c9   : > { %16693 = vst [vmem:[#allocation36_spill] sm:$0xff] %v9585_v62  ;;  %1366 = vrot.lane.b32.xlu0 %v16694_v19, %s8086_s17  ;;  %v16702_v62 = vld [vmem:[#allocation41_spill] sm:$0xff] }
 0x1ca   : > { %1368 = vrot.lane.b32.xlu1 %v16695_v47, %s8086_s17 }
 0x1cb   : > { %v9591_v46 = vpop.permute.xlu0 %1185 }
 0x1cc   : > { %16696 = vst [vmem:[#allocation34_spill] sm:$0xff] %v9591_v46  ;;  %v9593_v56 = vpop.permute.xlu1 %1187 }
 0x1cd   : > { %16697 = vst [vmem:[#allocation37_spill] sm:$0xff] %v9593_v56  ;;  %1370 = vrot.lane.b32.xlu0 %v16698_v9, %s8086_s17  ;;  %v16706_v56 = vld [vmem:[#allocation42_spill] sm:$0xff] }
 0x1ce   : > { %1372 = vrot.lane.b32.xlu1 %v16699_v41, %s8086_s17 }
 0x1cf   : > { %v9599_v40 = vpop.permute.xlu0 %1189 }
 0x1d0   : > { %16700 = vst [vmem:[#allocation38_spill] sm:$0xff] %v9599_v40  ;;  %v9601_v51 = vpop.permute.xlu1 %1191 }
 0x1d1   : > { %16701 = vst [vmem:[#allocation40_spill] sm:$0xff] %v9601_v51  ;;  %1374 = vrot.lane.b32.xlu0 %v16702_v62, %s8086_s17  ;;  %v16710_v51 = vld [vmem:[#allocation45_spill] sm:$0xff] }
 0x1d2   : > { %1376 = vrot.lane.b32.xlu1 %v16703_v35, %s8086_s17 }
 0x1d3   : > { %v9607_v34 = vpop.permute.xlu0 %1193 }
 0x1d4   : > { %16704 = vst [vmem:[#allocation41_spill] sm:$0xff] %v9607_v34  ;;  %v9609_v46 = vpop.permute.xlu1 %1195 }
 0x1d5   : > { %16705 = vst [vmem:[#allocation39_spill] sm:$0xff] %v9609_v46  ;;  %1378 = vrot.lane.b32.xlu0 %v16706_v56, %s8086_s17  ;;  %v16714_v46 = vld [vmem:[#allocation44_spill] sm:$0xff] }
 0x1d6   : > { %1380 = vrot.lane.b32.xlu1 %v16707_v29, %s8086_s17 }
 0x1d7   : > { %v9615_v28 = vpop.permute.xlu0 %1197 }
 0x1d8   : > { %16708 = vst [vmem:[#allocation42_spill] sm:$0xff] %v9615_v28  ;;  %v9617_v40 = vpop.permute.xlu1 %1199 }
 0x1d9   : > { %16709 = vst [vmem:[#allocation43_spill] sm:$0xff] %v9617_v40  ;;  %1382 = vrot.lane.b32.xlu0 %v16710_v51, %s8086_s17  ;;  %v16718_v40 = vld [vmem:[#allocation52_spill] sm:$0xff] }
 0x1da   : > { %1384 = vrot.lane.b32.xlu1 %v16711_v27, %s8086_s17 }
 0x1db   : > { %v9623_v23 = vpop.permute.xlu0 %1201 }
 0x1dc   : > { %16712 = vst [vmem:[#allocation45_spill] sm:$0xff] %v9623_v23  ;;  %v9625_v34 = vpop.permute.xlu1 %1203 }
 0x1dd   : > { %16713 = vst [vmem:[#allocation48_spill] sm:$0xff] %v9625_v34  ;;  %1386 = vrot.lane.b32.xlu0 %v16714_v46, %s8086_s17  ;;  %v16722_v34 = vld [vmem:[#allocation56_spill] sm:$0xff] }
 0x1de   : > { %1388 = vrot.lane.b32.xlu1 %v16715_v18, %s8086_s17 }
 0x1df   : > { %v9631_v17 = vpop.permute.xlu0 %1205 }
 0x1e0   : > { %16716 = vst [vmem:[#allocation44_spill] sm:$0xff] %v9631_v17  ;;  %v9633_v28 = vpop.permute.xlu1 %1207 }
 0x1e1   : > { %16717 = vst [vmem:[#allocation51_spill] sm:$0xff] %v9633_v28  ;;  %1390 = vrot.lane.b32.xlu0 %v16718_v40, %s8086_s17  ;;  %v16726_v28 = vld [vmem:[#allocation59_spill] sm:$0xff] }
 0x1e2   : > { %1392 = vrot.lane.b32.xlu1 %v16719_v11, %s8086_s17 }
 0x1e3   : > { %v9639_v10 = vpop.permute.xlu0 %1209 }
 0x1e4   : > { %16720 = vst [vmem:[#allocation52_spill] sm:$0xff] %v9639_v10  ;;  %v9641_v23 = vpop.permute.xlu1 %1211  ;;  %v1289_v10 = vrot.slane %v9411_v38, 1 }
 0x1e5   : > { %16721 = vst [vmem:[#allocation55_spill] sm:$0xff] %v9641_v23  ;;  %1394 = vrot.lane.b32.xlu0 %v16722_v34, %s8086_s17  ;;  %v1290_v23 = vrot.slane %v9420_v25, 1 }
 0x1e6   : > { %1396 = vrot.lane.b32.xlu1 %v16723_v26, %s8086_s17 }
 0x1e7   : > { %v9647_v44 = vpop.permute.xlu0 %1213 }
 0x1e8   : > { %16724 = vst [vmem:[#allocation236_spill] sm:$0xff] %v9647_v44  ;;  %v9649_v17 = vpop.permute.xlu1 %1215  ;;  %v1292_v44 = vrot.slane %v9425_v1, 1 }
 0x1e9   : > { %16725 = vst [vmem:[#allocation237_spill] sm:$0xff] %v9649_v17  ;;  %1398 = vrot.lane.b32.xlu0 %v16726_v28, %s8086_s17  ;;  %v16731_v17 = vld [vmem:[#allocation64_spill] sm:$0xff]  ;;  %v1294_v28 = vrot.slane %v9434_v2, 1 }
 0x1ea   : > { %1400 = vrot.lane.b32.xlu1 %v16727_v45, %s8086_s17  ;;  %v9670_v45 = vsel %vm526_vm0, %v1289_v10, %v1290_v23 }
 0x1eb   : > { %v9657_v31 = vpop.permute.xlu0 %1217  ;;  %16733 = vst [vmem:[#allocation241_spill] sm:$0xff] %v9670_v45 }
 0x1ec   : > { %16728 = vst [vmem:[#allocation238_spill] sm:$0xff] %v9657_v31  ;;  %v9659_v30 = vpop.permute.xlu1 %1219  ;;  %v16735_v31 = vld [vmem:[#allocation62_spill] sm:$0xff] }
 0x1ed   : > { %16729 = vst [vmem:[#allocation239_spill] sm:$0xff] %v9659_v30  ;;  %1402 = vrot.lane.b32.xlu0 %v16730_v4, %s8086_s17  ;;  %v9677_v30 = vrot.slane %v9439_v24, 1 }
 0x1ee   : > { %1404 = vrot.lane.b32.xlu1 %v16731_v17, %s8086_s17  ;;  %v9682_v17 = vsel %vm526_vm0, %v1290_v23, %v1292_v44 }
 0x1ef   : > { %v9667_v26 = vpop.permute.xlu0 %1221  ;;  %16736 = vst [vmem:[#allocation62_spill] sm:$0xff] %v9677_v30 }
 0x1f0   : > { %16732 = vst [vmem:[#allocation240_spill] sm:$0xff] %v9667_v26  ;;  %v9672_v34 = vpop.permute.xlu1 %1223  ;;  %v9687_v26 = vsel %vm526_vm0, %v1292_v44, %v1294_v28 }
 0x1f1   : > { %16734 = vst [vmem:[#allocation242_spill] sm:$0xff] %v9672_v34  ;;  %1406 = vrot.lane.b32.xlu0 %v16735_v31, %s8086_s17  ;;  %16738 = vst [vmem:[#allocation244_spill] sm:$0xff] %v9687_v26  ;;  %v9697_v34 = vsel %vm526_vm0, %v1294_v28, %v9677_v30  ;;  %v16746_v28 = vld [vmem:[#allocation74_spill] sm:$0xff] }
 0x1f2   : > { %1408 = vrot.lane.b32.xlu1 %v9670_v45, %s8086_s17  ;;  %16740 = vst [vmem:[#allocation246_spill] sm:$0xff] %v9697_v34 }
 0x1f3   : > { %v9684_v4 = vpop.permute.xlu0 %1225 }
 0x1f4   : > { %16737 = vst [vmem:[#allocation243_spill] sm:$0xff] %v9684_v4  ;;  %v9689_v10 = vpop.permute.xlu1 %1227  ;;  %v16745_v4 = vld [vmem:[#allocation72_spill] sm:$0xff] }
 0x1f5   : > { %16739 = vst [vmem:[#allocation245_spill] sm:$0xff] %v9689_v10  ;;  %1410 = vrot.lane.b32.xlu0 %v9682_v17, %s8086_s17 }
 0x1f6   : > { %1412 = vrot.lane.b32.xlu1 %v9687_v26, %s8086_s17  ;;  %v16753_v26 = vld [vmem:[#allocation75_spill] sm:$0xff] }
 0x1f7   : > { %v9699_v45 = vpop.permute.xlu0 %1298 }
 0x1f8   : > { %16741 = vst [vmem:[#allocation247_spill] sm:$0xff] %v9699_v45  ;;  %v9701_v23 = vpop.permute.xlu1 %1300 }
 0x1f9   : > { %16742 = vst [vmem:[#allocation248_spill] sm:$0xff] %v9701_v23  ;;  %1414 = vrot.lane.b32.xlu0 %v9697_v34, %s8086_s17  ;;  %v16749_v34 = vld [vmem:[#allocation77_spill] sm:$0xff] }
 0x1fa   : > { %1416 = vrot.lane.b32.xlu1 %v9677_v30, %s8086_s17  ;;  %v16750_v30 = vld [vmem:[#allocation79_spill] sm:$0xff] }
 0x1fb   : > { %v9707_v44 = vpop.permute.xlu0 %1302 }
 0x1fc   : > { %16743 = vst [vmem:[#allocation249_spill] sm:$0xff] %v9707_v44  ;;  %v9709_v10 = vpop.permute.xlu1 %1304 }
 0x1fd   : > { %16744 = vst [vmem:[#allocation250_spill] sm:$0xff] %v9709_v10  ;;  %1487 = vrot.lane.b32.xlu0 %v16745_v4, %s8087_s18  ;;  %v16754_v4 = vld [vmem:[#allocation82_spill] sm:$0xff] }
 0x1fe   : > { %1489 = vrot.lane.b32.xlu1 %v16746_v28, %s8087_s18 }
 0x1ff   : > { %v9715_v45 = vpop.permute.xlu0 %1306 }
 0x200   : > { %16747 = vst [vmem:[#allocation72_spill] sm:$0xff] %v9715_v45  ;;  %v9717_v23 = vpop.permute.xlu1 %1308 }
 0x201   : > { %16748 = vst [vmem:[#allocation74_spill] sm:$0xff] %v9717_v23  ;;  %1491 = vrot.lane.b32.xlu0 %v16749_v34, %s8087_s18  ;;  %v16757_v23 = vld [vmem:[#allocation84_spill] sm:$0xff]  ;;  %v16758_v34 = vld [vmem:[#allocation87_spill] sm:$0xff] }
 0x202   : > { %1493 = vrot.lane.b32.xlu1 %v16750_v30, %s8087_s18 }
 0x203   : > { %v9723_v44 = vpop.permute.xlu0 %1310 }
 0x204   : > { %16751 = vst [vmem:[#allocation77_spill] sm:$0xff] %v9723_v44  ;;  %v9725_v10 = vpop.permute.xlu1 %1312 }
 0x205   : > { %16752 = vst [vmem:[#allocation79_spill] sm:$0xff] %v9725_v10  ;;  %1495 = vrot.lane.b32.xlu0 %v16753_v26, %s8087_s18  ;;  %v16761_v10 = vld [vmem:[#allocation89_spill] sm:$0xff] }
 0x206   : > { %1497 = vrot.lane.b32.xlu1 %v16754_v4, %s8087_s18  ;;  %v16762_v26 = vld [vmem:[#allocation85_spill] sm:$0xff] }
 0x207   : > { %v9731_v28 = vpop.permute.xlu0 %1314 }
 0x208   : > { %16755 = vst [vmem:[#allocation75_spill] sm:$0xff] %v9731_v28  ;;  %v9733_v45 = vpop.permute.xlu1 %1316 }
 0x209   : > { %16756 = vst [vmem:[#allocation251_spill] sm:$0xff] %v9733_v45  ;;  %1499 = vrot.lane.b32.xlu0 %v16757_v23, %s8087_s18  ;;  %v16765_v45 = vld [vmem:[#allocation92_spill] sm:$0xff]  ;;  %v16766_v23 = vld [vmem:[#allocation94_spill] sm:$0xff] }
 0x20a   : > { %1501 = vrot.lane.b32.xlu1 %v16758_v34, %s8087_s18 }
 0x20b   : > { %v9739_v30 = vpop.permute.xlu0 %1318 }
 0x20c   : > { %16759 = vst [vmem:[#allocation252_spill] sm:$0xff] %v9739_v30  ;;  %v9741_v44 = vpop.permute.xlu1 %1320 }
 0x20d   : > { %16760 = vst [vmem:[#allocation253_spill] sm:$0xff] %v9741_v44  ;;  %1503 = vrot.lane.b32.xlu0 %v16761_v10, %s8087_s18  ;;  %v16769_v44 = vld [vmem:[#allocation97_spill] sm:$0xff]  ;;  %v16770_v10 = vld [vmem:[#allocation99_spill] sm:$0xff] }
 0x20e   : > { %1505 = vrot.lane.b32.xlu1 %v16762_v26, %s8087_s18 }
 0x20f   : > { %v9747_v4 = vpop.permute.xlu0 %1322 }
 0x210   : > { %16763 = vst [vmem:[#allocation254_spill] sm:$0xff] %v9747_v4  ;;  %v9749_v28 = vpop.permute.xlu1 %1324 }
 0x211   : > { %16764 = vst [vmem:[#allocation255_spill] sm:$0xff] %v9749_v28  ;;  %1507 = vrot.lane.b32.xlu0 %v16765_v45, %s8087_s18  ;;  %v16773_v28 = vld [vmem:[#allocation95_spill] sm:$0xff]  ;;  %v16774_v45 = vld [vmem:[#allocation102_spill] sm:$0xff] }
 0x212   : > { %1509 = vrot.lane.b32.xlu1 %v16766_v23, %s8087_s18 }
 0x213   : > { %v9755_v34 = vpop.permute.xlu0 %1326 }
 0x214   : > { %16767 = vst [vmem:[#allocation256_spill] sm:$0xff] %v9755_v34  ;;  %v9757_v30 = vpop.permute.xlu1 %1328 }
 0x215   : > { %16768 = vst [vmem:[#allocation257_spill] sm:$0xff] %v9757_v30  ;;  %1511 = vrot.lane.b32.xlu0 %v16769_v44, %s8087_s18  ;;  %v16777_v30 = vld [vmem:[#allocation104_spill] sm:$0xff]  ;;  %v16778_v44 = vld [vmem:[#allocation107_spill] sm:$0xff] }
 0x216   : > { %1513 = vrot.lane.b32.xlu1 %v16770_v10, %s8087_s18 }
 0x217   : > { %v9763_v26 = vpop.permute.xlu0 %1330 }
 0x218   : > { %16771 = vst [vmem:[#allocation258_spill] sm:$0xff] %v9763_v26  ;;  %v9765_v4 = vpop.permute.xlu1 %1332 }
 0x219   : > { %16772 = vst [vmem:[#allocation259_spill] sm:$0xff] %v9765_v4  ;;  %1515 = vrot.lane.b32.xlu0 %v16773_v28, %s8087_s18  ;;  %v16781_v4 = vld [vmem:[#allocation109_spill] sm:$0xff] }
 0x21a   : > { %1517 = vrot.lane.b32.xlu1 %v16774_v45, %s8087_s18  ;;  %v16782_v28 = vld [vmem:[#allocation105_spill] sm:$0xff] }
 0x21b   : > { %v9771_v23 = vpop.permute.xlu0 %1334 }
 0x21c   : > { %16775 = vst [vmem:[#allocation260_spill] sm:$0xff] %v9771_v23  ;;  %v9773_v34 = vpop.permute.xlu1 %1336 }
 0x21d   : > { %16776 = vst [vmem:[#allocation261_spill] sm:$0xff] %v9773_v34  ;;  %1519 = vrot.lane.b32.xlu0 %v16777_v30, %s8087_s18  ;;  %v16785_v34 = vld [vmem:[#allocation112_spill] sm:$0xff]  ;;  %v16786_v30 = vld [vmem:[#allocation114_spill] sm:$0xff] }
 0x21e   : > { %1521 = vrot.lane.b32.xlu1 %v16778_v44, %s8087_s18 }
 0x21f   : > { %v9779_v10 = vpop.permute.xlu0 %1338 }
 0x220   : > { %16779 = vst [vmem:[#allocation262_spill] sm:$0xff] %v9779_v10  ;;  %v9781_v26 = vpop.permute.xlu1 %1340 }
 0x221   : > { %16780 = vst [vmem:[#allocation263_spill] sm:$0xff] %v9781_v26  ;;  %1523 = vrot.lane.b32.xlu0 %v16781_v4, %s8087_s18  ;;  %v16789_v26 = vld [vmem:[#allocation117_spill] sm:$0xff]  ;;  %v16790_v4 = vld [vmem:[#allocation119_spill] sm:$0xff] }
 0x222   : > { %1525 = vrot.lane.b32.xlu1 %v16782_v28, %s8087_s18 }
 0x223   : > { %v9787_v45 = vpop.permute.xlu0 %1342 }
 0x224   : > { %16783 = vst [vmem:[#allocation264_spill] sm:$0xff] %v9787_v45  ;;  %v9789_v23 = vpop.permute.xlu1 %1344 }
 0x225   : > { %16784 = vst [vmem:[#allocation265_spill] sm:$0xff] %v9789_v23  ;;  %1527 = vrot.lane.b32.xlu0 %v16785_v34, %s8087_s18  ;;  %v16793_v23 = vld [vmem:[#allocation115_spill] sm:$0xff]  ;;  %v16794_v34 = vld [vmem:[#allocation122_spill] sm:$0xff] }
 0x226   : > { %1529 = vrot.lane.b32.xlu1 %v16786_v30, %s8087_s18 }
 0x227   : > { %v9795_v44 = vpop.permute.xlu0 %1346 }
 0x228   : > { %16787 = vst [vmem:[#allocation266_spill] sm:$0xff] %v9795_v44  ;;  %v9797_v10 = vpop.permute.xlu1 %1348 }
 0x229   : > { %16788 = vst [vmem:[#allocation267_spill] sm:$0xff] %v9797_v10  ;;  %1531 = vrot.lane.b32.xlu0 %v16789_v26, %s8087_s18  ;;  %v16797_v10 = vld [vmem:[#allocation124_spill] sm:$0xff]  ;;  %v16798_v26 = vld [vmem:[#allocation127_spill] sm:$0xff] }
 0x22a   : > { %1533 = vrot.lane.b32.xlu1 %v16790_v4, %s8087_s18 }
 0x22b   : > { %v9803_v28 = vpop.permute.xlu0 %1350 }
 0x22c   : > { %16791 = vst [vmem:[#allocation268_spill] sm:$0xff] %v9803_v28  ;;  %v9805_v45 = vpop.permute.xlu1 %1352 }
 0x22d   : > { %16792 = vst [vmem:[#allocation269_spill] sm:$0xff] %v9805_v45  ;;  %1535 = vrot.lane.b32.xlu0 %v16793_v23, %s8087_s18  ;;  %v16801_v45 = vld [vmem:[#allocation129_spill] sm:$0xff] }
 0x22e   : > { %1537 = vrot.lane.b32.xlu1 %v16794_v34, %s8087_s18  ;;  %v16802_v23 = vld [vmem:[#allocation125_spill] sm:$0xff] }
 0x22f   : > { %v9811_v30 = vpop.permute.xlu0 %1354 }
 0x230   : > { %16795 = vst [vmem:[#allocation270_spill] sm:$0xff] %v9811_v30  ;;  %v9813_v44 = vpop.permute.xlu1 %1356 }
 0x231   : > { %16796 = vst [vmem:[#allocation271_spill] sm:$0xff] %v9813_v44  ;;  %1539 = vrot.lane.b32.xlu0 %v16797_v10, %s8087_s18  ;;  %v16805_v44 = vld [vmem:[#allocation132_spill] sm:$0xff]  ;;  %v16806_v10 = vld [vmem:[#allocation134_spill] sm:$0xff] }
 0x232   : > { %1541 = vrot.lane.b32.xlu1 %v16798_v26, %s8087_s18 }
 0x233   : > { %v9819_v4 = vpop.permute.xlu0 %1358 }
 0x234   : > { %16799 = vst [vmem:[#allocation272_spill] sm:$0xff] %v9819_v4  ;;  %v9821_v28 = vpop.permute.xlu1 %1360 }
 0x235   : > { %16800 = vst [vmem:[#allocation273_spill] sm:$0xff] %v9821_v28  ;;  %1543 = vrot.lane.b32.xlu0 %v16801_v45, %s8087_s18  ;;  %v16809_v28 = vld [vmem:[#allocation137_spill] sm:$0xff]  ;;  %v16810_v45 = vld [vmem:[#allocation139_spill] sm:$0xff] }
 0x236   : > { %1545 = vrot.lane.b32.xlu1 %v16802_v23, %s8087_s18 }
 0x237   : > { %v9827_v34 = vpop.permute.xlu0 %1362 }
 0x238   : > { %16803 = vst [vmem:[#allocation274_spill] sm:$0xff] %v9827_v34  ;;  %v9829_v30 = vpop.permute.xlu1 %1364 }
 0x239   : > { %16804 = vst [vmem:[#allocation275_spill] sm:$0xff] %v9829_v30  ;;  %1547 = vrot.lane.b32.xlu0 %v16805_v44, %s8087_s18  ;;  %v16813_v30 = vld [vmem:[#allocation135_spill] sm:$0xff]  ;;  %v16814_v44 = vld [vmem:[#allocation142_spill] sm:$0xff] }
 0x23a   : > { %1549 = vrot.lane.b32.xlu1 %v16806_v10, %s8087_s18 }
 0x23b   : > { %v9835_v26 = vpop.permute.xlu0 %1366 }
 0x23c   : > { %16807 = vst [vmem:[#allocation276_spill] sm:$0xff] %v9835_v26  ;;  %v9837_v4 = vpop.permute.xlu1 %1368 }
 0x23d   : > { %16808 = vst [vmem:[#allocation277_spill] sm:$0xff] %v9837_v4  ;;  %1551 = vrot.lane.b32.xlu0 %v16809_v28, %s8087_s18  ;;  %v16817_v4 = vld [vmem:[#allocation144_spill] sm:$0xff]  ;;  %v16818_v28 = vld [vmem:[#allocation147_spill] sm:$0xff] }
 0x23e   : > { %1553 = vrot.lane.b32.xlu1 %v16810_v45, %s8087_s18 }
 0x23f   : > { %v9843_v23 = vpop.permute.xlu0 %1370 }
 0x240   : > { %16811 = vst [vmem:[#allocation278_spill] sm:$0xff] %v9843_v23  ;;  %v9845_v34 = vpop.permute.xlu1 %1372 }
 0x241   : > { %16812 = vst [vmem:[#allocation279_spill] sm:$0xff] %v9845_v34  ;;  %1555 = vrot.lane.b32.xlu0 %v16813_v30, %s8087_s18  ;;  %v16821_v34 = vld [vmem:[#allocation149_spill] sm:$0xff] }
 0x242   : > { %1557 = vrot.lane.b32.xlu1 %v16814_v44, %s8087_s18  ;;  %v16822_v30 = vld [vmem:[#allocation145_spill] sm:$0xff] }
 0x243   : > { %v9851_v10 = vpop.permute.xlu0 %1374 }
 0x244   : > { %16815 = vst [vmem:[#allocation280_spill] sm:$0xff] %v9851_v10  ;;  %v9853_v26 = vpop.permute.xlu1 %1376 }
 0x245   : > { %16816 = vst [vmem:[#allocation281_spill] sm:$0xff] %v9853_v26  ;;  %1559 = vrot.lane.b32.xlu0 %v16817_v4, %s8087_s18  ;;  %v16825_v26 = vld [vmem:[#allocation152_spill] sm:$0xff]  ;;  %v16826_v4 = vld [vmem:[#allocation154_spill] sm:$0xff] }
 0x246   : > { %1561 = vrot.lane.b32.xlu1 %v16818_v28, %s8087_s18 }
 0x247   : > { %v9859_v45 = vpop.permute.xlu0 %1378 }
 0x248   : > { %16819 = vst [vmem:[#allocation282_spill] sm:$0xff] %v9859_v45  ;;  %v9861_v23 = vpop.permute.xlu1 %1380 }
 0x249   : > { %16820 = vst [vmem:[#allocation283_spill] sm:$0xff] %v9861_v23  ;;  %1563 = vrot.lane.b32.xlu0 %v16821_v34, %s8087_s18  ;;  %v16829_v23 = vld [vmem:[#allocation157_spill] sm:$0xff]  ;;  %v16830_v34 = vld [vmem:[#allocation159_spill] sm:$0xff] }
 0x24a   : > { %1565 = vrot.lane.b32.xlu1 %v16822_v30, %s8087_s18 }
 0x24b   : > { %v9867_v44 = vpop.permute.xlu0 %1382 }
 0x24c   : > { %16823 = vst [vmem:[#allocation284_spill] sm:$0xff] %v9867_v44  ;;  %v9869_v10 = vpop.permute.xlu1 %1384 }
 0x24d   : > { %16824 = vst [vmem:[#allocation285_spill] sm:$0xff] %v9869_v10  ;;  %1567 = vrot.lane.b32.xlu0 %v16825_v26, %s8087_s18  ;;  %v16833_v10 = vld [vmem:[#allocation155_spill] sm:$0xff]  ;;  %v16834_v26 = vld [vmem:[#allocation160_spill] sm:$0xff] }
 0x24e   : > { %1569 = vrot.lane.b32.xlu1 %v16826_v4, %s8087_s18 }
 0x24f   : > { %v9875_v28 = vpop.permute.xlu0 %1386 }
 0x250   : > { %16827 = vst [vmem:[#allocation286_spill] sm:$0xff] %v9875_v28  ;;  %v9877_v45 = vpop.permute.xlu1 %1388 }
 0x251   : > { %16828 = vst [vmem:[#allocation287_spill] sm:$0xff] %v9877_v45  ;;  %1571 = vrot.lane.b32.xlu0 %v16829_v23, %s8087_s18  ;;  %v16837_v45 = vld [vmem:[#allocation161_spill] sm:$0xff]  ;;  %v16838_v23 = vld [vmem:[#allocation163_spill] sm:$0xff] }
 0x252   : > { %1573 = vrot.lane.b32.xlu1 %v16830_v34, %s8087_s18 }
 0x253   : > { %v9883_v30 = vpop.permute.xlu0 %1390 }
 0x254   : > { %16831 = vst [vmem:[#allocation288_spill] sm:$0xff] %v9883_v30  ;;  %v9885_v44 = vpop.permute.xlu1 %1392 }
 0x255   : > { %16832 = vst [vmem:[#allocation289_spill] sm:$0xff] %v9885_v44  ;;  %1575 = vrot.lane.b32.xlu0 %v16833_v10, %s8087_s18  ;;  %v16841_v44 = vld [vmem:[#allocation165_spill] sm:$0xff] }
 0x256   : > { %1577 = vrot.lane.b32.xlu1 %v16834_v26, %s8087_s18 }
 0x257   : > { %v9891_v4 = vpop.permute.xlu0 %1394 }
 0x258   : > { %16835 = vst [vmem:[#allocation155_spill] sm:$0xff] %v9891_v4  ;;  %v9893_v28 = vpop.permute.xlu1 %1396 }
 0x259   : > { %16836 = vst [vmem:[#allocation290_spill] sm:$0xff] %v9893_v28  ;;  %1579 = vrot.lane.b32.xlu0 %v16837_v45, %s8087_s18  ;;  %v16844_v28 = vld [vmem:[#allocation167_spill] sm:$0xff] }
 0x25a   : > { %1581 = vrot.lane.b32.xlu1 %v16838_v23, %s8087_s18 }
 0x25b   : > { %v9899_v34 = vpop.permute.xlu0 %1398 }
 0x25c   : > { %16839 = vst [vmem:[#allocation161_spill] sm:$0xff] %v9899_v34  ;;  %v9901_v30 = vpop.permute.xlu1 %1400  ;;  %v1478_v34 = vrot.slane %v9411_v38, 2 }
 0x25d   : > { %16840 = vst [vmem:[#allocation291_spill] sm:$0xff] %v9901_v30  ;;  %1583 = vrot.lane.b32.xlu0 %v16841_v44, %s8087_s18  ;;  %v1479_v30 = vrot.slane %v9420_v25, 2 }
 0x25e   : > { %1585 = vrot.lane.b32.xlu1 %v9125_v15, %s8087_s18 }
 0x25f   : > { %v9907_v26 = vpop.permute.xlu0 %1402 }
 0x260   : > { %16842 = vst [vmem:[#allocation292_spill] sm:$0xff] %v9907_v26  ;;  %v9909_v4 = vpop.permute.xlu1 %1404  ;;  %v1481_v26 = vrot.slane %v9425_v1, 2 }
 0x261   : > { %16843 = vst [vmem:[#allocation293_spill] sm:$0xff] %v9909_v4  ;;  %1587 = vrot.lane.b32.xlu0 %v16844_v28, %s8087_s18  ;;  %v1483_v4 = vrot.slane %v9434_v2, 2 }
 0x262   : > { %1589 = vrot.lane.b32.xlu1 %v9164_v21, %s8087_s18  ;;  %v9930_v21 = vsel %vm815_vm1, %v1478_v34, %v1479_v30 }
 0x263   : > { %v9917_v23 = vpop.permute.xlu0 %1406  ;;  %16848 = vst [vmem:[#allocation297_spill] sm:$0xff] %v9930_v21  ;;  %v9947_v34 = vsel %vm815_vm1, %v1481_v26, %v1483_v4 }
 0x264   : > { %16845 = vst [vmem:[#allocation294_spill] sm:$0xff] %v9917_v23  ;;  %v9919_v44 = vpop.permute.xlu1 %1408  ;;  %v9942_v23 = vsel %vm815_vm1, %v1479_v30, %v1481_v26  ;;  %16853 = vst [vmem:[#allocation302_spill] sm:$0xff] %v9947_v34 }
 0x265   : > { %16846 = vst [vmem:[#allocation295_spill] sm:$0xff] %v9919_v44  ;;  %1591 = vrot.lane.b32.xlu0 %v9172_v61, %s8087_s18  ;;  %v9937_v44 = vrot.slane %v9439_v24, 2  ;;  %16851 = vst [vmem:[#allocation300_spill] sm:$0xff] %v9942_v23 }
 0x266   : > { %1593 = vrot.lane.b32.xlu1 %v9182_v6, %s8087_s18 }
 0x267   : > { %v9927_v28 = vpop.permute.xlu0 %1410  ;;  %16850 = vst [vmem:[#allocation299_spill] sm:$0xff] %v9937_v44 }
 0x268   : > { %16847 = vst [vmem:[#allocation296_spill] sm:$0xff] %v9927_v28  ;;  %v9932_v15 = vpop.permute.xlu1 %1412 }
 0x269   : > { %16849 = vst [vmem:[#allocation298_spill] sm:$0xff] %v9932_v15  ;;  %1595 = vrot.lane.b32.xlu0 %v9167_v0, %s8087_s18 }
 0x26a   : > { %1597 = vrot.lane.b32.xlu1 %v9930_v21, %s8087_s18  ;;  %v9957_v21 = vsel %vm815_vm1, %v1483_v4, %v9937_v44  ;;  %v9977_v4 = vld [vmem:[%s8185_s20 + $0x58] sm:$0xff] }
 0x26b   : > { %v9944_v28 = vpop.permute.xlu0 %1414  ;;  %16855 = vst [vmem:[#allocation304_spill] sm:$0xff] %v9957_v21 }
 0x26c   : > { %16852 = vst [vmem:[#allocation301_spill] sm:$0xff] %v9944_v28  ;;  %v9949_v15 = vpop.permute.xlu1 %1416 }
 0x26d   : > { %16854 = vst [vmem:[#allocation303_spill] sm:$0xff] %v9949_v15  ;;  %1599 = vrot.lane.b32.xlu0 %v9942_v23, %s8087_s18 }
 0x26e   : > { %1601 = vrot.lane.b32.xlu1 %v9947_v34, %s8087_s18  ;;  %v9972_v34 = vld [vmem:[%s8185_s20 + $0x50] sm:$0xff] }
 0x26f   : > { %v9959_v30 = vpop.permute.xlu0 %1487 }
 0x270   : > { %16856 = vst [vmem:[#allocation305_spill] sm:$0xff] %v9959_v30  ;;  %v9961_v28 = vpop.permute.xlu1 %1489 }
 0x271   : > { %16857 = vst [vmem:[#allocation306_spill] sm:$0xff] %v9961_v28  ;;  %1603 = vrot.lane.b32.xlu0 %v9957_v21, %s8087_s18 }
 0x272   : > { %1605 = vrot.lane.b32.xlu1 %v9937_v44, %s8087_s18  ;;  %s8093_s18 = smov 48  }
 0x273   : > { %v9967_v26 = vpop.permute.xlu0 %1491 }
 0x274   : > { %16858 = vst [vmem:[#allocation307_spill] sm:$0xff] %v9967_v26  ;;  %v9969_v15 = vpop.permute.xlu1 %1493  ;;  %v9986_v26 = vld [vmem:[%s8185_s20 + $0x60] sm:$0xff] }
 0x275   : > { %16859 = vst [vmem:[#allocation308_spill] sm:$0xff] %v9969_v15  ;;  %1672 = vrot.lane.b32.xlu0 %v9972_v34, %s8088_s19  ;;  %v9991_v15 = vld [vmem:[%s8185_s20 + $0x68] sm:$0xff] }
 0x276   : > { %1674 = vrot.lane.b32.xlu1 %v9977_v4, %s8088_s19 }
 0x277   : > { %v9981_v28 = vpop.permute.xlu0 %1495 }
 0x278   : > { %16860 = vst [vmem:[#allocation309_spill] sm:$0xff] %v9981_v28  ;;  %v9983_v30 = vpop.permute.xlu1 %1497  ;;  %v10000_v28 = vld [vmem:[%s8185_s20 + $0x70] sm:$0xff] }
 0x279   : > { %16861 = vst [vmem:[#allocation310_spill] sm:$0xff] %v9983_v30  ;;  %1676 = vrot.lane.b32.xlu0 %v9986_v26, %s8088_s19  ;;  %v10005_v30 = vld [vmem:[%s8286_s13] sm:$0xff] }
 0x27a   : > { %1678 = vrot.lane.b32.xlu1 %v9991_v15, %s8088_s19  ;;  %16864 = vst [vmem:[#allocation313_spill] sm:$0xff] %v10005_v30 }
 0x27b   : > { %v9995_v44 = vpop.permute.xlu0 %1499 }
 0x27c   : > { %16862 = vst [vmem:[#allocation311_spill] sm:$0xff] %v9995_v44  ;;  %v9997_v21 = vpop.permute.xlu1 %1501  ;;  %v10014_v44 = vld [vmem:[%s8286_s13 + $0x8] sm:$0xff] }
 0x27d   : > { %16863 = vst [vmem:[#allocation312_spill] sm:$0xff] %v9997_v21  ;;  %1680 = vrot.lane.b32.xlu0 %v10000_v28, %s8088_s19  ;;  %16867 = vst [vmem:[#allocation316_spill] sm:$0xff] %v10014_v44  ;;  %v10019_v21 = vld [vmem:[%s8286_s13 + $0x10] sm:$0xff] }
 0x27e   : > { %1682 = vrot.lane.b32.xlu1 %v10005_v30, %s8088_s19  ;;  %16868 = vst [vmem:[#allocation317_spill] sm:$0xff] %v10019_v21 }
 0x27f   : > { %v10009_v23 = vpop.permute.xlu0 %1503 }
 0x280   : > { %16865 = vst [vmem:[#allocation314_spill] sm:$0xff] %v10009_v23  ;;  %v10011_v0 = vpop.permute.xlu1 %1505  ;;  %v10028_v23 = vld [vmem:[%s8286_s13 + $0x18] sm:$0xff] }
 0x281   : > { %16866 = vst [vmem:[#allocation315_spill] sm:$0xff] %v10011_v0  ;;  %1684 = vrot.lane.b32.xlu0 %v10014_v44, %s8088_s19  ;;  %16871 = vst [vmem:[#allocation320_spill] sm:$0xff] %v10028_v23  ;;  %v10033_v0 = vld [vmem:[%s8286_s13 + $0x20] sm:$0xff] }
 0x282   : > { %1686 = vrot.lane.b32.xlu1 %v10019_v21, %s8088_s19  ;;  %16872 = vst [vmem:[#allocation321_spill] sm:$0xff] %v10033_v0 }
 0x283   : > { %v10023_v6 = vpop.permute.xlu0 %1507 }
 0x284   : > { %16869 = vst [vmem:[#allocation318_spill] sm:$0xff] %v10023_v6  ;;  %v10025_v61 = vpop.permute.xlu1 %1509  ;;  %v10042_v6 = vld [vmem:[%s8286_s13 + $0x28] sm:$0xff] }
 0x285   : > { %16870 = vst [vmem:[#allocation319_spill] sm:$0xff] %v10025_v61  ;;  %1688 = vrot.lane.b32.xlu0 %v10028_v23, %s8088_s19  ;;  %16875 = vst [vmem:[#allocation324_spill] sm:$0xff] %v10042_v6  ;;  %v10047_v61 = vld [vmem:[%s8286_s13 + $0x30] sm:$0xff] }
 0x286   : > { %1690 = vrot.lane.b32.xlu1 %v10033_v0, %s8088_s19  ;;  %16876 = vst [vmem:[#allocation325_spill] sm:$0xff] %v10047_v61 }
 0x287   : > { %v10037_v44 = vpop.permute.xlu0 %1511 }
 0x288   : > { %16873 = vst [vmem:[#allocation322_spill] sm:$0xff] %v10037_v44  ;;  %v10039_v21 = vpop.permute.xlu1 %1513  ;;  %v10056_v44 = vld [vmem:[%s8286_s13 + $0x38] sm:$0xff] }
 0x289   : > { %16874 = vst [vmem:[#allocation323_spill] sm:$0xff] %v10039_v21  ;;  %1692 = vrot.lane.b32.xlu0 %v10042_v6, %s8088_s19  ;;  %16879 = vst [vmem:[#allocation328_spill] sm:$0xff] %v10056_v44  ;;  %v10061_v21 = vld [vmem:[%s8286_s13 + $0x40] sm:$0xff] }
 0x28a   : > { %1694 = vrot.lane.b32.xlu1 %v10047_v61, %s8088_s19  ;;  %16880 = vst [vmem:[#allocation329_spill] sm:$0xff] %v10061_v21 }
 0x28b   : > { %v10051_v23 = vpop.permute.xlu0 %1515 }
 0x28c   : > { %16877 = vst [vmem:[#allocation326_spill] sm:$0xff] %v10051_v23  ;;  %v10053_v0 = vpop.permute.xlu1 %1517  ;;  %v10070_v23 = vld [vmem:[%s8286_s13 + $0x48] sm:$0xff] }
 0x28d   : > { %16878 = vst [vmem:[#allocation327_spill] sm:$0xff] %v10053_v0  ;;  %1696 = vrot.lane.b32.xlu0 %v10056_v44, %s8088_s19  ;;  %16883 = vst [vmem:[#allocation332_spill] sm:$0xff] %v10070_v23  ;;  %v10075_v0 = vld [vmem:[%s8286_s13 + $0x50] sm:$0xff] }
 0x28e   : > { %1698 = vrot.lane.b32.xlu1 %v10061_v21, %s8088_s19  ;;  %16884 = vst [vmem:[#allocation333_spill] sm:$0xff] %v10075_v0 }
 0x28f   : > { %v10065_v6 = vpop.permute.xlu0 %1519 }
 0x290   : > { %16881 = vst [vmem:[#allocation330_spill] sm:$0xff] %v10065_v6  ;;  %v10067_v61 = vpop.permute.xlu1 %1521  ;;  %v10084_v6 = vld [vmem:[%s8286_s13 + $0x58] sm:$0xff] }
 0x291   : > { %16882 = vst [vmem:[#allocation331_spill] sm:$0xff] %v10067_v61  ;;  %1700 = vrot.lane.b32.xlu0 %v10070_v23, %s8088_s19  ;;  %16887 = vst [vmem:[#allocation336_spill] sm:$0xff] %v10084_v6  ;;  %v10089_v61 = vld [vmem:[%s8286_s13 + $0x60] sm:$0xff] }
 0x292   : > { %1702 = vrot.lane.b32.xlu1 %v10075_v0, %s8088_s19  ;;  %16888 = vst [vmem:[#allocation337_spill] sm:$0xff] %v10089_v61 }
 0x293   : > { %v10079_v44 = vpop.permute.xlu0 %1523 }
 0x294   : > { %16885 = vst [vmem:[#allocation334_spill] sm:$0xff] %v10079_v44  ;;  %v10081_v21 = vpop.permute.xlu1 %1525  ;;  %v10098_v44 = vld [vmem:[%s8286_s13 + $0x68] sm:$0xff] }
 0x295   : > { %16886 = vst [vmem:[#allocation335_spill] sm:$0xff] %v10081_v21  ;;  %1704 = vrot.lane.b32.xlu0 %v10084_v6, %s8088_s19  ;;  %16891 = vst [vmem:[#allocation340_spill] sm:$0xff] %v10098_v44  ;;  %v10103_v21 = vld [vmem:[%s8286_s13 + $0x70] sm:$0xff] }
 0x296   : > { %1706 = vrot.lane.b32.xlu1 %v10089_v61, %s8088_s19  ;;  %16892 = vst [vmem:[#allocation341_spill] sm:$0xff] %v10103_v21 }
 0x297   : > { %v10093_v23 = vpop.permute.xlu0 %1527 }
 0x298   : > { %16889 = vst [vmem:[#allocation338_spill] sm:$0xff] %v10093_v23  ;;  %v10095_v0 = vpop.permute.xlu1 %1529  ;;  %v10112_v23 = vld [vmem:[%s8286_s13 + $0x78] sm:$0xff] }
 0x299   : > { %16890 = vst [vmem:[#allocation339_spill] sm:$0xff] %v10095_v0  ;;  %1708 = vrot.lane.b32.xlu0 %v10098_v44, %s8088_s19  ;;  %16895 = vst [vmem:[#allocation344_spill] sm:$0xff] %v10112_v23  ;;  %v10117_v0 = vld [vmem:[%s8286_s13 + $0x80] sm:$0xff] }
 0x29a   : > { %1710 = vrot.lane.b32.xlu1 %v10103_v21, %s8088_s19  ;;  %16896 = vst [vmem:[#allocation345_spill] sm:$0xff] %v10117_v0 }
 0x29b   : > { %v10107_v6 = vpop.permute.xlu0 %1531 }
 0x29c   : > { %16893 = vst [vmem:[#allocation342_spill] sm:$0xff] %v10107_v6  ;;  %v10109_v61 = vpop.permute.xlu1 %1533  ;;  %v10126_v6 = vld [vmem:[%s8286_s13 + $0x88] sm:$0xff] }
 0x29d   : > { %16894 = vst [vmem:[#allocation343_spill] sm:$0xff] %v10109_v61  ;;  %1712 = vrot.lane.b32.xlu0 %v10112_v23, %s8088_s19  ;;  %16899 = vst [vmem:[#allocation348_spill] sm:$0xff] %v10126_v6  ;;  %v10131_v61 = vld [vmem:[%s8286_s13 + $0x90] sm:$0xff] }
 0x29e   : > { %1714 = vrot.lane.b32.xlu1 %v10117_v0, %s8088_s19  ;;  %16900 = vst [vmem:[#allocation349_spill] sm:$0xff] %v10131_v61 }
 0x29f   : > { %v10121_v44 = vpop.permute.xlu0 %1535 }
 0x2a0   : > { %16897 = vst [vmem:[#allocation346_spill] sm:$0xff] %v10121_v44  ;;  %v10123_v21 = vpop.permute.xlu1 %1537  ;;  %v10140_v44 = vld [vmem:[%s8286_s13 + $0x98] sm:$0xff] }
 0x2a1   : > { %16898 = vst [vmem:[#allocation347_spill] sm:$0xff] %v10123_v21  ;;  %1716 = vrot.lane.b32.xlu0 %v10126_v6, %s8088_s19  ;;  %16903 = vst [vmem:[#allocation352_spill] sm:$0xff] %v10140_v44  ;;  %v10145_v21 = vld [vmem:[%s8286_s13 + $0xa0] sm:$0xff] }
 0x2a2   : > { %1718 = vrot.lane.b32.xlu1 %v10131_v61, %s8088_s19  ;;  %16904 = vst [vmem:[#allocation353_spill] sm:$0xff] %v10145_v21 }
 0x2a3   : > { %v10135_v23 = vpop.permute.xlu0 %1539 }
 0x2a4   : > { %16901 = vst [vmem:[#allocation350_spill] sm:$0xff] %v10135_v23  ;;  %v10137_v0 = vpop.permute.xlu1 %1541  ;;  %v10154_v23 = vld [vmem:[%s8286_s13 + $0xa8] sm:$0xff] }
 0x2a5   : > { %16902 = vst [vmem:[#allocation351_spill] sm:$0xff] %v10137_v0  ;;  %1720 = vrot.lane.b32.xlu0 %v10140_v44, %s8088_s19  ;;  %16907 = vst [vmem:[#allocation356_spill] sm:$0xff] %v10154_v23  ;;  %v10159_v0 = vld [vmem:[%s8286_s13 + $0xb0] sm:$0xff] }
 0x2a6   : > { %1722 = vrot.lane.b32.xlu1 %v10145_v21, %s8088_s19  ;;  %16908 = vst [vmem:[#allocation357_spill] sm:$0xff] %v10159_v0 }
 0x2a7   : > { %v10149_v6 = vpop.permute.xlu0 %1543 }
 0x2a8   : > { %16905 = vst [vmem:[#allocation354_spill] sm:$0xff] %v10149_v6  ;;  %v10151_v61 = vpop.permute.xlu1 %1545  ;;  %v10168_v6 = vld [vmem:[%s8286_s13 + $0xb8] sm:$0xff] }
 0x2a9   : > { %16906 = vst [vmem:[#allocation355_spill] sm:$0xff] %v10151_v61  ;;  %1724 = vrot.lane.b32.xlu0 %v10154_v23, %s8088_s19  ;;  %16911 = vst [vmem:[#allocation360_spill] sm:$0xff] %v10168_v6  ;;  %v10173_v61 = vld [vmem:[%s8286_s13 + $0xc0] sm:$0xff] }
 0x2aa   : > { %1726 = vrot.lane.b32.xlu1 %v10159_v0, %s8088_s19  ;;  %16912 = vst [vmem:[#allocation361_spill] sm:$0xff] %v10173_v61 }
 0x2ab   : > { %v10163_v44 = vpop.permute.xlu0 %1547 }
 0x2ac   : > { %16909 = vst [vmem:[#allocation358_spill] sm:$0xff] %v10163_v44  ;;  %v10165_v21 = vpop.permute.xlu1 %1549  ;;  %v10182_v44 = vld [vmem:[%s8286_s13 + $0xc8] sm:$0xff] }
 0x2ad   : > { %16910 = vst [vmem:[#allocation359_spill] sm:$0xff] %v10165_v21  ;;  %1728 = vrot.lane.b32.xlu0 %v10168_v6, %s8088_s19  ;;  %16915 = vst [vmem:[#allocation364_spill] sm:$0xff] %v10182_v44  ;;  %v10187_v21 = vld [vmem:[%s8286_s13 + $0xd0] sm:$0xff] }
 0x2ae   : > { %1730 = vrot.lane.b32.xlu1 %v10173_v61, %s8088_s19  ;;  %16916 = vst [vmem:[#allocation365_spill] sm:$0xff] %v10187_v21 }
 0x2af   : > { %v10177_v23 = vpop.permute.xlu0 %1551 }
 0x2b0   : > { %16913 = vst [vmem:[#allocation362_spill] sm:$0xff] %v10177_v23  ;;  %v10179_v0 = vpop.permute.xlu1 %1553  ;;  %v10196_v23 = vld [vmem:[%s8286_s13 + $0xd8] sm:$0xff] }
 0x2b1   : > { %16914 = vst [vmem:[#allocation363_spill] sm:$0xff] %v10179_v0  ;;  %1732 = vrot.lane.b32.xlu0 %v10182_v44, %s8088_s19  ;;  %16919 = vst [vmem:[#allocation368_spill] sm:$0xff] %v10196_v23  ;;  %v10201_v0 = vld [vmem:[%s8286_s13 + $0xe0] sm:$0xff] }
 0x2b2   : > { %1734 = vrot.lane.b32.xlu1 %v10187_v21, %s8088_s19  ;;  %16920 = vst [vmem:[#allocation369_spill] sm:$0xff] %v10201_v0 }
 0x2b3   : > { %v10191_v6 = vpop.permute.xlu0 %1555 }
 0x2b4   : > { %16917 = vst [vmem:[#allocation366_spill] sm:$0xff] %v10191_v6  ;;  %v10193_v61 = vpop.permute.xlu1 %1557  ;;  %v10210_v6 = vld [vmem:[%s8286_s13 + $0xe8] sm:$0xff] }
 0x2b5   : > { %16918 = vst [vmem:[#allocation367_spill] sm:$0xff] %v10193_v61  ;;  %1736 = vrot.lane.b32.xlu0 %v10196_v23, %s8088_s19  ;;  %16923 = vst [vmem:[#allocation372_spill] sm:$0xff] %v10210_v6  ;;  %v10215_v61 = vld [vmem:[%s8286_s13 + $0xf0] sm:$0xff] }
 0x2b6   : > { %1738 = vrot.lane.b32.xlu1 %v10201_v0, %s8088_s19  ;;  %16924 = vst [vmem:[#allocation373_spill] sm:$0xff] %v10215_v61 }
 0x2b7   : > { %v10205_v44 = vpop.permute.xlu0 %1559 }
 0x2b8   : > { %16921 = vst [vmem:[#allocation370_spill] sm:$0xff] %v10205_v44  ;;  %v10207_v21 = vpop.permute.xlu1 %1561  ;;  %v10224_v44 = vld [vmem:[%s8286_s13 + $0xf8] sm:$0xff] }
 0x2b9   : > { %16922 = vst [vmem:[#allocation371_spill] sm:$0xff] %v10207_v21  ;;  %1740 = vrot.lane.b32.xlu0 %v10210_v6, %s8088_s19  ;;  %16927 = vst [vmem:[#allocation376_spill] sm:$0xff] %v10224_v44  ;;  %v10229_v21 = vld [vmem:[%s8286_s13 + $0x100] sm:$0xff] }
 0x2ba   : > { %1742 = vrot.lane.b32.xlu1 %v10215_v61, %s8088_s19  ;;  %16928 = vst [vmem:[#allocation377_spill] sm:$0xff] %v10229_v21 }
 0x2bb   : > { %v10219_v23 = vpop.permute.xlu0 %1563 }
 0x2bc   : > { %16925 = vst [vmem:[#allocation374_spill] sm:$0xff] %v10219_v23  ;;  %v10221_v0 = vpop.permute.xlu1 %1565  ;;  %v10238_v23 = vld [vmem:[%s8286_s13 + $0x108] sm:$0xff] }
 0x2bd   : > { %16926 = vst [vmem:[#allocation375_spill] sm:$0xff] %v10221_v0  ;;  %1744 = vrot.lane.b32.xlu0 %v10224_v44, %s8088_s19  ;;  %16931 = vst [vmem:[#allocation380_spill] sm:$0xff] %v10238_v23  ;;  %v10243_v0 = vld [vmem:[%s8286_s13 + $0x110] sm:$0xff] }
 0x2be   : > { %1746 = vrot.lane.b32.xlu1 %v10229_v21, %s8088_s19  ;;  %16932 = vst [vmem:[#allocation381_spill] sm:$0xff] %v10243_v0 }
 0x2bf   : > { %v10233_v6 = vpop.permute.xlu0 %1567 }
 0x2c0   : > { %16929 = vst [vmem:[#allocation378_spill] sm:$0xff] %v10233_v6  ;;  %v10235_v61 = vpop.permute.xlu1 %1569  ;;  %v10252_v6 = vld [vmem:[%s8286_s13 + $0x118] sm:$0xff] }
 0x2c1   : > { %16930 = vst [vmem:[#allocation379_spill] sm:$0xff] %v10235_v61  ;;  %1748 = vrot.lane.b32.xlu0 %v10238_v23, %s8088_s19  ;;  %16935 = vst [vmem:[#allocation384_spill] sm:$0xff] %v10252_v6  ;;  %v10257_v61 = vld [vmem:[%s8286_s13 + $0x120] sm:$0xff] }
 0x2c2   : > { %1750 = vrot.lane.b32.xlu1 %v10243_v0, %s8088_s19  ;;  %16936 = vst [vmem:[#allocation385_spill] sm:$0xff] %v10257_v61 }
 0x2c3   : > { %v10247_v44 = vpop.permute.xlu0 %1571 }
 0x2c4   : > { %16933 = vst [vmem:[#allocation382_spill] sm:$0xff] %v10247_v44  ;;  %v10249_v21 = vpop.permute.xlu1 %1573  ;;  %v10266_v44 = vld [vmem:[%s8286_s13 + $0x128] sm:$0xff] }
 0x2c5   : > { %16934 = vst [vmem:[#allocation383_spill] sm:$0xff] %v10249_v21  ;;  %1752 = vrot.lane.b32.xlu0 %v10252_v6, %s8088_s19  ;;  %16939 = vst [vmem:[#allocation388_spill] sm:$0xff] %v10266_v44  ;;  %v10271_v21 = vld [vmem:[%s8286_s13 + $0x130] sm:$0xff] }
 0x2c6   : > { %1754 = vrot.lane.b32.xlu1 %v10257_v61, %s8088_s19  ;;  %16940 = vst [vmem:[#allocation389_spill] sm:$0xff] %v10271_v21 }
 0x2c7   : > { %v10261_v23 = vpop.permute.xlu0 %1575 }
 0x2c8   : > { %16937 = vst [vmem:[#allocation386_spill] sm:$0xff] %v10261_v23  ;;  %v10263_v0 = vpop.permute.xlu1 %1577  ;;  %v10280_v23 = vld [vmem:[%s8286_s13 + $0x138] sm:$0xff] }
 0x2c9   : > { %16938 = vst [vmem:[#allocation387_spill] sm:$0xff] %v10263_v0  ;;  %1756 = vrot.lane.b32.xlu0 %v10266_v44, %s8088_s19  ;;  %16943 = vst [vmem:[#allocation392_spill] sm:$0xff] %v10280_v23  ;;  %v10285_v0 = vld [vmem:[%s8185_s20 + $0x78] sm:$0xff] }
 0x2ca   : > { %1758 = vrot.lane.b32.xlu1 %v10271_v21, %s8088_s19  ;;  %16944 = vst [vmem:[#allocation393_spill] sm:$0xff] %v10285_v0  ;;  %v10294_v21 = vld [vmem:[%s8185_s20 + $0x80] sm:$0xff] }
 0x2cb   : > { %v10275_v6 = vpop.permute.xlu0 %1579 }
 0x2cc   : > { %16941 = vst [vmem:[#allocation390_spill] sm:$0xff] %v10275_v6  ;;  %v10277_v61 = vpop.permute.xlu1 %1581 }
 0x2cd   : > { %16942 = vst [vmem:[#allocation391_spill] sm:$0xff] %v10277_v61  ;;  %1760 = vrot.lane.b32.xlu0 %v10280_v23, %s8088_s19  ;;  %v10299_v61 = vld [vmem:[%s8185_s20 + $0x88] sm:$0xff] }
 0x2ce   : > { %1762 = vrot.lane.b32.xlu1 %v10285_v0, %s8088_s19  ;;  %16947 = vst [vmem:[#allocation396_spill] sm:$0xff] %v10299_v61  ;;  %v10308_v0 = vld [vmem:[%s8185_s20 + $0x90] sm:$0xff] }
 0x2cf   : > { %v10289_v44 = vpop.permute.xlu0 %1583 }
 0x2d0   : > { %16945 = vst [vmem:[#allocation394_spill] sm:$0xff] %v10289_v44  ;;  %v10291_v30 = vpop.permute.xlu1 %1585 }
 0x2d1   : > { %16946 = vst [vmem:[#allocation395_spill] sm:$0xff] %v10291_v30  ;;  %1764 = vrot.lane.b32.xlu0 %v10294_v21, %s8088_s19  ;;  %v10313_v30 = vld [vmem:[%s8185_s20 + $0x98] sm:$0xff] }
 0x2d2   : > { %1766 = vrot.lane.b32.xlu1 %v10299_v61, %s8088_s19 }
 0x2d3   : > { %v10303_v6 = vpop.permute.xlu0 %1587 }
 0x2d4   : > { %16948 = vst [vmem:[#allocation397_spill] sm:$0xff] %v10303_v6  ;;  %v10305_v23 = vpop.permute.xlu1 %1589 }
 0x2d5   : > { %16949 = vst [vmem:[#allocation398_spill] sm:$0xff] %v10305_v23  ;;  %1768 = vrot.lane.b32.xlu0 %v10308_v0, %s8088_s19 }
 0x2d6   : > { %1770 = vrot.lane.b32.xlu1 %v10313_v30, %s8088_s19 }
 0x2d7   : > { %v10317_v44 = vpop.permute.xlu0 %1591 }
 0x2d8   : > { %16950 = vst [vmem:[#allocation399_spill] sm:$0xff] %v10317_v44  ;;  %v10319_v61 = vpop.permute.xlu1 %1593 }
 0x2d9   : > { %16951 = vst [vmem:[#allocation400_spill] sm:$0xff] %v10319_v61  ;;  %1772 = vrot.lane.b32.xlu0 %v9411_v38, %s8088_s19  ;;  %v10336_v61 = vld [vmem:[%s8185_s20 + $0xc8] sm:$0xff] }
 0x2da   : > { %1774 = vrot.lane.b32.xlu1 %v9420_v25, %s8088_s19  ;;  %v10345_v25 = vld [vmem:[%s8185_s20 + $0xd0] sm:$0xff] }
 0x2db   : > { %v10325_v23 = vpop.permute.xlu0 %1595 }
 0x2dc   : > { %16952 = vst [vmem:[#allocation401_spill] sm:$0xff] %v10325_v23  ;;  %v10327_v6 = vpop.permute.xlu1 %1597 }
 0x2dd   : > { %16953 = vst [vmem:[#allocation402_spill] sm:$0xff] %v10327_v6  ;;  %1776 = vrot.lane.b32.xlu0 %v9425_v1, %s8088_s19  ;;  %v10350_v1 = vld [vmem:[%s8185_s20 + $0xd8] sm:$0xff] }
 0x2de   : > { %1778 = vrot.lane.b32.xlu1 %v9434_v2, %s8088_s19  ;;  %v10359_v2 = vld [vmem:[%s8185_s20 + $0xe0] sm:$0xff] }
 0x2df   : > { %v10333_v44 = vpop.permute.xlu0 %1599 }
 0x2e0   : > { %16954 = vst [vmem:[#allocation403_spill] sm:$0xff] %v10333_v44  ;;  %v10338_v38 = vpop.permute.xlu1 %1601 }
 0x2e1   : > { %16955 = vst [vmem:[#allocation404_spill] sm:$0xff] %v10338_v38  ;;  %1780 = vrot.lane.b32.xlu0 %v9439_v24, %s8088_s19  ;;  %v10364_v38 = vld [vmem:[%s8185_s20 + $0xe8] sm:$0xff] }
 0x2e2   : > { %1782 = vrot.lane.b32.xlu1 %v10336_v61, %s8088_s19  ;;  %16959 = vst [vmem:[#allocation408_spill] sm:$0xff] %v10364_v38 }
 0x2e3   : > { %v10347_v6 = vpop.permute.xlu0 %1603 }
 0x2e4   : > { %16956 = vst [vmem:[#allocation405_spill] sm:$0xff] %v10347_v6  ;;  %v10352_v23 = vpop.permute.xlu1 %1605 }
 0x2e5   : > { %16957 = vst [vmem:[#allocation406_spill] sm:$0xff] %v10352_v23  ;;  %1784 = vrot.lane.b32.xlu0 %v10345_v25, %s8088_s19 }
 0x2e6   : > { %1786 = vrot.lane.b32.xlu1 %v10350_v1, %s8088_s19 }
 0x2e7   : > { %v10361_v24 = vpop.permute.xlu0 %1672 }
 0x2e8   : > { %16958 = vst [vmem:[#allocation407_spill] sm:$0xff] %v10361_v24  ;;  %v10366_v44 = vpop.permute.xlu1 %1674 }
 0x2e9   : > { %16960 = vst [vmem:[#allocation409_spill] sm:$0xff] %v10366_v44  ;;  %1788 = vrot.lane.b32.xlu0 %v10359_v2, %s8088_s19 }
 0x2ea   : > { %1790 = vrot.lane.b32.xlu1 %v10364_v38, %s8088_s19 }
 0x2eb   : > { %v10372_v23 = vpop.permute.xlu0 %1676 }
 0x2ec   : > { %16961 = vst [vmem:[#allocation410_spill] sm:$0xff] %v10372_v23  ;;  %v10374_v6 = vpop.permute.xlu1 %1678 }
 0x2ed   : > { %16962 = vst [vmem:[#allocation411_spill] sm:$0xff] %v10374_v6  ;;  %1861 = vrot.lane.b32.xlu0 %v16635_v36, %s8089_s21 }
 0x2ee   : > { %1863 = vrot.lane.b32.xlu1 %v16638_v39, %s8089_s21 }
 0x2ef   : > { %v10380_v24 = vpop.permute.xlu0 %1680 }
 0x2f0   : > { %16963 = vst [vmem:[#allocation412_spill] sm:$0xff] %v10380_v24  ;;  %v10382_v44 = vpop.permute.xlu1 %1682  ;;  %v17192_v24 = vld [vmem:[#allocation143_spill] sm:$0xff] }
 0x2f1   : > { %16964 = vst [vmem:[#allocation413_spill] sm:$0xff] %v10382_v44  ;;  %1865 = vrot.lane.b32.xlu0 %v16639_v54, %s8089_s21  ;;  %v17187_v44 = vld [vmem:[#allocation140_spill] sm:$0xff] }
 0x2f2   : > { %1867 = vrot.lane.b32.xlu1 %v16642_v37, %s8089_s21 }
 0x2f3   : > { %v10388_v23 = vpop.permute.xlu0 %1684 }
 0x2f4   : > { %16965 = vst [vmem:[#allocation414_spill] sm:$0xff] %v10388_v23  ;;  %v10390_v6 = vpop.permute.xlu1 %1686  ;;  %v17183_v23 = vld [vmem:[#allocation136_spill] sm:$0xff] }
 0x2f5   : > { %16966 = vst [vmem:[#allocation415_spill] sm:$0xff] %v10390_v6  ;;  %1869 = vrot.lane.b32.xlu0 %v16643_v52, %s8089_s21 }
 0x2f6   : > { %1871 = vrot.lane.b32.xlu1 %v16646_v43, %s8089_s21 }
 0x2f7   : > { %v10396_v39 = vpop.permute.xlu0 %1688 }
 0x2f8   : > { %16967 = vst [vmem:[#allocation416_spill] sm:$0xff] %v10396_v39  ;;  %v10398_v36 = vpop.permute.xlu1 %1690 }
 0x2f9   : > { %16968 = vst [vmem:[#allocation417_spill] sm:$0xff] %v10398_v36  ;;  %1873 = vrot.lane.b32.xlu0 %v16647_v58, %s8089_s21 }
 0x2fa   : > { %1875 = vrot.lane.b32.xlu1 %v16650_v60, %s8089_s21 }
 0x2fb   : > { %v10404_v37 = vpop.permute.xlu0 %1692 }
 0x2fc   : > { %16969 = vst [vmem:[#allocation418_spill] sm:$0xff] %v10404_v37  ;;  %v10406_v54 = vpop.permute.xlu1 %1694 }
 0x2fd   : > { %16970 = vst [vmem:[#allocation419_spill] sm:$0xff] %v10406_v54  ;;  %1877 = vrot.lane.b32.xlu0 %v16651_v5, %s8089_s21  ;;  %v17162_v54 = vld [vmem:[#allocation118_spill] sm:$0xff] }
 0x2fe   : > { %1879 = vrot.lane.b32.xlu1 %v16654_v42, %s8089_s21 }
 0x2ff   : > { %v10412_v43 = vpop.permute.xlu0 %1696 }
 0x300   : > { %16971 = vst [vmem:[#allocation420_spill] sm:$0xff] %v10412_v43  ;;  %v10414_v52 = vpop.permute.xlu1 %1698  ;;  %v17156_v43 = vld [vmem:[#allocation111_spill] sm:$0xff] }
 0x301   : > { %16972 = vst [vmem:[#allocation421_spill] sm:$0xff] %v10414_v52  ;;  %1881 = vrot.lane.b32.xlu0 %v16655_v32, %s8089_s21  ;;  %v17153_v52 = vld [vmem:[#allocation110_spill] sm:$0xff] }
 0x302   : > { %1883 = vrot.lane.b32.xlu1 %v16658_v49, %s8089_s21 }
 0x303   : > { %v10420_v58 = vpop.permute.xlu0 %1700 }
 0x304   : > { %16973 = vst [vmem:[#allocation422_spill] sm:$0xff] %v10420_v58  ;;  %v10422_v60 = vpop.permute.xlu1 %1702  ;;  %v17147_v58 = vld [vmem:[#allocation103_spill] sm:$0xff] }
 0x305   : > { %16974 = vst [vmem:[#allocation423_spill] sm:$0xff] %v10422_v60  ;;  %1885 = vrot.lane.b32.xlu0 %v16659_v14, %s8089_s21 }
 0x306   : > { %1887 = vrot.lane.b32.xlu1 %v16662_v7, %s8089_s21 }
 0x307   : > { %v10428_v5 = vpop.permute.xlu0 %1704 }
 0x308   : > { %16975 = vst [vmem:[#allocation424_spill] sm:$0xff] %v10428_v5  ;;  %v10430_v42 = vpop.permute.xlu1 %1706 }
 0x309   : > { %16976 = vst [vmem:[#allocation425_spill] sm:$0xff] %v10430_v42  ;;  %1889 = vrot.lane.b32.xlu0 %v16663_v22, %s8089_s21 }
 0x30a   : > { %1891 = vrot.lane.b32.xlu1 %v16666_v53, %s8089_s21 }
 0x30b   : > { %v10436_v32 = vpop.permute.xlu0 %1708 }
 0x30c   : > { %16977 = vst [vmem:[#allocation426_spill] sm:$0xff] %v10436_v32  ;;  %v10438_v49 = vpop.permute.xlu1 %1710  ;;  %v8012_v32 = vld [vmem:[%s8185_s20 + $0x48] sm:$0xff] }
 0x30d   : > { %16978 = vst [vmem:[#allocation427_spill] sm:$0xff] %v10438_v49  ;;  %1893 = vrot.lane.b32.xlu0 %v16667_v59, %s8089_s21  ;;  %v8011_v49 = vld [vmem:[%s8185_s20 + $0x40] sm:$0xff] }
 0x30e   : > { %1895 = vrot.lane.b32.xlu1 %v16670_v3, %s8089_s21 }
 0x30f   : > { %v10444_v14 = vpop.permute.xlu0 %1712 }
 0x310   : > { %16979 = vst [vmem:[#allocation428_spill] sm:$0xff] %v10444_v14  ;;  %v10446_v7 = vpop.permute.xlu1 %1714 }
 0x311   : > { %16980 = vst [vmem:[#allocation429_spill] sm:$0xff] %v10446_v7  ;;  %1897 = vrot.lane.b32.xlu0 %v16671_v48, %s8089_s21 }
 0x312   : > { %1899 = vrot.lane.b32.xlu1 %v16674_v13, %s8089_s21 }
 0x313   : > { %v10452_v22 = vpop.permute.xlu0 %1716 }
 0x314   : > { %16981 = vst [vmem:[#allocation430_spill] sm:$0xff] %v10452_v22  ;;  %v10454_v53 = vpop.permute.xlu1 %1718  ;;  %v17077_v22 = vld [vmem:[#allocation127_spill] sm:$0xff] }
 0x315   : > { %16982 = vst [vmem:[#allocation431_spill] sm:$0xff] %v10454_v53  ;;  %1901 = vrot.lane.b32.xlu0 %v16675_v20, %s8089_s21 }
 0x316   : > { %1903 = vrot.lane.b32.xlu1 %v16678_v8, %s8089_s21 }
 0x317   : > { %v10460_v59 = vpop.permute.xlu0 %1720 }
 0x318   : > { %16983 = vst [vmem:[#allocation432_spill] sm:$0xff] %v10460_v59  ;;  %v10462_v3 = vpop.permute.xlu1 %1722  ;;  %v17073_v59 = vld [vmem:[#allocation122_spill] sm:$0xff] }
 0x319   : > { %16984 = vst [vmem:[#allocation433_spill] sm:$0xff] %v10462_v3  ;;  %1905 = vrot.lane.b32.xlu0 %v16679_v12, %s8089_s21 }
 0x31a   : > { %1907 = vrot.lane.b32.xlu1 %v16682_v16, %s8089_s21 }
 0x31b   : > { %v10468_v48 = vpop.permute.xlu0 %1724 }
 0x31c   : > { %16985 = vst [vmem:[#allocation434_spill] sm:$0xff] %v10468_v48  ;;  %v10470_v13 = vpop.permute.xlu1 %1726  ;;  %v17069_v48 = vld [vmem:[#allocation119_spill] sm:$0xff] }
 0x31d   : > { %16986 = vst [vmem:[#allocation435_spill] sm:$0xff] %v10470_v13  ;;  %1909 = vrot.lane.b32.xlu0 %v16683_v63, %s8089_s21 }
 0x31e   : > { %1911 = vrot.lane.b32.xlu1 %v16686_v50, %s8089_s21 }
 0x31f   : > { %v10476_v20 = vpop.permute.xlu0 %1728 }
 0x320   : > { %16987 = vst [vmem:[#allocation436_spill] sm:$0xff] %v10476_v20  ;;  %v10478_v8 = vpop.permute.xlu1 %1730  ;;  %v17065_v20 = vld [vmem:[#allocation114_spill] sm:$0xff] }
 0x321   : > { %16988 = vst [vmem:[#allocation437_spill] sm:$0xff] %v10478_v8  ;;  %1913 = vrot.lane.b32.xlu0 %v16687_v57, %s8089_s21 }
 0x322   : > { %1915 = vrot.lane.b32.xlu1 %v16690_v33, %s8089_s21 }
 0x323   : > { %v10484_v12 = vpop.permute.xlu0 %1732 }
 0x324   : > { %16989 = vst [vmem:[#allocation438_spill] sm:$0xff] %v10484_v12  ;;  %v10486_v16 = vpop.permute.xlu1 %1734  ;;  %v17061_v12 = vld [vmem:[#allocation105_spill] sm:$0xff] }
 0x325   : > { %16990 = vst [vmem:[#allocation439_spill] sm:$0xff] %v10486_v16  ;;  %1917 = vrot.lane.b32.xlu0 %v16691_v55, %s8089_s21 }
 0x326   : > { %1919 = vrot.lane.b32.xlu1 %v16694_v19, %s8089_s21 }
 0x327   : > { %v10492_v63 = vpop.permute.xlu0 %1736 }
 0x328   : > { %16991 = vst [vmem:[#allocation440_spill] sm:$0xff] %v10492_v63  ;;  %v10494_v50 = vpop.permute.xlu1 %1738  ;;  %v17057_v63 = vld [vmem:[#allocation107_spill] sm:$0xff] }
 0x329   : > { %16992 = vst [vmem:[#allocation441_spill] sm:$0xff] %v10494_v50  ;;  %1921 = vrot.lane.b32.xlu0 %v16695_v47, %s8089_s21 }
 0x32a   : > { %1923 = vrot.lane.b32.xlu1 %v16698_v9, %s8089_s21 }
 0x32b   : > { %v10500_v57 = vpop.permute.xlu0 %1740 }
 0x32c   : > { %16993 = vst [vmem:[#allocation442_spill] sm:$0xff] %v10500_v57  ;;  %v10502_v33 = vpop.permute.xlu1 %1742  ;;  %v17053_v57 = vld [vmem:[#allocation102_spill] sm:$0xff] }
 0x32d   : > { %16994 = vst [vmem:[#allocation443_spill] sm:$0xff] %v10502_v33  ;;  %1925 = vrot.lane.b32.xlu0 %v16699_v41, %s8089_s21 }
 0x32e   : > { %1927 = vrot.lane.b32.xlu1 %v16702_v62, %s8089_s21 }
 0x32f   : > { %v10508_v55 = vpop.permute.xlu0 %1744 }
 0x330   : > { %16995 = vst [vmem:[#allocation444_spill] sm:$0xff] %v10508_v55  ;;  %v10510_v19 = vpop.permute.xlu1 %1746  ;;  %v17049_v55 = vld [vmem:[#allocation99_spill] sm:$0xff] }
 0x331   : > { %16996 = vst [vmem:[#allocation445_spill] sm:$0xff] %v10510_v19  ;;  %1929 = vrot.lane.b32.xlu0 %v16703_v35, %s8089_s21 }
 0x332   : > { %1931 = vrot.lane.b32.xlu1 %v16706_v56, %s8089_s21 }
 0x333   : > { %v10516_v47 = vpop.permute.xlu0 %1748 }
 0x334   : > { %16997 = vst [vmem:[#allocation446_spill] sm:$0xff] %v10516_v47  ;;  %v10518_v9 = vpop.permute.xlu1 %1750  ;;  %v17045_v47 = vld [vmem:[#allocation94_spill] sm:$0xff] }
 0x335   : > { %16998 = vst [vmem:[#allocation447_spill] sm:$0xff] %v10518_v9  ;;  %1933 = vrot.lane.b32.xlu0 %v16707_v29, %s8089_s21 }
 0x336   : > { %1935 = vrot.lane.b32.xlu1 %v16710_v51, %s8089_s21 }
 0x337   : > { %v10524_v41 = vpop.permute.xlu0 %1752 }
 0x338   : > { %16999 = vst [vmem:[#allocation448_spill] sm:$0xff] %v10524_v41  ;;  %v10526_v62 = vpop.permute.xlu1 %1754  ;;  %v1859_v41 = vrot.slane %v10364_v38, 1 }
 0x339   : > { %17000 = vst [vmem:[#allocation449_spill] sm:$0xff] %v10526_v62  ;;  %1937 = vrot.lane.b32.xlu0 %v16711_v27, %s8089_s21  ;;  %v17005_v27 = vld [vmem:[#allocation56_spill] sm:$0xff] }
 0x33a   : > { %1939 = vrot.lane.b32.xlu1 %v16714_v46, %s8089_s21 }
 0x33b   : > { %v10532_v35 = vpop.permute.xlu0 %1756 }
 0x33c   : > { %17001 = vst [vmem:[#allocation450_spill] sm:$0xff] %v10532_v35  ;;  %v10534_v56 = vpop.permute.xlu1 %1758 }
 0x33d   : > { %17002 = vst [vmem:[#allocation451_spill] sm:$0xff] %v10534_v56  ;;  %1941 = vrot.lane.b32.xlu0 %v16715_v18, %s8089_s21  ;;  %v17008_v56 = vld [vmem:[#allocation53_spill] sm:$0xff]  ;;  %v17009_v18 = vld [vmem:[#allocation59_spill] sm:$0xff] }
 0x33e   : > { %1943 = vrot.lane.b32.xlu1 %v16718_v40, %s8089_s21 }
 0x33f   : > { %v10540_v29 = vpop.permute.xlu0 %1760 }
 0x340   : > { %17003 = vst [vmem:[#allocation452_spill] sm:$0xff] %v10540_v29  ;;  %v10542_v51 = vpop.permute.xlu1 %1762 }
 0x341   : > { %17004 = vst [vmem:[#allocation453_spill] sm:$0xff] %v10542_v51  ;;  %1945 = vrot.lane.b32.xlu0 %v16719_v11, %s8089_s21  ;;  %v17012_v51 = vld [vmem:[#allocation61_spill] sm:$0xff]  ;;  %v17013_v11 = vld [vmem:[#allocation63_spill] sm:$0xff] }
 0x342   : > { %1947 = vrot.lane.b32.xlu1 %v17005_v27, %s8089_s21 }
 0x343   : > { %v10548_v46 = vpop.permute.xlu0 %1764 }
 0x344   : > { %17006 = vst [vmem:[#allocation56_spill] sm:$0xff] %v10548_v46  ;;  %v10550_v35 = vpop.permute.xlu1 %1766 }
 0x345   : > { %17007 = vst [vmem:[#allocation454_spill] sm:$0xff] %v10550_v35  ;;  %1949 = vrot.lane.b32.xlu0 %v17008_v56, %s8089_s21  ;;  %v17016_v35 = vld [vmem:[#allocation64_spill] sm:$0xff] }
 0x346   : > { %1951 = vrot.lane.b32.xlu1 %v17009_v18, %s8089_s21 }
 0x347   : > { %v10556_v40 = vpop.permute.xlu0 %1768 }
 0x348   : > { %17010 = vst [vmem:[#allocation53_spill] sm:$0xff] %v10556_v40  ;;  %v10558_v29 = vpop.permute.xlu1 %1770 }
 0x349   : > { %17011 = vst [vmem:[#allocation59_spill] sm:$0xff] %v10558_v29  ;;  %1953 = vrot.lane.b32.xlu0 %v17012_v51, %s8089_s21  ;;  %v17019_v29 = vld [vmem:[#allocation241_spill] sm:$0xff]  ;;  %v1852_v51 = vrot.slane %v10336_v61, 1 }
 0x34a   : > { %1955 = vrot.lane.b32.xlu1 %v17013_v11, %s8089_s21  ;;  %v1853_v11 = vrot.slane %v10345_v25, 1 }
 0x34b   : > { %v10564_v27 = vpop.permute.xlu0 %1772 }
 0x34c   : > { %17014 = vst [vmem:[#allocation61_spill] sm:$0xff] %v10564_v27  ;;  %v10566_v46 = vpop.permute.xlu1 %1774  ;;  %v17023_v27 = vld [vmem:[#allocation246_spill] sm:$0xff]  ;;  %v1854_v62 = vsel %vm526_vm0, %v1852_v51, %v1853_v11 }
 0x34d   : > { %17015 = vst [vmem:[#allocation63_spill] sm:$0xff] %v10566_v46  ;;  %1957 = vrot.lane.b32.xlu0 %v17016_v35, %s8089_s21  ;;  %v461_v35 = vld [vmem:[%s15948_s2 + $0x8] sm:$0xff] }
 0x34e   : > { %1959 = vrot.lane.b32.xlu1 %v16735_v31, %s8089_s21  ;;  %v460_v31 = vld [vmem:[%s15948_s2] sm:$0xff] }
 0x34f   : > { %v10572_v56 = vpop.permute.xlu0 %1776 }
 0x350   : > { %17017 = vst [vmem:[#allocation64_spill] sm:$0xff] %v10572_v56  ;;  %v10574_v18 = vpop.permute.xlu1 %1778  ;;  %v17022_v56 = vld [vmem:[#allocation244_spill] sm:$0xff] }
 0x351   : > { %17018 = vst [vmem:[#allocation455_spill] sm:$0xff] %v10574_v18  ;;  %1961 = vrot.lane.b32.xlu0 %v17019_v29, %s8089_s21  ;;  %v7586_v29 = vpack.c.bf16 %v461_v35, %v460_v31  ;;  %v462_v31 = vld [vmem:[%s15948_s2 + $0x10] sm:$0xff] }
 0x352   : > { %1963 = vrot.lane.b32.xlu1 %v9682_v17, %s8089_s21  ;;  %v1855_v17 = vrot.slane %v10350_v1, 1 }
 0x353   : > { %v10582_v46 = vpop.permute.xlu0 %1780  ;;  %7587 = vmatprep.subr.bf16.mxu0 %v7586_v29 }
 0x354   : > { %17020 = vst [vmem:[#allocation241_spill] sm:$0xff] %v10582_v46  ;;  %v10590_v18 = vpop.permute.xlu1 %1782  ;;  %v1857_v46 = vrot.slane %v10359_v2, 1  ;;  %7589 = vmatpush3.bf16.msra.mxu0 %v7586_v29  ;;  %v1856_v51 = vsel %vm526_vm0, %v1853_v11, %v1855_v17 }
 0x355   : > { %17021 = vst [vmem:[#allocation456_spill] sm:$0xff] %v10590_v18  ;;  %1965 = vrot.lane.b32.xlu0 %v17022_v56, %s8089_s21  ;;  %v463_v56 = vld [vmem:[%s15948_s2 + $0x18] sm:$0xff] }
 0x356   : > { %1967 = vrot.lane.b32.xlu1 %v17023_v27, %s8089_s21  ;;  %v7590_v18 = vpack.c.bf16 %v463_v56, %v462_v31  ;;  %v17026_v27 = vld [vmem:[#allocation62_spill] sm:$0xff] }
 0x357   : > { %v10598_v40 = vpop.permute.xlu0 %1784  ;;  %v464_v31 = vld [vmem:[%s15948_s2 + $0x20] sm:$0xf] }
 0x358   : > { %17024 = vst [vmem:[#allocation244_spill] sm:$0xff] %v10598_v40  ;;  %v10607_v35 = vpop.permute.xlu1 %1786  ;;  %7591 = vmatprep.subr.bf16.mxu0 %v7590_v18  ;;  %v1858_v40 = vsel %vm526_vm0, %v1855_v17, %v1857_v46 }
 0x359   : > { %17025 = vst [vmem:[#allocation246_spill] sm:$0xff] %v10607_v35  ;;  %1969 = vrot.lane.b32.xlu0 %v17026_v27, %s8089_s21  ;;  %7593 = vmatpush3.bf16.msra.mxu0 %v7590_v18 }
 0x35a   : > { %1971 = vrot.lane.b32.xlu1 %v1854_v62, %s8089_s21  ;;  %v1860_v62 = vsel %vm526_vm0, %v1857_v46, %v1859_v41  ;;  %7397 = vmatprep.subr.msk.mxu0 %vm2990_vm2, %v464_v31  ;;  %v17034_v46 = vld [vmem:[#allocation84_spill] sm:$0xff] }
 0x35b   : > { %v10614_v29 = vpop.permute.xlu0 %1788 }
 0x35c   : > { %17027 = vst [vmem:[#allocation62_spill] sm:$0xff] %v10614_v29  ;;  %v10617_v9 = vpop.permute.xlu1 %1790  ;;  %v17041_v29 = vld [vmem:[#allocation85_spill] sm:$0xff] }
 0x35d   : > { %17028 = vst [vmem:[#allocation457_spill] sm:$0xff] %v10617_v9  ;;  %1973 = vrot.lane.b32.xlu0 %v1856_v51, %s8089_s21  ;;  %7398 = vmatpush3.msk.msra.mxu0 %vm2990_vm2, %v464_v31  ;;  %v17037_v31 = vld [vmem:[#allocation87_spill] sm:$0xff] }
 0x35e   : > { %1975 = vrot.lane.b32.xlu1 %v1858_v40, %s8089_s21  ;;  %v17033_v40 = vld [vmem:[#allocation82_spill] sm:$0xff] }
 0x35f   : > { %v10626_v11 = vpop.permute.xlu0 %1861 }
 0x360   : > { %17029 = vst [vmem:[#allocation458_spill] sm:$0xff] %v10626_v11  ;;  %v10629_v18 = vpop.permute.xlu1 %1863 }
 0x361   : > { %17030 = vst [vmem:[#allocation459_spill] sm:$0xff] %v10629_v18  ;;  %1977 = vrot.lane.b32.xlu0 %v1860_v62, %s8089_s21  ;;  %v17200_v18 = vld [vmem:[#allocation150_spill] sm:$0xff] }
 0x362   : > { %1979 = vrot.lane.b32.xlu1 %v1859_v41, %s8089_s21  ;;  %v17038_v41 = vld [vmem:[#allocation89_spill] sm:$0xff]  ;;  %s7208_s21 = sadd.s32 4294967294, %s8180_s16 }
 0x363   : > { %v10633_v17 = vpop.permute.xlu0 %1865 }
 0x364   : > { %17031 = vst [vmem:[#allocation460_spill] sm:$0xff] %v10633_v17  ;;  %v10635_v56 = vpop.permute.xlu1 %1867  ;;  %v17197_v17 = vld [vmem:[#allocation148_spill] sm:$0xff] }
 0x365   : > { %17032 = vst [vmem:[#allocation461_spill] sm:$0xff] %v10635_v56  ;;  %2050 = vrot.lane.b32.xlu0 %v17033_v40, %s8090_s26  ;;  %v17042_v40 = vld [vmem:[#allocation92_spill] sm:$0xff]  ;;  %v17194_v56 = vld [vmem:[#allocation146_spill] sm:$0xff] }
 0x366   : > { %2052 = vrot.lane.b32.xlu1 %v17034_v46, %s8090_s26 }
 0x367   : > { %v10641_v27 = vpop.permute.xlu0 %1869 }
 0x368   : > { %17035 = vst [vmem:[#allocation82_spill] sm:$0xff] %v10641_v27  ;;  %v10643_v51 = vpop.permute.xlu1 %1871  ;;  %v17189_v27 = vld [vmem:[#allocation141_spill] sm:$0xff] }
 0x369   : > { %17036 = vst [vmem:[#allocation84_spill] sm:$0xff] %v10643_v51  ;;  %2054 = vrot.lane.b32.xlu0 %v17037_v31, %s8090_s26  ;;  %v17046_v31 = vld [vmem:[#allocation97_spill] sm:$0xff]  ;;  %v17185_v51 = vld [vmem:[#allocation138_spill] sm:$0xff] }
 0x36a   : > { %2056 = vrot.lane.b32.xlu1 %v17038_v41, %s8090_s26 }
 0x36b   : > { %v10649_v62 = vpop.permute.xlu0 %1873 }
 0x36c   : > { %17039 = vst [vmem:[#allocation87_spill] sm:$0xff] %v10649_v62  ;;  %v10651_v9 = vpop.permute.xlu1 %1875 }
 0x36d   : > { %17040 = vst [vmem:[#allocation89_spill] sm:$0xff] %v10651_v9  ;;  %2058 = vrot.lane.b32.xlu0 %v17041_v29, %s8090_s26  ;;  %v17050_v29 = vld [vmem:[#allocation95_spill] sm:$0xff] }
 0x36e   : > { %2060 = vrot.lane.b32.xlu1 %v17042_v40, %s8090_s26 }
 0x36f   : > { %v10657_v46 = vpop.permute.xlu0 %1877 }
 0x370   : > { %17043 = vst [vmem:[#allocation85_spill] sm:$0xff] %v10657_v46  ;;  %v10659_v35 = vpop.permute.xlu1 %1879 }
 0x371   : > { %17044 = vst [vmem:[#allocation92_spill] sm:$0xff] %v10659_v35  ;;  %2062 = vrot.lane.b32.xlu0 %v17045_v47, %s8090_s26  ;;  %v17054_v47 = vld [vmem:[#allocation104_spill] sm:$0xff] }
 0x372   : > { %2064 = vrot.lane.b32.xlu1 %v17046_v31, %s8090_s26 }
 0x373   : > { %v10665_v41 = vpop.permute.xlu0 %1881 }
 0x374   : > { %17047 = vst [vmem:[#allocation94_spill] sm:$0xff] %v10665_v41  ;;  %v10667_v19 = vpop.permute.xlu1 %1883  ;;  %v17160_v41 = vld [vmem:[#allocation116_spill] sm:$0xff] }
 0x375   : > { %17048 = vst [vmem:[#allocation97_spill] sm:$0xff] %v10667_v19  ;;  %2066 = vrot.lane.b32.xlu0 %v17049_v55, %s8090_s26  ;;  %v17058_v55 = vld [vmem:[#allocation109_spill] sm:$0xff] }
 0x376   : > { %2068 = vrot.lane.b32.xlu1 %v17050_v29, %s8090_s26  ;;  %v17158_v19 = vld [vmem:[#allocation113_spill] sm:$0xff] }
 0x377   : > { %v10673_v40 = vpop.permute.xlu0 %1885 }
 0x378   : > { %17051 = vst [vmem:[#allocation99_spill] sm:$0xff] %v10673_v40  ;;  %v10675_v33 = vpop.permute.xlu1 %1887  ;;  %v17151_v40 = vld [vmem:[#allocation108_spill] sm:$0xff] }
 0x379   : > { %17052 = vst [vmem:[#allocation95_spill] sm:$0xff] %v10675_v33  ;;  %2070 = vrot.lane.b32.xlu0 %v17053_v57, %s8090_s26  ;;  %v17062_v57 = vld [vmem:[#allocation112_spill] sm:$0xff]  ;;  %v17149_v33 = vld [vmem:[#allocation106_spill] sm:$0xff] }
 0x37a   : > { %2072 = vrot.lane.b32.xlu1 %v17054_v47, %s8090_s26 }
 0x37b   : > { %v10681_v31 = vpop.permute.xlu0 %1889 }
 0x37c   : > { %17055 = vst [vmem:[#allocation102_spill] sm:$0xff] %v10681_v31  ;;  %v10683_v50 = vpop.permute.xlu1 %1891 }
 0x37d   : > { %17056 = vst [vmem:[#allocation104_spill] sm:$0xff] %v10683_v50  ;;  %2074 = vrot.lane.b32.xlu0 %v17057_v63, %s8090_s26  ;;  %v17066_v63 = vld [vmem:[#allocation117_spill] sm:$0xff] }
 0x37e   : > { %2076 = vrot.lane.b32.xlu1 %v17058_v55, %s8090_s26 }
 0x37f   : > { %v10689_v29 = vpop.permute.xlu0 %1893 }
 0x380   : > { %17059 = vst [vmem:[#allocation107_spill] sm:$0xff] %v10689_v29  ;;  %v10691_v16 = vpop.permute.xlu1 %1895 }
 0x381   : > { %17060 = vst [vmem:[#allocation109_spill] sm:$0xff] %v10691_v16  ;;  %2078 = vrot.lane.b32.xlu0 %v17061_v12, %s8090_s26  ;;  %v17070_v12 = vld [vmem:[#allocation115_spill] sm:$0xff]  ;;  %v17125_v16 = vld [vmem:[#allocation80_spill] sm:$0xff] }
 0x382   : > { %2080 = vrot.lane.b32.xlu1 %v17062_v57, %s8090_s26 }
 0x383   : > { %v10697_v47 = vpop.permute.xlu0 %1897 }
 0x384   : > { %17063 = vst [vmem:[#allocation105_spill] sm:$0xff] %v10697_v47  ;;  %v10699_v8 = vpop.permute.xlu1 %1899  ;;  %v8010_v47 = vld [vmem:[%s8185_s20 + $0x38] sm:$0xff] }
 0x385   : > { %17064 = vst [vmem:[#allocation112_spill] sm:$0xff] %v10699_v8  ;;  %2082 = vrot.lane.b32.xlu0 %v17065_v20, %s8090_s26  ;;  %v17074_v20 = vld [vmem:[#allocation124_spill] sm:$0xff] }
 0x386   : > { %2084 = vrot.lane.b32.xlu1 %v17066_v63, %s8090_s26  ;;  %v8009_v8 = vld [vmem:[%s8185_s20 + $0x30] sm:$0xff] }
 0x387   : > { %v10705_v55 = vpop.permute.xlu0 %1901 }
 0x388   : > { %17067 = vst [vmem:[#allocation114_spill] sm:$0xff] %v10705_v55  ;;  %v10707_v13 = vpop.permute.xlu1 %1903  ;;  %v17117_v55 = vld [vmem:[#allocation69_spill] sm:$0xff] }
 0x389   : > { %17068 = vst [vmem:[#allocation117_spill] sm:$0xff] %v10707_v13  ;;  %2086 = vrot.lane.b32.xlu0 %v17069_v48, %s8090_s26  ;;  %v17078_v48 = vld [vmem:[#allocation129_spill] sm:$0xff]  ;;  %v17116_v13 = vld [vmem:[#allocation68_spill] sm:$0xff] }
 0x38a   : > { %2088 = vrot.lane.b32.xlu1 %v17070_v12, %s8090_s26 }
 0x38b   : > { %v10713_v57 = vpop.permute.xlu0 %1905 }
 0x38c   : > { %17071 = vst [vmem:[#allocation119_spill] sm:$0xff] %v10713_v57  ;;  %v10715_v3 = vpop.permute.xlu1 %1907 }
 0x38d   : > { %17072 = vst [vmem:[#allocation115_spill] sm:$0xff] %v10715_v3  ;;  %2090 = vrot.lane.b32.xlu0 %v17073_v59, %s8090_s26  ;;  %v17081_v3 = vld [vmem:[#allocation125_spill] sm:$0xff]  ;;  %v17082_v59 = vld [vmem:[#allocation132_spill] sm:$0xff] }
 0x38e   : > { %2092 = vrot.lane.b32.xlu1 %v17074_v20, %s8090_s26 }
 0x38f   : > { %v10721_v63 = vpop.permute.xlu0 %1909 }
 0x390   : > { %17075 = vst [vmem:[#allocation122_spill] sm:$0xff] %v10721_v63  ;;  %v10723_v53 = vpop.permute.xlu1 %1911 }
 0x391   : > { %17076 = vst [vmem:[#allocation124_spill] sm:$0xff] %v10723_v53  ;;  %2094 = vrot.lane.b32.xlu0 %v17077_v22, %s8090_s26  ;;  %v17085_v53 = vld [vmem:[#allocation134_spill] sm:$0xff]  ;;  %v17086_v22 = vld [vmem:[#allocation137_spill] sm:$0xff] }
 0x392   : > { %2096 = vrot.lane.b32.xlu1 %v17078_v48, %s8090_s26 }
 0x393   : > { %v10729_v12 = vpop.permute.xlu0 %1913 }
 0x394   : > { %17079 = vst [vmem:[#allocation127_spill] sm:$0xff] %v10729_v12  ;;  %v10731_v57 = vpop.permute.xlu1 %1915 }
 0x395   : > { %17080 = vst [vmem:[#allocation129_spill] sm:$0xff] %v10731_v57  ;;  %2098 = vrot.lane.b32.xlu0 %v17081_v3, %s8090_s26  ;;  %v17089_v57 = vld [vmem:[#allocation139_spill] sm:$0xff] }
 0x396   : > { %2100 = vrot.lane.b32.xlu1 %v17082_v59, %s8090_s26  ;;  %v17090_v3 = vld [vmem:[#allocation135_spill] sm:$0xff] }
 0x397   : > { %v10737_v20 = vpop.permute.xlu0 %1917 }
 0x398   : > { %17083 = vst [vmem:[#allocation125_spill] sm:$0xff] %v10737_v20  ;;  %v10739_v63 = vpop.permute.xlu1 %1919 }
 0x399   : > { %17084 = vst [vmem:[#allocation132_spill] sm:$0xff] %v10739_v63  ;;  %2102 = vrot.lane.b32.xlu0 %v17085_v53, %s8090_s26  ;;  %v17093_v63 = vld [vmem:[#allocation142_spill] sm:$0xff]  ;;  %v17094_v53 = vld [vmem:[#allocation144_spill] sm:$0xff] }
 0x39a   : > { %2104 = vrot.lane.b32.xlu1 %v17086_v22, %s8090_s26 }
 0x39b   : > { %v10745_v48 = vpop.permute.xlu0 %1921 }
 0x39c   : > { %17087 = vst [vmem:[#allocation134_spill] sm:$0xff] %v10745_v48  ;;  %v10747_v12 = vpop.permute.xlu1 %1923 }
 0x39d   : > { %17088 = vst [vmem:[#allocation137_spill] sm:$0xff] %v10747_v12  ;;  %2106 = vrot.lane.b32.xlu0 %v17089_v57, %s8090_s26  ;;  %v17097_v12 = vld [vmem:[#allocation147_spill] sm:$0xff]  ;;  %v17098_v57 = vld [vmem:[#allocation149_spill] sm:$0xff] }
 0x39e   : > { %2108 = vrot.lane.b32.xlu1 %v17090_v3, %s8090_s26 }
 0x39f   : > { %v10753_v59 = vpop.permute.xlu0 %1925 }
 0x3a0   : > { %17091 = vst [vmem:[#allocation139_spill] sm:$0xff] %v10753_v59  ;;  %v10755_v20 = vpop.permute.xlu1 %1927  ;;  %v8006_v59 = vld [vmem:[%s8185_s20 + $0x18] sm:$0xff] }
 0x3a1   : > { %17092 = vst [vmem:[#allocation135_spill] sm:$0xff] %v10755_v20  ;;  %2110 = vrot.lane.b32.xlu0 %v17093_v63, %s8090_s26  ;;  %v17101_v63 = vld [vmem:[#allocation145_spill] sm:$0xff] }
 0x3a2   : > { %2112 = vrot.lane.b32.xlu1 %v17094_v53, %s8090_s26  ;;  %v17102_v53 = vld [vmem:[#allocation152_spill] sm:$0xff] }
 0x3a3   : > { %v10761_v22 = vpop.permute.xlu0 %1929 }
 0x3a4   : > { %17095 = vst [vmem:[#allocation142_spill] sm:$0xff] %v10761_v22  ;;  %v10763_v48 = vpop.permute.xlu1 %1931 }
 0x3a5   : > { %17096 = vst [vmem:[#allocation144_spill] sm:$0xff] %v10763_v48  ;;  %2114 = vrot.lane.b32.xlu0 %v17097_v12, %s8090_s26  ;;  %v17105_v12 = vld [vmem:[#allocation154_spill] sm:$0xff] }
 0x3a6   : > { %2116 = vrot.lane.b32.xlu1 %v17098_v57, %s8090_s26  ;;  %v17106_v57 = vld [vmem:[#allocation157_spill] sm:$0xff] }
 0x3a7   : > { %v10769_v3 = vpop.permute.xlu0 %1933 }
 0x3a8   : > { %17099 = vst [vmem:[#allocation147_spill] sm:$0xff] %v10769_v3  ;;  %v10771_v20 = vpop.permute.xlu1 %1935 }
 0x3a9   : > { %17100 = vst [vmem:[#allocation149_spill] sm:$0xff] %v10771_v20  ;;  %2118 = vrot.lane.b32.xlu0 %v17101_v63, %s8090_s26  ;;  %v17109_v63 = vld [vmem:[#allocation159_spill] sm:$0xff] }
 0x3aa   : > { %2120 = vrot.lane.b32.xlu1 %v17102_v53, %s8090_s26 }
 0x3ab   : > { %v10777_v22 = vpop.permute.xlu0 %1937 }
 0x3ac   : > { %17103 = vst [vmem:[#allocation145_spill] sm:$0xff] %v10777_v22  ;;  %v10779_v48 = vpop.permute.xlu1 %1939  ;;  %v17114_v22 = vld [vmem:[#allocation66_spill] sm:$0xff] }
 0x3ad   : > { %17104 = vst [vmem:[#allocation152_spill] sm:$0xff] %v10779_v48  ;;  %2122 = vrot.lane.b32.xlu0 %v17105_v12, %s8090_s26  ;;  %v17113_v48 = vld [vmem:[#allocation65_spill] sm:$0xff] }
 0x3ae   : > { %2124 = vrot.lane.b32.xlu1 %v17106_v57, %s8090_s26  ;;  %v17112_v57 = vld [vmem:[#allocation160_spill] sm:$0xff] }
 0x3af   : > { %v10785_v20 = vpop.permute.xlu0 %1941 }
 0x3b0   : > { %17107 = vst [vmem:[#allocation154_spill] sm:$0xff] %v10785_v20  ;;  %v10787_v3 = vpop.permute.xlu1 %1943  ;;  %v8003_v20 = vld [vmem:[%s8185_s20 + $0x20] sm:$0xff] }
 0x3b1   : > { %17108 = vst [vmem:[#allocation157_spill] sm:$0xff] %v10787_v3  ;;  %2126 = vrot.lane.b32.xlu0 %v17109_v63, %s8090_s26  ;;  %v10802_v3 = vsel %vm2230_vm3, %v8003_v20, %v17113_v48  ;;  %v8004_v63 = vld [vmem:[%s8185_s20 + $0x10] sm:$0xff]  ;;  %v10819_v20 = vsel %vm2230_vm3, %v8006_v59, %v17116_v13  ;;  %v8007_v48 = vld [vmem:[%s8185_s20 + $0x8] sm:$0xff]  ;;  %v17121_v13 = vld [vmem:[#allocation73_spill] sm:$0xff] }
 0x3b2   : > { %2128 = vrot.lane.b32.xlu1 %v16833_v10, %s8090_s26  ;;  %v10807_v10 = vsel %vm2230_vm3, %v8004_v63, %v17114_v22  ;;  %v10824_v7 = vsel %vm2230_vm3, %v8007_v48, %v17117_v55  ;;  %v8008_v22 = vld [vmem:[%s8185_s20 + $0x28] sm:$0xff]  ;;  %v17118_v63 = vld [vmem:[#allocation70_spill] sm:$0xff]  ;;  %v10841_v59 = vsel %vm2230_vm3, %v8010_v47, %v17121_v13  ;;  %v17122_v55 = vld [vmem:[#allocation76_spill] sm:$0xff] }
 0x3b3   : > { %v10793_v53 = vpop.permute.xlu0 %1945  ;;  %v10846_v48 = vsel %vm2230_vm3, %v8011_v49, %v17122_v55  ;;  %v17127_v13 = vld [vmem:[#allocation83_spill] sm:$0xff]  ;;  %v17128_v55 = vld [vmem:[#allocation86_spill] sm:$0xff] }
 0x3b4   : > { %17110 = vst [vmem:[#allocation159_spill] sm:$0xff] %v10793_v53  ;;  %v10795_v12 = vpop.permute.xlu1 %1947  ;;  %v17115_v53 = vld [vmem:[#allocation67_spill] sm:$0xff]  ;;  %v10868_v49 = vsel %vm2230_vm3, %v9986_v26, %v17127_v13  ;;  %v17134_v13 = vld [vmem:[#allocation316_spill] sm:$0xff] }
 0x3b5   : > { %17111 = vst [vmem:[#allocation462_spill] sm:$0xff] %v10795_v12  ;;  %2130 = vrot.lane.b32.xlu0 %v17112_v57, %s8090_s26  ;;  %v8005_v12 = vld [vmem:[%s8185_s20] sm:$0xff]  ;;  %v17133_v26 = vld [vmem:[#allocation91_spill] sm:$0xff] }
 0x3b6   : > { %2132 = vrot.lane.b32.xlu1 %v16837_v45, %s8090_s26  ;;  %v10814_v57 = vsel %vm2230_vm3, %v8005_v12, %v17115_v53  ;;  %v10829_v45 = vsel %vm2230_vm3, %v8008_v22, %v17118_v63  ;;  %v17120_v53 = vld [vmem:[#allocation71_spill] sm:$0xff]  ;;  %v17123_v22 = vld [vmem:[#allocation78_spill] sm:$0xff]  ;;  %v10890_v29 = vsel %vm2230_vm3, %v17134_v13, %v17133_v26  ;;  %v17142_v26 = vld [vmem:[#allocation100_spill] sm:$0xff] }
 0x3b7   : > { %v10831_v14 = vpop.permute.xlu0 %1949  ;;  %v10836_v12 = vsel %vm2230_vm3, %v8009_v8, %v17120_v53  ;;  %v10851_v63 = vsel %vm2230_vm3, %v8012_v32, %v17123_v22  ;;  %v10858_v8 = vsel %vm2230_vm3, %v9972_v34, %v17125_v16  ;;  %v17126_v53 = vld [vmem:[#allocation81_spill] sm:$0xff]  ;;  %v10873_v32 = vsel %vm2230_vm3, %v9991_v15, %v17128_v55  ;;  %v17129_v22 = vld [vmem:[#allocation163_spill] sm:$0xff]  ;;  %v17130_v34 = vld [vmem:[#allocation88_spill] sm:$0xff] }
 0x3b8   : > { %17119 = vst [vmem:[#allocation160_spill] sm:$0xff] %v10831_v14  ;;  %v10853_v14 = vpop.permute.xlu1 %1951  ;;  %v10863_v47 = vsel %vm2230_vm3, %v9977_v4, %v17126_v53  ;;  %v10880_v16 = vsel %vm2230_vm3, %v10000_v28, %v17130_v34  ;;  %v17131_v4 = vld [vmem:[#allocation90_spill] sm:$0xff]  ;;  %v17132_v53 = vld [vmem:[#allocation313_spill] sm:$0xff]  ;;  %v17138_v28 = vld [vmem:[#allocation96_spill] sm:$0xff] }
 0x3b9   : > { %17124 = vst [vmem:[#allocation65_spill] sm:$0xff] %v10853_v14  ;;  %2134 = vrot.lane.b32.xlu0 %v17129_v22, %s8090_s26  ;;  %v10885_v14 = vsel %vm2230_vm3, %v17132_v53, %v17131_v4  ;;  %v17135_v15 = vld [vmem:[#allocation93_spill] sm:$0xff]  ;;  %v17139_v34 = vld [vmem:[#allocation320_spill] sm:$0xff]  ;;  %v17140_v4 = vld [vmem:[#allocation98_spill] sm:$0xff] }
 0x3ba   : > { %v17136_v55 = vld [vmem:[#allocation317_spill] sm:$0xff]  ;;  %v10902_v5 = vsel %vm2230_vm3, %v17139_v34, %v17138_v28  ;;  %v17143_v13 = vld [vmem:[#allocation324_spill] sm:$0xff] }
 0x3bb   : > { %v10895_v42 = vsel %vm2230_vm3, %v17136_v55, %v17135_v15  ;;  %v17137_v22 = vld [vmem:[#allocation165_spill] sm:$0xff]  ;;  %v10912_v60 = vsel %vm2230_vm3, %v17143_v13, %v17142_v26  ;;  %v17148_v28 = vld [vmem:[#allocation328_spill] sm:$0xff] }
 0x3bc   : > { %2136 = vrot.lane.b32.xlu1 %v17137_v22, %s8090_s26  ;;  %v17141_v53 = vld [vmem:[#allocation321_spill] sm:$0xff]  ;;  %v10919_v22 = vpop.permute.xlu0 %1953  ;;  %v10924_v34 = vsel %vm2230_vm3, %v17148_v28, %v17147_v58  ;;  %v17152_v26 = vld [vmem:[#allocation332_spill] sm:$0xff] }
 0x3bd   : > { %v10907_v50 = vsel %vm2230_vm3, %v17141_v53, %v17140_v4  ;;  %v17144_v15 = vld [vmem:[#allocation101_spill] sm:$0xff]  ;;  %17146 = vst [vmem:[#allocation66_spill] sm:$0xff] %v10919_v22  ;;  %v10934_v13 = vsel %vm2230_vm3, %v17152_v26, %v17151_v40  ;;  %v10941_v22 = vpop.permute.xlu1 %1955  ;;  %v17157_v58 = vld [vmem:[#allocation336_spill] sm:$0xff] }
 0x3be   : > { %v17145_v55 = vld [vmem:[#allocation325_spill] sm:$0xff]  ;;  %17155 = vst [vmem:[#allocation67_spill] sm:$0xff] %v10941_v22  ;;  %v10946_v28 = vsel %vm2230_vm3, %v17157_v58, %v17156_v43  ;;  %v17161_v40 = vld [vmem:[#allocation340_spill] sm:$0xff]  ;;  %v17164_v22 = vld [vmem:[#allocation50_spill] sm:$0xff] }
 0x3bf   : > { %v10917_v31 = vsel %vm2230_vm3, %v17145_v55, %v17144_v15  ;;  %v17150_v4 = vld [vmem:[#allocation329_spill] sm:$0xff]  ;;  %v10956_v26 = vsel %vm2230_vm3, %v17161_v40, %v17160_v41  ;;  %2138 = vrot.lane.b32.xlu0 %v17164_v22, %s8090_s26  ;;  %v17165_v43 = vld [vmem:[#allocation120_spill] sm:$0xff]  ;;  %v17169_v41 = vld [vmem:[#allocation123_spill] sm:$0xff] }
 0x3c0   : > { %v10929_v53 = vsel %vm2230_vm3, %v17150_v4, %v17149_v33  ;;  %v17154_v15 = vld [vmem:[#allocation333_spill] sm:$0xff]  ;;  %v17166_v58 = vld [vmem:[#allocation344_spill] sm:$0xff]  ;;  %v17173_v22 = vld [vmem:[#allocation167_spill] sm:$0xff] }
 0x3c1   : > { %v10939_v55 = vsel %vm2230_vm3, %v17154_v15, %v17153_v52  ;;  %v17159_v33 = vld [vmem:[#allocation337_spill] sm:$0xff]  ;;  %v10968_v37 = vsel %vm2230_vm3, %v17166_v58, %v17165_v43  ;;  %v17170_v40 = vld [vmem:[#allocation348_spill] sm:$0xff]  ;;  %2140 = vrot.lane.b32.xlu1 %v17173_v22, %s8090_s26  ;;  %v11007_v22 = vpop.permute.xlu0 %1957 }
 0x3c2   : > { %v10951_v4 = vsel %vm2230_vm3, %v17159_v33, %v17158_v19  ;;  %v17163_v52 = vld [vmem:[#allocation341_spill] sm:$0xff]  ;;  %v10978_v46 = vsel %vm2230_vm3, %v17170_v40, %v17169_v41  ;;  %v17174_v43 = vld [vmem:[#allocation128_spill] sm:$0xff]  ;;  %v17178_v41 = vld [vmem:[#allocation131_spill] sm:$0xff]  ;;  %17182 = vst [vmem:[#allocation68_spill] sm:$0xff] %v11007_v22  ;;  %v11029_v22 = vpop.permute.xlu1 %1959 }
 0x3c3   : > { %v10961_v15 = vsel %vm2230_vm3, %v17163_v52, %v17162_v54  ;;  %v17167_v19 = vld [vmem:[#allocation121_spill] sm:$0xff]  ;;  %v17171_v54 = vld [vmem:[#allocation126_spill] sm:$0xff]  ;;  %v17175_v58 = vld [vmem:[#allocation352_spill] sm:$0xff]  ;;  %17191 = vst [vmem:[#allocation69_spill] sm:$0xff] %v11029_v22 }
 0x3c4   : > { %v17168_v33 = vld [vmem:[#allocation345_spill] sm:$0xff]  ;;  %v10990_v39 = vsel %vm2230_vm3, %v17175_v58, %v17174_v43  ;;  %v17179_v40 = vld [vmem:[#allocation356_spill] sm:$0xff] }
 0x3c5   : > { %v10973_v35 = vsel %vm2230_vm3, %v17168_v33, %v17167_v19  ;;  %v17172_v52 = vld [vmem:[#allocation349_spill] sm:$0xff]  ;;  %v17176_v19 = vld [vmem:[#allocation130_spill] sm:$0xff]  ;;  %v11000_v62 = vsel %vm2230_vm3, %v17179_v40, %v17178_v41  ;;  %v17184_v43 = vld [vmem:[#allocation360_spill] sm:$0xff] }
 0x3c6   : > { %v10983_v36 = vsel %vm2230_vm3, %v17172_v52, %v17171_v54  ;;  %v17177_v33 = vld [vmem:[#allocation353_spill] sm:$0xff]  ;;  %v11012_v58 = vsel %vm2230_vm3, %v17184_v43, %v17183_v23  ;;  %v17188_v41 = vld [vmem:[#allocation364_spill] sm:$0xff] }
 0x3c7   : > { %v10995_v9 = vsel %vm2230_vm3, %v17177_v33, %v17176_v19  ;;  %v17180_v54 = vld [vmem:[#allocation133_spill] sm:$0xff]  ;;  %v11022_v40 = vsel %vm2230_vm3, %v17188_v41, %v17187_v44  ;;  %v17193_v23 = vld [vmem:[#allocation368_spill] sm:$0xff] }
 0x3c8   : > { %v17181_v52 = vld [vmem:[#allocation357_spill] sm:$0xff]  ;;  %v11034_v43 = vsel %vm2230_vm3, %v17193_v23, %v17192_v24  ;;  %v17198_v44 = vld [vmem:[#allocation372_spill] sm:$0xff]  ;;  %v17204_v24 = vld [vmem:[#allocation151_spill] sm:$0xff] }
 0x3c9   : > { %v11005_v6 = vsel %vm2230_vm3, %v17181_v52, %v17180_v54  ;;  %v17186_v19 = vld [vmem:[#allocation361_spill] sm:$0xff]  ;;  %v11044_v41 = vsel %vm2230_vm3, %v17198_v44, %v17197_v17  ;;  %v17205_v23 = vld [vmem:[#allocation376_spill] sm:$0xff] }
 0x3ca   : > { %v11017_v33 = vsel %vm2230_vm3, %v17186_v19, %v17185_v51  ;;  %v17190_v54 = vld [vmem:[#allocation365_spill] sm:$0xff]  ;;  %17199 = vst [vmem:[#allocation71_spill] sm:$0xff] %v11044_v41  ;;  %v11056_v11 = vsel %vm2230_vm3, %v17205_v23, %v17204_v24  ;;  %v17210_v17 = vld [vmem:[#allocation156_spill] sm:$0xff]  ;;  %v17217_v24 = vld [vmem:[#allocation46_spill] sm:$0xff] }
 0x3cb   : > { %v11027_v52 = vsel %vm2230_vm3, %v17190_v54, %v17189_v27  ;;  %v17195_v51 = vld [vmem:[#allocation369_spill] sm:$0xff]  ;;  %17206 = vst [vmem:[#allocation76_spill] sm:$0xff] %v11056_v11  ;;  %v17211_v44 = vld [vmem:[#allocation380_spill] sm:$0xff] }
 0x3cc   : > { %v11039_v19 = vsel %vm2230_vm3, %v17195_v51, %v17194_v56  ;;  %v17201_v27 = vld [vmem:[#allocation373_spill] sm:$0xff]  ;;  %v11066_v41 = vsel %vm2230_vm3, %v17211_v44, %v17210_v17  ;;  %v17218_v23 = vld [vmem:[#allocation384_spill] sm:$0xff] }
 0x3cd   : > { %17196 = vst [vmem:[#allocation70_spill] sm:$0xff] %v11039_v19  ;;  %v11049_v54 = vsel %vm2230_vm3, %v17201_v27, %v17200_v18  ;;  %v17203_v22 = vld [vmem:[#allocation169_spill] sm:$0xff]  ;;  %17212 = vst [vmem:[#allocation80_spill] sm:$0xff] %v11066_v41  ;;  %v17213_v18 = vld [vmem:[#allocation158_spill] sm:$0xff]  ;;  %v11078_v11 = vsel %vm2230_vm3, %v17218_v23, %v17217_v24 }
 0x3ce   : > { %17202 = vst [vmem:[#allocation73_spill] sm:$0xff] %v11049_v54  ;;  %2142 = vrot.lane.b32.xlu0 %v17203_v22, %s8090_s26  ;;  %v17207_v56 = vld [vmem:[#allocation153_spill] sm:$0xff]  ;;  %v17216_v22 = vld [vmem:[#allocation171_spill] sm:$0xff]  ;;  %17219 = vst [vmem:[#allocation83_spill] sm:$0xff] %v11078_v11 }
 0x3cf   : > { %v17208_v51 = vld [vmem:[#allocation377_spill] sm:$0xff]  ;;  %2144 = vrot.lane.b32.xlu1 %v17216_v22, %s8090_s26  ;;  %v17224_v44 = vld [vmem:[#allocation388_spill] sm:$0xff]  ;;  %v11095_v22 = vpop.permute.xlu0 %1961  ;;  %v17231_v11 = vld [vmem:[#allocation166_spill] sm:$0xff] }
 0x3d0   : > { %v11061_v38 = vsel %vm2230_vm3, %v17208_v51, %v17207_v56  ;;  %v17214_v27 = vld [vmem:[#allocation381_spill] sm:$0xff]  ;;  %v17220_v56 = vld [vmem:[#allocation47_spill] sm:$0xff]  ;;  %17228 = vst [vmem:[#allocation88_spill] sm:$0xff] %v11095_v22  ;;  %v17229_v19 = vld [vmem:[#allocation164_spill] sm:$0xff]  ;;  %v11117_v22 = vpop.permute.xlu1 %1963 }
 0x3d1   : > { %17209 = vst [vmem:[#allocation78_spill] sm:$0xff] %v11061_v38  ;;  %v11071_v54 = vsel %vm2230_vm3, %v17214_v27, %v17213_v18  ;;  %v17221_v51 = vld [vmem:[#allocation385_spill] sm:$0xff]  ;;  %v17225_v18 = vld [vmem:[#allocation162_spill] sm:$0xff]  ;;  %v17230_v24 = vld [vmem:[#allocation392_spill] sm:$0xff] }
 0x3d2   : > { %17215 = vst [vmem:[#allocation81_spill] sm:$0xff] %v11071_v54  ;;  %v11083_v38 = vsel %vm2230_vm3, %v17221_v51, %v17220_v56  ;;  %v17223_v17 = vld [vmem:[#allocation49_spill] sm:$0xff]  ;;  %v11100_v23 = vsel %vm2230_vm3, %v17230_v24, %v17229_v19  ;;  %17238 = vst [vmem:[#allocation91_spill] sm:$0xff] %v11117_v22  ;;  %v17241_v24 = vld [vmem:[#allocation172_spill] sm:$0xff] }
 0x3d3   : > { %17222 = vst [vmem:[#allocation86_spill] sm:$0xff] %v11083_v38  ;;  %v11088_v41 = vsel %vm2230_vm3, %v17224_v44, %v17223_v17  ;;  %v17226_v27 = vld [vmem:[#allocation389_spill] sm:$0xff]  ;;  %v17235_v44 = vld [vmem:[#allocation168_spill] sm:$0xff] }
 0x3d4   : > { %v11093_v54 = vsel %vm2230_vm3, %v17226_v27, %v17225_v18  ;;  %v17232_v56 = vld [vmem:[#allocation393_spill] sm:$0xff]  ;;  %v17236_v18 = vld [vmem:[#allocation396_spill] sm:$0xff] }
 0x3d5   : > { %17227 = vst [vmem:[#allocation163_spill] sm:$0xff] %v11093_v54  ;;  %v11105_v51 = vsel %vm2230_vm3, %v17232_v56, %v17231_v11  ;;  %v17233_v38 = vld [vmem:[#allocation57_spill] sm:$0xff]  ;;  %v11115_v27 = vsel %vm2230_vm3, %v17236_v18, %v17235_v44  ;;  %v17239_v54 = vld [vmem:[#allocation170_spill] sm:$0xff]  ;;  %v11127_v11 = vsel %vm2230_vm3, %v10313_v30, %v17241_v24 }
 0x3d6   : > { %v11110_v17 = vsel %vm2230_vm3, %v10294_v21, %v17233_v38  ;;  %17237 = vst [vmem:[#allocation313_spill] sm:$0xff] %v11115_v27  ;;  %v11122_v19 = vsel %vm2230_vm3, %v10308_v0, %v17239_v54  ;;  %17242 = vst [vmem:[#allocation93_spill] sm:$0xff] %v11127_v11  ;;  %v17243_v56 = vld [vmem:[#allocation174_spill] sm:$0xff]  ;;  %v17244_v38 = vld [vmem:[#allocation175_spill] sm:$0xff] }
 0x3d7   : > { %17234 = vst [vmem:[#allocation90_spill] sm:$0xff] %v11110_v17  ;;  %17240 = vst [vmem:[#allocation316_spill] sm:$0xff] %v11122_v19  ;;  %v11132_v21 = vsel %vm2291_vm4, %v10814_v57, %v17243_v56  ;;  %v11137_v44 = vsel %vm2291_vm4, %v10824_v7, %v17244_v38  ;;  %v17245_v18 = vld [vmem:[#allocation173_spill] sm:$0xff]  ;;  %v17246_v0 = vld [vmem:[#allocation176_spill] sm:$0xff] }
 0x3d8   : > { %2146 = vrot.lane.b32.xlu0 %v17245_v18, %s8090_s26  ;;  %v11144_v54 = vsel %vm2291_vm4, %v10807_v10, %v17246_v0  ;;  %v17247_v30 = vld [vmem:[#allocation177_spill] sm:$0xff]  ;;  %v17248_v57 = vld [vmem:[#allocation178_spill] sm:$0xff]  ;;  %v17249_v7 = vld [vmem:[#allocation179_spill] sm:$0xff] }
 0x3d9   : > { %v11149_v24 = vsel %vm2291_vm4, %v10819_v20, %v17247_v30  ;;  %v11154_v56 = vsel %vm2291_vm4, %v10802_v3, %v17248_v57  ;;  %v11159_v38 = vsel %vm2291_vm4, %v10829_v45, %v17249_v7  ;;  %v17250_v18 = vld [vmem:[#allocation60_spill] sm:$0xff]  ;;  %v17252_v20 = vld [vmem:[#allocation181_spill] sm:$0xff]  ;;  %v17253_v3 = vld [vmem:[#allocation182_spill] sm:$0xff] }
 0x3da   : > { %2148 = vrot.lane.b32.xlu1 %v17250_v18, %s8090_s26  ;;  %v17251_v10 = vld [vmem:[#allocation180_spill] sm:$0xff]  ;;  %v11171_v30 = vsel %vm2291_vm4, %v10841_v59, %v17252_v20  ;;  %v11176_v57 = vsel %vm2291_vm4, %v10846_v48, %v17253_v3  ;;  %v17254_v45 = vld [vmem:[#allocation183_spill] sm:$0xff]  ;;  %v11183_v18 = vpop.permute.xlu0 %1965  ;;  %v17258_v20 = vld [vmem:[#allocation186_spill] sm:$0xff] }
 0x3db   : > { %v11166_v0 = vsel %vm2291_vm4, %v10836_v12, %v17251_v10  ;;  %v11181_v7 = vsel %vm2291_vm4, %v10851_v63, %v17254_v45  ;;  %17255 = vst [vmem:[#allocation317_spill] sm:$0xff] %v11183_v18  ;;  %v17256_v11 = vld [vmem:[#allocation184_spill] sm:$0xff]  ;;  %v17257_v10 = vld [vmem:[#allocation185_spill] sm:$0xff]  ;;  %v11198_v48 = vsel %vm2291_vm4, %v10868_v49, %v17258_v20  ;;  %v17259_v3 = vld [vmem:[#allocation187_spill] sm:$0xff]  ;;  %v11205_v45 = vpop.permute.xlu1 %1967 }
 0x3dc   : > { %v11188_v12 = vsel %vm2291_vm4, %v10858_v8, %v17256_v11  ;;  %v11193_v59 = vsel %vm2291_vm4, %v10863_v47, %v17257_v10  ;;  %v11203_v63 = vsel %vm2291_vm4, %v10873_v32, %v17259_v3  ;;  %17260 = vst [vmem:[#allocation165_spill] sm:$0xff] %v11205_v45  ;;  %v17261_v8 = vld [vmem:[#allocation188_spill] sm:$0xff]  ;;  %v17262_v47 = vld [vmem:[#allocation189_spill] sm:$0xff]  ;;  %v17263_v49 = vld [vmem:[#allocation190_spill] sm:$0xff] }
 0x3dd   : > { %v11210_v11 = vsel %vm2291_vm4, %v10880_v16, %v17261_v8  ;;  %v11215_v10 = vsel %vm2291_vm4, %v10885_v14, %v17262_v47  ;;  %v11220_v20 = vsel %vm2291_vm4, %v10890_v29, %v17263_v49  ;;  %v17264_v32 = vld [vmem:[#allocation191_spill] sm:$0xff]  ;;  %v17265_v45 = vld [vmem:[#allocation297_spill] sm:$0xff]  ;;  %v17266_v16 = vld [vmem:[#allocation192_spill] sm:$0xff] }
 0x3de   : > { %v11225_v3 = vsel %vm2291_vm4, %v10895_v42, %v17264_v32  ;;  %2150 = vrot.lane.b32.xlu0 %v17265_v45, %s8090_s26  ;;  %v11232_v8 = vsel %vm2291_vm4, %v10902_v5, %v17266_v16  ;;  %v17267_v14 = vld [vmem:[#allocation193_spill] sm:$0xff]  ;;  %v17268_v29 = vld [vmem:[#allocation194_spill] sm:$0xff]  ;;  %v17269_v42 = vld [vmem:[#allocation195_spill] sm:$0xff]  ;;  %v11263_v18 = vpop.permute.xlu0 %1969 }
 0x3df   : > { %v11237_v47 = vsel %vm2291_vm4, %v10907_v50, %v17267_v14  ;;  %v11242_v49 = vsel %vm2291_vm4, %v10912_v60, %v17268_v29  ;;  %v11247_v32 = vsel %vm2291_vm4, %v10917_v31, %v17269_v42  ;;  %v17270_v45 = vld [vmem:[#allocation300_spill] sm:$0xff]  ;;  %v17272_v50 = vld [vmem:[#allocation197_spill] sm:$0xff]  ;;  %v2041_v60 = vrot.slane %v10336_v61, 2  ;;  %17273 = vst [vmem:[#allocation96_spill] sm:$0xff] %v11263_v18  ;;  %v17274_v31 = vld [vmem:[#allocation198_spill] sm:$0xff] }
 0x3e0   : > { %2152 = vrot.lane.b32.xlu1 %v17270_v45, %s8090_s26  ;;  %v17271_v5 = vld [vmem:[#allocation196_spill] sm:$0xff]  ;;  %v11259_v14 = vsel %vm2291_vm4, %v10929_v53, %v17272_v50  ;;  %v2042_v29 = vrot.slane %v10345_v25, 2  ;;  %v11268_v42 = vsel %vm2291_vm4, %v10934_v13, %v17274_v31  ;;  %v17275_v45 = vld [vmem:[#allocation199_spill] sm:$0xff]  ;;  %v17277_v61 = vld [vmem:[#allocation201_spill] sm:$0xff]  ;;  %v11285_v50 = vpop.permute.xlu1 %1971 }
 0x3e1   : > { %v11254_v16 = vsel %vm2291_vm4, %v10924_v34, %v17271_v5  ;;  %v11273_v34 = vsel %vm2291_vm4, %v10939_v55, %v17275_v45  ;;  %v17276_v5 = vld [vmem:[#allocation200_spill] sm:$0xff]  ;;  %v11283_v25 = vsel %vm2291_vm4, %v10951_v4, %v17277_v61  ;;  %17278 = vst [vmem:[#allocation320_spill] sm:$0xff] %v11285_v50  ;;  %v17279_v18 = vld [vmem:[#allocation202_spill] sm:$0xff]  ;;  %v17280_v31 = vld [vmem:[#allocation203_spill] sm:$0xff] }
 0x3e2   : > { %v11278_v53 = vsel %vm2291_vm4, %v10946_v28, %v17276_v5  ;;  %v11290_v13 = vsel %vm2291_vm4, %v10956_v26, %v17279_v18  ;;  %v11295_v55 = vsel %vm2291_vm4, %v10961_v15, %v17280_v31  ;;  %v17281_v45 = vld [vmem:[#allocation204_spill] sm:$0xff]  ;;  %v17282_v5 = vld [vmem:[#allocation205_spill] sm:$0xff]  ;;  %v17283_v61 = vld [vmem:[#allocation302_spill] sm:$0xff]  ;;  %v11338_v50 = vpop.permute.xlu0 %1973 }
 0x3e3   : > { %v11300_v28 = vsel %vm2291_vm4, %v10968_v37, %v17281_v45  ;;  %v11305_v4 = vsel %vm2291_vm4, %v10973_v35, %v17282_v5  ;;  %2154 = vrot.lane.b32.xlu0 %v17283_v61, %s8090_s26  ;;  %v17284_v26 = vld [vmem:[#allocation206_spill] sm:$0xff]  ;;  %v17285_v15 = vld [vmem:[#allocation207_spill] sm:$0xff]  ;;  %v17286_v37 = vld [vmem:[#allocation208_spill] sm:$0xff]  ;;  %v2044_v35 = vrot.slane %v10350_v1, 2  ;;  %17290 = vst [vmem:[#allocation98_spill] sm:$0xff] %v11338_v50 }
 0x3e4   : > { %v11312_v18 = vsel %vm2291_vm4, %v10978_v46, %v17284_v26  ;;  %v11317_v31 = vsel %vm2291_vm4, %v10983_v36, %v17285_v15  ;;  %v11322_v45 = vsel %vm2291_vm4, %v10990_v39, %v17286_v37  ;;  %v17287_v5 = vld [vmem:[#allocation304_spill] sm:$0xff]  ;;  %v17288_v61 = vld [vmem:[#allocation209_spill] sm:$0xff]  ;;  %v17289_v26 = vld [vmem:[#allocation210_spill] sm:$0xff]  ;;  %v2046_v15 = vrot.slane %v10359_v2, 2 }
 0x3e5   : > { %2156 = vrot.lane.b32.xlu1 %v17287_v5, %s8090_s26  ;;  %v11330_v46 = vsel %vm2291_vm4, %v10995_v9, %v17288_v61  ;;  %v11335_v36 = vsel %vm2291_vm4, %v11000_v62, %v17289_v26  ;;  %v2043_v39 = vsel %vm815_vm1, %v2041_v60, %v2042_v29  ;;  %v17291_v1 = vld [vmem:[#allocation211_spill] sm:$0xff]  ;;  %v17292_v5 = vld [vmem:[#allocation212_spill] sm:$0xff]  ;;  %v17293_v61 = vld [vmem:[#allocation213_spill] sm:$0xff]  ;;  %v11361_v60 = vpop.permute.xlu1 %1975 }
 0x3e6   : > { %v11344_v37 = vsel %vm2291_vm4, %v11005_v6, %v17291_v1  ;;  %v11349_v9 = vsel %vm2291_vm4, %v11012_v58, %v17292_v5  ;;  %v11354_v62 = vsel %vm2291_vm4, %v11017_v33, %v17293_v61  ;;  %v17294_v2 = vld [vmem:[#allocation214_spill] sm:$0xff]  ;;  %17295 = vst [vmem:[#allocation321_spill] sm:$0xff] %v11361_v60  ;;  %v17296_v50 = vld [vmem:[#allocation215_spill] sm:$0xff]  ;;  %v17297_v1 = vld [vmem:[#allocation216_spill] sm:$0xff]  ;;  %v11396_v27 = vpop.permute.xlu0 %1977 }
 0x3e7   : > { %v11359_v26 = vsel %vm2291_vm4, %v11022_v40, %v17294_v2  ;;  %v11366_v6 = vsel %vm2291_vm4, %v11027_v52, %v17296_v50  ;;  %v11371_v58 = vsel %vm2291_vm4, %v11034_v43, %v17297_v1  ;;  %v17298_v5 = vld [vmem:[#allocation217_spill] sm:$0xff]  ;;  %v17299_v33 = vld [vmem:[#allocation70_spill] sm:$0xff]  ;;  %v17300_v40 = vld [vmem:[#allocation299_spill] sm:$0xff]  ;;  %v2045_v43 = vsel %vm815_vm1, %v2042_v29, %v2044_v35  ;;  %17309 = vst [vmem:[#allocation101_spill] sm:$0xff] %v11396_v27 }
 0x3e8   : > { %v11376_v61 = vsel %vm2291_vm4, %v17299_v33, %v17298_v5  ;;  %2158 = vrot.lane.b32.xlu0 %v17300_v40, %s8090_s26  ;;  %v17301_v2 = vld [vmem:[#allocation218_spill] sm:$0xff]  ;;  %v17302_v60 = vld [vmem:[#allocation71_spill] sm:$0xff]  ;;  %v17304_v52 = vld [vmem:[#allocation408_spill] sm:$0xff] }
 0x3e9   : > { %v11383_v19 = vsel %vm2291_vm4, %v17302_v60, %v17301_v2  ;;  %v2048_v50 = vrot.slane %v17304_v52, 2  ;;  %2160 = vrot.lane.b32.xlu1 %v2043_v39, %s8090_s26  ;;  %v17305_v1 = vld [vmem:[#allocation219_spill] sm:$0xff]  ;;  %v17306_v22 = vld [vmem:[#allocation73_spill] sm:$0xff]  ;;  %v17308_v33 = vld [vmem:[#allocation232_spill] sm:$0xff]  ;;  %v2047_v60 = vsel %vm815_vm1, %v2044_v35, %v2046_v15 }
 0x3ea   : > { %17303 = vst [vmem:[#allocation100_spill] sm:$0xff] %v11383_v19  ;;  %v11391_v5 = vsel %vm2291_vm4, %v17306_v22, %v17305_v1  ;;  %v2353_v40 = vsel %vm2352_vm5, %v11132_v21, %v17308_v33  ;;  %v17310_v2 = vld [vmem:[#allocation220_spill] sm:$0xff]  ;;  %v17313_v29 = vld [vmem:[#allocation233_spill] sm:$0xff]  ;;  %v17314_v22 = vld [vmem:[#allocation247_spill] sm:$0xff] }
 0x3eb   : > { %17307 = vst [vmem:[#allocation324_spill] sm:$0xff] %v11391_v5  ;;  %v17311_v52 = vld [vmem:[#allocation76_spill] sm:$0xff]  ;;  %v2354_v19 = vsel %vm2352_vm5, %v11137_v44, %v17313_v29  ;;  %v2414_v1 = vsel %vm2413_vm6, %v2353_v40, %v17314_v22  ;;  %v11409_v5 = vpop.permute.xlu1 %1979  ;;  %v17316_v21 = vld [vmem:[#allocation221_spill] sm:$0xff]  ;;  %v17317_v33 = vld [vmem:[#allocation78_spill] sm:$0xff] }
 0x3ec   : > { %v11402_v39 = vsel %vm2291_vm4, %v17311_v52, %v17310_v2  ;;  %17315 = vst [vmem:[#allocation103_spill] sm:$0xff] %v11409_v5  ;;  %v11414_v27 = vsel %vm2291_vm4, %v17317_v33, %v17316_v21  ;;  %v17319_v35 = vld [vmem:[#allocation248_spill] sm:$0xff]  ;;  %v17320_v2 = vld [vmem:[#allocation305_spill] sm:$0xff]  ;;  %2162 = vrot.lane.b32.xlu0 %v2045_v43, %s8090_s26  ;;  %v17321_v44 = vld [vmem:[#allocation222_spill] sm:$0xff] }
 0x3ed   : > { %17312 = vst [vmem:[#allocation325_spill] sm:$0xff] %v11402_v39  ;;  %17318 = vst [vmem:[#allocation328_spill] sm:$0xff] %v11414_v27  ;;  %v2415_v17 = vsel %vm2413_vm6, %v2354_v19, %v17319_v35  ;;  %v2475_v52 = vsel %vm2474_vm7, %v2414_v1, %v17320_v2  ;;  %v17322_v29 = vld [vmem:[#allocation80_spill] sm:$0xff]  ;;  %v17324_v22 = vld [vmem:[#allocation306_spill] sm:$0xff]  ;;  %2164 = vrot.lane.b32.xlu1 %v2047_v60, %s8090_s26  ;;  %v2049_v19 = vsel %vm815_vm1, %v2046_v15, %v2048_v50 }
 0x3ee   : > { %v11424_v40 = vsel %vm2291_vm4, %v17322_v29, %v17321_v44  ;;  %v2476_v5 = vsel %vm2474_vm7, %v2415_v17, %v17324_v22  ;;  %v17325_v39 = vld [vmem:[#allocation407_spill] sm:$0xff]  ;;  %v17326_v33 = vld [vmem:[#allocation234_spill] sm:$0xff]  ;;  %v17328_v2 = vld [vmem:[#allocation409_spill] sm:$0xff]  ;;  %v2051_v22 = vpop.permute.xlu0 %2050 }
 0x3ef   : > { %17323 = vst [vmem:[#allocation106_spill] sm:$0xff] %v11424_v40  ;;  %v2536_v21 = vsel %vm2535_vm8, %v2475_v52, %v17325_v39  ;;  %v2355_v43 = vsel %vm2352_vm5, %v11144_v54, %v17326_v33  ;;  %v17327_v1 = vld [vmem:[#allocation235_spill] sm:$0xff]  ;;  %v2537_v44 = vsel %vm2535_vm8, %v2476_v5, %v17328_v2  ;;  %v17329_v29 = vld [vmem:[#allocation458_spill] sm:$0xff]  ;;  %v17330_v39 = vld [vmem:[#allocation249_spill] sm:$0xff]  ;;  %v2053_v27 = vpop.permute.xlu1 %2052 }
 0x3f0   : > { %v2356_v35 = vsel %vm2352_vm5, %v11149_v24, %v17327_v1  ;;  %v2597_v17 = vsel %vm2596_vm9, %v2536_v21, %v17329_v29  ;;  %v2416_v60 = vsel %vm2413_vm6, %v2355_v43, %v17330_v39  ;;  %v17331_v52 = vld [vmem:[#allocation250_spill] sm:$0xff]  ;;  %v17332_v40 = vld [vmem:[#allocation459_spill] sm:$0xff]  ;;  %2166 = vrot.lane.b32.xlu0 %v2049_v19, %s8090_s26  ;;  %v17334_v21 = vld [vmem:[#allocation308_spill] sm:$0xff] }
 0x3f1   : > { %v2417_v15 = vsel %vm2413_vm6, %v2356_v35, %v17331_v52  ;;  %v2598_v54 = vsel %vm2596_vm9, %v2537_v44, %v17332_v40  ;;  %v2658_v33 = vsel %vm2657_vm10, %v2597_v17, %v2051_v22  ;;  %v17333_v24 = vld [vmem:[#allocation307_spill] sm:$0xff]  ;;  %v17335_v29 = vld [vmem:[#allocation410_spill] sm:$0xff]  ;;  %2168 = vrot.lane.b32.xlu1 %v2048_v50, %s8090_s26  ;;  %v17337_v44 = vld [vmem:[#allocation81_spill] sm:$0xff] }
 0x3f2   : > { %v2477_v1 = vsel %vm2474_vm7, %v2416_v60, %v17333_v24  ;;  %v2779_v5 = vrot.slane %v2658_v33, 3  ;;  %v2659_v2 = vsel %vm2657_vm10, %v2598_v54, %v2053_v27  ;;  %v2478_v43 = vsel %vm2474_vm7, %v2417_v15, %v17334_v21  ;;  %v17336_v40 = vld [vmem:[#allocation223_spill] sm:$0xff]  ;;  %v17338_v22 = vld [vmem:[#allocation2_spill] sm:$0xff]  ;;  %v17340_v52 = vld [vmem:[#allocation460_spill] sm:$0xff]  ;;  %v2055_v54 = vpop.permute.xlu0 %2054 }
 0x3f3   : > { %v2538_v35 = vsel %vm2535_vm8, %v2477_v1, %v17335_v29  ;;  %v2780_v39 = vrot.slane %v2659_v2, 3  ;;  %v11461_v17 = vsel %vm2291_vm4, %v17337_v44, %v17336_v40  ;;  %v2357_v27 = vsel %vm2352_vm5, %v11154_v56, %v17338_v22  ;;  %v17339_v19 = vld [vmem:[#allocation411_spill] sm:$0xff]  ;;  %v17341_v33 = vld [vmem:[#allocation72_spill] sm:$0xff]  ;;  %v17342_v24 = vld [vmem:[#allocation461_spill] sm:$0xff]  ;;  %v2057_v21 = vpop.permute.xlu1 %2056 }
 0x3f4   : > { %v2539_v60 = vsel %vm2535_vm8, %v2478_v43, %v17339_v19  ;;  %v2599_v15 = vsel %vm2596_vm9, %v2538_v35, %v17340_v52  ;;  %v2418_v50 = vsel %vm2413_vm6, %v2357_v27, %v17341_v33  ;;  %v17343_v40 = vld [vmem:[#allocation3_spill] sm:$0xff]  ;;  %v17344_v43 = vld [vmem:[#allocation309_spill] sm:$0xff] }
 0x3f5   : > { %v2600_v1 = vsel %vm2596_vm9, %v2539_v60, %v17342_v24  ;;  %v2660_v2 = vsel %vm2657_vm10, %v2599_v15, %v2055_v54  ;;  %v2781_v29 = vsel %vm16337_vm11, %v2779_v5, %v2780_v39  ;;  %v2358_v56 = vsel %vm2352_vm5, %v11159_v38, %v17343_v40  ;;  %v17345_v27 = vld [vmem:[#allocation5_spill] sm:$0xff]  ;;  %v17346_v60 = vld [vmem:[#allocation74_spill] sm:$0xff]  ;;  %v17347_v5 = vld [vmem:[#allocation412_spill] sm:$0xff] }
 0x3f6   : > { %v2479_v44 = vsel %vm2474_vm7, %v2418_v50, %v17344_v43  ;;  %v2782_v35 = vrot.slane %v2660_v2, 3  ;;  %v2661_v22 = vsel %vm2657_vm10, %v2600_v1, %v2057_v21  ;;  %7399 = vmatprep.mubr.msk.f32.mxu0 %vm2893_vm12, %v2781_v29  ;;  %v2359_v19 = vsel %vm2352_vm5, %v11166_v0, %v17345_v27  ;;  %v17348_v38 = vld [vmem:[#allocation6_spill] sm:$0xff]  ;;  %v2059_v21 = vpop.permute.xlu0 %2058  ;;  %v17351_v29 = vld [vmem:[#allocation77_spill] sm:$0xff]  ;;  %v17353_v27 = vld [vmem:[#allocation79_spill] sm:$0xff] }
 0x3f7   : > { %v2419_v52 = vsel %vm2413_vm6, %v2358_v56, %v17346_v60  ;;  %v2540_v15 = vsel %vm2535_vm8, %v2479_v44, %v17347_v5  ;;  %v2784_v54 = vrot.slane %v2661_v22, 3  ;;  %v2360_v33 = vsel %vm2352_vm5, %v11171_v30, %v17348_v38  ;;  %v17349_v50 = vld [vmem:[#allocation310_spill] sm:$0xff]  ;;  %v17352_v56 = vld [vmem:[#allocation413_spill] sm:$0xff]  ;;  %v2061_v30 = vpop.permute.xlu1 %2060  ;;  %v17356_v38 = vld [vmem:[#allocation4_spill] sm:$0xff] }
 0x3f8   : > { %v2480_v24 = vsel %vm2474_vm7, %v2419_v52, %v17349_v50  ;;  %v17350_v1 = vld [vmem:[#allocation82_spill] sm:$0xff]  ;;  %v2783_v0 = vsel %vm16337_vm11, %v2780_v39, %v2782_v35  ;;  %v2420_v40 = vsel %vm2413_vm6, %v2359_v19, %v17351_v29  ;;  %v2421_v60 = vsel %vm2413_vm6, %v2360_v33, %v17353_v27  ;;  %v17354_v52 = vld [vmem:[#allocation311_spill] sm:$0xff]  ;;  %v17355_v39 = vld [vmem:[#allocation84_spill] sm:$0xff] }
 0x3f9   : > { %v2601_v2 = vsel %vm2596_vm9, %v2540_v15, %v17350_v1  ;;  %v2541_v43 = vsel %vm2535_vm8, %v2480_v24, %v17352_v56  ;;  %7400 = vmatmul.mubr.msk.f32.vlgmr.msra.gmra.mrb[0].mxu0 %vm2893_vm12, %v2783_v0  ;;  %v2785_v22 = vsel %vm16337_vm11, %v2782_v35, %v2784_v54  ;;  %v2481_v5 = vsel %vm2474_vm7, %v2420_v40, %v17354_v52  ;;  %v17357_v24 = vld [vmem:[#allocation312_spill] sm:$0xff]  ;;  %v17358_v35 = vld [vmem:[#allocation414_spill] sm:$0xff]  ;;  %v17360_v29 = vld [vmem:[#allocation415_spill] sm:$0xff] }
 0x3fa   : > { %v2662_v44 = vsel %vm2657_vm10, %v2601_v2, %v2059_v21  ;;  %v2602_v15 = vsel %vm2596_vm9, %v2541_v43, %v17355_v39  ;;  %7402 = vmatprep.mubr.msk.f32.mxu0 %vm2893_vm12, %v2785_v22  ;;  %v2361_v50 = vsel %vm2352_vm5, %v11176_v57, %v17356_v38  ;;  %v2482_v1 = vsel %vm2474_vm7, %v2421_v60, %v17357_v24  ;;  %v17359_v21 = vld [vmem:[#allocation7_spill] sm:$0xff] }
 0x3fb   : > { %v2786_v19 = vrot.slane %v2662_v44, 3  ;;  %v2542_v2 = vsel %vm2535_vm8, %v2481_v5, %v17358_v35  ;;  %v2663_v33 = vsel %vm2657_vm10, %v2602_v15, %v2061_v30  ;;  %v2362_v0 = vsel %vm2352_vm5, %v11181_v7, %v17359_v21  ;;  %v17361_v56 = vld [vmem:[#allocation87_spill] sm:$0xff]  ;;  %v2063_v44 = vpop.permute.xlu0 %2062  ;;  %v17364_v30 = vld [vmem:[#allocation89_spill] sm:$0xff]  ;;  %v2065_v39 = vpop.permute.xlu1 %2064  ;;  %v17365_v15 = vld [vmem:[#allocation314_spill] sm:$0xff] }
 0x3fc   : > { %v2543_v40 = vsel %vm2535_vm8, %v2482_v1, %v17360_v29  ;;  %v2603_v43 = vsel %vm2596_vm9, %v2542_v2, %v17361_v56  ;;  %v17362_v22 = vld [vmem:[#allocation75_spill] sm:$0xff]  ;;  %v2788_v24 = vrot.slane %v2663_v33, 3  ;;  %v17368_v21 = vld [vmem:[#allocation416_spill] sm:$0xff] }
 0x3fd   : > { %v2787_v57 = vsel %vm16337_vm11, %v2784_v54, %v2786_v19  ;;  %v2422_v27 = vsel %vm2413_vm6, %v2361_v50, %v17362_v22  ;;  %v17363_v60 = vld [vmem:[#allocation251_spill] sm:$0xff]  ;;  %v2604_v5 = vsel %vm2596_vm9, %v2543_v40, %v17364_v30  ;;  %v2664_v7 = vsel %vm2657_vm10, %v2603_v43, %v2063_v44  ;;  %v17366_v19 = vld [vmem:[#allocation8_spill] sm:$0xff]  ;;  %v17369_v40 = vld [vmem:[#allocation10_spill] sm:$0xff] }
 0x3fe   : > { %v2423_v52 = vsel %vm2413_vm6, %v2362_v0, %v17363_v60  ;;  %7403 = vmatmul.mubr.msk.f32.gmra.mrb[2].mxu0 %vm2893_vm12, %v2787_v57  ;;  %v2483_v38 = vsel %vm2474_vm7, %v2422_v27, %v17365_v15  ;;  %v2789_v1 = vrot.slane %v2664_v7, 3  ;;  %v2665_v54 = vsel %vm2657_vm10, %v2604_v5, %v2065_v39  ;;  %v17367_v35 = vld [vmem:[#allocation315_spill] sm:$0xff]  ;;  %v17370_v43 = vld [vmem:[#allocation417_spill] sm:$0xff]  ;;  %v17372_v27 = vld [vmem:[#allocation252_spill] sm:$0xff] }
 0x3ff   : > { %v2363_v50 = vsel %vm2352_vm5, %v11188_v12, %v17366_v19  ;;  %v2484_v2 = vsel %vm2474_vm7, %v2423_v52, %v17367_v35  ;;  %v2544_v0 = vsel %vm2535_vm8, %v2483_v38, %v17368_v21  ;;  %v2791_v29 = vrot.slane %v2665_v54, 3  ;;  %v17371_v44 = vld [vmem:[#allocation85_spill] sm:$0xff]  ;;  %v2067_v22 = vpop.permute.xlu0 %2066  ;;  %v17373_v52 = vld [vmem:[#allocation92_spill] sm:$0xff]  ;;  %v17375_v38 = vld [vmem:[#allocation318_spill] sm:$0xff] }
 0x400   : > { %v2364_v56 = vsel %vm2352_vm5, %v11193_v59, %v17369_v40  ;;  %v2545_v33 = vsel %vm2535_vm8, %v2484_v2, %v17370_v43  ;;  %v2605_v57 = vsel %vm2596_vm9, %v2544_v0, %v17371_v44  ;;  %v2790_v12 = vsel %vm16337_vm11, %v2788_v24, %v2789_v1  ;;  %v2069_v59 = vpop.permute.xlu1 %2068  ;;  %v17374_v39 = vld [vmem:[#allocation253_spill] sm:$0xff]  ;;  %v17377_v2 = vld [vmem:[#allocation319_spill] sm:$0xff]  ;;  %v17378_v0 = vld [vmem:[#allocation418_spill] sm:$0xff] }
 0x401   : > { %v2424_v60 = vsel %vm2413_vm6, %v2363_v50, %v17372_v27  ;;  %v2606_v30 = vsel %vm2596_vm9, %v2545_v33, %v17373_v52  ;;  %v2666_v5 = vsel %vm2657_vm10, %v2605_v57, %v2067_v22  ;;  %7405 = vmatprep.mubr.msk.f32.mxu0 %vm2893_vm12, %v2790_v12  ;;  %v2792_v7 = vsel %vm16337_vm11, %v2789_v1, %v2791_v29  ;;  %v17376_v50 = vld [vmem:[#allocation11_spill] sm:$0xff]  ;;  %v17381_v57 = vld [vmem:[#allocation94_spill] sm:$0xff]  ;;  %v17383_v52 = vld [vmem:[#allocation97_spill] sm:$0xff] }
 0x402   : > { %v2425_v15 = vsel %vm2413_vm6, %v2364_v56, %v17374_v39  ;;  %v2485_v54 = vsel %vm2474_vm7, %v2424_v60, %v17375_v38  ;;  %v2793_v24 = vrot.slane %v2666_v5, 3  ;;  %v2667_v19 = vsel %vm2657_vm10, %v2606_v30, %v2069_v59  ;;  %7406 = vmatmul.mubr.msk.f32.gmra.mrb[4].mxu0 %vm2893_vm12, %v2792_v7  ;;  %v17379_v56 = vld [vmem:[#allocation9_spill] sm:$0xff]  ;;  %v17380_v33 = vld [vmem:[#allocation419_spill] sm:$0xff]  ;;  %v17382_v27 = vld [vmem:[#allocation254_spill] sm:$0xff] }
 0x403   : > { %v2365_v35 = vsel %vm2352_vm5, %v11198_v48, %v17376_v50  ;;  %v2486_v21 = vsel %vm2474_vm7, %v2425_v15, %v17377_v2  ;;  %v2546_v1 = vsel %vm2535_vm8, %v2485_v54, %v17378_v0  ;;  %v2795_v40 = vrot.slane %v2667_v19, 3  ;;  %v2071_v12 = vpop.permute.xlu0 %2070  ;;  %v17384_v7 = vld [vmem:[#allocation255_spill] sm:$0xff]  ;;  %v17385_v15 = vld [vmem:[#allocation322_spill] sm:$0xff]  ;;  %v17386_v19 = vld [vmem:[#allocation224_spill] sm:$0xff] }
 0x404   : > { %v2366_v43 = vsel %vm2352_vm5, %v11203_v63, %v17379_v56  ;;  %v2547_v44 = vsel %vm2535_vm8, %v2486_v21, %v17380_v33  ;;  %v2607_v22 = vsel %vm2596_vm9, %v2546_v1, %v17381_v57  ;;  %v2794_v48 = vsel %vm16337_vm11, %v2791_v29, %v2793_v24  ;;  %v2073_v63 = vpop.permute.xlu1 %2072  ;;  %v17387_v50 = vld [vmem:[#allocation83_spill] sm:$0xff]  ;;  %v17391_v56 = vld [vmem:[#allocation86_spill] sm:$0xff]  ;;  %v17392_v33 = vld [vmem:[#allocation12_spill] sm:$0xff] }
 0x405   : > { %v2426_v60 = vsel %vm2413_vm6, %v2365_v35, %v17382_v27  ;;  %v2608_v30 = vsel %vm2596_vm9, %v2547_v44, %v17383_v52  ;;  %v2668_v5 = vsel %vm2657_vm10, %v2607_v22, %v2071_v12  ;;  %7408 = vmatprep.mubr.msk.f32.mxu0 %vm2893_vm12, %v2794_v48  ;;  %v2796_v59 = vsel %vm16337_vm11, %v2793_v24, %v2795_v40  ;;  %v17388_v2 = vld [vmem:[#allocation323_spill] sm:$0xff]  ;;  %v17389_v24 = vld [vmem:[#allocation420_spill] sm:$0xff]  ;;  %v17390_v40 = vld [vmem:[#allocation225_spill] sm:$0xff] }
 0x406   : > { %v2427_v39 = vsel %vm2413_vm6, %v2366_v43, %v17384_v7  ;;  %v2487_v38 = vsel %vm2474_vm7, %v2426_v60, %v17385_v15  ;;  %v2797_v29 = vrot.slane %v2668_v5, 3  ;;  %v2669_v54 = vsel %vm2657_vm10, %v2608_v30, %v2073_v63  ;;  %7409 = vmatmul.mubr.msk.f32.gmra.mrb[6].mxu0 %vm2893_vm12, %v2796_v59  ;;  %v17393_v57 = vld [vmem:[#allocation421_spill] sm:$0xff]  ;;  %v17394_v12 = vld [vmem:[#allocation99_spill] sm:$0xff]  ;;  %v17395_v60 = vld [vmem:[#allocation256_spill] sm:$0xff] }
 0x407   : > { %v11598_v35 = vsel %vm2291_vm4, %v17387_v50, %v17386_v19  ;;  %v2488_v21 = vsel %vm2474_vm7, %v2427_v39, %v17388_v2  ;;  %v2548_v0 = vsel %vm2535_vm8, %v2487_v38, %v17389_v24  ;;  %v2798_v1 = vrot.slane %v2669_v54, 3  ;;  %v2075_v27 = vpop.permute.xlu0 %2074  ;;  %v17396_v30 = vld [vmem:[#allocation95_spill] sm:$0xff]  ;;  %v17397_v39 = vld [vmem:[#allocation13_spill] sm:$0xff]  ;;  %v17398_v15 = vld [vmem:[#allocation326_spill] sm:$0xff] }
 0x408   : > { %v11607_v43 = vsel %vm2291_vm4, %v17391_v56, %v17390_v40  ;;  %v2367_v44 = vsel %vm2352_vm5, %v11210_v11, %v17392_v33  ;;  %v2549_v22 = vsel %vm2535_vm8, %v2488_v21, %v17393_v57  ;;  %v2609_v48 = vsel %vm2596_vm9, %v2548_v0, %v17394_v12  ;;  %v2077_v59 = vpop.permute.xlu1 %2076  ;;  %v17399_v50 = vld [vmem:[#allocation15_spill] sm:$0xff]  ;;  %v17400_v21 = vld [vmem:[#allocation257_spill] sm:$0xff]  ;;  %v17404_v57 = vld [vmem:[#allocation102_spill] sm:$0xff] }
 0x409   : > { %v2428_v52 = vsel %vm2413_vm6, %v2367_v44, %v17395_v60  ;;  %v2610_v5 = vsel %vm2596_vm9, %v2549_v22, %v17396_v30  ;;  %v2670_v63 = vsel %vm2657_vm10, %v2609_v48, %v2075_v27  ;;  %v2799_v7 = vsel %vm16337_vm11, %v2797_v29, %v2798_v1  ;;  %v17401_v29 = vld [vmem:[#allocation422_spill] sm:$0xff]  ;;  %v17403_v33 = vld [vmem:[#allocation327_spill] sm:$0xff] }
 0x40a   : > { %v2368_v11 = vsel %vm2352_vm5, %v11215_v10, %v17397_v39  ;;  %v2489_v38 = vsel %vm2474_vm7, %v2428_v52, %v17398_v15  ;;  %v2800_v54 = vrot.slane %v2670_v63, 3  ;;  %v2671_v19 = vsel %vm2657_vm10, %v2610_v5, %v2077_v59  ;;  %7411 = vmatprep.mubr.msk.f32.mxu0 %vm2893_vm12, %v2799_v7  ;;  %v17402_v10 = vld [vmem:[#allocation16_spill] sm:$0xff]  ;;  %v17405_v48 = vld [vmem:[#allocation258_spill] sm:$0xff]  ;;  %v17406_v60 = vld [vmem:[#allocation423_spill] sm:$0xff] }
 0x40b   : > { %v2369_v2 = vsel %vm2352_vm5, %v11220_v20, %v17399_v50  ;;  %v2429_v24 = vsel %vm2413_vm6, %v2368_v11, %v17400_v21  ;;  %v2550_v0 = vsel %vm2535_vm8, %v2489_v38, %v17401_v29  ;;  %v2802_v40 = vrot.slane %v2671_v19, 3  ;;  %v2079_v12 = vpop.permute.xlu0 %2078  ;;  %v17407_v63 = vld [vmem:[#allocation259_spill] sm:$0xff]  ;;  %v17408_v7 = vld [vmem:[#allocation330_spill] sm:$0xff]  ;;  %v17413_v29 = vld [vmem:[#allocation17_spill] sm:$0xff] }
 0x40c   : > { %v2370_v56 = vsel %vm2352_vm5, %v11225_v3, %v17402_v10  ;;  %v2490_v44 = vsel %vm2474_vm7, %v2429_v24, %v17403_v33  ;;  %v2611_v22 = vsel %vm2596_vm9, %v2550_v0, %v17404_v57  ;;  %v2801_v20 = vsel %vm16337_vm11, %v2798_v1, %v2800_v54  ;;  %v2081_v3 = vpop.permute.xlu1 %2080  ;;  %v17409_v1 = vld [vmem:[#allocation104_spill] sm:$0xff]  ;;  %v17410_v38 = vld [vmem:[#allocation14_spill] sm:$0xff]  ;;  %v17411_v50 = vld [vmem:[#allocation331_spill] sm:$0xff] }
 0x40d   : > { %v2430_v27 = vsel %vm2413_vm6, %v2369_v2, %v17405_v48  ;;  %v2551_v52 = vsel %vm2535_vm8, %v2490_v44, %v17406_v60  ;;  %v2672_v30 = vsel %vm2657_vm10, %v2611_v22, %v2079_v12  ;;  %7412 = vmatmul.mubr.msk.f32.gmra.mrb[8].mxu0 %vm2893_vm12, %v2801_v20  ;;  %v2803_v5 = vsel %vm16337_vm11, %v2800_v54, %v2802_v40  ;;  %v17412_v54 = vld [vmem:[#allocation424_spill] sm:$0xff]  ;;  %v17414_v10 = vld [vmem:[#allocation425_spill] sm:$0xff]  ;;  %v17415_v33 = vld [vmem:[#allocation107_spill] sm:$0xff] }
 0x40e   : > { %v2431_v59 = vsel %vm2413_vm6, %v2370_v56, %v17407_v63  ;;  %v2491_v39 = vsel %vm2474_vm7, %v2430_v27, %v17408_v7  ;;  %v2612_v11 = vsel %vm2596_vm9, %v2551_v52, %v17409_v1  ;;  %v2804_v15 = vrot.slane %v2672_v30, 3  ;;  %7414 = vmatprep.mubr.msk.f32.mxu0 %vm2893_vm12, %v2803_v5  ;;  %v17416_v22 = vld [vmem:[#allocation260_spill] sm:$0xff]  ;;  %v17417_v20 = vld [vmem:[#allocation261_spill] sm:$0xff]  ;;  %v17419_v30 = vld [vmem:[#allocation334_spill] sm:$0xff] }
 0x40f   : > { %v2371_v19 = vsel %vm2352_vm5, %v11232_v8, %v17410_v38  ;;  %v2492_v2 = vsel %vm2474_vm7, %v2431_v59, %v17411_v50  ;;  %v2552_v21 = vsel %vm2535_vm8, %v2491_v39, %v17412_v54  ;;  %v2673_v24 = vsel %vm2657_vm10, %v2612_v11, %v2081_v3  ;;  %v2083_v57 = vpop.permute.xlu0 %2082  ;;  %v17418_v27 = vld [vmem:[#allocation109_spill] sm:$0xff]  ;;  %v17420_v59 = vld [vmem:[#allocation18_spill] sm:$0xff]  ;;  %v17421_v39 = vld [vmem:[#allocation335_spill] sm:$0xff] }
 0x410   : > { %v2372_v0 = vsel %vm2352_vm5, %v11237_v47, %v17413_v29  ;;  %v2553_v56 = vsel %vm2535_vm8, %v2492_v2, %v17414_v10  ;;  %v2613_v44 = vsel %vm2596_vm9, %v2552_v21, %v17415_v33  ;;  %v2805_v8 = vsel %vm16337_vm11, %v2802_v40, %v2804_v15  ;;  %v2085_v52 = vpop.permute.xlu1 %2084  ;;  %v17422_v11 = vld [vmem:[#allocation426_spill] sm:$0xff]  ;;  %v17424_v2 = vld [vmem:[#allocation427_spill] sm:$0xff]  ;;  %v17425_v21 = vld [vmem:[#allocation105_spill] sm:$0xff] }
 0x411   : > { %v2432_v12 = vsel %vm2413_vm6, %v2371_v19, %v17416_v22  ;;  %v2433_v48 = vsel %vm2413_vm6, %v2372_v0, %v17417_v20  ;;  %v2614_v60 = vsel %vm2596_vm9, %v2553_v56, %v17418_v27  ;;  %v2674_v47 = vsel %vm2657_vm10, %v2613_v44, %v2083_v57  ;;  %7415 = vmatmul.mubr.msk.f32.gmra.mrb[10].mxu0 %vm2893_vm12, %v2805_v8  ;;  %v17423_v19 = vld [vmem:[#allocation20_spill] sm:$0xff]  ;;  %v17426_v0 = vld [vmem:[#allocation262_spill] sm:$0xff]  ;;  %v17428_v8 = vld [vmem:[#allocation263_spill] sm:$0xff] }
 0x412   : > { %v2493_v3 = vsel %vm2474_vm7, %v2432_v12, %v17419_v30  ;;  %v2806_v5 = vrot.slane %v2673_v24, 3  ;;  %v2807_v63 = vrot.slane %v2674_v47, 3  ;;  %v2675_v40 = vsel %vm2657_vm10, %v2614_v60, %v2085_v52  ;;  %v17427_v56 = vld [vmem:[#allocation112_spill] sm:$0xff]  ;;  %v17429_v12 = vld [vmem:[#allocation338_spill] sm:$0xff]  ;;  %v17430_v60 = vld [vmem:[#allocation21_spill] sm:$0xff] }
 0x413   : > { %v2373_v7 = vsel %vm2352_vm5, %v11242_v49, %v17420_v59  ;;  %v2494_v1 = vsel %vm2474_vm7, %v2433_v48, %v17421_v39  ;;  %v2554_v15 = vsel %vm2535_vm8, %v2493_v3, %v17422_v11  ;;  %v2809_v38 = vrot.slane %v2675_v40, 3  ;;  %v2087_v29 = vpop.permute.xlu0 %2086  ;;  %v17431_v52 = vld [vmem:[#allocation339_spill] sm:$0xff]  ;;  %v17432_v3 = vld [vmem:[#allocation428_spill] sm:$0xff] }
 0x414   : > { %v2374_v50 = vsel %vm2352_vm5, %v11247_v32, %v17423_v19  ;;  %v2555_v54 = vsel %vm2535_vm8, %v2494_v1, %v17424_v2  ;;  %v2615_v24 = vsel %vm2596_vm9, %v2554_v15, %v17425_v21  ;;  %v2808_v49 = vsel %vm16337_vm11, %v2806_v5, %v2807_v63  ;;  %v2089_v32 = vpop.permute.xlu1 %2088  ;;  %v17433_v40 = vld [vmem:[#allocation19_spill] sm:$0xff]  ;;  %v17435_v1 = vld [vmem:[#allocation114_spill] sm:$0xff]  ;;  %v17436_v19 = vld [vmem:[#allocation264_spill] sm:$0xff] }
 0x415   : > { %v2434_v10 = vsel %vm2413_vm6, %v2373_v7, %v17426_v0  ;;  %v2616_v33 = vsel %vm2596_vm9, %v2555_v54, %v17427_v56  ;;  %v2676_v44 = vsel %vm2657_vm10, %v2615_v24, %v2087_v29  ;;  %7417 = vmatprep.mubr.msk.f32.mxu0 %vm2893_vm12, %v2808_v49  ;;  %v2810_v57 = vsel %vm16337_vm11, %v2807_v63, %v2809_v38  ;;  %v17434_v7 = vld [vmem:[#allocation429_spill] sm:$0xff]  ;;  %v17439_v0 = vld [vmem:[#allocation342_spill] sm:$0xff] }
 0x416   : > { %v2435_v22 = vsel %vm2413_vm6, %v2374_v50, %v17428_v8  ;;  %v2495_v20 = vsel %vm2474_vm7, %v2434_v10, %v17429_v12  ;;  %v2811_v48 = vrot.slane %v2676_v44, 3  ;;  %v2677_v27 = vsel %vm2657_vm10, %v2616_v33, %v2089_v32  ;;  %7418 = vmatmul.mubr.msk.f32.gmra.mrb[12].mxu0 %vm2893_vm12, %v2810_v57  ;;  %v17437_v2 = vld [vmem:[#allocation117_spill] sm:$0xff]  ;;  %v17440_v33 = vld [vmem:[#allocation226_spill] sm:$0xff]  ;;  %v17441_v32 = vld [vmem:[#allocation343_spill] sm:$0xff] }
 0x417   : > { %v2375_v47 = vsel %vm2352_vm5, %v11254_v16, %v17430_v60  ;;  %v2496_v30 = vsel %vm2474_vm7, %v2435_v22, %v17431_v52  ;;  %v2556_v5 = vsel %vm2535_vm8, %v2495_v20, %v17432_v3  ;;  %v2813_v63 = vrot.slane %v2677_v27, 3  ;;  %v2091_v15 = vpop.permute.xlu0 %2090  ;;  %v17438_v29 = vld [vmem:[#allocation265_spill] sm:$0xff]  ;;  %v17442_v8 = vld [vmem:[#allocation430_spill] sm:$0xff]  ;;  %v17443_v20 = vld [vmem:[#allocation227_spill] sm:$0xff] }
 0x418   : > { %v2376_v59 = vsel %vm2352_vm5, %v11259_v14, %v17433_v40  ;;  %v2557_v39 = vsel %vm2535_vm8, %v2496_v30, %v17434_v7  ;;  %v2617_v11 = vsel %vm2596_vm9, %v2556_v5, %v17435_v1  ;;  %v2812_v16 = vsel %vm16337_vm11, %v2809_v38, %v2811_v48  ;;  %v2093_v14 = vpop.permute.xlu1 %2092  ;;  %v17445_v60 = vld [vmem:[#allocation22_spill] sm:$0xff]  ;;  %v17446_v52 = vld [vmem:[#allocation431_spill] sm:$0xff] }
 0x419   : > { %v2436_v50 = vsel %vm2413_vm6, %v2375_v47, %v17436_v19  ;;  %v2618_v54 = vsel %vm2596_vm9, %v2557_v39, %v17437_v2  ;;  %v2678_v21 = vsel %vm2657_vm10, %v2617_v11, %v2091_v15  ;;  %7420 = vmatprep.mubr.msk.f32.mxu0 %vm2893_vm12, %v2812_v16  ;;  %v2814_v24 = vsel %vm16337_vm11, %v2811_v48, %v2813_v63  ;;  %v17444_v48 = vld [vmem:[#allocation163_spill] sm:$0xff]  ;;  %v17448_v63 = vld [vmem:[#allocation266_spill] sm:$0xff] }
 0x41a   : > { %v2437_v49 = vsel %vm2413_vm6, %v2376_v59, %v17438_v29  ;;  %v2497_v10 = vsel %vm2474_vm7, %v2436_v50, %v17439_v0  ;;  %v2815_v38 = vrot.slane %v2678_v21, 3  ;;  %v2679_v56 = vsel %vm2657_vm10, %v2618_v54, %v2093_v14  ;;  %7421 = vmatmul.mubr.msk.f32.gmra.mrb[14].mxu0 %vm2893_vm12, %v2814_v24  ;;  %v17447_v30 = vld [vmem:[#allocation119_spill] sm:$0xff]  ;;  %v17451_v16 = vld [vmem:[#allocation346_spill] sm:$0xff]  ;;  %v17452_v54 = vld [vmem:[#allocation25_spill] sm:$0xff] }
 0x41b   : > { %v11744_v44 = vsel %vm2291_vm4, %v11088_v41, %v17440_v33  ;;  %v2498_v57 = vsel %vm2474_vm7, %v2437_v49, %v17441_v32  ;;  %v2558_v22 = vsel %vm2535_vm8, %v2497_v10, %v17442_v8  ;;  %v2816_v12 = vrot.slane %v2679_v56, 3  ;;  %v2095_v5 = vpop.permute.xlu0 %2094  ;;  %v17449_v59 = vld [vmem:[#allocation115_spill] sm:$0xff]  ;;  %v17454_v29 = vld [vmem:[#allocation432_spill] sm:$0xff]  ;;  %v17457_v33 = vld [vmem:[#allocation122_spill] sm:$0xff] }
 0x41c   : > { %v11753_v27 = vsel %vm2291_vm4, %v17444_v48, %v17443_v20  ;;  %v2377_v47 = vsel %vm2352_vm5, %v11268_v42, %v17445_v60  ;;  %v2559_v41 = vsel %vm2535_vm8, %v2498_v57, %v17446_v52  ;;  %v2619_v3 = vsel %vm2596_vm9, %v2558_v22, %v17447_v30  ;;  %v2097_v1 = vpop.permute.xlu1 %2096  ;;  %v17450_v15 = vld [vmem:[#allocation23_spill] sm:$0xff]  ;;  %v17458_v8 = vld [vmem:[#allocation268_spill] sm:$0xff]  ;;  %v17459_v20 = vld [vmem:[#allocation433_spill] sm:$0xff] }
 0x41d   : > { %v2438_v40 = vsel %vm2413_vm6, %v2377_v47, %v17448_v63  ;;  %v2620_v7 = vsel %vm2596_vm9, %v2559_v41, %v17449_v59  ;;  %v2680_v39 = vsel %vm2657_vm10, %v2619_v3, %v2095_v5  ;;  %v2817_v11 = vsel %vm16337_vm11, %v2815_v38, %v2816_v12  ;;  %v17453_v14 = vld [vmem:[#allocation267_spill] sm:$0xff]  ;;  %v17460_v52 = vld [vmem:[#allocation269_spill] sm:$0xff]  ;;  %v17461_v30 = vld [vmem:[#allocation350_spill] sm:$0xff] }
 0x41e   : > { %v2378_v42 = vsel %vm2352_vm5, %v11273_v34, %v17450_v15  ;;  %v2499_v19 = vsel %vm2474_vm7, %v2438_v40, %v17451_v16  ;;  %v2818_v50 = vrot.slane %v2680_v39, 3  ;;  %v2681_v2 = vsel %vm2657_vm10, %v2620_v7, %v2097_v1  ;;  %7423 = vmatprep.mubr.msk.f32.mxu0 %vm2893_vm12, %v2817_v11  ;;  %v17455_v34 = vld [vmem:[#allocation26_spill] sm:$0xff]  ;;  %v17456_v38 = vld [vmem:[#allocation347_spill] sm:$0xff]  ;;  %v17463_v40 = vld [vmem:[#allocation24_spill] sm:$0xff] }
 0x41f   : > { %v2379_v21 = vsel %vm2352_vm5, %v11278_v53, %v17452_v54  ;;  %v2439_v24 = vsel %vm2413_vm6, %v2378_v42, %v17453_v14  ;;  %v2560_v49 = vsel %vm2535_vm8, %v2499_v19, %v17454_v29  ;;  %v2820_v0 = vrot.slane %v2681_v2, 3  ;;  %v2099_v57 = vpop.permute.xlu0 %2098  ;;  %v17464_v7 = vld [vmem:[#allocation351_spill] sm:$0xff]  ;;  %v17465_v1 = vld [vmem:[#allocation434_spill] sm:$0xff] }
 0x420   : > { %v2380_v10 = vsel %vm2352_vm5, %v11283_v25, %v17455_v34  ;;  %v2500_v56 = vsel %vm2474_vm7, %v2439_v24, %v17456_v38  ;;  %v2621_v32 = vsel %vm2596_vm9, %v2560_v49, %v17457_v33  ;;  %v2819_v53 = vsel %vm16337_vm11, %v2816_v12, %v2818_v50  ;;  %v2101_v25 = vpop.permute.xlu1 %2100  ;;  %v17462_v12 = vld [vmem:[#allocation124_spill] sm:$0xff]  ;;  %v17466_v42 = vld [vmem:[#allocation27_spill] sm:$0xff]  ;;  %v17469_v14 = vld [vmem:[#allocation270_spill] sm:$0xff] }
 0x421   : > { %v2440_v22 = vsel %vm2413_vm6, %v2379_v21, %v17458_v8  ;;  %v2561_v48 = vsel %vm2535_vm8, %v2500_v56, %v17459_v20  ;;  %v2682_v60 = vsel %vm2657_vm10, %v2621_v32, %v2099_v57  ;;  %7424 = vmatmul.mubr.msk.f32.gmra.mrb[16].mxu0 %vm2893_vm12, %v2819_v53  ;;  %v2821_v47 = vsel %vm16337_vm11, %v2818_v50, %v2820_v0  ;;  %v17467_v19 = vld [vmem:[#allocation435_spill] sm:$0xff]  ;;  %v17471_v34 = vld [vmem:[#allocation129_spill] sm:$0xff]  ;;  %v17472_v56 = vld [vmem:[#allocation354_spill] sm:$0xff] }
 0x422   : > { %v2441_v41 = vsel %vm2413_vm6, %v2380_v10, %v17460_v52  ;;  %v2501_v3 = vsel %vm2474_vm7, %v2440_v22, %v17461_v30  ;;  %v2622_v5 = vsel %vm2596_vm9, %v2561_v48, %v17462_v12  ;;  %v2822_v63 = vrot.slane %v2682_v60, 3  ;;  %7426 = vmatprep.mubr.msk.f32.mxu0 %vm2893_vm12, %v2821_v47  ;;  %v17468_v2 = vld [vmem:[#allocation127_spill] sm:$0xff]  ;;  %v17473_v53 = vld [vmem:[#allocation28_spill] sm:$0xff]  ;;  %v17476_v47 = vld [vmem:[#allocation30_spill] sm:$0xff] }
 0x423   : > { %v2381_v59 = vsel %vm2352_vm5, %v11290_v13, %v17463_v40  ;;  %v2502_v39 = vsel %vm2474_vm7, %v2441_v41, %v17464_v7  ;;  %v2562_v11 = vsel %vm2535_vm8, %v2501_v3, %v17465_v1  ;;  %v2683_v15 = vsel %vm2657_vm10, %v2622_v5, %v2101_v25  ;;  %v2103_v21 = vpop.permute.xlu0 %2102  ;;  %v17470_v29 = vld [vmem:[#allocation271_spill] sm:$0xff]  ;;  %v17475_v48 = vld [vmem:[#allocation436_spill] sm:$0xff]  ;;  %v17477_v41 = vld [vmem:[#allocation437_spill] sm:$0xff] }
 0x424   : > { %v2382_v16 = vsel %vm2352_vm5, %v11295_v55, %v17466_v42  ;;  %v2563_v50 = vsel %vm2535_vm8, %v2502_v39, %v17467_v19  ;;  %v2623_v54 = vsel %vm2596_vm9, %v2562_v11, %v17468_v2  ;;  %v2823_v13 = vsel %vm16337_vm11, %v2820_v0, %v2822_v63  ;;  %v2105_v38 = vpop.permute.xlu1 %2104  ;;  %v17474_v22 = vld [vmem:[#allocation355_spill] sm:$0xff]  ;;  %v17478_v3 = vld [vmem:[#allocation125_spill] sm:$0xff]  ;;  %v17479_v63 = vld [vmem:[#allocation272_spill] sm:$0xff] }
 0x425   : > { %v2442_v24 = vsel %vm2413_vm6, %v2381_v59, %v17469_v14  ;;  %v2443_v49 = vsel %vm2413_vm6, %v2382_v16, %v17470_v29  ;;  %v2624_v10 = vsel %vm2596_vm9, %v2563_v50, %v17471_v34  ;;  %v2684_v55 = vsel %vm2657_vm10, %v2623_v54, %v2103_v21  ;;  %7427 = vmatmul.mubr.msk.f32.gmra.mrb[18].mxu0 %vm2893_vm12, %v2823_v13  ;;  %v17480_v59 = vld [vmem:[#allocation132_spill] sm:$0xff]  ;;  %v17481_v11 = vld [vmem:[#allocation273_spill] sm:$0xff]  ;;  %v17482_v42 = vld [vmem:[#allocation358_spill] sm:$0xff] }
 0x426   : > { %v2503_v33 = vsel %vm2474_vm7, %v2442_v24, %v17472_v56  ;;  %v2824_v32 = vrot.slane %v2683_v15, 3  ;;  %v2825_v57 = vrot.slane %v2684_v55, 3  ;;  %v2685_v0 = vsel %vm2657_vm10, %v2624_v10, %v2105_v38  ;;  %v17483_v2 = vld [vmem:[#allocation31_spill] sm:$0xff]  ;;  %v17485_v14 = vld [vmem:[#allocation438_spill] sm:$0xff] }
 0x427   : > { %v2383_v8 = vsel %vm2352_vm5, %v11300_v28, %v17473_v53  ;;  %v2504_v20 = vsel %vm2474_vm7, %v2443_v49, %v17474_v22  ;;  %v2564_v60 = vsel %vm2535_vm8, %v2503_v33, %v17475_v48  ;;  %v2827_v25 = vrot.slane %v2685_v0, 3  ;;  %v2107_v5 = vpop.permute.xlu0 %2106  ;;  %v17484_v21 = vld [vmem:[#allocation359_spill] sm:$0xff]  ;;  %v17486_v49 = vld [vmem:[#allocation29_spill] sm:$0xff]  ;;  %v17488_v38 = vld [vmem:[#allocation134_spill] sm:$0xff] }
 0x428   : > { %v2384_v52 = vsel %vm2352_vm5, %v11305_v4, %v17476_v47  ;;  %v2565_v30 = vsel %vm2535_vm8, %v2504_v20, %v17477_v41  ;;  %v2625_v12 = vsel %vm2596_vm9, %v2564_v60, %v17478_v3  ;;  %v2826_v28 = vsel %vm16337_vm11, %v2824_v32, %v2825_v57  ;;  %v2109_v4 = vpop.permute.xlu1 %2108  ;;  %v17487_v10 = vld [vmem:[#allocation439_spill] sm:$0xff]  ;;  %v17489_v32 = vld [vmem:[#allocation274_spill] sm:$0xff]  ;;  %v17490_v0 = vld [vmem:[#allocation137_spill] sm:$0xff] }
 0x429   : > { %v2444_v40 = vsel %vm2413_vm6, %v2383_v8, %v17479_v63  ;;  %v2626_v7 = vsel %vm2596_vm9, %v2565_v30, %v17480_v59  ;;  %v2686_v39 = vsel %vm2657_vm10, %v2625_v12, %v2107_v5  ;;  %7429 = vmatprep.mubr.msk.f32.mxu0 %vm2893_vm12, %v2826_v28  ;;  %v2828_v1 = vsel %vm16337_vm11, %v2825_v57, %v2827_v25  ;;  %v17491_v20 = vld [vmem:[#allocation275_spill] sm:$0xff]  ;;  %v17492_v60 = vld [vmem:[#allocation362_spill] sm:$0xff]  ;;  %v17495_v5 = vld [vmem:[#allocation440_spill] sm:$0xff] }
 0x42a   : > { %v2445_v15 = vsel %vm2413_vm6, %v2384_v52, %v17481_v11  ;;  %v2505_v16 = vsel %vm2474_vm7, %v2444_v40, %v17482_v42  ;;  %v2829_v19 = vrot.slane %v2686_v39, 3  ;;  %v2687_v50 = vsel %vm2657_vm10, %v2626_v7, %v2109_v4  ;;  %7430 = vmatmul.mubr.msk.f32.gmra.mrb[20].mxu0 %vm2893_vm12, %v2828_v1  ;;  %v17493_v41 = vld [vmem:[#allocation54_spill] sm:$0xff]  ;;  %v17494_v3 = vld [vmem:[#allocation363_spill] sm:$0xff]  ;;  %v17496_v40 = vld [vmem:[#allocation228_spill] sm:$0xff] }
 0x42b   : > { %v2385_v54 = vsel %vm2352_vm5, %v11312_v18, %v17483_v2  ;;  %v2506_v13 = vsel %vm2474_vm7, %v2445_v15, %v17484_v21  ;;  %v2566_v24 = vsel %vm2535_vm8, %v2505_v16, %v17485_v14  ;;  %v2831_v29 = vrot.slane %v2687_v50, 3  ;;  %v2111_v33 = vpop.permute.xlu0 %2110  ;;  %v17497_v7 = vld [vmem:[#allocation32_spill] sm:$0xff]  ;;  %v17498_v4 = vld [vmem:[#allocation441_spill] sm:$0xff]  ;;  %v17499_v1 = vld [vmem:[#allocation139_spill] sm:$0xff] }
 0x42c   : > { %v2386_v34 = vsel %vm2352_vm5, %v11317_v31, %v17486_v49  ;;  %v2567_v55 = vsel %vm2535_vm8, %v2506_v13, %v17487_v10  ;;  %v2627_v56 = vsel %vm2596_vm9, %v2566_v24, %v17488_v38  ;;  %v2830_v18 = vsel %vm16337_vm11, %v2827_v25, %v2829_v19  ;;  %v2113_v31 = vpop.permute.xlu1 %2112  ;;  %v17500_v42 = vld [vmem:[#allocation276_spill] sm:$0xff]  ;;  %v17502_v21 = vld [vmem:[#allocation33_spill] sm:$0xff]  ;;  %v17503_v13 = vld [vmem:[#allocation366_spill] sm:$0xff] }
 0x42d   : > { %v2446_v57 = vsel %vm2413_vm6, %v2385_v54, %v17489_v32  ;;  %v2628_v53 = vsel %vm2596_vm9, %v2567_v55, %v17490_v0  ;;  %v2688_v8 = vsel %vm2657_vm10, %v2627_v56, %v2111_v33  ;;  %7432 = vmatprep.mubr.msk.f32.mxu0 %vm2893_vm12, %v2830_v18  ;;  %v2832_v22 = vsel %vm16337_vm11, %v2829_v19, %v2831_v29  ;;  %v17501_v19 = vld [vmem:[#allocation135_spill] sm:$0xff]  ;;  %v17505_v10 = vld [vmem:[#allocation277_spill] sm:$0xff]  ;;  %v17506_v38 = vld [vmem:[#allocation442_spill] sm:$0xff] }
 0x42e   : > { %v2447_v48 = vsel %vm2413_vm6, %v2386_v34, %v17491_v20  ;;  %v2507_v47 = vsel %vm2474_vm7, %v2446_v57, %v17492_v60  ;;  %v2833_v25 = vrot.slane %v2688_v8, 3  ;;  %v2689_v52 = vsel %vm2657_vm10, %v2628_v53, %v2113_v31  ;;  %7433 = vmatmul.mubr.msk.f32.gmra.mrb[22].mxu0 %vm2893_vm12, %v2832_v22  ;;  %v17504_v49 = vld [vmem:[#allocation35_spill] sm:$0xff]  ;;  %v17509_v0 = vld [vmem:[#allocation142_spill] sm:$0xff] }
 0x42f   : > { %v11890_v30 = vsel %vm2291_vm4, %v11100_v23, %v17493_v41  ;;  %v2508_v12 = vsel %vm2474_vm7, %v2447_v48, %v17494_v3  ;;  %v2568_v28 = vsel %vm2535_vm8, %v2507_v47, %v17495_v5  ;;  %v2834_v63 = vrot.slane %v2689_v52, 3  ;;  %v2115_v15 = vpop.permute.xlu0 %2114  ;;  %v17508_v32 = vld [vmem:[#allocation367_spill] sm:$0xff]  ;;  %v17510_v31 = vld [vmem:[#allocation278_spill] sm:$0xff] }
 0x430   : > { %v11899_v59 = vsel %vm2291_vm4, %v11105_v51, %v17496_v40  ;;  %v2387_v39 = vsel %vm2352_vm5, %v11322_v45, %v17497_v7  ;;  %v2569_v23 = vsel %vm2535_vm8, %v2508_v12, %v17498_v4  ;;  %v2629_v11 = vsel %vm2596_vm9, %v2568_v28, %v17499_v1  ;;  %v2117_v2 = vpop.permute.xlu1 %2116  ;;  %v17511_v20 = vld [vmem:[#allocation443_spill] sm:$0xff]  ;;  %v17513_v41 = vld [vmem:[#allocation370_spill] sm:$0xff]  ;;  %v17514_v12 = vld [vmem:[#allocation144_spill] sm:$0xff] }
 0x431   : > { %v2448_v16 = vsel %vm2413_vm6, %v2387_v39, %v17500_v42  ;;  %v2630_v50 = vsel %vm2596_vm9, %v2569_v23, %v17501_v19  ;;  %v2690_v51 = vsel %vm2657_vm10, %v2629_v11, %v2115_v15  ;;  %v2835_v54 = vsel %vm16337_vm11, %v2833_v25, %v2834_v63  ;;  %v17512_v25 = vld [vmem:[#allocation279_spill] sm:$0xff]  ;;  %v17517_v4 = vld [vmem:[#allocation444_spill] sm:$0xff]  ;;  %v17518_v11 = vld [vmem:[#allocation37_spill] sm:$0xff] }
 0x432   : > { %v2388_v45 = vsel %vm2352_vm5, %v11330_v46, %v17502_v21  ;;  %v2509_v14 = vsel %vm2474_vm7, %v2448_v16, %v17503_v13  ;;  %v2836_v24 = vrot.slane %v2690_v51, 3  ;;  %v2691_v29 = vsel %vm2657_vm10, %v2630_v50, %v2117_v2  ;;  %7435 = vmatprep.mubr.msk.f32.mxu0 %vm2893_vm12, %v2835_v54  ;;  %v17507_v46 = vld [vmem:[#allocation36_spill] sm:$0xff]  ;;  %v17516_v7 = vld [vmem:[#allocation371_spill] sm:$0xff]  ;;  %v17519_v42 = vld [vmem:[#allocation445_spill] sm:$0xff] }
 0x433   : > { %v2389_v34 = vsel %vm2352_vm5, %v11335_v36, %v17504_v49  ;;  %v2449_v55 = vsel %vm2413_vm6, %v2388_v45, %v17505_v10  ;;  %v2570_v56 = vsel %vm2535_vm8, %v2509_v14, %v17506_v38  ;;  %v2838_v33 = vrot.slane %v2691_v29, 3  ;;  %v2119_v8 = vpop.permute.xlu0 %2118  ;;  %v17520_v19 = vld [vmem:[#allocation147_spill] sm:$0xff]  ;;  %v17521_v2 = vld [vmem:[#allocation280_spill] sm:$0xff]  ;;  %v17522_v21 = vld [vmem:[#allocation281_spill] sm:$0xff] }
 0x434   : > { %v2390_v18 = vsel %vm2352_vm5, %v11344_v37, %v17507_v46  ;;  %v2510_v57 = vsel %vm2474_vm7, %v2449_v55, %v17508_v32  ;;  %v2631_v53 = vsel %vm2596_vm9, %v2570_v56, %v17509_v0  ;;  %v2837_v36 = vsel %vm16337_vm11, %v2834_v63, %v2836_v24  ;;  %v2121_v37 = vpop.permute.xlu1 %2120  ;;  %v17515_v63 = vld [vmem:[#allocation34_spill] sm:$0xff]  ;;  %v17523_v13 = vld [vmem:[#allocation149_spill] sm:$0xff]  ;;  %v17528_v0 = vld [vmem:[#allocation40_spill] sm:$0xff] }
 0x435   : > { %v2450_v22 = vsel %vm2413_vm6, %v2389_v34, %v17510_v31  ;;  %v2571_v48 = vsel %vm2535_vm8, %v2510_v57, %v17511_v20  ;;  %v2692_v60 = vsel %vm2657_vm10, %v2631_v53, %v2119_v8  ;;  %7436 = vmatmul.mubr.msk.f32.gmra.mrb[24].mxu0 %vm2893_vm12, %v2837_v36  ;;  %v2839_v47 = vsel %vm16337_vm11, %v2836_v24, %v2838_v33  ;;  %v17524_v29 = vld [vmem:[#allocation374_spill] sm:$0xff]  ;;  %v17529_v8 = vld [vmem:[#allocation447_spill] sm:$0xff]  ;;  %v17530_v31 = vld [vmem:[#allocation145_spill] sm:$0xff] }
 0x436   : > { %v2451_v52 = vsel %vm2413_vm6, %v2390_v18, %v17512_v25  ;;  %v2511_v3 = vsel %vm2474_vm7, %v2450_v22, %v17513_v41  ;;  %v2632_v5 = vsel %vm2596_vm9, %v2571_v48, %v17514_v12  ;;  %v2840_v28 = vrot.slane %v2692_v60, 3  ;;  %7438 = vmatprep.mubr.msk.f32.mxu0 %vm2893_vm12, %v2839_v47  ;;  %v17525_v38 = vld [vmem:[#allocation38_spill] sm:$0xff]  ;;  %v17533_v41 = vld [vmem:[#allocation283_spill] sm:$0xff] }
 0x437   : > { %v2391_v40 = vsel %vm2352_vm5, %v11349_v9, %v17515_v63  ;;  %v2512_v39 = vsel %vm2474_vm7, %v2451_v52, %v17516_v7  ;;  %v2572_v23 = vsel %vm2535_vm8, %v2511_v3, %v17517_v4  ;;  %v2693_v1 = vsel %vm2657_vm10, %v2632_v5, %v2121_v37  ;;  %v2123_v51 = vpop.permute.xlu0 %2122  ;;  %v17527_v18 = vld [vmem:[#allocation446_spill] sm:$0xff]  ;;  %v17532_v37 = vld [vmem:[#allocation152_spill] sm:$0xff] }
 0x438   : > { %v2392_v15 = vsel %vm2352_vm5, %v11354_v62, %v17518_v11  ;;  %v2573_v16 = vsel %vm2535_vm8, %v2512_v39, %v17519_v42  ;;  %v2633_v50 = vsel %vm2596_vm9, %v2572_v23, %v17520_v19  ;;  %v2841_v9 = vsel %vm16337_vm11, %v2838_v33, %v2840_v28  ;;  %v2125_v24 = vpop.permute.xlu1 %2124  ;;  %v17526_v33 = vld [vmem:[#allocation375_spill] sm:$0xff]  ;;  %v17531_v48 = vld [vmem:[#allocation282_spill] sm:$0xff]  ;;  %v17537_v23 = vld [vmem:[#allocation448_spill] sm:$0xff] }
 0x439   : > { %v2452_v54 = vsel %vm2413_vm6, %v2391_v40, %v17521_v2  ;;  %v2453_v45 = vsel %vm2413_vm6, %v2392_v15, %v17522_v21  ;;  %v2634_v14 = vsel %vm2596_vm9, %v2573_v16, %v17523_v13  ;;  %v2694_v62 = vsel %vm2657_vm10, %v2633_v50, %v2123_v51  ;;  %7439 = vmatmul.mubr.msk.f32.gmra.mrb[26].mxu0 %vm2893_vm12, %v2841_v9  ;;  %v17534_v12 = vld [vmem:[#allocation378_spill] sm:$0xff]  ;;  %v17535_v40 = vld [vmem:[#allocation41_spill] sm:$0xff]  ;;  %v17536_v39 = vld [vmem:[#allocation379_spill] sm:$0xff] }
 0x43a   : > { %v2513_v49 = vsel %vm2474_vm7, %v2452_v54, %v17524_v29  ;;  %v2842_v34 = vrot.slane %v2693_v1, 3  ;;  %v2843_v10 = vrot.slane %v2694_v62, 3  ;;  %v2695_v55 = vsel %vm2657_vm10, %v2634_v14, %v2125_v24  ;;  %v17538_v15 = vld [vmem:[#allocation39_spill] sm:$0xff]  ;;  %v17539_v16 = vld [vmem:[#allocation449_spill] sm:$0xff]  ;;  %v17540_v50 = vld [vmem:[#allocation154_spill] sm:$0xff] }
 0x43b   : > { %v2393_v56 = vsel %vm2352_vm5, %v11359_v26, %v17525_v38  ;;  %v2514_v46 = vsel %vm2474_vm7, %v2453_v45, %v17526_v33  ;;  %v2574_v32 = vsel %vm2535_vm8, %v2513_v49, %v17527_v18  ;;  %v2845_v57 = vrot.slane %v2695_v55, 3  ;;  %v2127_v20 = vpop.permute.xlu0 %2126  ;;  %v17541_v2 = vld [vmem:[#allocation284_spill] sm:$0xff]  ;;  %v17542_v21 = vld [vmem:[#allocation157_spill] sm:$0xff]  ;;  %v17544_v29 = vld [vmem:[#allocation382_spill] sm:$0xff] }
 0x43c   : > { %v2394_v53 = vsel %vm2352_vm5, %v11366_v6, %v17528_v0  ;;  %v2575_v36 = vsel %vm2535_vm8, %v2514_v46, %v17529_v8  ;;  %v2635_v22 = vsel %vm2596_vm9, %v2574_v32, %v17530_v31  ;;  %v2844_v26 = vsel %vm16337_vm11, %v2842_v34, %v2843_v10  ;;  %v2129_v6 = vpop.permute.xlu1 %2128  ;;  %v17543_v62 = vld [vmem:[#allocation285_spill] sm:$0xff]  ;;  %v17545_v55 = vld [vmem:[#allocation58_spill] sm:$0xff]  ;;  %v17547_v33 = vld [vmem:[#allocation383_spill] sm:$0xff] }
 0x43d   : > { %v2454_v60 = vsel %vm2413_vm6, %v2393_v56, %v17531_v48  ;;  %v2636_v47 = vsel %vm2596_vm9, %v2575_v36, %v17532_v37  ;;  %v2696_v25 = vsel %vm2657_vm10, %v2635_v22, %v2127_v20  ;;  %7441 = vmatprep.mubr.msk.f32.mxu0 %vm2893_vm12, %v2844_v26  ;;  %v2846_v52 = vsel %vm16337_vm11, %v2843_v10, %v2845_v57  ;;  %v17546_v38 = vld [vmem:[#allocation90_spill] sm:$0xff]  ;;  %v17549_v0 = vld [vmem:[#allocation229_spill] sm:$0xff]  ;;  %v17552_v31 = vld [vmem:[#allocation100_spill] sm:$0xff] }
 0x43e   : > { %v2455_v3 = vsel %vm2413_vm6, %v2394_v53, %v17533_v41  ;;  %v2515_v5 = vsel %vm2474_vm7, %v2454_v60, %v17534_v12  ;;  %v2847_v28 = vrot.slane %v2696_v25, 3  ;;  %v2697_v63 = vsel %vm2657_vm10, %v2636_v47, %v2129_v6  ;;  %7442 = vmatmul.mubr.msk.f32.gmra.mrb[28].mxu0 %vm2893_vm12, %v2846_v52  ;;  %v17548_v18 = vld [vmem:[#allocation450_spill] sm:$0xff]  ;;  %v17550_v53 = vld [vmem:[#allocation313_spill] sm:$0xff]  ;;  %v17553_v20 = vld [vmem:[#allocation451_spill] sm:$0xff] }
 0x43f   : > { %v2395_v7 = vsel %vm2352_vm5, %v11371_v58, %v17535_v40  ;;  %v2516_v4 = vsel %vm2474_vm7, %v2455_v3, %v17536_v39  ;;  %v2576_v1 = vsel %vm2535_vm8, %v2515_v5, %v17537_v23  ;;  %v2849_v11 = vrot.slane %v2697_v63, 3  ;;  %v2131_v9 = vpop.permute.xlu0 %2130  ;;  %v17551_v36 = vld [vmem:[#allocation42_spill] sm:$0xff]  ;;  %v17554_v48 = vld [vmem:[#allocation159_spill] sm:$0xff]  ;;  %v17560_v23 = vld [vmem:[#allocation45_spill] sm:$0xff] }
 0x440   : > { %v2396_v42 = vsel %vm2352_vm5, %v11376_v61, %v17538_v15  ;;  %v2577_v19 = vsel %vm2535_vm8, %v2516_v4, %v17539_v16  ;;  %v2637_v51 = vsel %vm2596_vm9, %v2576_v1, %v17540_v50  ;;  %v2848_v58 = vsel %vm16337_vm11, %v2845_v57, %v2847_v28  ;;  %v2133_v61 = vpop.permute.xlu1 %2132  ;;  %v17555_v47 = vld [vmem:[#allocation286_spill] sm:$0xff]  ;;  %v17557_v5 = vld [vmem:[#allocation43_spill] sm:$0xff]  ;;  %v17561_v1 = vld [vmem:[#allocation325_spill] sm:$0xff] }
 0x441   : > { %v2456_v54 = vsel %vm2413_vm6, %v2395_v7, %v17541_v2  ;;  %v2638_v45 = vsel %vm2596_vm9, %v2577_v19, %v17542_v21  ;;  %v2698_v13 = vsel %vm2657_vm10, %v2637_v51, %v2131_v9  ;;  %7444 = vmatprep.mubr.msk.f32.mxu0 %vm2893_vm12, %v2848_v58  ;;  %v2850_v14 = vsel %vm16337_vm11, %v2847_v28, %v2849_v11  ;;  %v17556_v6 = vld [vmem:[#allocation462_spill] sm:$0xff]  ;;  %v17558_v28 = vld [vmem:[#allocation324_spill] sm:$0xff]  ;;  %v17562_v15 = vld [vmem:[#allocation287_spill] sm:$0xff] }
 0x442   : > { %v2457_v24 = vsel %vm2413_vm6, %v2396_v42, %v17543_v62  ;;  %v2517_v49 = vsel %vm2474_vm7, %v2456_v54, %v17544_v29  ;;  %v2851_v34 = vrot.slane %v2698_v13, 3  ;;  %v2699_v10 = vsel %vm2657_vm10, %v2638_v45, %v2133_v61  ;;  %7445 = vmatmul.mubr.msk.f32.gmra.mrb[30].mxu0 %vm2893_vm12, %v2850_v14  ;;  %v17559_v40 = vld [vmem:[#allocation386_spill] sm:$0xff]  ;;  %v17563_v16 = vld [vmem:[#allocation452_spill] sm:$0xff]  ;;  %v17566_v2 = vld [vmem:[#allocation387_spill] sm:$0xff] }
 0x443   : > { %v12036_v56 = vsel %vm2291_vm4, %v17546_v38, %v17545_v55  ;;  %v2518_v46 = vsel %vm2474_vm7, %v2457_v24, %v17547_v33  ;;  %v2578_v32 = vsel %vm2535_vm8, %v2517_v49, %v17548_v18  ;;  %v2852_v57 = vrot.slane %v2699_v10, 3  ;;  %v2135_v37 = vpop.permute.xlu0 %2134  ;;  %v17564_v51 = vld [vmem:[#allocation48_spill] sm:$0xff]  ;;  %v17569_v24 = vld [vmem:[#allocation453_spill] sm:$0xff]  ;;  %v17571_v33 = vld [vmem:[#allocation390_spill] sm:$0xff] }
 0x444   : > { %v12045_v8 = vsel %vm2291_vm4, %v17550_v53, %v17549_v0  ;;  %v2397_v22 = vsel %vm2352_vm5, %v17552_v31, %v17551_v36  ;;  %v2579_v26 = vsel %vm2535_vm8, %v2518_v46, %v17553_v20  ;;  %v2639_v60 = vsel %vm2596_vm9, %v2578_v32, %v17554_v48  ;;  %v2137_v3 = vpop.permute.xlu1 %2136  ;;  %v17565_v9 = vld [vmem:[#allocation328_spill] sm:$0xff]  ;;  %v17570_v55 = vld [vmem:[#allocation289_spill] sm:$0xff]  ;;  %v17574_v53 = vld [vmem:[#allocation106_spill] sm:$0xff] }
 0x445   : > { %v2458_v25 = vsel %vm2413_vm6, %v2397_v22, %v17555_v47  ;;  %v2640_v52 = vsel %vm2596_vm9, %v2579_v26, %v17556_v6  ;;  %v2700_v41 = vsel %vm2657_vm10, %v2639_v60, %v2135_v37  ;;  %v2853_v12 = vsel %vm16337_vm11, %v2851_v34, %v2852_v57  ;;  %v17567_v21 = vld [vmem:[#allocation160_spill] sm:$0xff]  ;;  %v17572_v18 = vld [vmem:[#allocation65_spill] sm:$0xff]  ;;  %v17575_v31 = vld [vmem:[#allocation391_spill] sm:$0xff] }
 0x446   : > { %v2398_v63 = vsel %vm2352_vm5, %v17558_v28, %v17557_v5  ;;  %v2519_v7 = vsel %vm2474_vm7, %v2458_v25, %v17559_v40  ;;  %v2854_v39 = vrot.slane %v2700_v41, 3  ;;  %v2701_v4 = vsel %vm2657_vm10, %v2640_v52, %v2137_v3  ;;  %7447 = vmatprep.mubr.msk.f32.mxu0 %vm2893_vm12, %v2853_v12  ;;  %v17568_v14 = vld [vmem:[#allocation288_spill] sm:$0xff]  ;;  %v17577_v60 = vld [vmem:[#allocation51_spill] sm:$0xff]  ;;  %v17578_v47 = vld [vmem:[#allocation454_spill] sm:$0xff] }
 0x447   : > { %v2399_v11 = vsel %vm2352_vm5, %v17561_v1, %v17560_v23  ;;  %v2459_v42 = vsel %vm2413_vm6, %v2398_v63, %v17562_v15  ;;  %v2580_v19 = vsel %vm2535_vm8, %v2519_v7, %v17563_v16  ;;  %v2856_v50 = vrot.slane %v2701_v4, 3  ;;  %v2139_v13 = vpop.permute.xlu0 %2138  ;;  %v17573_v0 = vld [vmem:[#allocation44_spill] sm:$0xff]  ;;  %v17579_v6 = vld [vmem:[#allocation66_spill] sm:$0xff]  ;;  %v17580_v12 = vld [vmem:[#allocation155_spill] sm:$0xff] }
 0x448   : > { %v2400_v58 = vsel %vm2352_vm5, %v17565_v9, %v17564_v51  ;;  %v2520_v54 = vsel %vm2474_vm7, %v2459_v42, %v17566_v2  ;;  %v2641_v45 = vsel %vm2596_vm9, %v2580_v19, %v17567_v21  ;;  %v2855_v61 = vsel %vm16337_vm11, %v2852_v57, %v2854_v39  ;;  %v2141_v34 = vpop.permute.xlu1 %2140  ;;  %v17576_v20 = vld [vmem:[#allocation56_spill] sm:$0xff]  ;;  %v17581_v28 = vld [vmem:[#allocation290_spill] sm:$0xff]  ;;  %v17582_v40 = vld [vmem:[#allocation67_spill] sm:$0xff] }
 0x449   : > { %v2460_v62 = vsel %vm2413_vm6, %v2399_v11, %v17568_v14  ;;  %v2581_v29 = vsel %vm2535_vm8, %v2520_v54, %v17569_v24  ;;  %v2702_v49 = vsel %vm2657_vm10, %v2641_v45, %v2139_v13  ;;  %7448 = vmatmul.mubr.msk.f32.gmra.mrb[32].mxu0 %vm2893_vm12, %v2855_v61  ;;  %v2857_v10 = vsel %vm16337_vm11, %v2854_v39, %v2856_v50  ;;  %v17583_v4 = vld [vmem:[#allocation394_spill] sm:$0xff]  ;;  %v17584_v42 = vld [vmem:[#allocation52_spill] sm:$0xff]  ;;  %v17585_v19 = vld [vmem:[#allocation395_spill] sm:$0xff] }
 0x44a   : > { %v2461_v38 = vsel %vm2413_vm6, %v2400_v58, %v17570_v55  ;;  %v2521_v46 = vsel %vm2474_vm7, %v2460_v62, %v17571_v33  ;;  %v2642_v32 = vsel %vm2596_vm9, %v2581_v29, %v17572_v18  ;;  %v2858_v57 = vrot.slane %v2702_v49, 3  ;;  %7450 = vmatprep.mubr.msk.f32.mxu0 %vm2893_vm12, %v2857_v10  ;;  %v17586_v51 = vld [vmem:[#allocation53_spill] sm:$0xff]  ;;  %v17587_v2 = vld [vmem:[#allocation55_spill] sm:$0xff]  ;;  %v17589_v13 = vld [vmem:[#allocation68_spill] sm:$0xff] }
 0x44b   : > { %v2401_v36 = vsel %vm2352_vm5, %v17574_v53, %v17573_v0  ;;  %v2522_v22 = vsel %vm2474_vm7, %v2461_v38, %v17575_v31  ;;  %v2582_v26 = vsel %vm2535_vm8, %v2521_v46, %v17576_v20  ;;  %v2703_v48 = vsel %vm2657_vm10, %v2642_v32, %v2141_v34  ;;  %v2143_v41 = vpop.permute.xlu0 %2142  ;;  %v17588_v21 = vld [vmem:[#allocation59_spill] sm:$0xff]  ;;  %v17590_v62 = vld [vmem:[#allocation161_spill] sm:$0xff]  ;;  %v17595_v53 = vld [vmem:[#allocation398_spill] sm:$0xff] }
 0x44c   : > { %v2402_v37 = vsel %vm2352_vm5, %v11461_v17, %v17577_v60  ;;  %v2583_v25 = vsel %vm2535_vm8, %v2522_v22, %v17578_v47  ;;  %v2643_v52 = vsel %vm2596_vm9, %v2582_v26, %v17579_v6  ;;  %v2859_v3 = vsel %vm16337_vm11, %v2856_v50, %v2858_v57  ;;  %v2145_v39 = vpop.permute.xlu1 %2144  ;;  %v17591_v29 = vld [vmem:[#allocation69_spill] sm:$0xff]  ;;  %v17592_v55 = vld [vmem:[#allocation291_spill] sm:$0xff]  ;;  %v17594_v57 = vld [vmem:[#allocation236_spill] sm:$0xff] }
 0x44d   : > { %v2462_v5 = vsel %vm2413_vm6, %v2401_v36, %v17580_v12  ;;  %v2463_v63 = vsel %vm2413_vm6, %v2402_v37, %v17581_v28  ;;  %v2644_v7 = vsel %vm2596_vm9, %v2583_v25, %v17582_v40  ;;  %v2704_v17 = vsel %vm2657_vm10, %v2643_v52, %v2143_v41  ;;  %7451 = vmatmul.mubr.msk.f32.gmra.mrb[34].mxu0 %vm2893_vm12, %v2859_v3  ;;  %v17593_v33 = vld [vmem:[#allocation397_spill] sm:$0xff]  ;;  %v17598_v60 = vld [vmem:[#allocation63_spill] sm:$0xff]  ;;  %v17599_v47 = vld [vmem:[#allocation88_spill] sm:$0xff] }
 0x44e   : > { %v2523_v23 = vsel %vm2474_vm7, %v2462_v5, %v17583_v4  ;;  %v2860_v1 = vrot.slane %v2703_v48, 3  ;;  %v2861_v11 = vrot.slane %v2704_v17, 3  ;;  %v2705_v15 = vsel %vm2657_vm10, %v2644_v7, %v2145_v39  ;;  %v17596_v31 = vld [vmem:[#allocation61_spill] sm:$0xff]  ;;  %v17600_v52 = vld [vmem:[#allocation292_spill] sm:$0xff]  ;;  %v17601_v3 = vld [vmem:[#allocation91_spill] sm:$0xff] }
 0x44f   : > { %v2403_v16 = vsel %vm2352_vm5, %v11598_v35, %v17584_v42  ;;  %v2524_v50 = vsel %vm2474_vm7, %v2463_v63, %v17585_v19  ;;  %v2584_v9 = vsel %vm2535_vm8, %v2523_v23, %v17586_v51  ;;  %v2863_v58 = vrot.slane %v2705_v15, 3  ;;  %v2147_v14 = vpop.permute.xlu0 %2146  ;;  %v17597_v26 = vld [vmem:[#allocation237_spill] sm:$0xff]  ;;  %v17603_v7 = vld [vmem:[#allocation399_spill] sm:$0xff]  ;;  %v17604_v23 = vld [vmem:[#allocation230_spill] sm:$0xff] }
 0x450   : > { %v2404_v54 = vsel %vm2352_vm5, %v11607_v43, %v17587_v2  ;;  %v2585_v45 = vsel %vm2535_vm8, %v2524_v50, %v17588_v21  ;;  %v2645_v61 = vsel %vm2596_vm9, %v2584_v9, %v17589_v13  ;;  %v2862_v35 = vsel %vm16337_vm11, %v2860_v1, %v2861_v11  ;;  %v2149_v43 = vpop.permute.xlu1 %2148  ;;  %v17602_v63 = vld [vmem:[#allocation293_spill] sm:$0xff]  ;;  %v17605_v1 = vld [vmem:[#allocation316_spill] sm:$0xff]  ;;  %v17608_v51 = vld [vmem:[#allocation231_spill] sm:$0xff] }
 0x451   : > { %v2464_v24 = vsel %vm2413_vm6, %v2403_v16, %v17590_v62  ;;  %v2646_v49 = vsel %vm2596_vm9, %v2585_v45, %v17591_v29  ;;  %v2706_v34 = vsel %vm2657_vm10, %v2645_v61, %v2147_v14  ;;  %7453 = vmatprep.mubr.msk.f32.mxu0 %vm2893_vm12, %v2862_v35  ;;  %v2864_v10 = vsel %vm16337_vm11, %v2861_v11, %v2863_v58  ;;  %v17606_v15 = vld [vmem:[#allocation400_spill] sm:$0xff]  ;;  %v17609_v9 = vld [vmem:[#allocation93_spill] sm:$0xff]  ;;  %v17610_v2 = vld [vmem:[#allocation238_spill] sm:$0xff] }
 0x452   : > { %v2465_v38 = vsel %vm2413_vm6, %v2404_v54, %v17592_v55  ;;  %v2525_v46 = vsel %vm2474_vm7, %v2464_v24, %v17593_v33  ;;  %v2865_v18 = vrot.slane %v2706_v34, 3  ;;  %v2707_v32 = vsel %vm2657_vm10, %v2646_v49, %v2149_v43  ;;  %7454 = vmatmul.mubr.msk.f32.gmra.mrb[36].mxu0 %vm2893_vm12, %v2864_v10  ;;  %v17607_v16 = vld [vmem:[#allocation64_spill] sm:$0xff]  ;;  %v17611_v21 = vld [vmem:[#allocation455_spill] sm:$0xff]  ;;  %v17612_v13 = vld [vmem:[#allocation317_spill] sm:$0xff] }
 0x453   : > { %v2405_v0 = vsel %vm2352_vm5, %v11744_v44, %v17594_v57  ;;  %v2526_v36 = vsel %vm2474_vm7, %v2465_v38, %v17595_v53  ;;  %v2586_v22 = vsel %vm2535_vm8, %v2525_v46, %v17596_v31  ;;  %v2867_v20 = vrot.slane %v2707_v32, 3  ;;  %v2151_v6 = vpop.permute.xlu0 %2150  ;;  %v17613_v35 = vld [vmem:[#allocation294_spill] sm:$0xff]  ;;  %v17614_v24 = vld [vmem:[#allocation165_spill] sm:$0xff]  ;;  %v17615_v10 = vld [vmem:[#allocation239_spill] sm:$0xff] }
 0x454   : > { %v2406_v48 = vsel %vm2352_vm5, %v11753_v27, %v17597_v26  ;;  %v2587_v37 = vsel %vm2535_vm8, %v2526_v36, %v17598_v60  ;;  %v2647_v25 = vsel %vm2596_vm9, %v2586_v22, %v17599_v47  ;;  %v2866_v44 = vsel %vm16337_vm11, %v2863_v58, %v2865_v18  ;;  %v2153_v27 = vpop.permute.xlu1 %2152  ;;  %v17616_v55 = vld [vmem:[#allocation401_spill] sm:$0xff]  ;;  %v17618_v57 = vld [vmem:[#allocation295_spill] sm:$0xff]  ;;  %v17623_v47 = vld [vmem:[#allocation296_spill] sm:$0xff] }
 0x455   : > { %v2466_v41 = vsel %vm2413_vm6, %v2405_v0, %v17600_v52  ;;  %v2648_v12 = vsel %vm2596_vm9, %v2587_v37, %v17601_v3  ;;  %v2708_v5 = vsel %vm2657_vm10, %v2647_v25, %v2151_v6  ;;  %7456 = vmatprep.mubr.msk.f32.mxu0 %vm2893_vm12, %v2866_v44  ;;  %v2868_v28 = vsel %vm16337_vm11, %v2865_v18, %v2867_v20  ;;  %v17617_v18 = vld [vmem:[#allocation240_spill] sm:$0xff]  ;;  %v17619_v53 = vld [vmem:[#allocation241_spill] sm:$0xff]  ;;  %v17621_v20 = vld [vmem:[#allocation402_spill] sm:$0xff] }
 0x456   : > { %v2467_v40 = vsel %vm2413_vm6, %v2406_v48, %v17602_v63  ;;  %v2527_v17 = vsel %vm2474_vm7, %v2466_v41, %v17603_v7  ;;  %v2869_v39 = vrot.slane %v2708_v5, 3  ;;  %v2709_v4 = vsel %vm2657_vm10, %v2648_v12, %v2153_v27  ;;  %7457 = vmatmul.mubr.msk.f32.gmra.mrb[38].mxu0 %vm2893_vm12, %v2868_v28  ;;  %v17622_v48 = vld [vmem:[#allocation96_spill] sm:$0xff]  ;;  %v17625_v3 = vld [vmem:[#allocation298_spill] sm:$0xff]  ;;  %v17626_v5 = vld [vmem:[#allocation403_spill] sm:$0xff] }
 0x457   : > { %v2350_v11 = vsel %vm2291_vm4, %v17605_v1, %v17604_v23  ;;  %v2528_v42 = vsel %vm2474_vm7, %v2467_v40, %v17606_v15  ;;  %v2588_v19 = vsel %vm2535_vm8, %v2527_v17, %v17607_v16  ;;  %v2870_v50 = vrot.slane %v2709_v4, 3  ;;  %v2155_v14 = vpop.permute.xlu0 %2154  ;;  %v17624_v6 = vld [vmem:[#allocation456_spill] sm:$0xff]  ;;  %v17628_v7 = vld [vmem:[#allocation243_spill] sm:$0xff] }
 0x458   : > { %v2351_v58 = vsel %vm2291_vm4, %v17609_v9, %v17608_v51  ;;  %v2407_v54 = vsel %vm2352_vm5, %v11890_v30, %v17610_v2  ;;  %v2589_v45 = vsel %vm2535_vm8, %v2528_v42, %v17611_v21  ;;  %v2649_v61 = vsel %vm2596_vm9, %v2588_v19, %v17612_v13  ;;  %v2157_v34 = vpop.permute.xlu1 %2156  ;;  %v17627_v28 = vld [vmem:[#allocation320_spill] sm:$0xff]  ;;  %v17631_v42 = vld [vmem:[#allocation245_spill] sm:$0xff]  ;;  %v17632_v19 = vld [vmem:[#allocation246_spill] sm:$0xff] }
 0x459   : > { %v2468_v62 = vsel %vm2413_vm6, %v2407_v54, %v17613_v35  ;;  %v2650_v29 = vsel %vm2596_vm9, %v2589_v45, %v17614_v24  ;;  %v2710_v49 = vsel %vm2657_vm10, %v2649_v61, %v2155_v14  ;;  %v2871_v43 = vsel %vm16337_vm11, %v2869_v39, %v2870_v50  ;;  %v17629_v39 = vld [vmem:[#allocation404_spill] sm:$0xff]  ;;  %v17633_v51 = vld [vmem:[#allocation98_spill] sm:$0xff]  ;;  %v17634_v54 = vld [vmem:[#allocation301_spill] sm:$0xff] }
 0x45a   : > { %v2408_v30 = vsel %vm2352_vm5, %v11899_v59, %v17615_v10  ;;  %v2529_v38 = vsel %vm2474_vm7, %v2468_v62, %v17616_v55  ;;  %v2872_v33 = vrot.slane %v2710_v49, 3  ;;  %v2711_v46 = vsel %vm2657_vm10, %v2650_v29, %v2157_v34  ;;  %7459 = vmatprep.mubr.msk.f32.mxu0 %vm2893_vm12, %v2871_v43  ;;  %v17620_v59 = vld [vmem:[#allocation242_spill] sm:$0xff]  ;;  %v17630_v23 = vld [vmem:[#allocation244_spill] sm:$0xff]  ;;  %v17635_v45 = vld [vmem:[#allocation303_spill] sm:$0xff] }
 0x45b   : > { %v2409_v32 = vsel %vm2352_vm5, %v12036_v56, %v17617_v18  ;;  %v2469_v0 = vsel %vm2413_vm6, %v2408_v30, %v17618_v57  ;;  %v2590_v36 = vsel %vm2535_vm8, %v2529_v38, %v17619_v53  ;;  %v2874_v31 = vrot.slane %v2711_v46, 3  ;;  %v2159_v37 = vpop.permute.xlu0 %2158  ;;  %v17636_v61 = vld [vmem:[#allocation321_spill] sm:$0xff]  ;;  %v17638_v43 = vld [vmem:[#allocation406_spill] sm:$0xff]  ;;  %v17642_v53 = vld [vmem:[#allocation103_spill] sm:$0xff] }
 0x45c   : > { %v2410_v22 = vsel %vm2352_vm5, %v12045_v8, %v17620_v59  ;;  %v2530_v26 = vsel %vm2474_vm7, %v2469_v0, %v17621_v20  ;;  %v2651_v60 = vsel %vm2596_vm9, %v2590_v36, %v17622_v48  ;;  %v2873_v56 = vsel %vm16337_vm11, %v2870_v50, %v2872_v33  ;;  %v2161_v8 = vpop.permute.xlu1 %2160  ;;  %v17637_v62 = vld [vmem:[#allocation405_spill] sm:$0xff]  ;;  %v17639_v30 = vld [vmem:[#allocation62_spill] sm:$0xff] }
 0x45d   : > { %v2470_v25 = vsel %vm2413_vm6, %v2409_v32, %v17623_v47  ;;  %v2591_v44 = vsel %vm2535_vm8, %v2530_v26, %v17624_v6  ;;  %v2712_v52 = vsel %vm2657_vm10, %v2651_v60, %v2159_v37  ;;  %7460 = vmatmul.mubr.msk.f32.gmra.mrb[40].mxu0 %vm2893_vm12, %v2873_v56  ;;  %v2875_v41 = vsel %vm16337_vm11, %v2872_v33, %v2874_v31  ;;  %v17640_v33 = vld [vmem:[#allocation457_spill] sm:$0xff]  ;;  %v12291_v47 = vld [vmem:[%s15949_s3] ss:$0 sm:$0xff] }
 0x45e   : > { %v2471_v12 = vsel %vm2413_vm6, %v2410_v22, %v17625_v3  ;;  %v2531_v27 = vsel %vm2474_vm7, %v2470_v25, %v17626_v5  ;;  %v2652_v63 = vsel %vm2596_vm9, %v2591_v44, %v17627_v28  ;;  %v2876_v40 = vrot.slane %v2712_v52, 3  ;;  %7462 = vmatprep.mubr.msk.f32.mxu0 %vm2893_vm12, %v2875_v41  ;;  %v17641_v18 = vld [vmem:[#allocation101_spill] sm:$0xff] }
 0x45f   : > { %v2411_v17 = vsel %vm2352_vm5, %v2350_v11, %v17628_v7  ;;  %v2532_v4 = vsel %vm2474_vm7, %v2471_v12, %v17629_v39  ;;  %v2592_v1 = vsel %vm2535_vm8, %v2531_v27, %v17630_v23  ;;  %v2713_v15 = vsel %vm2657_vm10, %v2652_v63, %v2161_v8  ;;  %v2163_v2 = vpop.permute.xlu0 %2162 }
 0x460   : > { %v2412_v16 = vsel %vm2352_vm5, %v2351_v58, %v17631_v42  ;;  %v2593_v50 = vsel %vm2535_vm8, %v2532_v4, %v17632_v19  ;;  %v2653_v9 = vsel %vm2596_vm9, %v2592_v1, %v17633_v51  ;;  %v2877_v11 = vsel %vm16337_vm11, %v2874_v31, %v2876_v40  ;;  %v2165_v35 = vpop.permute.xlu1 %2164 }
 0x461   : > { %v2472_v21 = vsel %vm2413_vm6, %v2411_v17, %v17634_v54  ;;  %v2473_v13 = vsel %vm2413_vm6, %v2412_v16, %v17635_v45  ;;  %v2654_v14 = vsel %vm2596_vm9, %v2593_v50, %v17636_v61  ;;  %v2714_v58 = vsel %vm2657_vm10, %v2653_v9, %v2163_v2  ;;  %7463 = vmatmul.mubr.msk.f32.gmra.mrb[42].mxu0 %vm2893_vm12, %v2877_v11 }
 0x462   : > { %v2533_v24 = vsel %vm2474_vm7, %v2472_v21, %v17637_v62  ;;  %v2878_v29 = vrot.slane %v2713_v15, 3  ;;  %v2879_v49 = vrot.slane %v2714_v58, 3  ;;  %v2715_v34 = vsel %vm2657_vm10, %v2654_v14, %v2165_v35 }
 0x463   : > { %v2534_v10 = vsel %vm2474_vm7, %v2473_v13, %v17638_v43  ;;  %v2594_v55 = vsel %vm2535_vm8, %v2533_v24, %v17639_v30  ;;  %v2881_v38 = vrot.slane %v2715_v34, 3  ;;  %v2167_v57 = vpop.permute.xlu0 %2166  ;;  %v12284_v56 = vstv %s7208_s21  ;;  %s8101_s21 = smov 96  }
 0x464   : > { %v2595_v46 = vsel %vm2535_vm8, %v2534_v10, %v17640_v33  ;;  %v2655_v32 = vsel %vm2596_vm9, %v2594_v55, %v17641_v18  ;;  %v2880_v0 = vsel %vm16337_vm11, %v2878_v29, %v2879_v49  ;;  %v2169_v59 = vpop.permute.xlu1 %2168  ;;  %vm3319_vm13 = vcmp.ge.s32.totalorder %v12284_v56, 0 }
 0x465   : > { %v2656_v36 = vsel %vm2596_vm9, %v2595_v46, %v17642_v53  ;;  %v2716_v31 = vsel %vm2657_vm10, %v2655_v32, %v2167_v57  ;;  %7465 = vmatprep.mubr.msk.f32.mxu0 %vm2893_vm12, %v2880_v0  ;;  %v2882_v22 = vsel %vm16337_vm11, %v2879_v49, %v2881_v38  ;;  %vm3331_vm14 = vcmp.lt.s32.totalorder %v12284_v56, 16 }
 0x466   : > { %v2883_v20 = vrot.slane %v2716_v31, 3  ;;  %v2717_v26 = vsel %vm2657_vm10, %v2656_v36, %v2169_v59  ;;  %7466 = vmatmul.mubr.msk.f32.gmra.mrb[44].mxu0 %vm2893_vm12, %v2882_v22  ;;  %vm3343_vm15 = vmand %vm3319_vm13, %vm3331_vm14  ;;  %v16226_v52 = vmov 0.0   ;;  %v3301_v41 = vadd.s32 1, %v12284_v56 }
 0x467   : > { %v2885_v48 = vrot.slane %v2717_v26, 3  ;;  %v12295_v8 = vrot.slane %v16226_v52, 1  ;;  %v3302_v51 = vadd.s32 2, %v12284_v56  ;;  %v3303_v62 = vadd.s32 3, %v12284_v56 }
 0x468   : > { %v2884_v60 = vsel %vm16337_vm11, %v2881_v38, %v2883_v20  ;;  %vm3320_vm3 = vcmp.ge.s32.totalorder %v3301_v41, 0  ;;  %vm3332_vm7 = vcmp.lt.s32.totalorder %v3301_v41, 16  ;;  %v3304_v31 = vadd.s32 4, %v12284_v56 }
 0x469   : > { %7468 = vmatprep.mubr.msk.f32.mxu0 %vm2893_vm12, %v2884_v60  ;;  %v2886_v37 = vsel %vm16337_vm11, %v2883_v20, %v2885_v48  ;;  %17643 = vst [vmem:[#allocation329_spill] sm:$0xff] %v12295_v8  ;;  %vm12308_vm9 = vmand %vm3320_vm3, %vm3332_vm7  ;;  %v12324_v16 = vpack.i.bf16 %v12295_v8, %v12295_v8  ;;  %vm3321_vm13 = vcmp.ge.s32.totalorder %v3302_v51, 0  ;;  %vm3333_vm14 = vcmp.lt.s32.totalorder %v3302_v51, 16 }
 0x46a   : > { %7469 = vmatmul.mubr.msk.f32.gmra.mrb[46].mxu0 %vm2893_vm12, %v2886_v37  ;;  %vm3322_vm3 = vcmp.ge.s32.totalorder %v3303_v62, 0  ;;  %vm3334_vm7 = vcmp.lt.s32.totalorder %v3303_v62, 16 }
 0x4cc   : > { %v7401_v25 = vpop.f32.mrb[0].mxu0 }
 0x4cd   : > { %v3066_v6 = vadd.f32 %v7401_v25, %v12291_v47  ;;  %v3060_v44 = vpop.f32.mrb[1].mxu0 }
 0x4cf   : > { %v12298_v3 = vsel %vm3343_vm15, %v3066_v6, 0.0 }
 0x4d0   : > { %17644 = vst [vmem:[#allocation108_spill] sm:$0xff] %v12298_v3  ;;  %v3654_v12 = vrot.slane %v12298_v3, 1 }
 0x4d1   : > { %v7404_v5 = vpop.f32.mrb[2].mxu0 }
 0x4d2   : > { %v3070_v27 = vpop.f32.mrb[3].mxu0  ;;  %v3655_v63 = vsel %vm526_vm0, %v12295_v8, %v3654_v12 }
 0x4d3   : > { %v3071_v28 = vadd.f32 %v12291_v47, %v3070_v27  ;;  %3723 = vrot.lane.b32.xlu0 %v3655_v63, %s8084_s14 }
 0x4d5   : > { %v12305_v40 = vsel %vm3343_vm15, %v3071_v28, 0.0  ;;  %v7407_v17 = vpop.f32.mrb[4].mxu0  ;;  %vm12342_vm15 = vmand %vm3321_vm13, %vm3333_vm14  ;;  %vm3323_vm13 = vcmp.ge.s32.totalorder %v3304_v31, 0  ;;  %vm3335_vm14 = vcmp.lt.s32.totalorder %v3304_v31, 16 }
 0x4d6   : > { %17645 = vst [vmem:[#allocation332_spill] sm:$0xff] %v12305_v40  ;;  %v3656_v7 = vrot.slane %v12305_v40, 1  ;;  %v3086_v4 = vadd.f32 %v7407_v17, %v12291_v47  ;;  %v3080_v23 = vpop.f32.mrb[5].mxu0 }
 0x4d7   : > { %v3308_v23 = vadd.s32 8, %v12284_v56 }
 0x4d8   : > { %v3659_v1 = vsel %vm526_vm0, %v3656_v7, %v12295_v8  ;;  %v3657_v15 = vsel %vm526_vm0, %v3654_v12, %v3656_v7  ;;  %v12318_v42 = vsel %vm12308_vm9, %v3086_v4, 0.0  ;;  %v3305_v12 = vadd.s32 5, %v12284_v56 }
 0x4d9   : > { %17648 = vst [vmem:[#allocation110_spill] sm:$0xff] %v12318_v42  ;;  %3727 = vrot.lane.b32.xlu0 %v3659_v1, %s8084_s14  ;;  %3725 = vrot.lane.b32.xlu1 %v3657_v15, %s8084_s14  ;;  %v3661_v19 = vrot.slane %v12318_v42, 1  ;;  %v7410_v50 = vpop.f32.mrb[6].mxu0 }
 0x4da   : > { %v3090_v9 = vpop.f32.mrb[7].mxu0 }
 0x4db   : > { %v3091_v2 = vadd.f32 %v12291_v47, %v3090_v9  ;;  %v12331_v11 = vsel %vm526_vm0, %v12295_v8, %v3661_v19 }
 0x4dd   : > { %3731 = vrot.lane.b32.xlu0 %v12331_v11, %s8084_s14  ;;  %7704 = vrot.lane.b32.xlu1 %v12324_v16, %s8084_s14  ;;  %v12339_v54 = vsel %vm12308_vm9, %v3091_v2, 0.0  ;;  %vm12375_vm9 = vmand %vm3322_vm3, %vm3334_vm7  ;;  %vm3324_vm3 = vcmp.ge.s32.totalorder %v3305_v12, 0  ;;  %vm3336_vm7 = vcmp.lt.s32.totalorder %v3305_v12, 16 }
 0x4de   : > { %17649 = vst [vmem:[#allocation333_spill] sm:$0xff] %v12339_v54  ;;  %v3663_v21 = vrot.slane %v12339_v54, 1 }
 0x4e0   : > { %v7413_v45 = vpop.f32.mrb[8].mxu0  ;;  %v12348_v61 = vsel %vm526_vm0, %v3663_v21, %v12295_v8  ;;  %v12351_v14 = vsel %vm526_vm0, %v3661_v19, %v3663_v21 }
 0x4e1   : > { %v3106_v58 = vadd.f32 %v7413_v45, %v12291_v47  ;;  %3735 = vrot.lane.b32.xlu0 %v12348_v61, %s8084_s14  ;;  %3733 = vrot.lane.b32.xlu1 %v12351_v14, %s8084_s14  ;;  %v3100_v35 = vpop.f32.mrb[9].mxu0  ;;  %v3306_v45 = vadd.s32 6, %v12284_v56 }
 0x4e3   : > { %v12361_v24 = vsel %vm12342_vm15, %v3106_v58, 0.0 }
 0x4e4   : > { %v7416_v29 = vpop.f32.mrb[10].mxu0  ;;  %v3668_v49 = vrot.slane %v12361_v24, 1 }
 0x4e5   : > { %v3110_v34 = vpop.f32.mrb[11].mxu0 }
 0x4e6   : > { %v3111_v43 = vadd.f32 %v12291_v47, %v3110_v34  ;;  %v12367_v10 = vsel %vm526_vm0, %v12295_v8, %v3668_v49 }
 0x4e7   : > { %3739 = vrot.lane.b32.xlu1 %v12367_v10, %s8084_s14 }
 0x4e8   : > { %v12373_v30 = vsel %vm12342_vm15, %v3111_v43, 0.0  ;;  %vm12412_vm15 = vmand %vm3323_vm13, %vm3335_vm14  ;;  %vm3325_vm13 = vcmp.ge.s32.totalorder %v3306_v45, 0  ;;  %vm3337_vm14 = vcmp.lt.s32.totalorder %v3306_v45, 16 }
 0x4e9   : > { %v7419_v55 = vpop.f32.mrb[12].mxu0  ;;  %v3670_v33 = vrot.slane %v12373_v30, 1 }
 0x4ea   : > { %v3126_v46 = vadd.f32 %v7419_v55, %v12291_v47  ;;  %v3120_v18 = vpop.f32.mrb[13].mxu0 }
 0x4eb   : > { %v12383_v32 = vsel %vm526_vm0, %v3670_v33, %v12295_v8  ;;  %v12386_v57 = vsel %vm526_vm0, %v3668_v49, %v3670_v33 }
 0x4ec   : > { %v12390_v0 = vsel %vm12375_vm9, %v3126_v46, 0.0  ;;  %3743 = vrot.lane.b32.xlu1 %v12383_v32, %s8084_s14  ;;  %3741 = vrot.lane.b32.xlu0 %v12386_v57, %s8084_s14  ;;  %v3307_v46 = vadd.s32 7, %v12284_v56 }
 0x4ed   : > { %v7422_v53 = vpop.f32.mrb[14].mxu0  ;;  %v3675_v36 = vrot.slane %v12390_v0, 1 }
 0x4ee   : > { %v3130_v59 = vpop.f32.mrb[15].mxu0 }
 0x4ef   : > { %v3131_v22 = vadd.f32 %v12291_v47, %v3130_v59  ;;  %v12401_v20 = vsel %vm526_vm0, %v12295_v8, %v3675_v36 }
 0x4f0   : > { %3747 = vrot.lane.b32.xlu1 %v12401_v20, %s8084_s14  ;;  %7709 = vrot.lane.b32.xlu0 %v12324_v16, %s8084_s14 }
 0x4f1   : > { %v12409_v26 = vsel %vm12375_vm9, %v3131_v22, 0.0  ;;  %vm12445_vm9 = vmand %vm3324_vm3, %vm3336_vm7  ;;  %vm3326_vm3 = vcmp.ge.s32.totalorder %v3307_v46, 0  ;;  %vm3338_vm7 = vcmp.lt.s32.totalorder %v3307_v46, 16 }
 0x4f2   : > { %v3677_v48 = vrot.slane %v12409_v26, 1 }
 0x4f4   : > { %v7425_v60 = vpop.f32.mrb[16].mxu0  ;;  %v12418_v25 = vsel %vm526_vm0, %v3677_v48, %v12295_v8  ;;  %v12421_v6 = vsel %vm526_vm0, %v3675_v36, %v3677_v48 }
 0x4f5   : > { %v3146_v44 = vadd.f32 %v7425_v60, %v12291_v47  ;;  %3751 = vrot.lane.b32.xlu1 %v12418_v25, %s8084_s14  ;;  %3749 = vrot.lane.b32.xlu0 %v12421_v6, %s8084_s14  ;;  %v3140_v41 = vpop.f32.mrb[17].mxu0 }
 0x4f7   : > { %v12431_v5 = vsel %vm12412_vm15, %v3146_v44, 0.0 }
 0x4f8   : > { %v7428_v27 = vpop.f32.mrb[18].mxu0  ;;  %v3682_v28 = vrot.slane %v12431_v5, 1 }
 0x4f9   : > { %v3150_v63 = vpop.f32.mrb[19].mxu0 }
 0x4fa   : > { %v3151_v7 = vadd.f32 %v12291_v47, %v3150_v63  ;;  %v12437_v17 = vsel %vm526_vm0, %v12295_v8, %v3682_v28 }
 0x4fb   : > { %3755 = vrot.lane.b32.xlu0 %v12437_v17, %s8084_s14 }
 0x4fc   : > { %v12443_v39 = vsel %vm12412_vm15, %v3151_v7, 0.0  ;;  %vm12482_vm15 = vmand %vm3325_vm13, %vm3337_vm14  ;;  %vm3327_vm13 = vcmp.ge.s32.totalorder %v3308_v23, 0  ;;  %vm3339_vm14 = vcmp.lt.s32.totalorder %v3308_v23, 16 }
 0x4fd   : > { %17656 = vst [vmem:[#allocation111_spill] sm:$0xff] %v12443_v39  ;;  %v7431_v4 = vpop.f32.mrb[20].mxu0  ;;  %v3684_v1 = vrot.slane %v12443_v39, 1 }
 0x4fe   : > { %v3166_v15 = vadd.f32 %v7431_v4, %v12291_v47  ;;  %v3160_v19 = vpop.f32.mrb[21].mxu0 }
 0x4ff   : > { %v12453_v50 = vsel %vm526_vm0, %v3684_v1, %v12295_v8  ;;  %v12456_v51 = vsel %vm526_vm0, %v3682_v28, %v3684_v1 }
 0x500   : > { %v12460_v9 = vsel %vm12445_vm9, %v3166_v15, 0.0  ;;  %3759 = vrot.lane.b32.xlu0 %v12453_v50, %s8084_s14  ;;  %3757 = vrot.lane.b32.xlu1 %v12456_v51, %s8084_s14 }
 0x501   : > { %17659 = vst [vmem:[#allocation336_spill] sm:$0xff] %v12460_v9  ;;  %v7434_v2 = vpop.f32.mrb[22].mxu0  ;;  %v3689_v21 = vrot.slane %v12460_v9, 1 }
 0x502   : > { %v3170_v13 = vpop.f32.mrb[23].mxu0 }
 0x503   : > { %v3171_v58 = vadd.f32 %v12291_v47, %v3170_v13  ;;  %v12471_v35 = vsel %vm526_vm0, %v12295_v8, %v3689_v21 }
 0x504   : > { %3763 = vrot.lane.b32.xlu0 %v12471_v35, %s8084_s14  ;;  %7714 = vrot.lane.b32.xlu1 %v12324_v16, %s8084_s14 }
 0x505   : > { %v12479_v62 = vsel %vm12445_vm9, %v3171_v58, 0.0  ;;  %vm12515_vm9 = vmand %vm3326_vm3, %vm3338_vm7 }
 0x506   : > { %17660 = vst [vmem:[#allocation113_spill] sm:$0xff] %v12479_v62  ;;  %v3691_v29 = vrot.slane %v12479_v62, 1 }
 0x508   : > { %v7437_v49 = vpop.f32.mrb[24].mxu0  ;;  %v12488_v43 = vsel %vm526_vm0, %v3691_v29, %v12295_v8  ;;  %v12491_v55 = vsel %vm526_vm0, %v3689_v21, %v3691_v29 }
 0x509   : > { %v3186_v38 = vadd.f32 %v7437_v49, %v12291_v47  ;;  %3767 = vrot.lane.b32.xlu0 %v12488_v43, %s8084_s14  ;;  %3765 = vrot.lane.b32.xlu1 %v12491_v55, %s8084_s14  ;;  %v3180_v33 = vpop.f32.mrb[25].mxu0 }
 0x50b   : > { %v12501_v18 = vsel %vm12482_vm15, %v3186_v38, 0.0  ;;  %v3309_v38 = vadd.s32 9, %v12284_v56 }
 0x50c   : > { %17663 = vst [vmem:[#allocation337_spill] sm:$0xff] %v12501_v18  ;;  %v7440_v53 = vpop.f32.mrb[26].mxu0  ;;  %v3696_v36 = vrot.slane %v12501_v18, 1 }
 0x50d   : > { %v3190_v31 = vpop.f32.mrb[27].mxu0  ;;  %vm3328_vm3 = vcmp.ge.s32.totalorder %v3309_v38, 0  ;;  %vm3340_vm7 = vcmp.lt.s32.totalorder %v3309_v38, 16 }
 0x50e   : > { %v3191_v59 = vadd.f32 %v12291_v47, %v3190_v31  ;;  %v12507_v22 = vsel %vm526_vm0, %v12295_v8, %v3696_v36 }
 0x50f   : > { %3771 = vrot.lane.b32.xlu1 %v12507_v22, %s8084_s14 }
 0x510   : > { %v12513_v48 = vsel %vm12482_vm15, %v3191_v59, 0.0  ;;  %vm12552_vm15 = vmand %vm3327_vm13, %vm3339_vm14 }
 0x511   : > { %17664 = vst [vmem:[#allocation116_spill] sm:$0xff] %v12513_v48  ;;  %v7443_v60 = vpop.f32.mrb[28].mxu0  ;;  %v3698_v44 = vrot.slane %v12513_v48, 1 }
 0x512   : > { %v3206_v41 = vadd.f32 %v7443_v60, %v12291_v47  ;;  %v3200_v12 = vpop.f32.mrb[29].mxu0 }
 0x513   : > { %v12523_v27 = vsel %vm526_vm0, %v3698_v44, %v12295_v8  ;;  %v12526_v28 = vsel %vm526_vm0, %v3696_v36, %v3698_v44 }
 0x514   : > { %v12530_v63 = vsel %vm12515_vm9, %v3206_v41, 0.0  ;;  %3775 = vrot.lane.b32.xlu1 %v12523_v27, %s8084_s14  ;;  %3773 = vrot.lane.b32.xlu0 %v12526_v28, %s8084_s14 }
 0x515   : > { %17667 = vst [vmem:[#allocation340_spill] sm:$0xff] %v12530_v63  ;;  %v7446_v7 = vpop.f32.mrb[30].mxu0  ;;  %v3703_v4 = vrot.slane %v12530_v63, 1 }
 0x516   : > { %v3210_v1 = vpop.f32.mrb[31].mxu0 }
 0x517   : > { %v3211_v15 = vadd.f32 %v12291_v47, %v3210_v1  ;;  %v12541_v19 = vsel %vm526_vm0, %v12295_v8, %v3703_v4 }
 0x518   : > { %17668 = vst [vmem:[#allocation118_spill] sm:$0xff] %v12541_v19  ;;  %3779 = vrot.lane.b32.xlu1 %v12541_v19, %s8084_s14  ;;  %7719 = vrot.lane.b32.xlu0 %v12324_v16, %s8084_s14 }
 0x519   : > { %v12549_v2 = vsel %vm12515_vm9, %v3211_v15, 0.0  ;;  %vm12585_vm9 = vmand %vm3328_vm3, %vm3340_vm7 }
 0x51a   : > { %17669 = vst [vmem:[#allocation341_spill] sm:$0xff] %v12549_v2  ;;  %v3705_v21 = vrot.slane %v12549_v2, 1 }
 0x51c   : > { %v7449_v45 = vpop.f32.mrb[32].mxu0  ;;  %v12558_v58 = vsel %vm526_vm0, %v3705_v21, %v12295_v8  ;;  %v12561_v29 = vsel %vm526_vm0, %v3703_v4, %v3705_v21 }
 0x51d   : > { %17672 = vst [vmem:[#allocation50_spill] sm:$0xff] %v12558_v58  ;;  %v3226_v49 = vadd.f32 %v7449_v45, %v12291_v47  ;;  %3783 = vrot.lane.b32.xlu1 %v12558_v58, %s8084_s14  ;;  %3781 = vrot.lane.b32.xlu0 %v12561_v29, %s8084_s14  ;;  %v3220_v34 = vpop.f32.mrb[33].mxu0 }
 0x51f   : > { %v12571_v33 = vsel %vm12552_vm15, %v3226_v49, 0.0 }
 0x520   : > { %17673 = vst [vmem:[#allocation120_spill] sm:$0xff] %v12571_v33  ;;  %v7452_v46 = vpop.f32.mrb[34].mxu0  ;;  %v3710_v53 = vrot.slane %v12571_v33, 1 }
 0x521   : > { %v3230_v36 = vpop.f32.mrb[35].mxu0  ;;  %v12622_v46 = vrot.slane %v16226_v52, 2 }
 0x522   : > { %v3231_v31 = vadd.f32 %v12291_v47, %v3230_v36  ;;  %v12577_v59 = vsel %vm526_vm0, %v12295_v8, %v3710_v53  ;;  %v3846_v36 = vrot.slane %v12305_v40, 2 }
 0x523   : > { %17674 = vst [vmem:[#allocation344_spill] sm:$0xff] %v12577_v59  ;;  %3787 = vrot.lane.b32.xlu0 %v12577_v59, %s8084_s14  ;;  %17683 = vst [vmem:[#allocation167_spill] sm:$0xff] %v12622_v46 }
 0x524   : > { %v12583_v60 = vsel %vm12552_vm15, %v3231_v31, 0.0 }
 0x525   : > { %17675 = vst [vmem:[#allocation121_spill] sm:$0xff] %v12583_v60  ;;  %v7455_v37 = vpop.f32.mrb[36].mxu0  ;;  %v3712_v41 = vrot.slane %v12583_v60, 1 }
 0x526   : > { %v3246_v12 = vadd.f32 %v7455_v37, %v12291_v47  ;;  %v3240_v7 = vpop.f32.mrb[37].mxu0 }
 0x527   : > { %v12593_v4 = vsel %vm526_vm0, %v3712_v41, %v12295_v8  ;;  %v12596_v23 = vsel %vm526_vm0, %v3710_v53, %v3712_v41  ;;  %v3844_v53 = vrot.slane %v12298_v3, 2  ;;  %v3860_v3 = vrot.slane %v12373_v30, 2 }
 0x528   : > { %17678 = vst [vmem:[#allocation345_spill] sm:$0xff] %v12593_v4  ;;  %17679 = vst [vmem:[#allocation123_spill] sm:$0xff] %v12596_v23  ;;  %v12600_v1 = vsel %vm12585_vm9, %v3246_v12, 0.0  ;;  %3791 = vrot.lane.b32.xlu0 %v12593_v4, %s8084_s14  ;;  %3789 = vrot.lane.b32.xlu1 %v12596_v23, %s8084_s14 }
 0x529   : > { %17680 = vst [vmem:[#allocation348_spill] sm:$0xff] %v12600_v1  ;;  %v7458_v15 = vpop.f32.mrb[38].mxu0  ;;  %v3717_v21 = vrot.slane %v12600_v1, 1  ;;  %v3847_v7 = vsel %vm815_vm1, %v3844_v53, %v3846_v36 }
 0x52a   : > { %v3250_v45 = vpop.f32.mrb[39].mxu0  ;;  %v3845_v15 = vsel %vm815_vm1, %v12622_v46, %v3844_v53 }
 0x52b   : > { %v3251_v13 = vadd.f32 %v12291_v47, %v3250_v45  ;;  %v12610_v49 = vsel %vm526_vm0, %v12295_v8, %v3717_v21 }
 0x52c   : > { %17681 = vst [vmem:[#allocation126_spill] sm:$0xff] %v12610_v49  ;;  %3795 = vrot.lane.b32.xlu0 %v12610_v49, %s8084_s14  ;;  %7724 = vrot.lane.b32.xlu1 %v12324_v16, %s8084_s14 }
 0x52d   : > { %v12618_v34 = vsel %vm12585_vm9, %v3251_v13, 0.0  ;;  %v3311_v13 = vadd.s32 11, %v12284_v56 }
 0x52e   : > { %17682 = vst [vmem:[#allocation349_spill] sm:$0xff] %v12618_v34  ;;  %v3719_v38 = vrot.slane %v12618_v34, 1 }
 0x52f   : > { %vm3330_vm13 = vcmp.ge.s32.totalorder %v3311_v13, 0  ;;  %vm3342_vm14 = vcmp.lt.s32.totalorder %v3311_v13, 16 }
 0x530   : > { %v12626_v31 = vpop.f32.mrb[40].mxu0  ;;  %v12630_v37 = vsel %vm526_vm0, %v3719_v38, %v12295_v8  ;;  %v12633_v41 = vsel %vm526_vm0, %v3717_v21, %v3719_v38  ;;  %v12648_v21 = vpack.i.bf16 %v12622_v46, %v12622_v46  ;;  %v3851_v38 = vrot.slane %v12318_v42, 2  ;;  %vm3354_vm15 = vmand %vm3330_vm13, %vm3342_vm14 }
 0x531   : > { %17684 = vst [vmem:[#allocation128_spill] sm:$0xff] %v12630_v37  ;;  %17685 = vst [vmem:[#allocation352_spill] sm:$0xff] %v12633_v41  ;;  %3799 = vrot.lane.b32.xlu0 %v12630_v37, %s8084_s14  ;;  %3797 = vrot.lane.b32.xlu1 %v12633_v41, %s8084_s14  ;;  %v3260_v44 = vpop.f32.mrb[41].mxu0  ;;  %vm4949_vm13 = vcmask 326656   ;;  %vm4990_vm14 = vcmask 392192  }
 0x532   : > { %v3853_v44 = vrot.slane %v12339_v54, 2  ;;  %v12664_v40 = vsel %vm815_vm1, %v12622_v46, %v3851_v38 }
 0x533   : > { %17687 = vst [vmem:[#allocation353_spill] sm:$0xff] %v12664_v40 }
 0x534   : > { %v7464_v12 = vpop.f32.mrb[42].mxu0  ;;  %v12660_v52 = vsel %vm815_vm1, %v3851_v38, %v3853_v44  ;;  %v12681_v8 = vsel %vm815_vm1, %v3853_v44, %v12622_v46  ;;  %v12695_v44 = vsel %vm815_vm1, %v3860_v3, %v12622_v46 }
 0x535   : > { %3915 = vrot.lane.b32.xlu0 %v3847_v7, %s8086_s17  ;;  %3913 = vrot.lane.b32.xlu1 %v3845_v15, %s8086_s17  ;;  %v12644_v45 = vpop.f32.mrb[43].mxu0  ;;  %v3849_v12 = vsel %vm815_vm1, %v3846_v36, %v12622_v46  ;;  %17686 = vst [vmem:[#allocation130_spill] sm:$0xff] %v12660_v52  ;;  %v3858_v36 = vrot.slane %v12361_v24, 2  ;;  %17690 = vst [vmem:[#allocation133_spill] sm:$0xff] %v12681_v8 }
 0x537   : > { %v12677_v38 = vsel %vm815_vm1, %v12622_v46, %v3858_v36 }
 0x538   : > { %17689 = vst [vmem:[#allocation356_spill] sm:$0xff] %v12677_v38 }
 0x539   : > { %7729 = vrot.lane.b32.xlu0 %v12648_v21, %s8086_s17  ;;  %3917 = vrot.lane.b32.xlu1 %v3849_v12, %s8086_s17  ;;  %v7467_v53 = vpop.f32.mrb[44].mxu0 }
 0x53a   : > { %v3280_v7 = vpop.f32.mrb[45].mxu0  ;;  %v3286_v15 = vadd.f32 %v7467_v53, %v12291_v47 }
 0x53c   : > { %v12671_v7 = vsel %vm3354_vm15, %v3286_v15, 0.0 }
 0x53d   : > { %3923 = vrot.lane.b32.xlu0 %v12660_v52, %s8086_s17  ;;  %3921 = vrot.lane.b32.xlu1 %v12664_v40, %s8086_s17  ;;  %v7470_v13 = vpop.f32.mrb[46].mxu0  ;;  %17688 = vst [vmem:[#allocation131_spill] sm:$0xff] %v12671_v7  ;;  %v16242_v15 = vrot.slane %v12671_v7, 1 }
 0x53e   : > { %v3290_v12 = vpop.f32.mrb[47].mxu0  ;;  %v16241_v13 = vrot.slane %v12671_v7, 2 }
 0x53f   : > { %v3291_v53 = vadd.f32 %v12291_v47, %v3290_v12 }
 0x541   : > { %v12683_v52 = vsel %vm3354_vm15, %v3291_v53, 0.0  ;;  %3929 = vrot.lane.b32.xlu0 %v12677_v38, %s8086_s17  ;;  %3925 = vrot.lane.b32.xlu1 %v12681_v8, %s8086_s17  ;;  %v12698_v53 = vsel %vm815_vm1, %v3858_v36, %v3860_v3  ;;  %v3865_v38 = vrot.slane %v12390_v0, 2  ;;  %v3867_v36 = vrot.slane %v12409_v26, 2 }
 0x542   : > { %17691 = vst [vmem:[#allocation357_spill] sm:$0xff] %v12683_v52  ;;  %v16240_v12 = vrot.slane %v12683_v52, 1  ;;  %v16239_v40 = vrot.slane %v12683_v52, 2  ;;  %v3874_v52 = vrot.slane %v12443_v39, 2  ;;  %vm5031_vm15 = vcmask 457728  }
 0x543   : > { %v12721_v3 = vsel %vm815_vm1, %v12622_v46, %v3865_v38 }
 0x544   : > { %v12706_v8 = vsel %vm526_vm0, %v16242_v15, %v16240_v12  ;;  %v12713_v41 = vsel %vm815_vm1, %v16241_v13, %v16239_v40  ;;  %v12732_v12 = vsel %vm815_vm1, %v3867_v36, %v12622_v46  ;;  %v12735_v13 = vsel %vm815_vm1, %v3865_v38, %v3867_v36 }
 0x545   : > { %17692 = vst [vmem:[#allocation136_spill] sm:$0xff] %v12706_v8  ;;  %17693 = vst [vmem:[#allocation360_spill] sm:$0xff] %v12713_v41  ;;  %3933 = vrot.lane.b32.xlu0 %v12695_v44, %s8086_s17  ;;  %3931 = vrot.lane.b32.xlu1 %v12698_v53, %s8086_s17  ;;  %v12728_v40 = vpop.permute.xlu0 %3723  ;;  %v3872_v15 = vrot.slane %v12431_v5, 2 }
 0x546   : > { %17694 = vst [vmem:[#allocation138_spill] sm:$0xff] %v12728_v40  ;;  %17695 = vst [vmem:[#allocation361_spill] sm:$0xff] %v12735_v13  ;;  %v3881_v40 = vrot.slane %v12479_v62, 2 }
 0x547   : > { %v12748_v7 = vsel %vm815_vm1, %v3872_v15, %v3874_v52  ;;  %v12752_v38 = vsel %vm815_vm1, %v12622_v46, %v3872_v15 }
 0x548   : > { %17698 = vst [vmem:[#allocation141_spill] sm:$0xff] %v12748_v7  ;;  %17699 = vst [vmem:[#allocation365_spill] sm:$0xff] %v12752_v38 }
 0x549   : > { %3937 = vrot.lane.b32.xlu0 %v12721_v3, %s8086_s17  ;;  %7734 = vrot.lane.b32.xlu1 %v12648_v21, %s8086_s17 }
 0x54b   : > { %v12743_v41 = vpop.permute.xlu1 %3725  ;;  %v12745_v8 = vpop.permute.xlu0 %3727 }
 0x54c   : > { %17696 = vst [vmem:[#allocation140_spill] sm:$0xff] %v12743_v41  ;;  %17697 = vst [vmem:[#allocation364_spill] sm:$0xff] %v12745_v8  ;;  %v12762_v41 = vsel %vm815_vm1, %v3874_v52, %v12622_v46  ;;  %v3879_v8 = vrot.slane %v12460_v9, 2  ;;  %v3886_v52 = vrot.slane %v12501_v18, 2 }
 0x54d   : > { %3941 = vrot.lane.b32.xlu0 %v12732_v12, %s8086_s17  ;;  %3939 = vrot.lane.b32.xlu1 %v12735_v13, %s8086_s17  ;;  %17701 = vst [vmem:[#allocation368_spill] sm:$0xff] %v12762_v41  ;;  %v3888_v13 = vrot.slane %v12513_v48, 2 }
 0x54f   : > { %v12758_v36 = vpop.permute.xlu1 %7704  ;;  %v12770_v15 = vpop.permute.xlu0 %3731 }
 0x550   : > { %17700 = vst [vmem:[#allocation143_spill] sm:$0xff] %v12758_v36  ;;  %17702 = vst [vmem:[#allocation146_spill] sm:$0xff] %v12770_v15  ;;  %v12777_v36 = vsel %vm815_vm1, %v12622_v46, %v3879_v8  ;;  %v12790_v15 = vsel %vm815_vm1, %v12622_v46, %v3886_v52 }
 0x551   : > { %3947 = vrot.lane.b32.xlu0 %v12748_v7, %s8086_s17  ;;  %3945 = vrot.lane.b32.xlu1 %v12752_v38, %s8086_s17  ;;  %v12773_v7 = vsel %vm815_vm1, %v3879_v8, %v3881_v40  ;;  %17704 = vst [vmem:[#allocation148_spill] sm:$0xff] %v12777_v36  ;;  %17707 = vst [vmem:[#allocation373_spill] sm:$0xff] %v12790_v15  ;;  %v12794_v8 = vsel %vm815_vm1, %v3881_v40, %v12622_v46  ;;  %v3893_v40 = vrot.slane %v12530_v63, 2 }
 0x552   : > { %17703 = vst [vmem:[#allocation369_spill] sm:$0xff] %v12773_v7  ;;  %17708 = vst [vmem:[#allocation169_spill] sm:$0xff] %v12794_v8 }
 0x553   : > { %v12784_v38 = vpop.permute.xlu1 %3733 }
 0x554   : > { %17705 = vst [vmem:[#allocation372_spill] sm:$0xff] %v12784_v38 }
 0x555   : > { %7739 = vrot.lane.b32.xlu0 %v12648_v21, %s8086_s17  ;;  %3949 = vrot.lane.b32.xlu1 %v12762_v41, %s8086_s17  ;;  %v12786_v41 = vpop.permute.xlu0 %3735 }
 0x556   : > { %17706 = vst [vmem:[#allocation150_spill] sm:$0xff] %v12786_v41  ;;  %v12807_v41 = vsel %vm815_vm1, %v3888_v13, %v12622_v46 }
 0x557   : > { %17711 = vst [vmem:[#allocation153_spill] sm:$0xff] %v12807_v41 }
 0x559   : > { %3955 = vrot.lane.b32.xlu0 %v12773_v7, %s8086_s17  ;;  %3953 = vrot.lane.b32.xlu1 %v12777_v36, %s8086_s17  ;;  %v12801_v36 = vpop.permute.xlu1 %3739  ;;  %v12810_v7 = vsel %vm815_vm1, %v3886_v52, %v3888_v13 }
 0x55a   : > { %17709 = vst [vmem:[#allocation151_spill] sm:$0xff] %v12801_v36  ;;  %17712 = vst [vmem:[#allocation377_spill] sm:$0xff] %v12810_v7  ;;  %v3895_v36 = vrot.slane %v12549_v2, 2 }
 0x55c   : > { %v12832_v52 = vsel %vm815_vm1, %v3895_v36, %v12622_v46 }
 0x55d   : > { %3961 = vrot.lane.b32.xlu0 %v12790_v15, %s8086_s17  ;;  %3957 = vrot.lane.b32.xlu1 %v12794_v8, %s8086_s17  ;;  %17716 = vst [vmem:[#allocation381_spill] sm:$0xff] %v12832_v52 }
 0x55e   : > { %v12803_v38 = vpop.permute.xlu0 %3741  ;;  %v12817_v15 = vpop.permute.xlu1 %3743 }
 0x55f   : > { %17710 = vst [vmem:[#allocation376_spill] sm:$0xff] %v12803_v38  ;;  %17713 = vst [vmem:[#allocation156_spill] sm:$0xff] %v12817_v15  ;;  %v12821_v38 = vsel %vm815_vm1, %v12622_v46, %v3893_v40  ;;  %v12835_v15 = vsel %vm815_vm1, %v3893_v40, %v3895_v36 }
 0x560   : > { %17714 = vst [vmem:[#allocation380_spill] sm:$0xff] %v12821_v38  ;;  %17717 = vst [vmem:[#allocation171_spill] sm:$0xff] %v12835_v15 }
 0x561   : > { %3965 = vrot.lane.b32.xlu0 %v12807_v41, %s8086_s17  ;;  %3963 = vrot.lane.b32.xlu1 %v12810_v7, %s8086_s17  ;;  %v3900_v41 = vrot.slane %v12571_v33, 2  ;;  %v3902_v7 = vrot.slane %v12583_v60, 2 }
 0x562   : > { %v12828_v13 = vpop.permute.xlu0 %7709 }
 0x563   : > { %17715 = vst [vmem:[#allocation158_spill] sm:$0xff] %v12828_v13  ;;  %v12848_v8 = vsel %vm815_vm1, %v3900_v41, %v3902_v7  ;;  %v12852_v36 = vsel %vm815_vm1, %v12622_v46, %v3900_v41 }
 0x564   : > { %17720 = vst [vmem:[#allocation47_spill] sm:$0xff] %v12848_v8 }
 0x565   : > { %3969 = vrot.lane.b32.xlu0 %v12821_v38, %s8086_s17  ;;  %7744 = vrot.lane.b32.xlu1 %v12648_v21, %s8086_s17  ;;  %v12843_v38 = vpop.permute.xlu1 %3747 }
 0x566   : > { %17718 = vst [vmem:[#allocation46_spill] sm:$0xff] %v12843_v38  ;;  %v3907_v38 = vrot.slane %v12600_v1, 2 }
 0x567   : > { %v12845_v13 = vpop.permute.xlu0 %3749 }
 0x568   : > { %17719 = vst [vmem:[#allocation384_spill] sm:$0xff] %v12845_v13  ;;  %v12864_v13 = vsel %vm815_vm1, %v3902_v7, %v12622_v46 }
 0x569   : > { %3973 = vrot.lane.b32.xlu0 %v12832_v52, %s8086_s17  ;;  %3971 = vrot.lane.b32.xlu1 %v12835_v15, %s8086_s17  ;;  %v12858_v40 = vpop.permute.xlu1 %3751  ;;  %17723 = vst [vmem:[#allocation388_spill] sm:$0xff] %v12864_v13  ;;  %v3909_v52 = vrot.slane %v12618_v34, 2 }
 0x56a   : > { %17721 = vst [vmem:[#allocation385_spill] sm:$0xff] %v12858_v40 }
 0x56b   : > { %v12875_v40 = vsel %vm815_vm1, %v3907_v38, %v3909_v52 }
 0x56c   : > { %17725 = vst [vmem:[#allocation389_spill] sm:$0xff] %v12875_v40 }
 0x56d   : > { %3979 = vrot.lane.b32.xlu0 %v12848_v8, %s8086_s17  ;;  %3977 = vrot.lane.b32.xlu1 %v12852_v36, %s8086_s17  ;;  %v12860_v15 = vpop.permute.xlu0 %3755  ;;  %v12889_v8 = vsel %vm815_vm1, %v3909_v52, %v12622_v46 }
 0x56e   : > { %17722 = vst [vmem:[#allocation49_spill] sm:$0xff] %v12860_v15  ;;  %v12879_v15 = vsel %vm815_vm1, %v12622_v46, %v3907_v38 }
 0x571   : > { %7749 = vrot.lane.b32.xlu0 %v12648_v21, %s8086_s17  ;;  %3981 = vrot.lane.b32.xlu1 %v12864_v13, %s8086_s17 }
 0x572   : > { %v12872_v41 = vpop.permute.xlu1 %3757  ;;  %v12885_v7 = vpop.permute.xlu0 %3759 }
 0x573   : > { %17724 = vst [vmem:[#allocation162_spill] sm:$0xff] %v12872_v41  ;;  %17726 = vst [vmem:[#allocation164_spill] sm:$0xff] %v12885_v7  ;;  %v17727_v41 = vmov 0.0  }
 0x575   : > { %3987 = vrot.lane.b32.xlu0 %v12875_v40, %s8086_s17  ;;  %3985 = vrot.lane.b32.xlu1 %v12879_v15, %s8086_s17 }
 0x576   : > { %v12895_v38 = vpop.permute.xlu1 %7714  ;;  %v12897_v13 = vpop.permute.xlu0 %3763 }
 0x577   : > { %17728 = vst [vmem:[#allocation392_spill] sm:$0xff] %v12895_v38  ;;  %17729 = vst [vmem:[#allocation166_spill] sm:$0xff] %v12897_v13 }
 0x579   : > { %7754 = vrot.lane.b32.xlu0 %v17727_v41, %s8088_s19  ;;  %3989 = vrot.lane.b32.xlu1 %v12889_v8, %s8086_s17  ;;  %s8092_s17 = smov 40  }
 0x57b   : > { %v12903_v7 = vpop.permute.xlu1 %3765  ;;  %v12909_v52 = vpop.permute.xlu0 %3767 }
 0x57c   : > { %17730 = vst [vmem:[#allocation393_spill] sm:$0xff] %v12903_v7  ;;  %17731 = vst [vmem:[#allocation57_spill] sm:$0xff] %v12909_v52 }
 0x57d   : > { %4041 = vrot.lane.b32.xlu0 %v12339_v54, %s8088_s19  ;;  %4039 = vrot.lane.b32.xlu1 %v12318_v42, %s8088_s19  ;;  %v3266_v42 = vadd.f32 %v12626_v31, %v12291_v47 }
 0x581   : > { %4047 = vrot.lane.b32.xlu0 %v12361_v24, %s8088_s19  ;;  %7759 = vrot.lane.b32.xlu1 %v17727_v41, %s8088_s19  ;;  %v12911_v46 = vpop.permute.xlu1 %3771 }
 0x582   : > { %17732 = vst [vmem:[#allocation168_spill] sm:$0xff] %v12911_v46 }
 0x585   : > { %7764 = vrot.lane.b32.xlu0 %v17727_v41, %s8088_s19  ;;  %4049 = vrot.lane.b32.xlu1 %v12373_v30, %s8088_s19 }
 0x586   : > { %v12917_v13 = vpop.permute.xlu0 %3773  ;;  %v12923_v7 = vpop.permute.xlu1 %3775 }
 0x587   : > { %17733 = vst [vmem:[#allocation396_spill] sm:$0xff] %v12917_v13  ;;  %17734 = vst [vmem:[#allocation170_spill] sm:$0xff] %v12923_v7 }
 0x589   : > { %4057 = vrot.lane.b32.xlu0 %v12409_v26, %s8088_s19  ;;  %4055 = vrot.lane.b32.xlu1 %v12390_v0, %s8088_s19 }
 0x58a   : > { %v12925_v38 = vpop.permute.xlu0 %7719  ;;  %v12931_v46 = vpop.permute.xlu1 %3779 }
 0x58b   : > { %17735 = vst [vmem:[#allocation172_spill] sm:$0xff] %v12925_v38  ;;  %17736 = vst [vmem:[#allocation174_spill] sm:$0xff] %v12931_v46 }
 0x58d   : > { %4063 = vrot.lane.b32.xlu0 %v12431_v5, %s8088_s19  ;;  %7769 = vrot.lane.b32.xlu1 %v17727_v41, %s8088_s19 }
 0x58f   : > { %v12933_v52 = vpop.permute.xlu0 %3781  ;;  %v12945_v38 = vpop.permute.xlu1 %3783 }
 0x590   : > { %17737 = vst [vmem:[#allocation175_spill] sm:$0xff] %v12933_v52  ;;  %17739 = vst [vmem:[#allocation176_spill] sm:$0xff] %v12945_v38 }
 0x591   : > { %7774 = vrot.lane.b32.xlu0 %v17727_v41, %s8088_s19  ;;  %4065 = vrot.lane.b32.xlu1 %v12443_v39, %s8088_s19 }
 0x595   : > { %v12939_v13 = vpop.permute.xlu0 %3787  ;;  %4073 = vrot.lane.b32.xlu0 %v12479_v62, %s8088_s19  ;;  %4071 = vrot.lane.b32.xlu1 %v12460_v9, %s8088_s19 }
 0x596   : > { %17738 = vst [vmem:[#allocation173_spill] sm:$0xff] %v12939_v13 }
 0x599   : > { %4079 = vrot.lane.b32.xlu0 %v12501_v18, %s8088_s19  ;;  %7779 = vrot.lane.b32.xlu1 %v17727_v41, %s8088_s19 }
 0x59a   : > { %v12951_v52 = vpop.permute.xlu0 %3791  ;;  %v12953_v46 = vpop.permute.xlu1 %3789 }
 0x59b   : > { %17740 = vst [vmem:[#allocation177_spill] sm:$0xff] %v12951_v52  ;;  %17741 = vst [vmem:[#allocation178_spill] sm:$0xff] %v12953_v46 }
 0x59d   : > { %7784 = vrot.lane.b32.xlu0 %v17727_v41, %s8088_s19  ;;  %4081 = vrot.lane.b32.xlu1 %v12513_v48, %s8088_s19 }
 0x59e   : > { %v12959_v13 = vpop.permute.xlu0 %3795  ;;  %v12961_v7 = vpop.permute.xlu1 %7724 }
 0x59f   : > { %17742 = vst [vmem:[#allocation179_spill] sm:$0xff] %v12959_v13  ;;  %17743 = vst [vmem:[#allocation60_spill] sm:$0xff] %v12961_v7  ;;  %v3310_v13 = vadd.s32 10, %v12284_v56 }
 0x5a1   : > { %4089 = vrot.lane.b32.xlu0 %v12549_v2, %s8088_s19  ;;  %4087 = vrot.lane.b32.xlu1 %v12530_v63, %s8088_s19  ;;  %vm3329_vm3 = vcmp.ge.s32.totalorder %v3310_v13, 0  ;;  %vm3341_vm7 = vcmp.lt.s32.totalorder %v3310_v13, 16  ;;  %v3271_v13 = vadd.f32 %v12291_v47, %v12644_v45 }
 0x5a2   : > { %vm3353_vm9 = vmand %vm3329_vm3, %vm3341_vm7  ;;  %vm5072_vm3 = vcmask 523264   ;;  %vm16338_vm7 = vcmask 588800  }
 0x5a3   : > { %v12967_v38 = vpop.permute.xlu0 %3799  ;;  %v12969_v52 = vpop.permute.xlu1 %3797 }
 0x5a4   : > { %17744 = vst [vmem:[#allocation180_spill] sm:$0xff] %v12967_v38  ;;  %17745 = vst [vmem:[#allocation181_spill] sm:$0xff] %v12969_v52 }
 0x5a5   : > { %4095 = vrot.lane.b32.xlu0 %v12571_v33, %s8088_s19  ;;  %7789 = vrot.lane.b32.xlu1 %v17727_v41, %s8088_s19 }
 0x5a7   : > { %v12976_v46 = vpop.permute.xlu0 %3915  ;;  %v12978_v7 = vpop.permute.xlu1 %3913 }
 0x5a8   : > { %17746 = vst [vmem:[#allocation182_spill] sm:$0xff] %v12976_v46  ;;  %17747 = vst [vmem:[#allocation183_spill] sm:$0xff] %v12978_v7  ;;  %v12998_v7 = vsel %vm3353_vm9, %v3266_v42, 0.0 }
 0x5a9   : > { %7794 = vrot.lane.b32.xlu0 %v17727_v41, %s8088_s19  ;;  %4097 = vrot.lane.b32.xlu1 %v12583_v60, %s8088_s19  ;;  %17752 = vst [vmem:[#allocation188_spill] sm:$0xff] %v12998_v7 }
 0x5ab   : > { %v12984_v38 = vpop.permute.xlu0 %7729  ;;  %v12986_v52 = vpop.permute.xlu1 %3917 }
 0x5ac   : > { %17748 = vst [vmem:[#allocation184_spill] sm:$0xff] %v12984_v38  ;;  %17749 = vst [vmem:[#allocation185_spill] sm:$0xff] %v12986_v52  ;;  %v13010_v52 = vsel %vm3353_vm9, %v3271_v13, 0.0 }
 0x5ad   : > { %4105 = vrot.lane.b32.xlu0 %v12618_v34, %s8088_s19  ;;  %4103 = vrot.lane.b32.xlu1 %v12600_v1, %s8088_s19  ;;  %17755 = vst [vmem:[#allocation191_spill] sm:$0xff] %v13010_v52 }
 0x5af   : > { %v12994_v56 = vpop.permute.xlu0 %3923  ;;  %v12996_v54 = vpop.permute.xlu1 %3921 }
 0x5b0   : > { %17750 = vst [vmem:[#allocation186_spill] sm:$0xff] %v12994_v56  ;;  %17751 = vst [vmem:[#allocation187_spill] sm:$0xff] %v12996_v54 }
 0x5b1   : > { %4111 = vrot.lane.b32.xlu0 %v12998_v7, %s8088_s19  ;;  %7799 = vrot.lane.b32.xlu1 %v17727_v41, %s8088_s19 }
 0x5b3   : > { %v13006_v31 = vpop.permute.xlu0 %3929  ;;  %v13008_v38 = vpop.permute.xlu1 %3925 }
 0x5b4   : > { %17753 = vst [vmem:[#allocation189_spill] sm:$0xff] %v13006_v31  ;;  %17754 = vst [vmem:[#allocation190_spill] sm:$0xff] %v13008_v38  ;;  %v4160_v31 = vrot.slane %v13010_v52, 1  ;;  %v17789_v38 = vld [vmem:[#allocation329_spill] sm:$0xff] }
 0x5b5   : > { %4164 = vrot.lane.b32.xlu0 %v12331_v11, %s8090_s26  ;;  %4113 = vrot.lane.b32.xlu1 %v13010_v52, %s8088_s19 }
 0x5b7   : > { %v13016_v42 = vpop.permute.xlu0 %3933  ;;  %v13018_v47 = vpop.permute.xlu1 %3931 }
 0x5b8   : > { %17756 = vst [vmem:[#allocation297_spill] sm:$0xff] %v13016_v42  ;;  %17757 = vst [vmem:[#allocation192_spill] sm:$0xff] %v13018_v47 }
 0x5b9   : > { %4168 = vrot.lane.b32.xlu0 %v12348_v61, %s8090_s26  ;;  %4166 = vrot.lane.b32.xlu1 %v12351_v14, %s8090_s26 }
 0x5bb   : > { %v13024_v45 = vpop.permute.xlu0 %3937  ;;  %v13026_v13 = vpop.permute.xlu1 %7734 }
 0x5bc   : > { %17758 = vst [vmem:[#allocation193_spill] sm:$0xff] %v13024_v45  ;;  %17759 = vst [vmem:[#allocation194_spill] sm:$0xff] %v13026_v13  ;;  %v17786_v13 = vld [vmem:[#allocation352_spill] sm:$0xff] }
 0x5bd   : > { %4172 = vrot.lane.b32.xlu0 %v12367_v10, %s8090_s26  ;;  %7804 = vrot.lane.b32.xlu1 %v12324_v16, %s8090_s26 }
 0x5bf   : > { %v13032_v11 = vpop.permute.xlu0 %3941  ;;  %v13034_v42 = vpop.permute.xlu1 %3939 }
 0x5c0   : > { %17760 = vst [vmem:[#allocation195_spill] sm:$0xff] %v13032_v11  ;;  %17761 = vst [vmem:[#allocation300_spill] sm:$0xff] %v13034_v42 }
 0x5c1   : > { %4176 = vrot.lane.b32.xlu0 %v12383_v32, %s8090_s26  ;;  %4174 = vrot.lane.b32.xlu1 %v12386_v57, %s8090_s26 }
 0x5c3   : > { %v13040_v61 = vpop.permute.xlu0 %3947  ;;  %v13042_v14 = vpop.permute.xlu1 %3945 }
 0x5c4   : > { %17762 = vst [vmem:[#allocation196_spill] sm:$0xff] %v13040_v61  ;;  %17763 = vst [vmem:[#allocation197_spill] sm:$0xff] %v13042_v14 }
 0x5c5   : > { %4182 = vrot.lane.b32.xlu0 %v12421_v6, %s8090_s26  ;;  %4180 = vrot.lane.b32.xlu1 %v12401_v20, %s8090_s26 }
 0x5c7   : > { %v13048_v45 = vpop.permute.xlu0 %7739  ;;  %v13050_v11 = vpop.permute.xlu1 %3949 }
 0x5c8   : > { %17764 = vst [vmem:[#allocation198_spill] sm:$0xff] %v13048_v45  ;;  %17765 = vst [vmem:[#allocation199_spill] sm:$0xff] %v13050_v11 }
 0x5c9   : > { %7809 = vrot.lane.b32.xlu0 %v12324_v16, %s8090_s26  ;;  %4184 = vrot.lane.b32.xlu1 %v12418_v25, %s8090_s26 }
 0x5cb   : > { %v13056_v42 = vpop.permute.xlu0 %3955  ;;  %v13058_v61 = vpop.permute.xlu1 %3953 }
 0x5cc   : > { %17766 = vst [vmem:[#allocation200_spill] sm:$0xff] %v13056_v42  ;;  %17767 = vst [vmem:[#allocation201_spill] sm:$0xff] %v13058_v61 }
 0x5cd   : > { %4190 = vrot.lane.b32.xlu0 %v12456_v51, %s8090_s26  ;;  %4188 = vrot.lane.b32.xlu1 %v12437_v17, %s8090_s26 }
 0x5cf   : > { %v13064_v14 = vpop.permute.xlu0 %3961  ;;  %v13066_v45 = vpop.permute.xlu1 %3957 }
 0x5d0   : > { %17768 = vst [vmem:[#allocation202_spill] sm:$0xff] %v13064_v14  ;;  %17769 = vst [vmem:[#allocation203_spill] sm:$0xff] %v13066_v45 }
 0x5d1   : > { %4196 = vrot.lane.b32.xlu0 %v12471_v35, %s8090_s26  ;;  %4192 = vrot.lane.b32.xlu1 %v12453_v50, %s8090_s26 }
 0x5d3   : > { %v13072_v11 = vpop.permute.xlu0 %3965  ;;  %v13074_v42 = vpop.permute.xlu1 %3963 }
 0x5d4   : > { %17770 = vst [vmem:[#allocation204_spill] sm:$0xff] %v13072_v11  ;;  %17771 = vst [vmem:[#allocation205_spill] sm:$0xff] %v13074_v42 }
 0x5d5   : > { %4200 = vrot.lane.b32.xlu0 %v12488_v43, %s8090_s26  ;;  %4198 = vrot.lane.b32.xlu1 %v12491_v55, %s8090_s26 }
 0x5d7   : > { %v13080_v61 = vpop.permute.xlu0 %3969  ;;  %v13082_v14 = vpop.permute.xlu1 %7744 }
 0x5d8   : > { %17772 = vst [vmem:[#allocation302_spill] sm:$0xff] %v13080_v61  ;;  %17773 = vst [vmem:[#allocation206_spill] sm:$0xff] %v13082_v14 }
 0x5d9   : > { %4204 = vrot.lane.b32.xlu0 %v12507_v22, %s8090_s26  ;;  %7814 = vrot.lane.b32.xlu1 %v12324_v16, %s8090_s26 }
 0x5db   : > { %v13088_v45 = vpop.permute.xlu0 %3973  ;;  %v13090_v11 = vpop.permute.xlu1 %3971 }
 0x5dc   : > { %17774 = vst [vmem:[#allocation207_spill] sm:$0xff] %v13088_v45  ;;  %17775 = vst [vmem:[#allocation208_spill] sm:$0xff] %v13090_v11 }
 0x5dd   : > { %4208 = vrot.lane.b32.xlu0 %v12523_v27, %s8090_s26  ;;  %4206 = vrot.lane.b32.xlu1 %v12526_v28, %s8090_s26 }
 0x5df   : > { %v13096_v42 = vpop.permute.xlu0 %3979  ;;  %v13098_v61 = vpop.permute.xlu1 %3977 }
 0x5e0   : > { %17776 = vst [vmem:[#allocation304_spill] sm:$0xff] %v13096_v42  ;;  %17777 = vst [vmem:[#allocation209_spill] sm:$0xff] %v13098_v61 }
 0x5e1   : > { %4214 = vrot.lane.b32.xlu0 %v12561_v29, %s8090_s26  ;;  %4212 = vrot.lane.b32.xlu1 %v12541_v19, %s8090_s26 }
 0x5e3   : > { %v13104_v14 = vpop.permute.xlu0 %7749  ;;  %v13106_v45 = vpop.permute.xlu1 %3981 }
 0x5e4   : > { %17778 = vst [vmem:[#allocation210_spill] sm:$0xff] %v13104_v14  ;;  %17779 = vst [vmem:[#allocation211_spill] sm:$0xff] %v13106_v45 }
 0x5e5   : > { %7819 = vrot.lane.b32.xlu0 %v12324_v16, %s8090_s26  ;;  %4216 = vrot.lane.b32.xlu1 %v12558_v58, %s8090_s26  ;;  %v17835_v58 = vld [vmem:[#allocation171_spill] sm:$0xff] }
 0x5e7   : > { %v13112_v11 = vpop.permute.xlu0 %3987  ;;  %v13114_v42 = vpop.permute.xlu1 %3985 }
 0x5e8   : > { %17780 = vst [vmem:[#allocation212_spill] sm:$0xff] %v13112_v11  ;;  %17781 = vst [vmem:[#allocation213_spill] sm:$0xff] %v13114_v42  ;;  %v4158_v42 = vrot.slane %v12998_v7, 1 }
 0x5e9   : > { %4222 = vrot.lane.b32.xlu0 %v12596_v23, %s8090_s26  ;;  %4220 = vrot.lane.b32.xlu1 %v12577_v59, %s8090_s26 }
 0x5ea   : > { %v13144_v54 = vsel %vm526_vm0, %v17789_v38, %v4158_v42 }
 0x5eb   : > { %v13120_v61 = vpop.permute.xlu0 %7754  ;;  %v13122_v14 = vpop.permute.xlu1 %3989  ;;  %17790 = vst [vmem:[#allocation218_spill] sm:$0xff] %v13144_v54 }
 0x5ec   : > { %17782 = vst [vmem:[#allocation214_spill] sm:$0xff] %v13120_v61  ;;  %17783 = vst [vmem:[#allocation215_spill] sm:$0xff] %v13122_v14  ;;  %v17820_v61 = vld [vmem:[#allocation148_spill] sm:$0xff] }
 0x5ed   : > { %4228 = vrot.lane.b32.xlu0 %v12610_v49, %s8090_s26  ;;  %4224 = vrot.lane.b32.xlu1 %v12593_v4, %s8090_s26  ;;  %v17831_v4 = vld [vmem:[#allocation153_spill] sm:$0xff] }
 0x5ef   : > { %v13128_v45 = vpop.permute.xlu0 %4041  ;;  %v13130_v11 = vpop.permute.xlu1 %4039 }
 0x5f0   : > { %17784 = vst [vmem:[#allocation216_spill] sm:$0xff] %v13128_v45  ;;  %17785 = vst [vmem:[#allocation217_spill] sm:$0xff] %v13130_v11 }
 0x5f1   : > { %4232 = vrot.lane.b32.xlu0 %v12630_v37, %s8090_s26  ;;  %4230 = vrot.lane.b32.xlu1 %v17786_v13, %s8090_s26  ;;  %v17827_v13 = vld [vmem:[#allocation373_spill] sm:$0xff] }
 0x5f3   : > { %v13137_v47 = vpop.permute.xlu0 %4047  ;;  %v13139_v14 = vpop.permute.xlu1 %7759 }
 0x5f4   : > { %17787 = vst [vmem:[#allocation70_spill] sm:$0xff] %v13137_v47  ;;  %17788 = vst [vmem:[#allocation299_spill] sm:$0xff] %v13139_v14  ;;  %v13156_v47 = vsel %vm526_vm0, %v4160_v31, %v17789_v38  ;;  %v13159_v14 = vsel %vm526_vm0, %v4158_v42, %v4160_v31  ;;  %v17801_v42 = vld [vmem:[#allocation133_spill] sm:$0xff] }
 0x5f5   : > { %4236 = vrot.lane.b32.xlu0 %v13144_v54, %s8090_s26  ;;  %7824 = vrot.lane.b32.xlu1 %v12324_v16, %s8090_s26  ;;  %17793 = vst [vmem:[#allocation219_spill] sm:$0xff] %v13156_v47  ;;  %17794 = vst [vmem:[#allocation73_spill] sm:$0xff] %v13159_v14 }
 0x5f7   : > { %v13150_v56 = vpop.permute.xlu0 %7764  ;;  %v13152_v45 = vpop.permute.xlu1 %4049 }
 0x5f8   : > { %17791 = vst [vmem:[#allocation71_spill] sm:$0xff] %v13150_v56  ;;  %17792 = vst [vmem:[#allocation408_spill] sm:$0xff] %v13152_v45  ;;  %v17797_v56 = vld [vmem:[#allocation130_spill] sm:$0xff]  ;;  %v17798_v45 = vld [vmem:[#allocation353_spill] sm:$0xff] }
 0x5f9   : > { %4240 = vrot.lane.b32.xlu0 %v13156_v47, %s8090_s26  ;;  %4238 = vrot.lane.b32.xlu1 %v13159_v14, %s8090_s26  ;;  %v17816_v14 = vld [vmem:[#allocation141_spill] sm:$0xff]  ;;  %s8095_s26 = smov 64  }
 0x5fb   : > { %v13165_v54 = vpop.permute.xlu0 %4057  ;;  %v13167_v11 = vpop.permute.xlu1 %4055 }
 0x5fc   : > { %17795 = vst [vmem:[#allocation232_spill] sm:$0xff] %v13165_v54  ;;  %17796 = vst [vmem:[#allocation220_spill] sm:$0xff] %v13167_v11 }
 0x5fd   : > { %4293 = vrot.lane.b32.xlu0 %v17797_v56, %s8092_s17  ;;  %4291 = vrot.lane.b32.xlu1 %v17798_v45, %s8092_s17  ;;  %v17804_v56 = vld [vmem:[#allocation356_spill] sm:$0xff] }
 0x5ff   : > { %v13173_v38 = vpop.permute.xlu0 %4063  ;;  %v13175_v31 = vpop.permute.xlu1 %7769 }
 0x600   : > { %17799 = vst [vmem:[#allocation76_spill] sm:$0xff] %v13173_v38  ;;  %17800 = vst [vmem:[#allocation233_spill] sm:$0xff] %v13175_v31 }
 0x601   : > { %7829 = vrot.lane.b32.xlu0 %v12648_v21, %s8092_s17  ;;  %4295 = vrot.lane.b32.xlu1 %v17801_v42, %s8092_s17 }
 0x603   : > { %v13181_v54 = vpop.permute.xlu0 %7774  ;;  %v13183_v11 = vpop.permute.xlu1 %4065 }
 0x604   : > { %17802 = vst [vmem:[#allocation247_spill] sm:$0xff] %v13181_v54  ;;  %17803 = vst [vmem:[#allocation221_spill] sm:$0xff] %v13183_v11  ;;  %v17809_v11 = vld [vmem:[#allocation361_spill] sm:$0xff] }
 0x605   : > { %4301 = vrot.lane.b32.xlu0 %v12698_v53, %s8092_s17  ;;  %4299 = vrot.lane.b32.xlu1 %v17804_v56, %s8092_s17 }
 0x607   : > { %v13189_v45 = vpop.permute.xlu0 %4073  ;;  %v13191_v38 = vpop.permute.xlu1 %4071 }
 0x608   : > { %17805 = vst [vmem:[#allocation78_spill] sm:$0xff] %v13189_v45  ;;  %17806 = vst [vmem:[#allocation248_spill] sm:$0xff] %v13191_v38  ;;  %v17812_v38 = vld [vmem:[#allocation365_spill] sm:$0xff] }
 0x609   : > { %4307 = vrot.lane.b32.xlu0 %v12721_v3, %s8092_s17  ;;  %4303 = vrot.lane.b32.xlu1 %v12695_v44, %s8092_s17 }
 0x60b   : > { %v13197_v42 = vpop.permute.xlu0 %4079  ;;  %v13199_v54 = vpop.permute.xlu1 %7779 }
 0x60c   : > { %17807 = vst [vmem:[#allocation305_spill] sm:$0xff] %v13197_v42  ;;  %17808 = vst [vmem:[#allocation222_spill] sm:$0xff] %v13199_v54  ;;  %v17815_v54 = vld [vmem:[#allocation368_spill] sm:$0xff] }
 0x60d   : > { %4311 = vrot.lane.b32.xlu0 %v12732_v12, %s8092_s17  ;;  %4309 = vrot.lane.b32.xlu1 %v17809_v11, %s8092_s17 }
 0x60f   : > { %v13205_v31 = vpop.permute.xlu0 %7784  ;;  %v13207_v45 = vpop.permute.xlu1 %4081 }
 0x610   : > { %17810 = vst [vmem:[#allocation80_spill] sm:$0xff] %v13205_v31  ;;  %17811 = vst [vmem:[#allocation306_spill] sm:$0xff] %v13207_v45  ;;  %v17819_v45 = vld [vmem:[#allocation369_spill] sm:$0xff] }
 0x611   : > { %4315 = vrot.lane.b32.xlu0 %v17812_v38, %s8092_s17  ;;  %7834 = vrot.lane.b32.xlu1 %v12648_v21, %s8092_s17 }
 0x613   : > { %v13213_v47 = vpop.permute.xlu0 %4089  ;;  %v13215_v42 = vpop.permute.xlu1 %4087 }
 0x614   : > { %17813 = vst [vmem:[#allocation407_spill] sm:$0xff] %v13213_v47  ;;  %17814 = vst [vmem:[#allocation234_spill] sm:$0xff] %v13215_v42  ;;  %v17823_v42 = vld [vmem:[#allocation169_spill] sm:$0xff] }
 0x615   : > { %4319 = vrot.lane.b32.xlu0 %v17815_v54, %s8092_s17  ;;  %4317 = vrot.lane.b32.xlu1 %v17816_v14, %s8092_s17 }
 0x617   : > { %v13221_v46 = vpop.permute.xlu0 %4095  ;;  %v13223_v31 = vpop.permute.xlu1 %7789 }
 0x618   : > { %17817 = vst [vmem:[#allocation235_spill] sm:$0xff] %v13221_v46  ;;  %17818 = vst [vmem:[#allocation409_spill] sm:$0xff] %v13223_v31  ;;  %v17826_v31 = vld [vmem:[#allocation377_spill] sm:$0xff] }
 0x619   : > { %4325 = vrot.lane.b32.xlu0 %v17819_v45, %s8092_s17  ;;  %4323 = vrot.lane.b32.xlu1 %v17820_v61, %s8092_s17 }
 0x61b   : > { %v13229_v37 = vpop.permute.xlu0 %7794  ;;  %v13231_v47 = vpop.permute.xlu1 %4097 }
 0x61c   : > { %17821 = vst [vmem:[#allocation458_spill] sm:$0xff] %v13229_v37  ;;  %17822 = vst [vmem:[#allocation249_spill] sm:$0xff] %v13231_v47  ;;  %v17830_v47 = vld [vmem:[#allocation380_spill] sm:$0xff] }
 0x61d   : > { %7839 = vrot.lane.b32.xlu0 %v12648_v21, %s8092_s17  ;;  %4327 = vrot.lane.b32.xlu1 %v17823_v42, %s8092_s17 }
 0x61f   : > { %v13237_v49 = vpop.permute.xlu0 %4105  ;;  %v13239_v46 = vpop.permute.xlu1 %4103 }
 0x620   : > { %17824 = vst [vmem:[#allocation250_spill] sm:$0xff] %v13237_v49  ;;  %17825 = vst [vmem:[#allocation459_spill] sm:$0xff] %v13239_v46  ;;  %v17834_v46 = vld [vmem:[#allocation381_spill] sm:$0xff] }
 0x621   : > { %4333 = vrot.lane.b32.xlu0 %v17826_v31, %s8092_s17  ;;  %4331 = vrot.lane.b32.xlu1 %v17827_v13, %s8092_s17 }
 0x623   : > { %v13245_v23 = vpop.permute.xlu0 %4111  ;;  %v13247_v37 = vpop.permute.xlu1 %7799 }
 0x624   : > { %17828 = vst [vmem:[#allocation307_spill] sm:$0xff] %v13245_v23  ;;  %17829 = vst [vmem:[#allocation308_spill] sm:$0xff] %v13247_v37 }
 0x625   : > { %4339 = vrot.lane.b32.xlu0 %v17830_v47, %s8092_s17  ;;  %4335 = vrot.lane.b32.xlu1 %v17831_v4, %s8092_s17 }
 0x627   : > { %v13253_v59 = vpop.permute.xlu0 %4164  ;;  %v13255_v49 = vpop.permute.xlu1 %4113 }
 0x628   : > { %17832 = vst [vmem:[#allocation410_spill] sm:$0xff] %v13253_v59  ;;  %17833 = vst [vmem:[#allocation223_spill] sm:$0xff] %v13255_v49  ;;  %v17840_v49 = vld [vmem:[#allocation388_spill] sm:$0xff] }
 0x629   : > { %4343 = vrot.lane.b32.xlu0 %v17834_v46, %s8092_s17  ;;  %4341 = vrot.lane.b32.xlu1 %v17835_v58, %s8092_s17  ;;  %v17841_v46 = vld [vmem:[#allocation47_spill] sm:$0xff] }
 0x62b   : > { %v13261_v19 = vpop.permute.xlu0 %4168  ;;  %v13263_v23 = vpop.permute.xlu1 %4166 }
 0x62c   : > { %17836 = vst [vmem:[#allocation81_spill] sm:$0xff] %v13261_v19  ;;  %17837 = vst [vmem:[#allocation2_spill] sm:$0xff] %v13263_v23 }
 0x62d   : > { %4347 = vrot.lane.b32.xlu0 %v12852_v36, %s8092_s17  ;;  %7844 = vrot.lane.b32.xlu1 %v12648_v21, %s8092_s17 }
 0x62f   : > { %v13269_v37 = vpop.permute.xlu0 %4172  ;;  %v13271_v59 = vpop.permute.xlu1 %7804 }
 0x630   : > { %17838 = vst [vmem:[#allocation411_spill] sm:$0xff] %v13269_v37  ;;  %17839 = vst [vmem:[#allocation460_spill] sm:$0xff] %v13271_v59  ;;  %v4285_v59 = vrot.slane %v12998_v7, 2 }
 0x631   : > { %4351 = vrot.lane.b32.xlu0 %v17840_v49, %s8092_s17  ;;  %4349 = vrot.lane.b32.xlu1 %v17841_v46, %s8092_s17  ;;  %v4287_v49 = vrot.slane %v13010_v52, 2 }
 0x633   : > { %v13277_v58 = vpop.permute.xlu0 %4176  ;;  %v13279_v19 = vpop.permute.xlu1 %4174 }
 0x634   : > { %17842 = vst [vmem:[#allocation72_spill] sm:$0xff] %v13277_v58  ;;  %17843 = vst [vmem:[#allocation461_spill] sm:$0xff] %v13279_v19 }
 0x635   : > { %4357 = vrot.lane.b32.xlu0 %v12875_v40, %s8092_s17  ;;  %4355 = vrot.lane.b32.xlu1 %v12879_v15, %s8092_s17  ;;  %v13300_v40 = vsel %vm815_vm1, %v4285_v59, %v4287_v49 }
 0x637   : > { %v13285_v23 = vpop.permute.xlu0 %4182  ;;  %v13287_v37 = vpop.permute.xlu1 %4180 }
 0x638   : > { %17844 = vst [vmem:[#allocation3_spill] sm:$0xff] %v13285_v23  ;;  %17845 = vst [vmem:[#allocation309_spill] sm:$0xff] %v13287_v37  ;;  %v17848_v23 = vld [vmem:[#allocation167_spill] sm:$0xff] }
 0x639   : > { %7849 = vrot.lane.b32.xlu0 %v12648_v21, %s8092_s17  ;;  %4359 = vrot.lane.b32.xlu1 %v12889_v8, %s8092_s17  ;;  %v13304_v37 = vsel %vm815_vm1, %v17848_v23, %v4285_v59 }
 0x63b   : > { %v13295_v58 = vpop.permute.xlu0 %7809  ;;  %v13297_v19 = vpop.permute.xlu1 %4184 }
 0x63c   : > { %17846 = vst [vmem:[#allocation5_spill] sm:$0xff] %v13295_v58  ;;  %17847 = vst [vmem:[#allocation74_spill] sm:$0xff] %v13297_v19  ;;  %v13316_v58 = vsel %vm815_vm1, %v4287_v49, %v17848_v23 }
 0x63d   : > { %4365 = vrot.lane.b32.xlu0 %v13300_v40, %s8092_s17  ;;  %4363 = vrot.lane.b32.xlu1 %v13304_v37, %s8092_s17 }
 0x63f   : > { %v13310_v7 = vpop.permute.xlu0 %4190  ;;  %v13312_v52 = vpop.permute.xlu1 %4188 }
 0x640   : > { %17849 = vst [vmem:[#allocation412_spill] sm:$0xff] %v13310_v7  ;;  %17850 = vst [vmem:[#allocation6_spill] sm:$0xff] %v13312_v52 }
 0x641   : > { %7854 = vrot.lane.b32.xlu0 %v17727_v41, %s8093_s18  ;;  %4367 = vrot.lane.b32.xlu1 %v13316_v58, %s8092_s17 }
 0x643   : > { %v13322_v59 = vpop.permute.xlu0 %4196  ;;  %v13324_v19 = vpop.permute.xlu1 %4192 }
 0x644   : > { %17851 = vst [vmem:[#allocation310_spill] sm:$0xff] %v13322_v59  ;;  %17852 = vst [vmem:[#allocation82_spill] sm:$0xff] %v13324_v19 }
 0x645   : > { %4419 = vrot.lane.b32.xlu0 %v12373_v30, %s8093_s18  ;;  %4417 = vrot.lane.b32.xlu1 %v12361_v24, %s8093_s18 }
 0x647   : > { %v13330_v7 = vpop.permute.xlu0 %4200  ;;  %v13332_v49 = vpop.permute.xlu1 %4198 }
 0x648   : > { %17853 = vst [vmem:[#allocation77_spill] sm:$0xff] %v13330_v7  ;;  %17854 = vst [vmem:[#allocation413_spill] sm:$0xff] %v13332_v49 }
 0x649   : > { %4425 = vrot.lane.b32.xlu0 %v12390_v0, %s8093_s18  ;;  %7859 = vrot.lane.b32.xlu1 %v17727_v41, %s8093_s18 }
 0x64b   : > { %v13338_v52 = vpop.permute.xlu0 %4204  ;;  %v13340_v59 = vpop.permute.xlu1 %7814 }
 0x64c   : > { %17855 = vst [vmem:[#allocation79_spill] sm:$0xff] %v13338_v52  ;;  %17856 = vst [vmem:[#allocation311_spill] sm:$0xff] %v13340_v59 }
 0x64d   : > { %7864 = vrot.lane.b32.xlu0 %v17727_v41, %s8093_s18  ;;  %4427 = vrot.lane.b32.xlu1 %v12409_v26, %s8093_s18 }
 0x64f   : > { %v13346_v19 = vpop.permute.xlu0 %4208  ;;  %v13348_v7 = vpop.permute.xlu1 %4206 }
 0x650   : > { %17857 = vst [vmem:[#allocation84_spill] sm:$0xff] %v13346_v19  ;;  %17858 = vst [vmem:[#allocation4_spill] sm:$0xff] %v13348_v7 }
 0x651   : > { %4435 = vrot.lane.b32.xlu0 %v12443_v39, %s8093_s18  ;;  %4433 = vrot.lane.b32.xlu1 %v12431_v5, %s8093_s18  ;;  %v17939_v39 = vld [vmem:[#allocation81_spill] sm:$0xff] }
 0x653   : > { %v13354_v49 = vpop.permute.xlu0 %4214  ;;  %v13356_v52 = vpop.permute.xlu1 %4212 }
 0x654   : > { %17859 = vst [vmem:[#allocation312_spill] sm:$0xff] %v13354_v49  ;;  %17860 = vst [vmem:[#allocation414_spill] sm:$0xff] %v13356_v52 }
 0x655   : > { %4441 = vrot.lane.b32.xlu0 %v12460_v9, %s8093_s18  ;;  %7869 = vrot.lane.b32.xlu1 %v17727_v41, %s8093_s18 }
 0x657   : > { %v13362_v59 = vpop.permute.xlu0 %7819  ;;  %v13364_v19 = vpop.permute.xlu1 %4216 }
 0x658   : > { %17861 = vst [vmem:[#allocation7_spill] sm:$0xff] %v13362_v59  ;;  %17862 = vst [vmem:[#allocation415_spill] sm:$0xff] %v13364_v19  ;;  %v3603_v19 = vld [vmem:[%s15950_s4] sm:$0xff] }
 0x659   : > { %7874 = vrot.lane.b32.xlu0 %v17727_v41, %s8093_s18  ;;  %4443 = vrot.lane.b32.xlu1 %v12479_v62, %s8093_s18 }
 0x65b   : > { %v13370_v7 = vpop.permute.xlu0 %4222  ;;  %v13372_v49 = vpop.permute.xlu1 %4220 }
 0x65c   : > { %17863 = vst [vmem:[#allocation87_spill] sm:$0xff] %v13370_v7  ;;  %17864 = vst [vmem:[#allocation75_spill] sm:$0xff] %v13372_v49  ;;  %v3604_v7 = vld [vmem:[%s15950_s4 + $0x8] sm:$0xff] }
 0x65d   : > { %4451 = vrot.lane.b32.xlu0 %v12513_v48, %s8093_s18  ;;  %4449 = vrot.lane.b32.xlu1 %v12501_v18, %s8093_s18  ;;  %v7594_v49 = vpack.c.bf16 %v3604_v7, %v3603_v19  ;;  %v3606_v18 = vld [vmem:[%s15950_s4 + $0x18] sm:$0xff] }
 0x65f   : > { %v13378_v52 = vpop.permute.xlu0 %4228  ;;  %v13380_v59 = vpop.permute.xlu1 %4224  ;;  %7595 = vmatprep.subr.bf16.mxu1 %v7594_v49 }
 0x660   : > { %17865 = vst [vmem:[#allocation251_spill] sm:$0xff] %v13378_v52  ;;  %17866 = vst [vmem:[#allocation89_spill] sm:$0xff] %v13380_v59  ;;  %7597 = vmatpush3.bf16.msra.mxu1 %v7594_v49  ;;  %v3605_v59 = vld [vmem:[%s15950_s4 + $0x10] sm:$0xff]  ;;  %v3607_v49 = vld [vmem:[%s15950_s4 + $0x20] sm:$0xff] }
 0x661   : > { %4457 = vrot.lane.b32.xlu0 %v12530_v63, %s8093_s18  ;;  %7879 = vrot.lane.b32.xlu1 %v17727_v41, %s8093_s18  ;;  %v7598_v19 = vpack.c.bf16 %v3606_v18, %v3605_v59 }
 0x663   : > { %v13392_v48 = vpop.permute.xlu0 %4232  ;;  %v13394_v52 = vpop.permute.xlu1 %4230  ;;  %7599 = vmatprep.subr.bf16.mxu1 %v7598_v19 }
 0x664   : > { %17867 = vst [vmem:[#allocation314_spill] sm:$0xff] %v13392_v48  ;;  %17868 = vst [vmem:[#allocation8_spill] sm:$0xff] %v13394_v52  ;;  %7601 = vmatpush3.bf16.msra.mxu1 %v7598_v19  ;;  %v3608_v48 = vld [vmem:[%s15950_s4 + $0x28] sm:$0xff]  ;;  %v3609_v19 = vld [vmem:[%s15950_s4 + $0x30] sm:$0xff] }
 0x665   : > { %7884 = vrot.lane.b32.xlu0 %v17727_v41, %s8093_s18  ;;  %4459 = vrot.lane.b32.xlu1 %v12549_v2, %s8093_s18  ;;  %v7602_v18 = vpack.c.bf16 %v3608_v48, %v3607_v49 }
 0x667   : > { %v13406_v7 = vpop.permute.xlu0 %4236  ;;  %v13408_v52 = vpop.permute.xlu1 %7824  ;;  %7603 = vmatprep.subr.bf16.mxu1 %v7602_v18 }
 0x668   : > { %17869 = vst [vmem:[#allocation315_spill] sm:$0xff] %v13406_v7  ;;  %17870 = vst [vmem:[#allocation416_spill] sm:$0xff] %v13408_v52  ;;  %7605 = vmatpush3.bf16.msra.mxu1 %v7602_v18  ;;  %v3610_v52 = vld [vmem:[%s15950_s4 + $0x38] sm:$0xff]  ;;  %v3611_v18 = vld [vmem:[%s15950_s4 + $0x40] sm:$0xff] }
 0x669   : > { %4467 = vrot.lane.b32.xlu0 %v12583_v60, %s8093_s18  ;;  %4465 = vrot.lane.b32.xlu1 %v12571_v33, %s8093_s18  ;;  %v7606_v48 = vpack.c.bf16 %v3610_v52, %v3609_v19 }
 0x66b   : > { %v13420_v59 = vpop.permute.xlu0 %4240  ;;  %v13422_v7 = vpop.permute.xlu1 %4238  ;;  %7607 = vmatprep.subr.bf16.mxu1 %v7606_v48 }
 0x66c   : > { %17871 = vst [vmem:[#allocation10_spill] sm:$0xff] %v13420_v59  ;;  %17872 = vst [vmem:[#allocation417_spill] sm:$0xff] %v13422_v7  ;;  %7609 = vmatpush3.bf16.msra.mxu1 %v7606_v48 }
 0x66d   : > { %4473 = vrot.lane.b32.xlu0 %v12600_v1, %s8093_s18  ;;  %7889 = vrot.lane.b32.xlu1 %v17727_v41, %s8093_s18 }
 0x66e   : > { %7487 = vmatprep.subr.mxu1 %v3611_v18 }
 0x66f   : > { %v13434_v49 = vpop.permute.xlu0 %4293  ;;  %v13436_v59 = vpop.permute.xlu1 %4291 }
 0x670   : > { %7488 = vmatpush3.msra.mxu1 %v3611_v18 }
 0x671   : > { %4542 = vrot.lane.b32.xlu0 %v12367_v10, %s8094_s23  ;;  %4475 = vrot.lane.b32.xlu1 %v12618_v34, %s8093_s18 }
 0x673   : > { %v13445_v7 = vpop.permute.xlu0 %7829  ;;  %v13447_v52 = vpop.permute.xlu1 %4295 }
 0x675   : > { %4546 = vrot.lane.b32.xlu0 %v12383_v32, %s8094_s23  ;;  %4544 = vrot.lane.b32.xlu1 %v12386_v57, %s8094_s23 }
 0x677   : > { %v13453_v10 = vpop.permute.xlu0 %4301  ;;  %v13455_v19 = vpop.permute.xlu1 %4299 }
 0x679   : > { %4671 = vrot.lane.b32.xlu0 %v12698_v53, %s8095_s26  ;;  %4669 = vrot.lane.b32.xlu1 %v17804_v56, %s8095_s26 }
 0x67b   : > { %v13461_v48 = vpop.permute.xlu0 %4307  ;;  %v13463_v18 = vpop.permute.xlu1 %4303 }
 0x67d   : > { %7894 = vrot.lane.b32.xlu0 %v12324_v16, %s8094_s23  ;;  %4673 = vrot.lane.b32.xlu1 %v12695_v44, %s8095_s26 }
 0x67f   : > { %v13469_v32 = vpop.permute.xlu0 %4311  ;;  %v13471_v57 = vpop.permute.xlu1 %4309 }
 0x681   : > { %4552 = vrot.lane.b32.xlu0 %v12421_v6, %s8094_s23  ;;  %4550 = vrot.lane.b32.xlu1 %v12401_v20, %s8094_s23 }
 0x683   : > { %v13477_v53 = vpop.permute.xlu0 %4315  ;;  %v13479_v56 = vpop.permute.xlu1 %7834 }
 0x685   : > { %4677 = vrot.lane.b32.xlu0 %v12721_v3, %s8095_s26  ;;  %7899 = vrot.lane.b32.xlu1 %v12648_v21, %s8095_s26 }
 0x687   : > { %v13485_v44 = vpop.permute.xlu0 %4319  ;;  %v13487_v34 = vpop.permute.xlu1 %4317 }
 0x689   : > { %4554 = vrot.lane.b32.xlu0 %v12418_v25, %s8094_s23  ;;  %4679 = vrot.lane.b32.xlu1 %v17809_v11, %s8095_s26 }
 0x68b   : > { %v13493_v20 = vpop.permute.xlu0 %4325  ;;  %v13495_v6 = vpop.permute.xlu1 %4323 }
 0x68c   : > { %17873 = vst [vmem:[#allocation85_spill] sm:$0xff] %v13493_v20  ;;  %17874 = vst [vmem:[#allocation252_spill] sm:$0xff] %v13495_v6 }
 0x68d   : > { %4558 = vrot.lane.b32.xlu0 %v12437_v17, %s8094_s23  ;;  %4681 = vrot.lane.b32.xlu1 %v12732_v12, %s8095_s26 }
 0x68f   : > { %v13501_v3 = vpop.permute.xlu0 %7839  ;;  %v13503_v1 = vpop.permute.xlu1 %4327 }
 0x690   : > { %17875 = vst [vmem:[#allocation92_spill] sm:$0xff] %v13501_v3  ;;  %17876 = vst [vmem:[#allocation253_spill] sm:$0xff] %v13503_v1  ;;  %v17926_v3 = vld [vmem:[#allocation131_spill] sm:$0xff]  ;;  %v17932_v1 = vld [vmem:[#allocation2_spill] sm:$0xff] }
 0x691   : > { %4562 = vrot.lane.b32.xlu0 %v12453_v50, %s8094_s23  ;;  %4560 = vrot.lane.b32.xlu1 %v12456_v51, %s8094_s23  ;;  %v17927_v9 = vrot.slane %v17926_v3, 1 }
 0x693   : > { %v13509_v25 = vpop.permute.xlu0 %4333  ;;  %v13511_v11 = vpop.permute.xlu1 %4331 }
 0x694   : > { %17877 = vst [vmem:[#allocation318_spill] sm:$0xff] %v13509_v25  ;;  %17878 = vst [vmem:[#allocation11_spill] sm:$0xff] %v13511_v11  ;;  %v17924_v25 = vld [vmem:[#allocation183_spill] sm:$0xff] }
 0x695   : > { %4687 = vrot.lane.b32.xlu0 %v17816_v14, %s8095_s26  ;;  %4685 = vrot.lane.b32.xlu1 %v17812_v38, %s8095_s26 }
 0x697   : > { %v13517_v17 = vpop.permute.xlu0 %4339  ;;  %v13519_v12 = vpop.permute.xlu1 %4335 }
 0x698   : > { %17879 = vst [vmem:[#allocation319_spill] sm:$0xff] %v13517_v17  ;;  %17880 = vst [vmem:[#allocation418_spill] sm:$0xff] %v13519_v12  ;;  %v17922_v12 = vld [vmem:[#allocation188_spill] sm:$0xff] }
 0x699   : > { %7904 = vrot.lane.b32.xlu0 %v12324_v16, %s8094_s23  ;;  %4689 = vrot.lane.b32.xlu1 %v17815_v54, %s8095_s26 }
 0x69b   : > { %v13525_v50 = vpop.permute.xlu0 %4343  ;;  %v13527_v51 = vpop.permute.xlu1 %4341 }
 0x69c   : > { %17881 = vst [vmem:[#allocation9_spill] sm:$0xff] %v13525_v50  ;;  %17882 = vst [vmem:[#allocation419_spill] sm:$0xff] %v13527_v51  ;;  %v17912_v50 = vld [vmem:[#allocation128_spill] sm:$0xff] }
 0x69d   : > { %4568 = vrot.lane.b32.xlu0 %v12491_v55, %s8094_s23  ;;  %4566 = vrot.lane.b32.xlu1 %v12471_v35, %s8094_s23 }
 0x69f   : > { %v13533_v38 = vpop.permute.xlu0 %4347  ;;  %v13535_v14 = vpop.permute.xlu1 %7844 }
 0x6a0   : > { %17883 = vst [vmem:[#allocation94_spill] sm:$0xff] %v13533_v38  ;;  %17884 = vst [vmem:[#allocation254_spill] sm:$0xff] %v13535_v14  ;;  %v17906_v14 = vld [vmem:[#allocation352_spill] sm:$0xff] }
 0x6a1   : > { %4693 = vrot.lane.b32.xlu0 %v17820_v61, %s8095_s26  ;;  %7909 = vrot.lane.b32.xlu1 %v12648_v21, %s8095_s26 }
 0x6a3   : > { %v13541_v54 = vpop.permute.xlu0 %4351  ;;  %v13543_v33 = vpop.permute.xlu1 %4349 }
 0x6a4   : > { %17885 = vst [vmem:[#allocation97_spill] sm:$0xff] %v13541_v54  ;;  %17886 = vst [vmem:[#allocation255_spill] sm:$0xff] %v13543_v33  ;;  %v17899_v54 = vld [vmem:[#allocation345_spill] sm:$0xff] }
 0x6a5   : > { %4570 = vrot.lane.b32.xlu0 %v12488_v43, %s8094_s23  ;;  %4695 = vrot.lane.b32.xlu1 %v17819_v45, %s8095_s26 }
 0x6a7   : > { %v13549_v35 = vpop.permute.xlu0 %4357  ;;  %v13551_v55 = vpop.permute.xlu1 %4355 }
 0x6a8   : > { %17887 = vst [vmem:[#allocation322_spill] sm:$0xff] %v13549_v35  ;;  %17888 = vst [vmem:[#allocation224_spill] sm:$0xff] %v13551_v55 }
 0x6a9   : > { %4574 = vrot.lane.b32.xlu0 %v12507_v22, %s8094_s23  ;;  %4697 = vrot.lane.b32.xlu1 %v17823_v42, %s8095_s26 }
 0x6ab   : > { %v13557_v61 = vpop.permute.xlu0 %7849  ;;  %v13559_v60 = vpop.permute.xlu1 %4359 }
 0x6ac   : > { %17889 = vst [vmem:[#allocation83_spill] sm:$0xff] %v13557_v61  ;;  %17890 = vst [vmem:[#allocation323_spill] sm:$0xff] %v13559_v60  ;;  %v17897_v60 = vld [vmem:[#allocation344_spill] sm:$0xff] }
 0x6ad   : > { %4578 = vrot.lane.b32.xlu0 %v12523_v27, %s8094_s23  ;;  %4576 = vrot.lane.b32.xlu1 %v12526_v28, %s8094_s23 }
 0x6af   : > { %v13565_v43 = vpop.permute.xlu0 %4365  ;;  %v13567_v45 = vpop.permute.xlu1 %4363 }
 0x6b0   : > { %17891 = vst [vmem:[#allocation420_spill] sm:$0xff] %v13565_v43  ;;  %17892 = vst [vmem:[#allocation225_spill] sm:$0xff] %v13567_v45  ;;  %v17895_v45 = vld [vmem:[#allocation50_spill] sm:$0xff] }
 0x6b1   : > { %4703 = vrot.lane.b32.xlu0 %v17826_v31, %s8095_s26  ;;  %4701 = vrot.lane.b32.xlu1 %v17827_v13, %s8095_s26  ;;  %v17894_v31 = vld [vmem:[#allocation118_spill] sm:$0xff] }
 0x6b3   : > { %v13573_v22 = vpop.permute.xlu0 %7854  ;;  %v13575_v42 = vpop.permute.xlu1 %4367 }
 0x6b4   : > { %17893 = vst [vmem:[#allocation86_spill] sm:$0xff] %v13575_v42 }
 0x6b5   : > { %7914 = vrot.lane.b32.xlu0 %v12324_v16, %s8094_s23  ;;  %4705 = vrot.lane.b32.xlu1 %v17831_v4, %s8095_s26 }
 0x6b7   : > { %v13581_v27 = vpop.permute.xlu0 %4419  ;;  %v13583_v28 = vpop.permute.xlu1 %4417 }
 0x6b9   : > { %4584 = vrot.lane.b32.xlu0 %v12561_v29, %s8094_s23  ;;  %4582 = vrot.lane.b32.xlu1 %v17894_v31, %s8094_s23  ;;  %v17896_v29 = vld [vmem:[#allocation171_spill] sm:$0xff] }
 0x6bb   : > { %v13589_v13 = vpop.permute.xlu0 %4425  ;;  %v13591_v43 = vpop.permute.xlu1 %7859 }
 0x6bd   : > { %4709 = vrot.lane.b32.xlu0 %v17830_v47, %s8095_s26  ;;  %7919 = vrot.lane.b32.xlu1 %v12648_v21, %s8095_s26  ;;  %v17898_v47 = vld [vmem:[#allocation381_spill] sm:$0xff] }
 0x6bf   : > { %v13597_v4 = vpop.permute.xlu0 %7864  ;;  %v13599_v42 = vpop.permute.xlu1 %4427 }
 0x6c1   : > { %4586 = vrot.lane.b32.xlu0 %v17895_v45, %s8094_s23  ;;  %4711 = vrot.lane.b32.xlu1 %v17896_v29, %s8095_s26  ;;  %v17900_v45 = vld [vmem:[#allocation123_spill] sm:$0xff] }
 0x6c3   : > { %v13605_v31 = vpop.permute.xlu0 %4435  ;;  %v13607_v61 = vpop.permute.xlu1 %4433 }
 0x6c5   : > { %4590 = vrot.lane.b32.xlu0 %v17897_v60, %s8094_s23  ;;  %4713 = vrot.lane.b32.xlu1 %v17898_v47, %s8095_s26 }
 0x6c7   : > { %v13613_v35 = vpop.permute.xlu0 %4441  ;;  %v13615_v55 = vpop.permute.xlu1 %7869 }
 0x6c9   : > { %4594 = vrot.lane.b32.xlu0 %v17899_v54, %s8094_s23  ;;  %4592 = vrot.lane.b32.xlu1 %v17900_v45, %s8094_s23  ;;  %v17903_v54 = vld [vmem:[#allocation388_spill] sm:$0xff] }
 0x6cb   : > { %v13621_v29 = vpop.permute.xlu0 %7874  ;;  %v13623_v33 = vpop.permute.xlu1 %4443 }
 0x6cd   : > { %4719 = vrot.lane.b32.xlu0 %v17841_v46, %s8095_s26  ;;  %4717 = vrot.lane.b32.xlu1 %v12852_v36, %s8095_s26  ;;  %v17907_v46 = vld [vmem:[#allocation126_spill] sm:$0xff] }
 0x6cf   : > { %v13629_v60 = vpop.permute.xlu0 %4451  ;;  %v13631_v47 = vpop.permute.xlu1 %4449 }
 0x6d0   : > { %17901 = vst [vmem:[#allocation12_spill] sm:$0xff] %v13629_v60  ;;  %17902 = vst [vmem:[#allocation421_spill] sm:$0xff] %v13631_v47  ;;  %v17934_v47 = vld [vmem:[#allocation73_spill] sm:$0xff] }
 0x6d1   : > { %7924 = vrot.lane.b32.xlu0 %v12324_v16, %s8094_s23  ;;  %4721 = vrot.lane.b32.xlu1 %v17903_v54, %s8095_s26 }
 0x6d3   : > { %v13637_v45 = vpop.permute.xlu0 %4457  ;;  %v13639_v38 = vpop.permute.xlu1 %7879 }
 0x6d4   : > { %17904 = vst [vmem:[#allocation99_spill] sm:$0xff] %v13637_v45  ;;  %17905 = vst [vmem:[#allocation256_spill] sm:$0xff] %v13639_v38  ;;  %v17923_v45 = vld [vmem:[#allocation182_spill] sm:$0xff] }
 0x6d5   : > { %4600 = vrot.lane.b32.xlu0 %v17906_v14, %s8094_s23  ;;  %4598 = vrot.lane.b32.xlu1 %v17907_v46, %s8094_s23  ;;  %v17913_v14 = vld [vmem:[#allocation389_spill] sm:$0xff] }
 0x6d7   : > { %v13645_v36 = vpop.permute.xlu0 %7884  ;;  %v13647_v2 = vpop.permute.xlu1 %4459 }
 0x6d8   : > { %17908 = vst [vmem:[#allocation95_spill] sm:$0xff] %v13645_v36  ;;  %17909 = vst [vmem:[#allocation13_spill] sm:$0xff] %v13647_v2  ;;  %v17918_v36 = vld [vmem:[#allocation138_spill] sm:$0xff]  ;;  %v17919_v2 = vld [vmem:[#allocation140_spill] sm:$0xff] }
 0x6d9   : > { %4725 = vrot.lane.b32.xlu0 %v12879_v15, %s8095_s26  ;;  %7929 = vrot.lane.b32.xlu1 %v12648_v21, %s8095_s26  ;;  %v17916_v15 = vld [vmem:[#allocation214_spill] sm:$0xff] }
 0x6db   : > { %v13653_v54 = vpop.permute.xlu0 %4467  ;;  %v13655_v63 = vpop.permute.xlu1 %4465 }
 0x6dc   : > { %17910 = vst [vmem:[#allocation326_spill] sm:$0xff] %v13653_v54  ;;  %17911 = vst [vmem:[#allocation15_spill] sm:$0xff] %v13655_v63  ;;  %v7756_v54 = vunpack.i.l.bf16 %v17916_v15 }
 0x6dd   : > { %4602 = vrot.lane.b32.xlu0 %v17912_v50, %s8094_s23  ;;  %4727 = vrot.lane.b32.xlu1 %v17913_v14, %s8095_s26  ;;  %v4789_v50 = vsel %vm2291_vm4, 0.0, %v17918_v36  ;;  %v17920_v14 = vld [vmem:[#allocation108_spill] sm:$0xff]  ;;  %v17925_v36 = vld [vmem:[#allocation217_spill] sm:$0xff] }
 0x6de   : > { %v4829_v11 = vsel %vm2413_vm6, %v4789_v50, %v17924_v25  ;;  %v17931_v50 = vld [vmem:[#allocation410_spill] sm:$0xff] }
 0x6df   : > { %v13661_v46 = vpop.permute.xlu0 %4473  ;;  %v13663_v51 = vpop.permute.xlu1 %7889 }
 0x6e0   : > { %17914 = vst [vmem:[#allocation257_spill] sm:$0xff] %v13661_v46  ;;  %17915 = vst [vmem:[#allocation422_spill] sm:$0xff] %v13663_v51  ;;  %v4790_v46 = vsel %vm2291_vm4, %v17920_v14, %v17919_v2  ;;  %v17921_v51 = vld [vmem:[#allocation191_spill] sm:$0xff]  ;;  %v4869_v2 = vsel %vm2535_vm8, %v4829_v11, %v7756_v54 }
 0x6e1   : > { %7934 = vrot.lane.b32.xlu0 %v17727_v41, %s8093_s18  ;;  %4729 = vrot.lane.b32.xlu1 %v12889_v8, %s8095_s26  ;;  %v4830_v8 = vsel %vm2413_vm6, %v4790_v46, %v17923_v45  ;;  %v17929_v45 = vld [vmem:[#allocation364_spill] sm:$0xff]  ;;  %v4909_v60 = vsel %vm2657_vm10, %v4869_v2, %v17931_v50  ;;  %v17933_v11 = vld [vmem:[#allocation143_spill] sm:$0xff] }
 0x6e2   : > { %v4870_v38 = vsel %vm2535_vm8, %v4830_v8, %v17925_v36  ;;  %v17930_v46 = vld [vmem:[#allocation332_spill] sm:$0xff]  ;;  %v7707_v54 = vunpack.i.h.bf16 %v17933_v11  ;;  %v7706_v2 = vunpack.i.l.bf16 %v17933_v11 }
 0x6e3   : > { %v4543_v17 = vpop.permute.xlu0 %4542  ;;  %v13670_v63 = vpop.permute.xlu1 %4475  ;;  %v4791_v25 = vsel %vm2291_vm4, %v17930_v46, %v17929_v45  ;;  %v4910_v8 = vsel %vm2657_vm10, %v4870_v38, %v17932_v1  ;;  %v17935_v45 = vld [vmem:[#allocation218_spill] sm:$0xff]  ;;  %v17936_v46 = vld [vmem:[#allocation185_spill] sm:$0xff]  ;;  %v17937_v50 = vld [vmem:[#allocation184_spill] sm:$0xff] }
 0x6e4   : > { %17917 = vst [vmem:[#allocation16_spill] sm:$0xff] %v13670_v63  ;;  %v7856_v63 = vunpack.i.l.bf16 %v13573_v22  ;;  %v4951_v36 = vsel %vm4949_vm13, %v4910_v8, %v13434_v49  ;;  %v4831_v1 = vsel %vm2413_vm6, %v4791_v25, %v17936_v46  ;;  %v7732_v8 = vunpack.i.h.bf16 %v17937_v50 }
 0x6e5   : > { %4483 = vrot.lane.b32.xlu0 %v17921_v51, %s8093_s18  ;;  %4481 = vrot.lane.b32.xlu1 %v17922_v12, %s8093_s18  ;;  %v17928_v12 = vld [vmem:[#allocation329_spill] sm:$0xff]  ;;  %v4992_v38 = vsel %vm4990_vm14, %v4951_v36, %v13583_v28  ;;  %v7731_v11 = vunpack.i.l.bf16 %v17937_v50 }
 0x6e6   : > { %v13693_v62 = vsel %vm526_vm0, %v17928_v12, %v17927_v9  ;;  %v4950_v9 = vsel %vm4949_vm13, %v4909_v60, %v13436_v59  ;;  %v17938_v59 = vld [vmem:[#allocation216_spill] sm:$0xff] }
 0x6e7   : > { %v4547_v14 = vpop.permute.xlu0 %4546  ;;  %v4545_v51 = vpop.permute.xlu1 %4544  ;;  %v4991_v49 = vsel %vm4990_vm14, %v4950_v9, %v7856_v63  ;;  %v4871_v60 = vsel %vm2535_vm8, %v4831_v1, %v17938_v59 }
 0x6e8   : > { %v4911_v25 = vsel %vm2657_vm10, %v4871_v60, %v17939_v39  ;;  %v4796_v39 = vsel %vm2291_vm4, 0.0, %v7707_v54  ;;  %v17945_v54 = vld [vmem:[#allocation110_spill] sm:$0xff] }
 0x6e9   : > { %4608 = vrot.lane.b32.xlu0 %v17934_v47, %s8094_s23  ;;  %4606 = vrot.lane.b32.xlu1 %v17935_v45, %s8094_s23  ;;  %v5032_v47 = vsel %vm5031_vm15, %v4991_v49, %v4543_v17  ;;  %v5033_v45 = vsel %vm5031_vm15, %v4992_v38, %v4545_v51  ;;  %v4952_v36 = vsel %vm4949_vm13, %v4911_v25, %v13447_v52  ;;  %v17940_v17 = vld [vmem:[#allocation219_spill] sm:$0xff]  ;;  %v17941_v51 = vld [vmem:[#allocation146_spill] sm:$0xff]  ;;  %v17943_v38 = vld [vmem:[#allocation333_spill] sm:$0xff] }
 0x6ea   : > { %v4793_v1 = vsel %vm2291_vm4, 0.0, %v17941_v51  ;;  %v17942_v52 = vld [vmem:[#allocation150_spill] sm:$0xff] }
 0x6eb   : > { %v4672_v6 = vpop.permute.xlu0 %4671  ;;  %v4670_v20 = vpop.permute.xlu1 %4669  ;;  %v4795_v49 = vsel %vm2291_vm4, %v17943_v38, %v17942_v52 }
 0x6ec   : > { %v5074_v28 = vsel %vm5072_vm3, %v5033_v45, %v4672_v6  ;;  %v5073_v63 = vsel %vm5072_vm3, %v5032_v47, %v4670_v20  ;;  %v4792_v6 = vsel %vm2291_vm4, 0.0, %v7706_v2  ;;  %v4993_v20 = vsel %vm4990_vm14, %v4952_v36, %v13581_v27  ;;  %v17944_v45 = vld [vmem:[#allocation372_spill] sm:$0xff]  ;;  %v17946_v27 = vld [vmem:[#allocation299_spill] sm:$0xff] }
 0x6ed   : > { %v5154_v9 = vrot.slane %v5074_v28, 3  ;;  %v5153_v46 = vrot.slane %v5073_v63, 3  ;;  %4733 = vrot.lane.b32.xlu0 %v13304_v37, %s8095_s26  ;;  %4610 = vrot.lane.b32.xlu1 %v17940_v17, %s8094_s23  ;;  %v7757_v37 = vunpack.i.h.bf16 %v17916_v15  ;;  %v5034_v50 = vsel %vm5031_vm15, %v4993_v20, %v4547_v14  ;;  %v17948_v17 = vld [vmem:[#allocation187_spill] sm:$0xff] }
 0x6ee   : > { %v4794_v2 = vsel %vm2291_vm4, %v17945_v54, %v17944_v45  ;;  %v4832_v25 = vsel %vm2413_vm6, %v4792_v6, %v7731_v11  ;;  %v7762_v28 = vunpack.i.h.bf16 %v17946_v27  ;;  %v4836_v15 = vsel %vm2413_vm6, %v4796_v39, %v7732_v8  ;;  %v17947_v11 = vld [vmem:[#allocation186_spill] sm:$0xff]  ;;  %v17949_v6 = vld [vmem:[#allocation460_spill] sm:$0xff] }
 0x6ef   : > { %v13744_v59 = vpop.permute.xlu0 %7894  ;;  %v4674_v60 = vpop.permute.xlu1 %4673  ;;  %v5155_v47 = vsel %vm16337_vm11, %v5153_v46, %v5154_v9  ;;  %v7761_v14 = vunpack.i.l.bf16 %v17946_v27  ;;  %v4834_v46 = vsel %vm2413_vm6, %v4794_v2, %v17947_v11  ;;  %v4833_v51 = vsel %vm2413_vm6, %v4793_v1, %v17948_v17  ;;  %v17950_v39 = vld [vmem:[#allocation190_spill] sm:$0xff] }
 0x6f0   : > { %v13753_v63 = vsel %vm5072_vm3, %v5034_v50, %v4674_v60  ;;  %7489 = vmatprep.mubr.msk.f32.mxu1 %vm16338_vm7, %v5155_v47  ;;  %v7807_v20 = vunpack.i.h.bf16 %v17949_v6  ;;  %v7806_v8 = vunpack.i.l.bf16 %v17949_v6  ;;  %v4835_v52 = vsel %vm2413_vm6, %v4795_v49, %v17950_v39  ;;  %v17951_v47 = vld [vmem:[#allocation70_spill] sm:$0xff]  ;;  %v17952_v49 = vld [vmem:[#allocation408_spill] sm:$0xff] }
 0x6f1   : > { %v5156_v36 = vrot.slane %v13753_v63, 3  ;;  %4737 = vrot.lane.b32.xlu0 %v13316_v58, %s8095_s26  ;;  %4735 = vrot.lane.b32.xlu1 %v13300_v40, %s8095_s26  ;;  %v4872_v38 = vsel %vm2535_vm8, %v4832_v25, %v7757_v37  ;;  %v7831_v58 = vunpack.i.l.bf16 %v13445_v7  ;;  %v4874_v45 = vsel %vm2535_vm8, %v4834_v46, %v17951_v47  ;;  %v17955_v47 = vld [vmem:[#allocation72_spill] sm:$0xff] }
 0x6f2   : > { %v4876_v1 = vsel %vm2535_vm8, %v4836_v15, %v7762_v28  ;;  %v7857_v54 = vunpack.i.h.bf16 %v13573_v22  ;;  %v7861_v2 = vunpack.i.l.bf16 %v13591_v43  ;;  %v4875_v37 = vsel %vm2535_vm8, %v4835_v52, %v17952_v49  ;;  %v17954_v15 = vld [vmem:[#allocation461_spill] sm:$0xff] }
 0x6f3   : > { %v4553_v50 = vpop.permute.xlu0 %4552  ;;  %v4551_v60 = vpop.permute.xlu1 %4550  ;;  %v5157_v40 = vsel %vm16337_vm11, %v5154_v9, %v5156_v36  ;;  %v4873_v25 = vsel %vm2535_vm8, %v4833_v51, %v7761_v14  ;;  %v7896_v27 = vunpack.i.l.bf16 %v13744_v59  ;;  %v17953_v9 = vld [vmem:[#allocation411_spill] sm:$0xff]  ;;  %v4912_v28 = vsel %vm2657_vm10, %v4872_v38, %v7806_v8 }
 0x6f4   : > { %7490 = vmatmul.mubr.msk.f32.vlgmr.msra.gmra.mrb[0].mxu1 %vm16338_vm7, %v5157_v40  ;;  %v4913_v22 = vsel %vm2657_vm10, %v4873_v25, %v17953_v9  ;;  %v4916_v63 = vsel %vm2657_vm10, %v4876_v1, %v7807_v20  ;;  %v4914_v11 = vsel %vm2657_vm10, %v4874_v45, %v17954_v15  ;;  %v7832_v14 = vunpack.i.h.bf16 %v13445_v7 }
 0x6f5   : > { %4489 = vrot.lane.b32.xlu0 %v17926_v3, %s8093_s18  ;;  %7939 = vrot.lane.b32.xlu1 %v17727_v41, %s8093_s18  ;;  %v4953_v46 = vsel %vm4949_vm13, %v4912_v28, %v7831_v58  ;;  %v4955_v17 = vsel %vm4949_vm13, %v4914_v11, %v13453_v10  ;;  %v4954_v41 = vsel %vm4949_vm13, %v4913_v22, %v13455_v19  ;;  %v7862_v8 = vunpack.i.h.bf16 %v13591_v43  ;;  %v17957_v22 = vld [vmem:[#allocation71_spill] sm:$0xff] }
 0x6f6   : > { %v4994_v39 = vsel %vm4990_vm14, %v4953_v46, %v7857_v54  ;;  %v4995_v20 = vsel %vm4990_vm14, %v4954_v41, %v7861_v2  ;;  %v7897_v38 = vunpack.i.h.bf16 %v13744_v59  ;;  %v4996_v10 = vsel %vm4990_vm14, %v4955_v17, %v13589_v13  ;;  %v17959_v46 = vld [vmem:[#allocation151_spill] sm:$0xff]  ;;  %v17960_v41 = vld [vmem:[#allocation376_spill] sm:$0xff] }
 0x6f7   : > { %v4678_v51 = vpop.permute.xlu0 %4677  ;;  %v7900_v6 = vpop.permute.xlu1 %7899  ;;  %v5035_v7 = vsel %vm5031_vm15, %v4994_v39, %v7896_v27  ;;  %v5036_v58 = vsel %vm5031_vm15, %v4995_v20, %v4551_v60  ;;  %v4915_v59 = vsel %vm2657_vm10, %v4875_v37, %v17955_v47  ;;  %v4957_v45 = vsel %vm4949_vm13, %v4916_v63, %v7832_v14  ;;  %v17956_v37 = vld [vmem:[#allocation136_spill] sm:$0xff]  ;;  %v17962_v20 = vld [vmem:[#allocation189_spill] sm:$0xff] }
 0x6f8   : > { %v7901_v52 = vunpack.i.l.bf16 %v7900_v6  ;;  %v5077_v19 = vsel %vm5072_vm3, %v5036_v58, %v4678_v51  ;;  %v7902_v43 = vunpack.i.h.bf16 %v7900_v6  ;;  %v5037_v60 = vsel %vm5031_vm15, %v4996_v10, %v4553_v50  ;;  %v17961_v39 = vld [vmem:[#allocation360_spill] sm:$0xff] }
 0x6f9   : > { %4614 = vrot.lane.b32.xlu0 %v13693_v62, %s8094_s23  ;;  %7944 = vrot.lane.b32.xlu1 %v12324_v16, %s8094_s23  ;;  %v4956_v16 = vsel %vm4949_vm13, %v4915_v59, %v13463_v18  ;;  %v4998_v13 = vsel %vm4990_vm14, %v4957_v45, %v7862_v8  ;;  %v5160_v25 = vrot.slane %v5077_v19, 3  ;;  %v7766_v28 = vunpack.i.l.bf16 %v17957_v22  ;;  %v17964_v58 = vld [vmem:[#allocation220_spill] sm:$0xff]  ;;  %v17965_v59 = vld [vmem:[#allocation3_spill] sm:$0xff] }
 0x6fa   : > { %v5076_v40 = vsel %vm5072_vm3, %v5035_v7, %v7901_v52  ;;  %v5039_v49 = vsel %vm5031_vm15, %v4998_v13, %v7897_v38  ;;  %v4997_v9 = vsel %vm4990_vm14, %v4956_v16, %v13599_v42  ;;  %v4797_v17 = vsel %vm2291_vm4, 0.0, %v17959_v46  ;;  %v17963_v52 = vld [vmem:[#allocation192_spill] sm:$0xff] }
 0x6fb   : > { %v4555_v1 = vpop.permute.xlu0 %4554  ;;  %v4680_v62 = vpop.permute.xlu1 %4679  ;;  %v5158_v54 = vrot.slane %v5076_v40, 3  ;;  %v5080_v18 = vsel %vm5072_vm3, %v5039_v49, %v7902_v43  ;;  %v4798_v51 = vsel %vm2291_vm4, %v12361_v24, %v17960_v41  ;;  %v7866_v7 = vunpack.i.l.bf16 %v13597_v4  ;;  %v17969_v13 = vld [vmem:[#allocation156_spill] sm:$0xff] }
 0x6fc   : > { %v5078_v2 = vsel %vm5072_vm3, %v5037_v60, %v4680_v62  ;;  %v5038_v63 = vsel %vm5031_vm15, %v4997_v9, %v4555_v1  ;;  %v5165_v8 = vrot.slane %v5080_v18, 3  ;;  %v4838_v38 = vsel %vm2413_vm6, %v4798_v51, %v17963_v52  ;;  %v17966_v60 = vld [vmem:[#allocation309_spill] sm:$0xff]  ;;  %v17973_v18 = vld [vmem:[#allocation232_spill] sm:$0xff] }
 0x6fd   : > { %v5161_v27 = vrot.slane %v5078_v2, 3  ;;  %7949 = vrot.lane.b32.xlu0 %v12648_v21, %s8095_s26  ;;  %4616 = vrot.lane.b32.xlu1 %v17956_v37, %s8094_s23  ;;  %v5159_v50 = vsel %vm16337_vm11, %v5156_v36, %v5158_v54  ;;  %v17958_v36 = vrot.slane %v17926_v3, 2  ;;  %v4837_v3 = vsel %vm2413_vm6, %v4797_v17, %v17962_v20  ;;  %v17967_v62 = vld [vmem:[#allocation357_spill] sm:$0xff] }
 0x6fe   : > { %7492 = vmatprep.mubr.msk.f32.mxu1 %vm16338_vm7, %v5159_v50  ;;  %v4878_v10 = vsel %vm2535_vm8, %v4838_v38, %v17964_v58  ;;  %v4877_v24 = vsel %vm2535_vm8, %v4837_v3, %v7766_v28  ;;  %v17968_v54 = vrot.slane %v17967_v62, 1  ;;  %v4799_v2 = vsel %vm2291_vm4, %v12373_v30, %v17969_v13 }
 0x6ff   : > { %v4559_v15 = vpop.permute.xlu0 %4558  ;;  %v4682_v11 = vpop.permute.xlu1 %4681  ;;  %v5162_v21 = vsel %vm16337_vm11, %v5160_v25, %v5161_v27  ;;  %v4664_v42 = vsel %vm815_vm1, %v17848_v23, %v17958_v36  ;;  %v4918_v45 = vsel %vm2657_vm10, %v4878_v10, %v17965_v59  ;;  %v4917_v1 = vsel %vm2657_vm10, %v4877_v24, %v17966_v60  ;;  %v17974_v36 = vld [vmem:[#allocation74_spill] sm:$0xff]  ;;  %v17978_v59 = vld [vmem:[#allocation385_spill] sm:$0xff] }
 0x700   : > { %v5079_v14 = vsel %vm5072_vm3, %v5038_v63, %v4682_v11  ;;  %7493 = vmatmul.mubr.msk.f32.gmra.mrb[2].mxu1 %vm16338_vm7, %v5162_v21  ;;  %v4541_v16 = vsel %vm526_vm0, %v17968_v54, %v17928_v12  ;;  %v4958_v49 = vsel %vm4949_vm13, %v4917_v1, %v13461_v48  ;;  %v4959_v25 = vsel %vm4949_vm13, %v4918_v45, %v13471_v57  ;;  %v17972_v57 = vld [vmem:[#allocation158_spill] sm:$0xff]  ;;  %v17979_v45 = vld [vmem:[#allocation233_spill] sm:$0xff] }
 0x701   : > { %v5163_v6 = vrot.slane %v5079_v14, 3  ;;  %4743 = vrot.lane.b32.xlu0 %v17961_v39, %s8095_s26  ;;  %4741 = vrot.lane.b32.xlu1 %v4664_v42, %s8095_s26  ;;  %v5000_v12 = vsel %vm4990_vm14, %v4959_v25, %v13607_v61  ;;  %v4999_v50 = vsel %vm4990_vm14, %v4958_v49, %v7866_v7  ;;  %v17971_v30 = vrot.slane %v17967_v62, 2  ;;  %v8014_v54 = vld [vmem:[%s8185_s20 + $0x60] sm:$0xff] }
 0x702   : > { %v7712_v9 = vunpack.i.h.bf16 %v17972_v57  ;;  %v5040_v63 = vsel %vm5031_vm15, %v4999_v50, %v4559_v15  ;;  %v7711_v14 = vunpack.i.l.bf16 %v17972_v57  ;;  %v8013_v15 = vld [vmem:[%s8185_s20 + $0x58] sm:$0xff]  ;;  %v7772_v60 = vunpack.i.h.bf16 %v17979_v45  ;;  %v17983_v57 = vld [vmem:[#allocation300_spill] sm:$0xff] }
 0x703   : > { %v4563_v19 = vpop.permute.xlu0 %4562  ;;  %v4561_v43 = vpop.permute.xlu1 %4560  ;;  %v5164_v40 = vsel %vm16337_vm11, %v5161_v27, %v5163_v6  ;;  %v5166_v47 = vsel %vm16337_vm11, %v5163_v6, %v5165_v8  ;;  %v17970_v27 = vld [vmem:[#allocation297_spill] sm:$0xff]  ;;  %v4668_v48 = vsel %vm815_vm1, %v17971_v30, %v17848_v23  ;;  %v17975_v6 = vld [vmem:[#allocation46_spill] sm:$0xff]  ;;  %v7771_v1 = vunpack.i.l.bf16 %v17979_v45 }
 0x704   : > { %7495 = vmatprep.mubr.msk.f32.mxu1 %vm16338_vm7, %v5164_v40  ;;  %v4839_v37 = vsel %vm2413_vm6, %v4799_v2, %v17970_v27  ;;  %v5041_v11 = vsel %vm5031_vm15, %v5000_v12, %v4561_v43  ;;  %v4801_v39 = vsel %vm2291_vm4, 0.0, %v17975_v6  ;;  %v17976_v8 = vld [vmem:[#allocation194_spill] sm:$0xff]  ;;  %v4804_v52 = vsel %vm2291_vm4, 0.0, %v7712_v9  ;;  %v17977_v43 = vld [vmem:[#allocation384_spill] sm:$0xff]  ;;  %v17981_v2 = vld [vmem:[#allocation5_spill] sm:$0xff] }
 0x705   : > { %4618 = vrot.lane.b32.xlu0 %v4541_v16, %s8094_s23  ;;  %4491 = vrot.lane.b32.xlu1 %v17967_v62, %s8093_s18  ;;  %v4879_v28 = vsel %vm2535_vm8, %v4839_v37, %v17973_v18  ;;  %v7737_v20 = vunpack.i.h.bf16 %v17976_v8  ;;  %v4800_v24 = vsel %vm2291_vm4, 0.0, %v7711_v14  ;;  %v4802_v40 = vsel %vm2291_vm4, %v12390_v0, %v17977_v43  ;;  %v8015_v0 = vld [vmem:[%s8185_s20 + $0x68] sm:$0xff]  ;;  %v17987_v6 = vld [vmem:[#allocation412_spill] sm:$0xff] }
 0x706   : > { %7496 = vmatmul.mubr.msk.f32.gmra.mrb[4].mxu1 %vm16338_vm7, %v5166_v47  ;;  %v4919_v42 = vsel %vm2657_vm10, %v4879_v28, %v17974_v36  ;;  %v7812_v49 = vunpack.i.h.bf16 %v17981_v2  ;;  %v17982_v27 = vld [vmem:[#allocation195_spill] sm:$0xff]  ;;  %v7836_v12 = vunpack.i.l.bf16 %v13479_v56  ;;  %v4842_v9 = vsel %vm2413_vm6, %v4802_v40, %v17983_v57 }
 0x707   : > { %v4688_v61 = vpop.permute.xlu0 %4687  ;;  %v4686_v21 = vpop.permute.xlu1 %4685  ;;  %v4960_v17 = vsel %vm4949_vm13, %v4919_v42, %v13469_v32  ;;  %v7736_v32 = vunpack.i.l.bf16 %v17976_v8  ;;  %v4844_v13 = vsel %vm2413_vm6, %v4804_v52, %v7737_v20  ;;  %v7867_v28 = vunpack.i.h.bf16 %v13597_v4  ;;  %v8016_v42 = vld [vmem:[%s8286_s13 + $0x8] sm:$0xff]  ;;  %v17985_v4 = vld [vmem:[#allocation221_spill] sm:$0xff] }
 0x708   : > { %v5082_v46 = vsel %vm5072_vm3, %v5041_v11, %v4688_v61  ;;  %v5081_v23 = vsel %vm5072_vm3, %v5040_v63, %v4686_v21  ;;  %v5001_v3 = vsel %vm4990_vm14, %v4960_v17, %v13605_v31  ;;  %v7767_v31 = vunpack.i.h.bf16 %v17957_v22  ;;  %v17980_v22 = vld [vmem:[#allocation193_spill] sm:$0xff]  ;;  %v17984_v11 = vld [vmem:[#allocation76_spill] sm:$0xff] }
 0x709   : > { %v5168_v41 = vrot.slane %v5082_v46, 3  ;;  %v5167_v51 = vrot.slane %v5081_v23, 3  ;;  %4745 = vrot.lane.b32.xlu1 %v4668_v48, %s8095_s26  ;;  %5706 = vrot.lane.b32.xlu0 %v8013_v15, %s8084_s14  ;;  %v5042_v38 = vsel %vm5031_vm15, %v5001_v3, %v4563_v19  ;;  %v4803_v19 = vsel %vm2291_vm4, %v12409_v26, %v17978_v59  ;;  %v8017_v46 = vld [vmem:[%s8286_s13 + $0x10] sm:$0xff] }
 0x70a   : > { %v4841_v16 = vsel %vm2413_vm6, %v4801_v39, %v17980_v22  ;;  %v7811_v26 = vunpack.i.l.bf16 %v17981_v2  ;;  %v4840_v25 = vsel %vm2413_vm6, %v4800_v24, %v7736_v32  ;;  %v4843_v37 = vsel %vm2413_vm6, %v4803_v19, %v17982_v27  ;;  %v8019_v59 = vld [vmem:[%s8286_s13 + $0x30] sm:$0xff] }
 0x70b   : > { %v13911_v7 = vpop.permute.xlu0 %7904  ;;  %v4690_v58 = vpop.permute.xlu1 %4689  ;;  %v5169_v10 = vsel %vm16337_vm11, %v5167_v51, %v5168_v41  ;;  %v4880_v18 = vsel %vm2535_vm8, %v4840_v25, %v7767_v31  ;;  %v7871_v63 = vunpack.i.l.bf16 %v13615_v55  ;;  %v4882_v61 = vsel %vm2535_vm8, %v4842_v9, %v17984_v11  ;;  %v17986_v51 = vld [vmem:[#allocation6_spill] sm:$0xff]  ;;  %v8018_v31 = vld [vmem:[%s8286_s13 + $0x18] sm:$0xff] }
 0x70c   : > { %v13920_v47 = vsel %vm5072_vm3, %v5042_v38, %v4690_v58  ;;  %7498 = vmatprep.mubr.msk.f32.mxu1 %vm16338_vm7, %v5169_v10  ;;  %v4884_v21 = vsel %vm2535_vm8, %v4844_v13, %v7772_v60  ;;  %v4881_v14 = vsel %vm2535_vm8, %v4841_v16, %v7771_v1  ;;  %v7906_v36 = vunpack.i.l.bf16 %v13911_v7 }
 0x70d   : > { %v5170_v62 = vrot.slane %v13920_v47, 3  ;;  %5708 = vrot.lane.b32.xlu1 %v8014_v54, %s8084_s14  ;;  %5710 = vrot.lane.b32.xlu0 %v8015_v0, %s8084_s14  ;;  %v4883_v23 = vsel %vm2535_vm8, %v4843_v37, %v17985_v4  ;;  %v4920_v17 = vsel %vm2657_vm10, %v4880_v18, %v7811_v26  ;;  %v4921_v15 = vsel %vm2657_vm10, %v4881_v14, %v17986_v51  ;;  %v8020_v37 = vld [vmem:[%s8286_s13 + $0x38] sm:$0xff] }
 0x70e   : > { %v4922_v39 = vsel %vm2657_vm10, %v4882_v61, %v17987_v6  ;;  %v4962_v8 = vsel %vm4949_vm13, %v4921_v15, %v13477_v53  ;;  %v7837_v20 = vunpack.i.h.bf16 %v13479_v56  ;;  %v4961_v3 = vsel %vm4949_vm13, %v4920_v17, %v7836_v12  ;;  %v8021_v12 = vld [vmem:[%s8286_s13 + $0x40] sm:$0xff]  ;;  %v8022_v14 = vld [vmem:[%s8286_s13 + $0x58] sm:$0xff] }
 0x70f   : > { %v4569_v50 = vpop.permute.xlu0 %4568  ;;  %v4567_v30 = vpop.permute.xlu1 %4566  ;;  %v5171_v48 = vsel %vm16337_vm11, %v5168_v41, %v5170_v62  ;;  %v4924_v41 = vsel %vm2657_vm10, %v4884_v21, %v7812_v49  ;;  %v5002_v38 = vsel %vm4990_vm14, %v4961_v3, %v7867_v28  ;;  %v7872_v58 = vunpack.i.h.bf16 %v13615_v55  ;;  %v17990_v28 = vld [vmem:[#allocation49_spill] sm:$0xff] }
 0x710   : > { %7499 = vmatmul.mubr.msk.f32.gmra.mrb[6].mxu1 %vm16338_vm7, %v5171_v48  ;;  %v5003_v10 = vsel %vm4990_vm14, %v4962_v8, %v7871_v63  ;;  %v4963_v43 = vsel %vm4949_vm13, %v4922_v39, %v13487_v34  ;;  %v7907_v40 = vunpack.i.h.bf16 %v13911_v7  ;;  %v5043_v53 = vsel %vm5031_vm15, %v5002_v38, %v7906_v36  ;;  %v17988_v7 = vld [vmem:[#allocation82_spill] sm:$0xff]  ;;  %v17993_v4 = vld [vmem:[#allocation197_spill] sm:$0xff]  ;;  %v17997_v38 = vld [vmem:[#allocation164_spill] sm:$0xff] }
 0x711   : > { %5712 = vrot.lane.b32.xlu1 %v8016_v42, %s8084_s14  ;;  %5714 = vrot.lane.b32.xlu0 %v8017_v46, %s8084_s14  ;;  %v5044_v56 = vsel %vm5031_vm15, %v5003_v10, %v4567_v30  ;;  %v5004_v55 = vsel %vm4990_vm14, %v4963_v43, %v13613_v35  ;;  %v4923_v60 = vsel %vm2657_vm10, %v4883_v23, %v17988_v7  ;;  %v17989_v30 = vld [vmem:[#allocation247_spill] sm:$0xff]  ;;  %v17991_v63 = vld [vmem:[#allocation162_spill] sm:$0xff]  ;;  %v17992_v42 = vld [vmem:[#allocation196_spill] sm:$0xff]  ;;  %v7876_v17 = vunpack.i.l.bf16 %v13621_v29 }
 0x712   : > { %v4965_v1 = vsel %vm4949_vm13, %v4924_v41, %v7837_v20  ;;  %v5045_v54 = vsel %vm5031_vm15, %v5004_v55, %v4569_v50  ;;  %v4964_v35 = vsel %vm4949_vm13, %v4923_v60, %v13485_v44  ;;  %v7776_v48 = vunpack.i.l.bf16 %v17989_v30  ;;  %v8023_v36 = vld [vmem:[%s8286_s13 + $0x60] sm:$0xff]  ;;  %v17994_v41 = vld [vmem:[#allocation248_spill] sm:$0xff]  ;;  %v18002_v55 = vld [vmem:[#allocation421_spill] sm:$0xff] }
 0x713   : > { %v4694_v52 = vpop.permute.xlu0 %4693  ;;  %v7910_v32 = vpop.permute.xlu1 %7909  ;;  %v5006_v13 = vsel %vm4990_vm14, %v4965_v1, %v7872_v58  ;;  %v5005_v44 = vsel %vm4990_vm14, %v4964_v35, %v13623_v33  ;;  %v4805_v33 = vsel %vm2291_vm4, 0.0, %v17990_v28  ;;  %v4806_v11 = vsel %vm2291_vm4, %v12431_v5, %v17991_v63  ;;  %v17995_v20 = vld [vmem:[#allocation310_spill] sm:$0xff]  ;;  %v17998_v58 = vld [vmem:[#allocation111_spill] sm:$0xff]  ;;  %v18003_v7 = vld [vmem:[#allocation392_spill] sm:$0xff] }
 0x714   : > { %v7911_v24 = vunpack.i.l.bf16 %v7910_v32  ;;  %v5085_v19 = vsel %vm5072_vm3, %v5044_v56, %v4694_v52  ;;  %v7912_v45 = vunpack.i.h.bf16 %v7910_v32  ;;  %v5047_v49 = vsel %vm5031_vm15, %v5006_v13, %v7907_v40  ;;  %v17996_v52 = vld [vmem:[#allocation413_spill] sm:$0xff]  ;;  %v18000_v40 = vld [vmem:[#allocation252_spill] sm:$0xff]  ;;  %v8024_v56 = vld [vmem:[%s8286_s13 + $0x68] sm:$0xff] }
 0x715   : > { %5716 = vrot.lane.b32.xlu1 %v8018_v31, %s8084_s14  ;;  %5718 = vrot.lane.b32.xlu0 %v8019_v59, %s8084_s14  ;;  %v5174_v26 = vrot.slane %v5085_v19, 3  ;;  %v4846_v46 = vsel %vm2413_vm6, %v4806_v11, %v17992_v42  ;;  %v4845_v23 = vsel %vm2413_vm6, %v4805_v33, %v17993_v4  ;;  %v4807_v10 = vsel %vm2291_vm4, %v17998_v58, %v17997_v38  ;;  %v18001_v31 = vld [vmem:[#allocation199_spill] sm:$0xff]  ;;  %v18004_v1 = vld [vmem:[#allocation78_spill] sm:$0xff]  ;;  %v18010_v42 = vld [vmem:[#allocation57_spill] sm:$0xff] }
 0x716   : > { %v5084_v34 = vsel %vm5072_vm3, %v5043_v53, %v7911_v24  ;;  %v5088_v50 = vsel %vm5072_vm3, %v5047_v49, %v7912_v45  ;;  %v4886_v5 = vsel %vm2535_vm8, %v4846_v46, %v17994_v41  ;;  %v4885_v51 = vsel %vm2535_vm8, %v4845_v23, %v7776_v48  ;;  %v17999_v24 = vld [vmem:[#allocation85_spill] sm:$0xff]  ;;  %v18007_v48 = vld [vmem:[#allocation198_spill] sm:$0xff]  ;;  %v8029_v58 = vld [vmem:[%s8286_s13 + $0xb0] sm:$0xff] }
 0x717   : > { %v4571_v0 = vpop.permute.xlu0 %4570  ;;  %v4696_v22 = vpop.permute.xlu1 %4695  ;;  %v5172_v16 = vrot.slane %v5084_v34, 3  ;;  %v5179_v21 = vrot.slane %v5088_v50, 3  ;;  %v4925_v3 = vsel %vm2657_vm10, %v4885_v51, %v17995_v20  ;;  %v4926_v32 = vsel %vm2657_vm10, %v4886_v5, %v17996_v52  ;;  %v8025_v34 = vld [vmem:[%s8286_s13 + $0x80] sm:$0xff]  ;;  %v8026_v50 = vld [vmem:[%s8286_s13 + $0x88] sm:$0xff]  ;;  %v18011_v46 = vld [vmem:[#allocation113_spill] sm:$0xff] }
 0x718   : > { %v5086_v2 = vsel %vm5072_vm3, %v5045_v54, %v4696_v22  ;;  %v5046_v47 = vsel %vm5031_vm15, %v5005_v44, %v4571_v0  ;;  %v4967_v43 = vsel %vm4949_vm13, %v4926_v32, %v17999_v24  ;;  %v4966_v53 = vsel %vm4949_vm13, %v4925_v3, %v18000_v40  ;;  %v18009_v28 = vld [vmem:[#allocation166_spill] sm:$0xff]  ;;  %v18012_v41 = vld [vmem:[#allocation393_spill] sm:$0xff]  ;;  %v18013_v5 = vld [vmem:[#allocation336_spill] sm:$0xff] }
 0x719   : > { %v5175_v25 = vrot.slane %v5086_v2, 3  ;;  %v5173_v27 = vsel %vm16337_vm11, %v5170_v62, %v5172_v16  ;;  %5720 = vrot.lane.b32.xlu1 %v8020_v37, %s8084_s14  ;;  %5722 = vrot.lane.b32.xlu0 %v8021_v12, %s8084_s14  ;;  %v4847_v59 = vsel %vm2413_vm6, %v4807_v10, %v18001_v31  ;;  %v5008_v19 = vsel %vm4990_vm14, %v4967_v43, %v18002_v55  ;;  %v18005_v2 = vld [vmem:[#allocation77_spill] sm:$0xff]  ;;  %v8028_v20 = vld [vmem:[%s8286_s13 + $0xa8] sm:$0xff]  ;;  %v18016_v10 = vld [vmem:[#allocation200_spill] sm:$0xff] }
 0x71a   : > { %7501 = vmatprep.mubr.msk.f32.mxu1 %vm16338_vm7, %v5173_v27  ;;  %v5007_v45 = vsel %vm4990_vm14, %v4966_v53, %v7876_v17  ;;  %v7717_v60 = vunpack.i.h.bf16 %v18003_v7  ;;  %v4887_v54 = vsel %vm2535_vm8, %v4847_v59, %v18004_v1  ;;  %v7716_v13 = vunpack.i.l.bf16 %v18003_v7  ;;  %v18006_v27 = vld [vmem:[#allocation253_spill] sm:$0xff]  ;;  %v18015_v52 = vld [vmem:[#allocation311_spill] sm:$0xff]  ;;  %v18018_v53 = vld [vmem:[#allocation92_spill] sm:$0xff] }
 0x71b   : > { %v4575_v62 = vpop.permute.xlu0 %4574  ;;  %v4698_v57 = vpop.permute.xlu1 %4697  ;;  %v5176_v9 = vsel %vm16337_vm11, %v5174_v26, %v5175_v25  ;;  %v4927_v49 = vsel %vm2657_vm10, %v4887_v54, %v18005_v2  ;;  %v4809_v33 = vsel %vm2291_vm4, 0.0, %v18009_v28  ;;  %v4811_v4 = vsel %vm2291_vm4, %v18011_v46, %v18010_v42  ;;  %v18017_v43 = vld [vmem:[#allocation201_spill] sm:$0xff]  ;;  %v18022_v2 = vld [vmem:[#allocation306_spill] sm:$0xff] }
 0x71c   : > { %v5087_v18 = vsel %vm5072_vm3, %v5046_v47, %v4698_v57  ;;  %7502 = vmatmul.mubr.msk.f32.gmra.mrb[8].mxu1 %vm16338_vm7, %v5176_v9  ;;  %v5048_v0 = vsel %vm5031_vm15, %v5007_v45, %v4575_v62  ;;  %v4968_v37 = vsel %vm4949_vm13, %v4927_v49, %v18006_v27  ;;  %v7742_v47 = vunpack.i.h.bf16 %v18007_v48  ;;  %v18008_v57 = vld [vmem:[#allocation12_spill] sm:$0xff]  ;;  %v18021_v54 = vld [vmem:[#allocation305_spill] sm:$0xff] }
 0x71d   : > { %v5177_v61 = vrot.slane %v5087_v18, 3  ;;  %5724 = vrot.lane.b32.xlu1 %v8022_v14, %s8084_s14  ;;  %5726 = vrot.lane.b32.xlu0 %v8023_v36, %s8084_s14  ;;  %v7741_v62 = vunpack.i.l.bf16 %v18007_v48  ;;  %v5009_v9 = vsel %vm4990_vm14, %v4968_v37, %v18008_v57  ;;  %v8027_v18 = vld [vmem:[%s8286_s13 + $0x90] sm:$0xff]  ;;  %v4812_v63 = vsel %vm2291_vm4, 0.0, %v7717_v60  ;;  %v8032_v46 = vld [vmem:[%s8286_s13 + $0xd8] sm:$0xff] }
 0x71e   : > { %v4808_v36 = vsel %vm2291_vm4, 0.0, %v7716_v13  ;;  %v7777_v23 = vunpack.i.h.bf16 %v17989_v30  ;;  %v4810_v51 = vsel %vm2291_vm4, %v18013_v5, %v18012_v41  ;;  %v4852_v3 = vsel %vm2413_vm6, %v4812_v63, %v7742_v47  ;;  %v18020_v60 = vld [vmem:[#allocation256_spill] sm:$0xff]  ;;  %v8030_v13 = vld [vmem:[%s8286_s13 + $0xb8] sm:$0xff]  ;;  %v18025_v47 = vld [vmem:[#allocation11_spill] sm:$0xff] }
 0x71f   : > { %v4579_v15 = vpop.permute.xlu0 %4578  ;;  %v4577_v6 = vpop.permute.xlu1 %4576  ;;  %v5178_v39 = vsel %vm16337_vm11, %v5175_v25, %v5177_v61  ;;  %v5180_v8 = vsel %vm16337_vm11, %v5177_v61, %v5179_v21  ;;  %v4848_v30 = vsel %vm2413_vm6, %v4808_v36, %v7741_v62  ;;  %v7817_v32 = vunpack.i.h.bf16 %v18015_v52  ;;  %v8031_v37 = vld [vmem:[%s8286_s13 + $0xd0] sm:$0xff] }
 0x720   : > { %7504 = vmatprep.mubr.msk.f32.mxu1 %vm16338_vm7, %v5178_v39  ;;  %v5049_v22 = vsel %vm5031_vm15, %v5008_v19, %v4577_v6  ;;  %v5050_v11 = vsel %vm5031_vm15, %v5009_v9, %v4579_v15  ;;  %v18014_v15 = vld [vmem:[#allocation222_spill] sm:$0xff]  ;;  %v7816_v38 = vunpack.i.l.bf16 %v18015_v52  ;;  %v4850_v24 = vsel %vm2413_vm6, %v4810_v51, %v18016_v10  ;;  %v18019_v19 = vld [vmem:[#allocation203_spill] sm:$0xff] }
 0x721   : > { %7505 = vmatmul.mubr.msk.f32.gmra.mrb[10].mxu1 %vm16338_vm7, %v5180_v8  ;;  %5728 = vrot.lane.b32.xlu1 %v8024_v56, %s8084_s14  ;;  %v7782_v6 = vunpack.i.h.bf16 %v18014_v15  ;;  %v7781_v39 = vunpack.i.l.bf16 %v18014_v15  ;;  %v4849_v40 = vsel %vm2413_vm6, %v4809_v33, %v18017_v43  ;;  %v7841_v56 = vunpack.i.l.bf16 %v18018_v53  ;;  %v8033_v15 = vld [vmem:[%s8286_s13 + $0xe0] sm:$0xff] }
 0x722   : > { %5730 = vrot.lane.b32.xlu0 %v8025_v34, %s8084_s14  ;;  %v4851_v45 = vsel %vm2413_vm6, %v4811_v4, %v18019_v19  ;;  %v4888_v34 = vsel %vm2535_vm8, %v4848_v30, %v7777_v23  ;;  %v7877_v7 = vunpack.i.h.bf16 %v13621_v29  ;;  %v7881_v1 = vunpack.i.l.bf16 %v18020_v60  ;;  %v18023_v29 = vld [vmem:[#allocation79_spill] sm:$0xff]  ;;  %v8035_v19 = vld [vmem:[%s8286_s13 + $0x100] sm:$0xff] }
 0x723   : > { %v4704_v16 = vpop.permute.xlu0 %4703  ;;  %v4702_v35 = vpop.permute.xlu1 %4701  ;;  %v4891_v49 = vsel %vm2535_vm8, %v4851_v45, %v18022_v2  ;;  %v7882_v28 = vunpack.i.h.bf16 %v18020_v60  ;;  %v18027_v4 = vld [vmem:[#allocation99_spill] sm:$0xff]  ;;  %v18031_v45 = vld [vmem:[#allocation80_spill] sm:$0xff] }
 0x724   : > { %v5090_v26 = vsel %vm5072_vm3, %v5049_v22, %v4704_v16  ;;  %v5089_v25 = vsel %vm5072_vm3, %v5048_v0, %v4702_v35  ;;  %v4890_v0 = vsel %vm2535_vm8, %v4850_v24, %v18021_v54  ;;  %v4892_v22 = vsel %vm2535_vm8, %v4852_v3, %v7782_v6  ;;  %v18032_v54 = vld [vmem:[#allocation168_spill] sm:$0xff] }
 0x725   : > { %v5182_v12 = vrot.slane %v5090_v26, 3  ;;  %v5181_v44 = vrot.slane %v5089_v25, 3  ;;  %5732 = vrot.lane.b32.xlu1 %v8026_v50, %s8084_s14  ;;  %v4889_v16 = vsel %vm2535_vm8, %v4849_v40, %v7781_v39  ;;  %v4928_v25 = vsel %vm2657_vm10, %v4888_v34, %v7816_v38 }
 0x726   : > { %5734 = vrot.lane.b32.xlu0 %v8027_v18, %s8084_s14  ;;  %v4929_v26 = vsel %vm2657_vm10, %v4889_v16, %v18023_v29  ;;  %v4932_v27 = vsel %vm2657_vm10, %v4892_v22, %v7817_v32  ;;  %v7842_v50 = vunpack.i.h.bf16 %v18018_v53  ;;  %v4969_v48 = vsel %vm4949_vm13, %v4928_v25, %v7841_v56  ;;  %v18029_v32 = vld [vmem:[#allocation418_spill] sm:$0xff]  ;;  %v8034_v56 = vld [vmem:[%s8286_s13 + $0xf8] sm:$0xff]  ;;  %v18033_v22 = vld [vmem:[#allocation396_spill] sm:$0xff] }
 0x727   : > { %v14078_v61 = vpop.permute.xlu0 %7914  ;;  %v4706_v21 = vpop.permute.xlu1 %4705  ;;  %v5183_v14 = vsel %vm16337_vm11, %v5181_v44, %v5182_v12  ;;  %v4970_v62 = vsel %vm4949_vm13, %v4929_v26, %v18025_v47  ;;  %v5010_v18 = vsel %vm4990_vm14, %v4969_v48, %v7877_v7  ;;  %v7786_v34 = vunpack.i.l.bf16 %v18031_v45  ;;  %v18034_v16 = vld [vmem:[#allocation337_spill] sm:$0xff]  ;;  %v18035_v29 = vld [vmem:[#allocation202_spill] sm:$0xff] }
 0x728   : > { %v14087_v17 = vsel %vm5072_vm3, %v5050_v11, %v4706_v21  ;;  %7507 = vmatprep.mubr.msk.f32.mxu1 %vm16338_vm7, %v5183_v14  ;;  %v7916_v35 = vunpack.i.l.bf16 %v14078_v61  ;;  %v5011_v33 = vsel %vm4990_vm14, %v4970_v62, %v7881_v1  ;;  %v18026_v11 = vld [vmem:[#allocation318_spill] sm:$0xff]  ;;  %v7917_v14 = vunpack.i.h.bf16 %v14078_v61  ;;  %v18028_v61 = vld [vmem:[#allocation84_spill] sm:$0xff]  ;;  %v18036_v25 = vld [vmem:[#allocation205_spill] sm:$0xff] }
 0x729   : > { %v5184_v8 = vrot.slane %v14087_v17, 3  ;;  %5736 = vrot.lane.b32.xlu1 %v8028_v20, %s8084_s14  ;;  %v4931_v6 = vsel %vm2657_vm10, %v4891_v49, %v18028_v61  ;;  %v4973_v39 = vsel %vm4949_vm13, %v4932_v27, %v7842_v50  ;;  %v8036_v49 = vld [vmem:[%s8286_s13 + $0x108] sm:$0xff]  ;;  %v18038_v50 = vld [vmem:[#allocation234_spill] sm:$0xff] }
 0x72a   : > { %5738 = vrot.lane.b32.xlu0 %v8029_v58, %s8084_s14  ;;  %v5051_v36 = vsel %vm5031_vm15, %v5010_v18, %v7916_v35  ;;  %v4972_v38 = vsel %vm4949_vm13, %v4931_v6, %v18029_v32  ;;  %v5014_v58 = vsel %vm4990_vm14, %v4973_v39, %v7882_v28  ;;  %v4814_v35 = vsel %vm2291_vm4, %v18034_v16, %v18033_v22  ;;  %v18039_v28 = vld [vmem:[#allocation312_spill] sm:$0xff] }
 0x72b   : > { %v4585_v31 = vpop.permute.xlu0 %4584  ;;  %v4583_v59 = vpop.permute.xlu1 %4582  ;;  %v5185_v55 = vsel %vm16337_vm11, %v5182_v12, %v5184_v8  ;;  %v18024_v12 = vld [vmem:[#allocation4_spill] sm:$0xff]  ;;  %v5055_v24 = vsel %vm5031_vm15, %v5014_v58, %v7917_v14  ;;  %v4854_v27 = vsel %vm2413_vm6, %v4814_v35, %v18036_v25 }
 0x72c   : > { %7508 = vmatmul.mubr.msk.f32.gmra.mrb[12].mxu1 %vm16338_vm7, %v5185_v55  ;;  %v4930_v44 = vsel %vm2657_vm10, %v4890_v0, %v18024_v12  ;;  %v5052_v42 = vsel %vm5031_vm15, %v5011_v33, %v4583_v59  ;;  %v4813_v0 = vsel %vm2291_vm4, 0.0, %v18032_v54  ;;  %v4894_v48 = vsel %vm2535_vm8, %v4854_v27, %v18038_v50  ;;  %v18042_v14 = vld [vmem:[#allocation116_spill] sm:$0xff] }
 0x72d   : > { %5740 = vrot.lane.b32.xlu1 %v8030_v13, %s8084_s14  ;;  %v4971_v21 = vsel %vm4949_vm13, %v4930_v44, %v18026_v11  ;;  %v4853_v26 = vsel %vm2413_vm6, %v4813_v0, %v18035_v29  ;;  %v8037_v44 = vld [vmem:[%s8286_s13 + $0x120] sm:$0xff]  ;;  %v4934_v33 = vsel %vm2657_vm10, %v4894_v48, %v18039_v28  ;;  %v8039_v39 = vld [vmem:[%s8286_s13 + $0x130] sm:$0xff]  ;;  %v8041_v0 = vld [vmem:[%s8185_s20 + $0x88] sm:$0xff] }
 0x72e   : > { %5742 = vrot.lane.b32.xlu0 %v8031_v37, %s8084_s14  ;;  %v5012_v23 = vsel %vm4990_vm14, %v4971_v21, %v18027_v4  ;;  %v18037_v37 = vld [vmem:[#allocation95_spill] sm:$0xff]  ;;  %v4893_v47 = vsel %vm2535_vm8, %v4853_v26, %v7786_v34  ;;  %v18041_v21 = vld [vmem:[#allocation170_spill] sm:$0xff]  ;;  %v18055_v25 = vld [vmem:[#allocation340_spill] sm:$0xff] }
 0x72f   : > { %v4710_v57 = vpop.permute.xlu0 %4709  ;;  %v7920_v9 = vpop.permute.xlu1 %7919  ;;  %v5053_v20 = vsel %vm5031_vm15, %v5012_v23, %v4585_v31  ;;  %v18030_v31 = vld [vmem:[#allocation13_spill] sm:$0xff]  ;;  %v7886_v12 = vunpack.i.l.bf16 %v18037_v37  ;;  %v18044_v4 = vld [vmem:[#allocation419_spill] sm:$0xff]  ;;  %v8040_v34 = vld [vmem:[%s8185_s20 + $0x80] sm:$0xff] }
 0x730   : > { %v7921_v63 = vunpack.i.l.bf16 %v7920_v9  ;;  %v5093_v41 = vsel %vm5072_vm3, %v5052_v42, %v4710_v57  ;;  %v7922_v5 = vunpack.i.h.bf16 %v7920_v9  ;;  %v5013_v59 = vsel %vm4990_vm14, %v4972_v38, %v18030_v31  ;;  %v18043_v42 = vld [vmem:[#allocation319_spill] sm:$0xff]  ;;  %v18050_v31 = vld [vmem:[#allocation9_spill] sm:$0xff]  ;;  %v18056_v50 = vld [vmem:[#allocation176_spill] sm:$0xff] }
 0x731   : > { %5744 = vrot.lane.b32.xlu1 %v8032_v46, %s8084_s14  ;;  %v5188_v43 = vrot.slane %v5093_v41, 3  ;;  %v4975_v23 = vsel %vm4949_vm13, %v4934_v33, %v18044_v4  ;;  %v8038_v41 = vld [vmem:[%s8286_s13 + $0x128] sm:$0xff]  ;;  %v18057_v48 = vld [vmem:[#allocation341_spill] sm:$0xff]  ;;  %v8042_v28 = vld [vmem:[%s8185_s20 + $0x90] sm:$0xff]  ;;  %s7243_s20 = sadd.s32 4294967295, %s8180_s16  ;;  %s8096_s16 = smov 36  }
 0x732   : > { %v5092_v51 = vsel %vm5072_vm3, %v5051_v36, %v7921_v63  ;;  %5746 = vrot.lane.b32.xlu0 %v8033_v15, %s8084_s14  ;;  %v5096_v55 = vsel %vm5072_vm3, %v5055_v24, %v7922_v5  ;;  %v18040_v63 = vld [vmem:[#allocation414_spill] sm:$0xff]  ;;  %v4815_v36 = vsel %vm2291_vm4, %v18042_v14, %v18041_v21  ;;  %v18045_v5 = vld [vmem:[#allocation204_spill] sm:$0xff]  ;;  %v18046_v15 = vld [vmem:[#allocation15_spill] sm:$0xff] }
 0x733   : > { %v4587_v30 = vpop.permute.xlu0 %4586  ;;  %v4712_v3 = vpop.permute.xlu1 %4711  ;;  %v5186_v52 = vrot.slane %v5092_v51, 3  ;;  %v5193_v2 = vrot.slane %v5096_v55, 3  ;;  %v4933_v11 = vsel %vm2657_vm10, %v4893_v47, %v18040_v63  ;;  %v4855_v51 = vsel %vm2413_vm6, %v4815_v36, %v18045_v5  ;;  %v18054_v26 = vld [vmem:[#allocation175_spill] sm:$0xff]  ;;  %v18059_v33 = vld [vmem:[#allocation302_spill] sm:$0xff] }
 0x734   : > { %v5094_v10 = vsel %vm5072_vm3, %v5053_v20, %v4712_v3  ;;  %v5054_v17 = vsel %vm5031_vm15, %v5013_v59, %v4587_v30  ;;  %v4974_v46 = vsel %vm4949_vm13, %v4933_v11, %v18043_v42  ;;  %v5016_v61 = vsel %vm4990_vm14, %v4975_v23, %v18046_v15  ;;  %v18047_v20 = vld [vmem:[#allocation172_spill] sm:$0xff]  ;;  %v18048_v3 = vld [vmem:[#allocation407_spill] sm:$0xff]  ;;  %v18062_v4 = vld [vmem:[#allocation254_spill] sm:$0xff] }
 0x735   : > { %v5189_v40 = vrot.slane %v5094_v10, 3  ;;  %v5187_v53 = vsel %vm16337_vm11, %v5184_v8, %v5186_v52  ;;  %5748 = vrot.lane.b32.xlu1 %v8034_v56, %s8084_s14  ;;  %v5015_v6 = vsel %vm4990_vm14, %v4974_v46, %v7886_v12  ;;  %v7722_v30 = vunpack.i.h.bf16 %v18047_v20  ;;  %v18060_v11 = vld [vmem:[#allocation7_spill] sm:$0xff]  ;;  %v18063_v15 = vld [vmem:[#allocation208_spill] sm:$0xff] }
 0x736   : > { %7510 = vmatprep.mubr.msk.f32.mxu1 %vm16338_vm7, %v5187_v53  ;;  %5750 = vrot.lane.b32.xlu0 %v8035_v19, %s8084_s14  ;;  %v4895_v52 = vsel %vm2535_vm8, %v4855_v51, %v18048_v3  ;;  %v7721_v24 = vunpack.i.l.bf16 %v18047_v20  ;;  %v4818_v27 = vsel %vm2291_vm4, %v18055_v25, %v18054_v26  ;;  %v7787_v12 = vunpack.i.h.bf16 %v18031_v45  ;;  %v18061_v42 = vld [vmem:[#allocation207_spill] sm:$0xff]  ;;  %v18064_v20 = vld [vmem:[#allocation422_spill] sm:$0xff] }
 0x737   : > { %v4591_v8 = vpop.permute.xlu0 %4590  ;;  %v4714_v7 = vpop.permute.xlu1 %4713  ;;  %v5190_v60 = vsel %vm16337_vm11, %v5188_v43, %v5189_v40  ;;  %v18049_v43 = vld [vmem:[#allocation415_spill] sm:$0xff]  ;;  %v4820_v22 = vsel %vm2291_vm4, 0.0, %v7722_v30  ;;  %v4819_v47 = vsel %vm2291_vm4, %v18057_v48, %v18056_v50  ;;  %v7822_v21 = vunpack.i.h.bf16 %v18060_v11 }
 0x738   : > { %v5095_v1 = vsel %vm5072_vm3, %v5054_v17, %v4714_v7  ;;  %7511 = vmatmul.mubr.msk.f32.gmra.mrb[14].mxu1 %vm16338_vm7, %v5190_v60  ;;  %v5056_v32 = vsel %vm5031_vm15, %v5015_v6, %v4591_v8  ;;  %v18051_v17 = vld [vmem:[#allocation174_spill] sm:$0xff]  ;;  %v4816_v29 = vsel %vm2291_vm4, 0.0, %v7721_v24  ;;  %v7821_v14 = vunpack.i.l.bf16 %v18060_v11  ;;  %v18065_v3 = vld [vmem:[#allocation235_spill] sm:$0xff] }
 0x739   : > { %v5191_v13 = vrot.slane %v5095_v1, 3  ;;  %5752 = vrot.lane.b32.xlu1 %v8036_v49, %s8084_s14  ;;  %v4817_v8 = vsel %vm2291_vm4, 0.0, %v18051_v17  ;;  %v18052_v7 = vld [vmem:[#allocation206_spill] sm:$0xff]  ;;  %v4859_v46 = vsel %vm2413_vm6, %v4819_v47, %v18061_v42  ;;  %v7846_v23 = vunpack.i.l.bf16 %v18062_v4 }
 0x73a   : > { %5754 = vrot.lane.b32.xlu0 %v8037_v44, %s8084_s14  ;;  %v7747_v60 = vunpack.i.h.bf16 %v18052_v7  ;;  %v18053_v1 = vld [vmem:[#allocation326_spill] sm:$0xff]  ;;  %v7746_v16 = vunpack.i.l.bf16 %v18052_v7  ;;  %v4857_v45 = vsel %vm2413_vm6, %v4817_v8, %v18059_v33  ;;  %v7891_v30 = vunpack.i.l.bf16 %v18064_v20 }
 0x73b   : > { %v4595_v62 = vpop.permute.xlu0 %4594  ;;  %v4593_v57 = vpop.permute.xlu1 %4592  ;;  %v5192_v9 = vsel %vm16337_vm11, %v5189_v40, %v5191_v13  ;;  %v5194_v18 = vsel %vm16337_vm11, %v5191_v13, %v5193_v2  ;;  %v4935_v40 = vsel %vm2657_vm10, %v4895_v52, %v18049_v43 }
 0x73c   : > { %7513 = vmatprep.mubr.msk.f32.mxu1 %vm16338_vm7, %v5192_v9  ;;  %v5057_v38 = vsel %vm5031_vm15, %v5016_v61, %v4593_v57  ;;  %v4976_v59 = vsel %vm4949_vm13, %v4935_v40, %v18050_v31  ;;  %v4860_v63 = vsel %vm2413_vm6, %v4820_v22, %v7747_v60  ;;  %v4856_v36 = vsel %vm2413_vm6, %v4816_v29, %v7746_v16  ;;  %v18067_v40 = vld [vmem:[#allocation75_spill] sm:$0xff] }
 0x73d   : > { %7514 = vmatmul.mubr.msk.f32.gmra.mrb[16].mxu1 %vm16338_vm7, %v5194_v18  ;;  %5756 = vrot.lane.b32.xlu1 %v8038_v41, %s8084_s14  ;;  %v5017_v54 = vsel %vm4990_vm14, %v4976_v59, %v18053_v1  ;;  %v4858_v61 = vsel %vm2413_vm6, %v4818_v27, %v18063_v15  ;;  %v4896_v6 = vsel %vm2535_vm8, %v4856_v36, %v7787_v12  ;;  %v18069_v59 = vld [vmem:[#allocation94_spill] sm:$0xff]  ;;  %v7892_v60 = vunpack.i.h.bf16 %v18064_v20  ;;  %v18072_v12 = vld [vmem:[#allocation89_spill] sm:$0xff] }
 0x73e   : > { %5758 = vrot.lane.b32.xlu0 %v8039_v39, %s8084_s14  ;;  %v5058_v35 = vsel %vm5031_vm15, %v5017_v54, %v4595_v62  ;;  %v18058_v62 = vld [vmem:[#allocation409_spill] sm:$0xff]  ;;  %v7887_v39 = vunpack.i.h.bf16 %v18037_v37  ;;  %v4898_v52 = vsel %vm2535_vm8, %v4858_v61, %v18065_v3  ;;  %v4936_v43 = vsel %vm2657_vm10, %v4896_v6, %v7821_v14  ;;  %v18074_v14 = vld [vmem:[#allocation16_spill] sm:$0xff]  ;;  %v18075_v20 = vld [vmem:[#allocation458_spill] sm:$0xff] }
 0x73f   : > { %v4720_v58 = vpop.permute.xlu0 %4719  ;;  %v4718_v10 = vpop.permute.xlu1 %4717  ;;  %v7792_v57 = vunpack.i.h.bf16 %v18058_v62  ;;  %v7791_v9 = vunpack.i.l.bf16 %v18058_v62  ;;  %v18076_v3 = vld [vmem:[#allocation173_spill] sm:$0xff] }
 0x740   : > { %v5098_v53 = vsel %vm5072_vm3, %v5057_v38, %v4720_v58  ;;  %v5097_v56 = vsel %vm5072_vm3, %v5056_v32, %v4718_v10  ;;  %v18066_v10 = vld [vmem:[#allocation249_spill] sm:$0xff] }
 0x741   : > { %v5196_v55 = vrot.slane %v5098_v53, 3  ;;  %v5195_v19 = vrot.slane %v5097_v56, 3  ;;  %5760 = vrot.lane.b32.xlu1 %v8040_v34, %s8084_s14  ;;  %v4900_v32 = vsel %vm2535_vm8, %v4860_v63, %v7792_v57  ;;  %v4897_v38 = vsel %vm2535_vm8, %v4857_v45, %v7791_v9  ;;  %v18068_v56 = vld [vmem:[#allocation87_spill] sm:$0xff]  ;;  %v18073_v57 = vld [vmem:[#allocation97_spill] sm:$0xff] }
 0x742   : > { %5762 = vrot.lane.b32.xlu0 %v8041_v0, %s8084_s14  ;;  %v4899_v24 = vsel %vm2535_vm8, %v4859_v46, %v18066_v10  ;;  %v4940_v37 = vsel %vm2657_vm10, %v4900_v32, %v7822_v21  ;;  %v4937_v53 = vsel %vm2657_vm10, %v4897_v38, %v18067_v40  ;;  %v4938_v31 = vsel %vm2657_vm10, %v4898_v52, %v18068_v56  ;;  %v18070_v0 = vld [vmem:[#allocation255_spill] sm:$0xff]  ;;  %v18081_v56 = vld [vmem:[#allocation120_spill] sm:$0xff] }
 0x743   : > { %v14245_v13 = vpop.permute.xlu0 %7924  ;;  %v4722_v2 = vpop.permute.xlu1 %4721  ;;  %v5197_v49 = vsel %vm16337_vm11, %v5195_v19, %v5196_v55  ;;  %v7847_v19 = vunpack.i.h.bf16 %v18062_v4  ;;  %v4977_v34 = vsel %vm4949_vm13, %v4936_v43, %v7846_v23  ;;  %v4979_v22 = vsel %vm4949_vm13, %v4938_v31, %v18070_v0  ;;  %v18078_v43 = vld [vmem:[#allocation177_spill] sm:$0xff] }
 0x744   : > { %v14254_v44 = vsel %vm5072_vm3, %v5058_v35, %v4722_v2  ;;  %7516 = vmatprep.mubr.msk.f32.mxu1 %vm16338_vm7, %v5197_v49  ;;  %v7926_v58 = vunpack.i.l.bf16 %v14245_v13  ;;  %v5018_v7 = vsel %vm4990_vm14, %v4977_v34, %v7887_v39  ;;  %v7927_v16 = vunpack.i.h.bf16 %v14245_v13  ;;  %v18071_v49 = vld [vmem:[#allocation257_spill] sm:$0xff]  ;;  %v18083_v34 = vld [vmem:[#allocation211_spill] sm:$0xff] }
 0x745   : > { %v5198_v18 = vrot.slane %v14254_v44, 3  ;;  %5764 = vrot.lane.b32.xlu1 %v8042_v28, %s8084_s14  ;;  %v5020_v29 = vsel %vm4990_vm14, %v4979_v22, %v18071_v49  ;;  %v4939_v44 = vsel %vm2657_vm10, %v4899_v24, %v18072_v12  ;;  %v4981_v50 = vsel %vm4949_vm13, %v4940_v37, %v7847_v19  ;;  %v18079_v37 = vld [vmem:[#allocation121_spill] sm:$0xff]  ;;  %v18087_v22 = vld [vmem:[#allocation224_spill] sm:$0xff]  ;;  %v18088_v49 = vld [vmem:[#allocation314_spill] sm:$0xff] }
 0x746   : > { %v5059_v35 = vsel %vm5031_vm15, %v5018_v7, %v7926_v58  ;;  %v4980_v9 = vsel %vm4949_vm13, %v4939_v44, %v18073_v57  ;;  %v5022_v28 = vsel %vm4990_vm14, %v4981_v50, %v7892_v60  ;;  %v4821_v52 = vsel %vm2291_vm4, 0.0, %v18076_v3  ;;  %v18077_v58 = vld [vmem:[#allocation209_spill] sm:$0xff]  ;;  %v18085_v60 = vld [vmem:[#allocation250_spill] sm:$0xff]  ;;  %v18091_v50 = vld [vmem:[#allocation323_spill] sm:$0xff] }
 0x747   : > { %v4601_v41 = vpop.permute.xlu0 %4600  ;;  %v4599_v5 = vpop.permute.xlu1 %4598  ;;  %v5199_v51 = vsel %vm16337_vm11, %v5196_v55, %v5198_v18  ;;  %v4978_v55 = vsel %vm4949_vm13, %v4937_v53, %v18069_v59  ;;  %v5063_v45 = vsel %vm5031_vm15, %v5022_v28, %v7927_v16  ;;  %v5021_v36 = vsel %vm4990_vm14, %v4980_v9, %v18074_v14  ;;  %v18080_v53 = vld [vmem:[#allocation178_spill] sm:$0xff]  ;;  %v18095_v3 = vld [vmem:[#allocation179_spill] sm:$0xff] }
 0x748   : > { %7517 = vmatmul.mubr.msk.f32.gmra.mrb[18].mxu1 %vm16338_vm7, %v5199_v51  ;;  %v5019_v1 = vsel %vm4990_vm14, %v4978_v55, %v7891_v30  ;;  %v5061_v48 = vsel %vm5031_vm15, %v5020_v29, %v4601_v41  ;;  %v7796_v30 = vunpack.i.l.bf16 %v18075_v20  ;;  %v4861_v10 = vsel %vm2413_vm6, %v4821_v52, %v18077_v58  ;;  %v18082_v55 = vld [vmem:[#allocation304_spill] sm:$0xff]  ;;  %v18090_v12 = vld [vmem:[#allocation322_spill] sm:$0xff] }
 0x749   : > { %v5060_v2 = vsel %vm5031_vm15, %v5019_v1, %v4599_v5  ;;  %v4823_v40 = vsel %vm2291_vm4, %v18079_v37, %v18078_v43  ;;  %v4822_v31 = vsel %vm2291_vm4, %v18081_v56, %v18080_v53  ;;  %v4825_v52 = vsel %vm2291_vm4, 0.0, %v18095_v3  ;;  %v18098_v43 = vld [vmem:[#allocation348_spill] sm:$0xff] }
 0x74a   : > { %v4901_v59 = vsel %vm2535_vm8, %v4861_v10, %v7796_v30  ;;  %v4862_v19 = vsel %vm2413_vm6, %v4822_v31, %v18082_v55 }
 0x74b   : > { %v4726_v17 = vpop.permute.xlu0 %4725  ;;  %v7930_v8 = vpop.permute.xlu1 %7929 }
 0x74c   : > { %v7931_v54 = vunpack.i.l.bf16 %v7930_v8  ;;  %v5101_v26 = vsel %vm5072_vm3, %v5060_v2, %v4726_v17  ;;  %v7932_v25 = vunpack.i.h.bf16 %v7930_v8  ;;  %v4863_v17 = vsel %vm2413_vm6, %v4823_v40, %v18083_v34  ;;  %v18084_v8 = vld [vmem:[#allocation251_spill] sm:$0xff] }
 0x74d   : > { %v5202_v63 = vrot.slane %v5101_v26, 3  ;;  %v4941_v7 = vsel %vm2657_vm10, %v4901_v59, %v18084_v8  ;;  %v4903_v1 = vsel %vm2535_vm8, %v4863_v17, %v18085_v60  ;;  %v18089_v26 = vld [vmem:[#allocation8_spill] sm:$0xff]  ;;  %v18099_v40 = vld [vmem:[#allocation83_spill] sm:$0xff]  ;;  %v18100_v59 = vld [vmem:[#allocation213_spill] sm:$0xff] }
 0x74e   : > { %v5100_v27 = vsel %vm5072_vm3, %v5059_v35, %v7931_v54  ;;  %v5104_v42 = vsel %vm5072_vm3, %v5063_v45, %v7932_v25  ;;  %v18086_v54 = vld [vmem:[#allocation459_spill] sm:$0xff]  ;;  %v4982_v16 = vsel %vm4949_vm13, %v4941_v7, %v18087_v22  ;;  %v4943_v29 = vsel %vm2657_vm10, %v4903_v1, %v18088_v49  ;;  %v18101_v1 = vld [vmem:[#allocation212_spill] sm:$0xff] }
 0x74f   : > { %v4603_v13 = vpop.permute.xlu0 %4602  ;;  %v4728_v47 = vpop.permute.xlu1 %4727  ;;  %v5200_v62 = vrot.slane %v5100_v27, 3  ;;  %v4902_v0 = vsel %vm2535_vm8, %v4862_v19, %v18086_v54  ;;  %v7851_v53 = vunpack.i.l.bf16 %v18099_v40  ;;  %v4865_v55 = vsel %vm2413_vm6, %v4825_v52, %v18100_v59  ;;  %v18102_v22 = vld [vmem:[#allocation315_spill] sm:$0xff] }
 0x750   : > { %v5102_v33 = vsel %vm5072_vm3, %v5061_v48, %v4728_v47  ;;  %v5062_v46 = vsel %vm5031_vm15, %v5021_v36, %v4603_v13  ;;  %v4942_v25 = vsel %vm2657_vm10, %v4902_v0, %v18089_v26  ;;  %v4984_v48 = vsel %vm4949_vm13, %v4943_v29, %v18091_v50  ;;  %v18105_v29 = vld [vmem:[#allocation307_spill] sm:$0xff] }
 0x751   : > { %v5203_v11 = vrot.slane %v5102_v33, 3  ;;  %v5201_v21 = vsel %vm16337_vm11, %v5198_v18, %v5200_v62  ;;  %v5207_v18 = vrot.slane %v5104_v42, 3  ;;  %v4983_v44 = vsel %vm4949_vm13, %v4942_v25, %v18090_v12  ;;  %v18092_v42 = vld [vmem:[#allocation60_spill] sm:$0xff] }
 0x752   : > { %7519 = vmatprep.mubr.msk.f32.mxu1 %vm16338_vm7, %v5201_v21 }
 0x753   : > { %v14325_v4 = vpop.permute.xlu0 %7934  ;;  %v4730_v23 = vpop.permute.xlu1 %4729  ;;  %v5204_v41 = vsel %vm16337_vm11, %v5202_v63, %v5203_v11 }
 0x754   : > { %v5103_v5 = vsel %vm5072_vm3, %v5062_v46, %v4730_v23  ;;  %7520 = vmatmul.mubr.msk.f32.gmra.mrb[20].mxu1 %vm16338_vm7, %v5204_v41  ;;  %v7936_v24 = vunpack.i.l.bf16 %v14325_v4  ;;  %v7727_v46 = vunpack.i.h.bf16 %v18092_v42  ;;  %v7726_v23 = vunpack.i.l.bf16 %v18092_v42 }
 0x755   : > { %v5205_v51 = vrot.slane %v5103_v5, 3  ;;  %v7937_v19 = vunpack.i.h.bf16 %v14325_v4  ;;  %v18103_v4 = vld [vmem:[#allocation180_spill] sm:$0xff] }
 0x756   : > { %v5023_v27 = vsel %vm4990_vm14, %v4982_v16, %v7936_v24  ;;  %v4828_v58 = vsel %vm2291_vm4, 0.0, %v7727_v46  ;;  %v4824_v10 = vsel %vm2291_vm4, 0.0, %v7726_v23  ;;  %v18097_v24 = vld [vmem:[#allocation181_spill] sm:$0xff] }
 0x757   : > { %v4484_v15 = vpop.permute.xlu0 %4483  ;;  %v4482_v61 = vpop.permute.xlu1 %4481  ;;  %v5206_v6 = vsel %vm16337_vm11, %v5203_v11, %v5205_v51  ;;  %v5208_v39 = vsel %vm16337_vm11, %v5205_v51, %v5207_v18  ;;  %v4826_v37 = vsel %vm2291_vm4, %v18098_v43, %v18097_v24 }
 0x758   : > { %7522 = vmatprep.mubr.msk.f32.mxu1 %vm16338_vm7, %v5206_v6  ;;  %v5025_v47 = vsel %vm4990_vm14, %v4984_v48, %v4484_v15  ;;  %v5024_v62 = vsel %vm4990_vm14, %v4983_v44, %v4482_v61  ;;  %v18093_v15 = vld [vmem:[#allocation210_spill] sm:$0xff]  ;;  %v7797_v6 = vunpack.i.h.bf16 %v18075_v20  ;;  %v4866_v54 = vsel %vm2413_vm6, %v4826_v37, %v18101_v1  ;;  %v18107_v48 = vld [vmem:[#allocation417_spill] sm:$0xff] }
 0x759   : > { %7523 = vmatmul.mubr.msk.f32.gmra.mrb[22].mxu1 %vm16338_vm7, %v5208_v39  ;;  %v7751_v61 = vunpack.i.l.bf16 %v18093_v15  ;;  %v18094_v39 = vld [vmem:[#allocation308_spill] sm:$0xff]  ;;  %v7752_v17 = vunpack.i.h.bf16 %v18093_v15  ;;  %v4906_v26 = vsel %vm2535_vm8, %v4866_v54, %v18105_v29  ;;  %v18111_v37 = vld [vmem:[#allocation10_spill] sm:$0xff] }
 0x75a   : > { %v7801_v30 = vunpack.i.l.bf16 %v18094_v39  ;;  %v7802_v0 = vunpack.i.h.bf16 %v18094_v39 }
 0x75b   : > { %v4609_v32 = vpop.permute.xlu0 %4608  ;;  %v4607_v38 = vpop.permute.xlu1 %4606  ;;  %v4864_v31 = vsel %vm2413_vm6, %v4824_v10, %v7751_v61 }
 0x75c   : > { %v5064_v13 = vsel %vm5031_vm15, %v5023_v27, %v4607_v38  ;;  %v5065_v9 = vsel %vm5031_vm15, %v5024_v62, %v4609_v32  ;;  %v18096_v32 = vld [vmem:[#allocation416_spill] sm:$0xff]  ;;  %v4904_v8 = vsel %vm2535_vm8, %v4864_v31, %v7797_v6  ;;  %v4905_v7 = vsel %vm2535_vm8, %v4865_v55, %v7801_v30  ;;  %v18106_v27 = vld [vmem:[#allocation225_spill] sm:$0xff]  ;;  %v18110_v30 = vld [vmem:[#allocation223_spill] sm:$0xff] }
 0x75d   : > { %v7826_v38 = vunpack.i.l.bf16 %v18096_v32  ;;  %v4945_v16 = vsel %vm2657_vm10, %v4905_v7, %v18102_v22  ;;  %v7827_v42 = vunpack.i.h.bf16 %v18096_v32  ;;  %v3312_v22 = vlaneseq }
 0x75e   : > { %v4986_v12 = vsel %vm4949_vm13, %v4945_v16, %v18106_v27 }
 0x75f   : > { %v4734_v35 = vpop.permute.xlu0 %4733  ;;  %v4611_v2 = vpop.permute.xlu1 %4610  ;;  %v3313_v16 = vshrl.u32 %v3312_v22, 7 }
 0x760   : > { %v5105_v57 = vsel %vm5072_vm3, %v5064_v13, %v4734_v35  ;;  %v5066_v28 = vsel %vm5031_vm15, %v5025_v47, %v4611_v2  ;;  %v4944_v35 = vsel %vm2657_vm10, %v4904_v8, %v7826_v38  ;;  %v18104_v2 = vld [vmem:[#allocation349_spill] sm:$0xff]  ;;  %v4946_v13 = vsel %vm2657_vm10, %v4906_v26, %v18107_v48 }
 0x761   : > { %v5209_v21 = vrot.slane %v5105_v57, 3  ;;  %v4827_v49 = vsel %vm2291_vm4, %v18104_v2, %v18103_v4  ;;  %v4985_v25 = vsel %vm4949_vm13, %v4944_v35, %v7851_v53  ;;  %v14468_v35 = vstv %s7243_s20  ;;  %v14477_v2 = vld [vmem:[%s15951_s5] ss:$0 sm:$0xff]  ;;  %s8098_s20 = smov 72  }
 0x762   : > { %v5026_v47 = vsel %vm4990_vm14, %v4985_v25, %v7937_v19  ;;  %v14470_v4 = vadd.s32 4294967292, %v3313_v16 }
 0x763   : > { %v4738_v33 = vpop.permute.xlu0 %4737  ;;  %v4736_v45 = vpop.permute.xlu1 %4735 }
 0x764   : > { %v14375_v63 = vsel %vm5072_vm3, %v5066_v28, %v4738_v33  ;;  %v5106_v11 = vsel %vm5072_vm3, %v5065_v9, %v4736_v45  ;;  %v4868_v9 = vsel %vm2413_vm6, %v4828_v58, %v7752_v17  ;;  %v18108_v28 = vld [vmem:[#allocation215_spill] sm:$0xff]  ;;  %v18109_v45 = vld [vmem:[#allocation420_spill] sm:$0xff] }
 0x765   : > { %v5212_v14 = vrot.slane %v14375_v63, 3  ;;  %v5210_v36 = vrot.slane %v5106_v11, 3  ;;  %v4867_v33 = vsel %vm2413_vm6, %v4827_v49, %v18108_v28  ;;  %v4987_v11 = vsel %vm4949_vm13, %v4946_v13, %v18109_v45 }
 0x766   : > { %v4907_v3 = vsel %vm2535_vm8, %v4867_v33, %v18110_v30  ;;  %vm5520_vm6 = vcmp.ge.s32.totalorder %v14468_v35, 0 }
 0x767   : > { %v4490_v41 = vpop.permute.xlu0 %4489  ;;  %v14381_v5 = vpop.permute.xlu1 %7939  ;;  %v5211_v51 = vsel %vm16337_vm11, %v5209_v21, %v5210_v36  ;;  %v5213_v18 = vsel %vm16337_vm11, %v5210_v36, %v5212_v14  ;;  %v4908_v36 = vsel %vm2535_vm8, %v4868_v9, %v7802_v0  ;;  %v5507_v9 = vadd.s32 1, %v14468_v35 }
 0x768   : > { %7525 = vmatprep.mubr.msk.f32.mxu1 %vm16338_vm7, %v5211_v51  ;;  %v7941_v34 = vunpack.i.l.bf16 %v14381_v5  ;;  %v5028_v46 = vsel %vm4990_vm14, %v4987_v11, %v4490_v41  ;;  %v7852_v51 = vunpack.i.h.bf16 %v18099_v40  ;;  %v7942_v52 = vunpack.i.h.bf16 %v14381_v5 }
 0x769   : > { %7526 = vmatmul.mubr.msk.f32.gmra.mrb[24].mxu1 %vm16338_vm7, %v5213_v18  ;;  %v4948_v43 = vsel %vm2657_vm10, %v4908_v36, %v7827_v42  ;;  %v4947_v40 = vsel %vm2657_vm10, %v4907_v3, %v18111_v37  ;;  %vm5530_vm10 = vcmp.lt.s32.totalorder %v14468_v35, 16 }
 0x76a   : > { %v5027_v62 = vsel %vm4990_vm14, %v4986_v12, %v7941_v34  ;;  %v4989_v5 = vsel %vm4949_vm13, %v4948_v43, %v7852_v51  ;;  %vm14479_vm9 = vmand %vm5520_vm6, %vm5530_vm10  ;;  %vm5531_vm6 = vcmp.lt.s32.totalorder %v5507_v9, 16 }
 0x76b   : > { %v4615_v20 = vpop.permute.xlu0 %4614  ;;  %v7945_v56 = vpop.permute.xlu1 %7944  ;;  %v5030_v63 = vsel %vm4990_vm14, %v4989_v5, %v7942_v52 }
 0x76c   : > { %v7946_v60 = vunpack.i.l.bf16 %v7945_v56  ;;  %v5068_v18 = vsel %vm5031_vm15, %v5027_v62, %v4615_v20  ;;  %v7947_v38 = vunpack.i.h.bf16 %v7945_v56  ;;  %v18112_v20 = vld [vmem:[#allocation86_spill] sm:$0xff] }
 0x76d   : > { %v4988_v31 = vsel %vm4949_vm13, %v4947_v40, %v18112_v20  ;;  %vm5550_vm13 = vcmp.ge.s32.totalorder %v14470_v4, 0 }
 0x76e   : > { %v5067_v21 = vsel %vm5031_vm15, %v5026_v47, %v7946_v60  ;;  %v5071_v19 = vsel %vm5031_vm15, %v5030_v63, %v7947_v38 }
 0x76f   : > { %v7950_v44 = vpop.permute.xlu0 %7949  ;;  %v4617_v50 = vpop.permute.xlu1 %4616 }
 0x770   : > { %v7951_v57 = vunpack.i.l.bf16 %v7950_v44  ;;  %v5069_v15 = vsel %vm5031_vm15, %v5028_v46, %v4617_v50  ;;  %v7952_v53 = vunpack.i.h.bf16 %v7950_v44  ;;  %v3314_v50 = vadd.s32 16, %v3313_v16 }
 0x772   : > { %v5108_v23 = vsel %vm5072_vm3, %v5067_v21, %v7951_v57  ;;  %v5112_v34 = vsel %vm5072_vm3, %v5071_v19, %v7952_v53  ;;  %v14501_v33 = vadd.s32 4294967292, %v3314_v50 }
 0x773   : > { %v4744_v61 = vpop.permute.xlu0 %4743  ;;  %v4742_v6 = vpop.permute.xlu1 %4741  ;;  %v5214_v39 = vrot.slane %v5108_v23, 3  ;;  %v5221_v1 = vrot.slane %v5112_v34, 3 }
 0x774   : > { %v5110_v32 = vsel %vm5072_vm3, %v5069_v15, %v4744_v61  ;;  %v5109_v41 = vsel %vm5072_vm3, %v5068_v18, %v4742_v6  ;;  %vm5585_vm10 = vcmp.lt.s32.totalorder %v14501_v33, 16 }
 0x775   : > { %v5217_v58 = vrot.slane %v5110_v32, 3  ;;  %v5216_v10 = vrot.slane %v5109_v41, 3  ;;  %v5215_v24 = vsel %vm16337_vm11, %v5212_v14, %v5214_v39  ;;  %v5508_v41 = vadd.s32 2, %v14468_v35 }
 0x776   : > { %7528 = vmatprep.mubr.msk.f32.mxu1 %vm16338_vm7, %v5215_v24 }
 0x777   : > { %v4492_v56 = vpop.permute.xlu1 %4491  ;;  %v5218_v59 = vsel %vm16337_vm11, %v5216_v10, %v5217_v58  ;;  %v4619_v14 = vpop.permute.xlu0 %4618 }
 0x778   : > { %v5029_v55 = vsel %vm4990_vm14, %v4988_v31, %v4492_v56  ;;  %7529 = vmatmul.mubr.msk.f32.gmra.mrb[26].mxu1 %vm16338_vm7, %v5218_v59 }
 0x779   : > { %v5070_v17 = vsel %vm5031_vm15, %v5029_v55, %v4619_v14  ;;  %vm5553_vm15 = vmand %vm14479_vm9, %vm5550_vm13 }
 0x77b   : > { %v4746_v8 = vpop.permute.xlu1 %4745  ;;  %v5707_v44 = vpop.permute.xlu0 %5706 }
 0x77c   : > { %v5111_v7 = vsel %vm5072_vm3, %v5070_v17, %v4746_v8  ;;  %vm5521_vm3 = vcmp.ge.s32.totalorder %v5507_v9, 0 }
 0x77d   : > { %v5219_v60 = vrot.slane %v5111_v7, 3 }
 0x77f   : > { %v5220_v54 = vsel %vm16337_vm11, %v5217_v58, %v5219_v60  ;;  %v5222_v0 = vsel %vm16337_vm11, %v5219_v60, %v5221_v1  ;;  %v5709_v27 = vpop.permute.xlu1 %5708  ;;  %vm5588_vm11 = vmand %vm14479_vm9, %vm5585_vm10  ;;  %v5711_v51 = vpop.permute.xlu0 %5710 }
 0x780   : > { %7531 = vmatprep.mubr.msk.f32.mxu1 %vm16338_vm7, %v5220_v54  ;;  %v5509_v54 = vadd.s32 3, %v14468_v35 }
 0x781   : > { %7532 = vmatmul.mubr.msk.f32.gmra.mrb[28].mxu1 %vm16338_vm7, %v5222_v0 }
 0x783   : > { %v5713_v42 = vpop.permute.xlu1 %5712  ;;  %v5715_v58 = vpop.permute.xlu0 %5714 }
 0x787   : > { %v5717_v32 = vpop.permute.xlu1 %5716  ;;  %v5719_v8 = vpop.permute.xlu0 %5718 }
 0x78b   : > { %v5721_v34 = vpop.permute.xlu1 %5720 }
 0x7c7   : > { %v7491_v29 = vpop.f32.mrb[0].mxu1 }
 0x7c8   : > { %v5362_v26 = vadd.f32 %v7491_v29, %v14477_v2  ;;  %v5356_v25 = vpop.f32.mrb[1].mxu1 }
 0x7c9   : > { %v5357_v12 = vadd.f32 %v14477_v2, %v5356_v25  ;;  %v5725_v25 = vpop.permute.xlu1 %5724 }
 0x7ca   : > { %v5677_v48 = vsel %vm14479_vm9, %v5362_v26, 0.0 }
 0x7cb   : > { %v5676_v13 = vsel %vm5553_vm15, %v5357_v12, 0.0  ;;  %v14493_v47 = vsel %vm2291_vm4, %v5677_v48, %v5709_v27  ;;  %vm14506_vm15 = vmand %vm5521_vm3, %vm5531_vm6  ;;  %vm5532_vm6 = vcmp.lt.s32.totalorder %v5508_v41, 16 }
 0x7cc   : > { %v5866_v62 = vrot.slane %v14493_v47, 1  ;;  %v14497_v57 = vsel %vm2291_vm4, %v5676_v13, %v5707_v44  ;;  %vm14520_vm3 = vmand %vm14506_vm15, %vm5550_vm13  ;;  %v5723_v44 = vpop.permute.xlu0 %5722 }
 0x7cd   : > { %v5865_v28 = vrot.slane %v14497_v57, 1  ;;  %vm5591_vm9 = vmand %vm14506_vm15, %vm5585_vm10 }
 0x7cf   : > { %v5867_v45 = vsel %vm526_vm0, %v5865_v28, %v5866_v62 }
 0x7d0   : > { %5905 = vrot.lane.b32.xlu0 %v5867_v45, %s8085_s15 }
 0x7d3   : > { %v7494_v11 = vpop.f32.mrb[2].mxu1 }
 0x7d4   : > { %v5366_v36 = vpop.f32.mrb[3].mxu1  ;;  %v5372_v46 = vadd.f32 %v7494_v11, %v14477_v2  ;;  %v5729_v11 = vpop.permute.xlu1 %5728 }
 0x7d5   : > { %v5367_v23 = vadd.f32 %v14477_v2, %v5366_v36 }
 0x7d6   : > { %v5679_v6 = vsel %vm14520_vm3, %v5372_v46, 0.0  ;;  %v5510_v46 = vadd.s32 4, %v14468_v35 }
 0x7d7   : > { %v5678_v15 = vsel %vm5588_vm11, %v5367_v23, 0.0  ;;  %v14540_v24 = vsel %vm2291_vm4, %v5679_v6, %v5713_v42  ;;  %vm5522_vm11 = vcmp.ge.s32.totalorder %v5508_v41, 0  ;;  %v5727_v42 = vpop.permute.xlu0 %5726 }
 0x7d8   : > { %v14525_v61 = vsel %vm2291_vm4, %v5678_v15, %v5711_v51  ;;  %v5870_v20 = vrot.slane %v14540_v24, 1 }
 0x7d9   : > { %v5868_v39 = vrot.slane %v14525_v61, 1  ;;  %v7497_v30 = vpop.f32.mrb[4].mxu1 }
 0x7da   : > { %v5382_v3 = vadd.f32 %v7497_v30, %v14477_v2  ;;  %v5376_v52 = vpop.f32.mrb[5].mxu1 }
 0x7db   : > { %v5377_v38 = vadd.f32 %v14477_v2, %v5376_v52  ;;  %5909 = vrot.lane.b32.xlu0 %v5868_v39, %s8085_s15  ;;  %v5869_v10 = vsel %vm526_vm0, %v5866_v62, %v5868_v39 }
 0x7dc   : > { %v5681_v43 = vsel %vm5591_vm9, %v5382_v3, 0.0  ;;  %5907 = vrot.lane.b32.xlu1 %v5869_v10, %s8085_s15  ;;  %vm5523_vm9 = vcmp.ge.s32.totalorder %v5509_v54, 0 }
 0x7dd   : > { %v5680_v37 = vsel %vm14506_vm15, %v5377_v38, 0.0  ;;  %v14546_v40 = vsel %vm2291_vm4, %v5681_v43, %v5717_v32  ;;  %vm14563_vm15 = vmand %vm5522_vm11, %vm5532_vm6  ;;  %vm5533_vm11 = vcmp.lt.s32.totalorder %v5509_v54, 16 }
 0x7de   : > { %v14549_v53 = vrot.slane %v14546_v40, 1  ;;  %v14552_v5 = vsel %vm2291_vm4, %v5680_v37, %v5715_v58  ;;  %vm5559_vm3 = vmand %vm14563_vm15, %vm5550_vm13  ;;  %v5733_v37 = vpop.permute.xlu1 %5732 }
 0x7df   : > { %v5871_v31 = vrot.slane %v14552_v5, 1  ;;  %vm14595_vm6 = vmand %vm5523_vm9, %vm5533_vm11 }
 0x7e0   : > { %vm5562_vm7 = vmand %vm14595_vm6, %vm5550_vm13 }
 0x7e1   : > { %v14558_v56 = vsel %vm526_vm0, %v5871_v31, %v14549_v53  ;;  %v14561_v59 = vsel %vm526_vm0, %v5870_v20, %v5871_v31  ;;  %vm5597_vm9 = vmand %vm14595_vm6, %vm5585_vm10  ;;  %v5731_v31 = vpop.permute.xlu0 %5730 }
 0x7e2   : > { %5913 = vrot.lane.b32.xlu0 %v14558_v56, %s8085_s15  ;;  %5911 = vrot.lane.b32.xlu1 %v14561_v59, %s8085_s15 }
 0x7e3   : > { %v7500_v14 = vpop.f32.mrb[6].mxu1 }
 0x7e4   : > { %v5392_v55 = vadd.f32 %v7500_v14, %v14477_v2  ;;  %v5386_v19 = vpop.f32.mrb[7].mxu1 }
 0x7e5   : > { %v5387_v17 = vadd.f32 %v14477_v2, %v5386_v19  ;;  %v5511_v19 = vadd.s32 5, %v14468_v35 }
 0x7e6   : > { %v5683_v7 = vsel %vm14563_vm15, %v5392_v55, 0.0  ;;  %5915 = vrot.lane.b32.xlu1 %v14549_v53, %s8085_s15 }
 0x7e7   : > { %v5682_v60 = vsel %vm5559_vm3, %v5387_v17, 0.0  ;;  %v14582_v1 = vsel %vm2291_vm4, %v5683_v7, %v5721_v34  ;;  %vm5594_vm3 = vmand %vm14563_vm15, %vm5585_vm10  ;;  %vm5534_vm15 = vcmp.lt.s32.totalorder %v5510_v46, 16 }
 0x7e8   : > { %v14586_v0 = vsel %vm2291_vm4, %v5682_v60, %v5719_v8  ;;  %v5876_v22 = vrot.slane %v14582_v1, 1 }
 0x7e9   : > { %v5875_v16 = vrot.slane %v14586_v0, 1 }
 0x7eb   : > { %v14591_v49 = vsel %vm526_vm0, %v5875_v16, %v5876_v22 }
 0x7ec   : > { %5917 = vrot.lane.b32.xlu0 %v14591_v49, %s8085_s15 }
 0x7ef   : > { %v7503_v26 = vpop.f32.mrb[8].mxu1 }
 0x7f0   : > { %v5402_v27 = vadd.f32 %v7503_v26, %v14477_v2  ;;  %v5396_v12 = vpop.f32.mrb[9].mxu1  ;;  %v5735_v26 = vpop.permute.xlu0 %5734 }
 0x7f1   : > { %v5397_v50 = vadd.f32 %v14477_v2, %v5396_v12 }
 0x7f2   : > { %v5685_v13 = vsel %vm5562_vm7, %v5402_v27, 0.0  ;;  %vm5524_vm7 = vcmp.ge.s32.totalorder %v5510_v46, 0 }
 0x7f3   : > { %v5684_v48 = vsel %vm5594_vm3, %v5397_v50, 0.0  ;;  %v14623_v23 = vsel %vm2291_vm4, %v5685_v13, %v5725_v25  ;;  %vm14657_vm11 = vmand %vm5524_vm7, %vm5534_vm15  ;;  %vm5525_vm3 = vcmp.ge.s32.totalorder %v5511_v19, 0 }
 0x7f4   : > { %v14610_v62 = vsel %vm2291_vm4, %v5684_v48, %v5723_v44  ;;  %v7506_v9 = vpop.f32.mrb[10].mxu1  ;;  %18123 = vst [vmem:[#allocation327_spill] sm:$0xff] %v14623_v23  ;;  %v5880_v52 = vrot.slane %v14623_v23, 1  ;;  %vm5600_vm15 = vmand %vm14657_vm11, %vm5585_vm10 }
 0x7f5   : > { %v5412_v28 = vadd.f32 %v7506_v9, %v14477_v2  ;;  %v5406_v45 = vpop.f32.mrb[11].mxu1  ;;  %v14618_v21 = vrot.slane %v14610_v62, 1 }
 0x7f6   : > { %v5407_v36 = vadd.f32 %v14477_v2, %v5406_v45 }
 0x7f7   : > { %v5687_v51 = vsel %vm5597_vm9, %v5412_v28, 0.0  ;;  %5921 = vrot.lane.b32.xlu0 %v14618_v21, %s8085_s15  ;;  %v14629_v18 = vsel %vm526_vm0, %v5876_v22, %v14618_v21  ;;  %vm5535_vm9 = vcmp.lt.s32.totalorder %v5511_v19, 16  ;;  %v5737_v22 = vpop.permute.xlu1 %5736 }
 0x7f8   : > { %v5686_v15 = vsel %vm14595_vm6, %v5407_v36, 0.0  ;;  %v14634_v6 = vsel %vm2291_vm4, %v5687_v51, %v5729_v11  ;;  %5919 = vrot.lane.b32.xlu1 %v14629_v18, %s8085_s15  ;;  %vm5565_vm6 = vmand %vm14657_vm11, %vm5550_vm13  ;;  %v5739_v11 = vpop.permute.xlu0 %5738  ;;  %v5512_v36 = vadd.s32 6, %v14468_v35 }
 0x7f9   : > { %18124 = vst [vmem:[#allocation102_spill] sm:$0xff] %v14634_v6  ;;  %v14639_v39 = vrot.slane %v14634_v6, 1  ;;  %v14642_v30 = vsel %vm2291_vm4, %v5686_v15, %v5727_v42  ;;  %vm14685_vm7 = vmand %vm5525_vm3, %vm5535_vm9 }
 0x7fa   : > { %18125 = vst [vmem:[#allocation258_spill] sm:$0xff] %v14642_v30  ;;  %v5881_v3 = vrot.slane %v14642_v30, 1  ;;  %vm5603_vm3 = vmand %vm14685_vm7, %vm5585_vm10  ;;  %vm5536_vm9 = vcmp.lt.s32.totalorder %v5512_v36, 16 }
 0x7fb   : > { %v5741_v9 = vpop.permute.xlu1 %5740 }
 0x7fc   : > { %v14648_v32 = vsel %vm526_vm0, %v5881_v3, %v14639_v39  ;;  %v14651_v41 = vsel %vm526_vm0, %v5880_v52, %v5881_v3 }
 0x7fd   : > { %5925 = vrot.lane.b32.xlu0 %v14648_v32, %s8085_s15  ;;  %5923 = vrot.lane.b32.xlu1 %v14651_v41, %s8085_s15 }
 0x7ff   : > { %v7509_v58 = vpop.f32.mrb[12].mxu1  ;;  %v5745_v19 = vpop.permute.xlu1 %5744 }
 0x800   : > { %v5422_v10 = vadd.f32 %v7509_v58, %v14477_v2  ;;  %v5416_v43 = vpop.f32.mrb[13].mxu1 }
 0x801   : > { %v5417_v20 = vadd.f32 %v14477_v2, %v5416_v43  ;;  %5927 = vrot.lane.b32.xlu1 %v14639_v39, %s8085_s15 }
 0x802   : > { %v5689_v63 = vsel %vm14657_vm11, %v5422_v10, 0.0  ;;  %vm5526_vm11 = vcmp.ge.s32.totalorder %v5512_v36, 0 }
 0x803   : > { %v5688_v14 = vsel %vm5565_vm6, %v5417_v20, 0.0  ;;  %v14672_v55 = vsel %vm2291_vm4, %v5689_v63, %v5733_v37  ;;  %vm5568_vm6 = vmand %vm14685_vm7, %vm5550_vm13 }
 0x804   : > { %18128 = vst [vmem:[#allocation423_spill] sm:$0xff] %v14672_v55  ;;  %v14676_v34 = vsel %vm2291_vm4, %v5688_v14, %v5731_v31  ;;  %v5886_v17 = vrot.slane %v14672_v55, 1 }
 0x805   : > { %18129 = vst [vmem:[#allocation259_spill] sm:$0xff] %v14676_v34  ;;  %v5885_v8 = vrot.slane %v14676_v34, 1 }
 0x807   : > { %v14681_v7 = vsel %vm526_vm0, %v5885_v8, %v5886_v17  ;;  %v5743_v8 = vpop.permute.xlu0 %5742 }
 0x808   : > { %5929 = vrot.lane.b32.xlu0 %v14681_v7, %s8085_s15 }
 0x80b   : > { %v7512_v54 = vpop.f32.mrb[14].mxu1 }
 0x80c   : > { %v5432_v16 = vadd.f32 %v7512_v54, %v14477_v2  ;;  %v5426_v29 = vpop.f32.mrb[15].mxu1 }
 0x80d   : > { %v5427_v25 = vadd.f32 %v14477_v2, %v5426_v29 }
 0x80e   : > { %v5691_v12 = vsel %vm5568_vm6, %v5432_v16, 0.0  ;;  %v5513_v16 = vadd.s32 7, %v14468_v35 }
 0x80f   : > { %v5690_v27 = vsel %vm5600_vm15, %v5427_v25, 0.0  ;;  %v14713_v42 = vsel %vm2291_vm4, %v5691_v12, %v5737_v22  ;;  %v5978_v12 = vrot.slane %v14493_v47, 2 }
 0x810   : > { %v14700_v44 = vsel %vm2291_vm4, %v5690_v27, %v5735_v26  ;;  %v7515_v50 = vpop.f32.mrb[16].mxu1  ;;  %v5890_v10 = vrot.slane %v14713_v42, 1  ;;  %vm5527_vm6 = vcmp.ge.s32.totalorder %v5513_v16, 0 }
 0x811   : > { %18132 = vst [vmem:[#allocation330_spill] sm:$0xff] %v14700_v44  ;;  %v5442_v48 = vadd.f32 %v7515_v50, %v14477_v2  ;;  %v5436_v13 = vpop.f32.mrb[17].mxu1  ;;  %v14708_v28 = vrot.slane %v14700_v44, 1 }
 0x812   : > { %v5437_v45 = vadd.f32 %v14477_v2, %v5436_v13 }
 0x813   : > { %v5693_v46 = vsel %vm5603_vm3, %v5442_v48, 0.0  ;;  %5933 = vrot.lane.b32.xlu0 %v14708_v28, %s8085_s15  ;;  %v14719_v51 = vsel %vm526_vm0, %v5886_v17, %v14708_v28  ;;  %vm5537_vm3 = vcmp.lt.s32.totalorder %v5513_v16, 16  ;;  %v5749_v48 = vpop.permute.xlu1 %5748 }
 0x814   : > { %v5692_v15 = vsel %vm14685_vm7, %v5437_v45, 0.0  ;;  %v14724_v3 = vsel %vm2291_vm4, %v5693_v46, %v5741_v9  ;;  %5931 = vrot.lane.b32.xlu1 %v14719_v51, %s8085_s15  ;;  %vm14747_vm7 = vmand %vm5526_vm11, %vm5536_vm9  ;;  %v5747_v45 = vpop.permute.xlu0 %5746 }
 0x815   : > { %18133 = vst [vmem:[#allocation104_spill] sm:$0xff] %v14724_v3  ;;  %v14729_v52 = vrot.slane %v14724_v3, 1  ;;  %v14732_v38 = vsel %vm2291_vm4, %v5692_v15, %v5739_v11  ;;  %vm5571_vm15 = vmand %vm14747_vm7, %vm5550_vm13 }
 0x816   : > { %v5891_v58 = vrot.slane %v14732_v38, 1  ;;  %vm14775_vm11 = vmand %vm5527_vm6, %vm5537_vm3 }
 0x817   : > { %vm5606_vm9 = vmand %vm14747_vm7, %vm5585_vm10 }
 0x818   : > { %v14738_v43 = vsel %vm526_vm0, %v5891_v58, %v14729_v52  ;;  %v14741_v37 = vsel %vm526_vm0, %v5890_v10, %v5891_v58  ;;  %vm5609_vm6 = vmand %vm14775_vm11, %vm5585_vm10 }
 0x819   : > { %5937 = vrot.lane.b32.xlu0 %v14738_v43, %s8085_s15  ;;  %5935 = vrot.lane.b32.xlu1 %v14741_v37, %s8085_s15 }
 0x81b   : > { %v7518_v31 = vpop.f32.mrb[18].mxu1 }
 0x81c   : > { %v5452_v63 = vadd.f32 %v7518_v31, %v14477_v2  ;;  %v5446_v14 = vpop.f32.mrb[19].mxu1  ;;  %v5753_v31 = vpop.permute.xlu1 %5752 }
 0x81d   : > { %v5447_v17 = vadd.f32 %v14477_v2, %v5446_v14  ;;  %5939 = vrot.lane.b32.xlu1 %v14729_v52, %s8085_s15 }
 0x81e   : > { %v5695_v60 = vsel %vm14747_vm7, %v5452_v63, 0.0 }
 0x81f   : > { %v5694_v54 = vsel %vm5571_vm15, %v5447_v17, 0.0  ;;  %v14762_v22 = vsel %vm2291_vm4, %v5695_v60, %v5745_v19  ;;  %vm5574_vm15 = vmand %vm14775_vm11, %vm5550_vm13  ;;  %v5751_v19 = vpop.permute.xlu0 %5750 }
 0x820   : > { %v14766_v29 = vsel %vm2291_vm4, %v5694_v54, %v5743_v8  ;;  %v5896_v26 = vrot.slane %v14762_v22, 1 }
 0x821   : > { %v5895_v25 = vrot.slane %v14766_v29, 1 }
 0x823   : > { %v14771_v27 = vsel %vm526_vm0, %v5895_v25, %v5896_v26 }
 0x824   : > { %5941 = vrot.lane.b32.xlu0 %v14771_v27, %s8085_s15 }
 0x827   : > { %v7521_v50 = vpop.f32.mrb[20].mxu1 }
 0x828   : > { %v5462_v13 = vadd.f32 %v7521_v50, %v14477_v2  ;;  %v5456_v9 = vpop.f32.mrb[21].mxu1 }
 0x829   : > { %v5457_v11 = vadd.f32 %v14477_v2, %v5456_v9  ;;  %v5977_v9 = vrot.slane %v14497_v57, 2 }
 0x82a   : > { %v5697_v46 = vsel %vm5574_vm15, %v5462_v13, 0.0  ;;  %v5514_v13 = vadd.s32 8, %v14468_v35 }
 0x82b   : > { %v5696_v36 = vsel %vm5606_vm9, %v5457_v11, 0.0  ;;  %v14802_v17 = vsel %vm2291_vm4, %v5697_v46, %v5749_v48  ;;  %v5979_v46 = vsel %vm815_vm1, %v5977_v9, %v5978_v12 }
 0x82c   : > { %v14790_v15 = vsel %vm2291_vm4, %v5696_v36, %v5747_v45  ;;  %v7524_v58 = vpop.f32.mrb[22].mxu1  ;;  %18138 = vst [vmem:[#allocation14_spill] sm:$0xff] %v14802_v17  ;;  %vm5528_vm7 = vcmp.ge.s32.totalorder %v5514_v13, 0  ;;  %vm5538_vm3 = vcmp.lt.s32.totalorder %v5514_v13, 16  ;;  %v5980_v36 = vrot.slane %v14525_v61, 2 }
 0x82d   : > { %v5472_v10 = vadd.f32 %v7524_v58, %v14477_v2  ;;  %v5466_v20 = vpop.f32.mrb[23].mxu1  ;;  %v14798_v63 = vrot.slane %v14790_v15, 1 }
 0x82e   : > { %v5467_v14 = vadd.f32 %v14477_v2, %v5466_v20  ;;  %v5983_v20 = vrot.slane %v14552_v5, 2 }
 0x82f   : > { %v5699_v8 = vsel %vm5609_vm6, %v5472_v10, 0.0  ;;  %5945 = vrot.lane.b32.xlu0 %v14798_v63, %s8085_s15  ;;  %v14808_v60 = vsel %vm526_vm0, %v5896_v26, %v14798_v63  ;;  %v5900_v26 = vrot.slane %v14802_v17, 1  ;;  %v14849_v10 = vrot.slane %v14546_v40, 2 }
 0x830   : > { %v5698_v54 = vsel %vm14775_vm11, %v5467_v14, 0.0  ;;  %v14813_v16 = vsel %vm2291_vm4, %v5699_v8, %v5753_v31  ;;  %5943 = vrot.lane.b32.xlu1 %v14808_v60, %s8085_s15  ;;  %vm14844_vm11 = vmand %vm5528_vm7, %vm5538_vm3  ;;  %v5981_v14 = vsel %vm815_vm1, %v5978_v12, %v5980_v36 }
 0x831   : > { %18139 = vst [vmem:[#allocation331_spill] sm:$0xff] %v14813_v16  ;;  %v14818_v25 = vrot.slane %v14813_v16, 1  ;;  %v14821_v50 = vsel %vm2291_vm4, %v5698_v54, %v5751_v19  ;;  %v5982_v19 = vrot.slane %v14540_v24, 2  ;;  %vm14859_vm9 = vmand %vm14844_vm11, %vm5550_vm13  ;;  %v14870_v9 = vsel %vm815_vm1, %v5983_v20, %v14849_v10 }
 0x832   : > { %v5901_v48 = vrot.slane %v14821_v50, 1  ;;  %vm5612_vm7 = vmand %vm14844_vm11, %vm5585_vm10 }
 0x833   : > { %18140 = vst [vmem:[#allocation424_spill] sm:$0xff] %v14818_v25 }
 0x834   : > { %v14830_v45 = vsel %vm526_vm0, %v5901_v48, %v14818_v25  ;;  %v14833_v11 = vsel %vm526_vm0, %v5900_v26, %v5901_v48  ;;  %v5757_v26 = vpop.permute.xlu1 %5756 }
 0x835   : > { %18141 = vst [vmem:[#allocation17_spill] sm:$0xff] %v14830_v45  ;;  %18142 = vst [vmem:[#allocation425_spill] sm:$0xff] %v14833_v11  ;;  %5949 = vrot.lane.b32.xlu0 %v14830_v45, %s8085_s15  ;;  %5947 = vrot.lane.b32.xlu1 %v14833_v11, %s8085_s15 }
 0x838   : > { %v5761_v17 = vpop.permute.xlu1 %5760 }
 0x839   : > { %6017 = vrot.lane.b32.xlu0 %v5979_v46, %s8088_s19  ;;  %5951 = vrot.lane.b32.xlu1 %v14818_v25, %s8085_s15  ;;  %v14873_v46 = vsel %vm815_vm1, %v5982_v19, %v5983_v20  ;;  %s8097_s15 = smov 60  }
 0x83c   : > { %v7527_v31 = vpop.f32.mrb[24].mxu1 }
 0x83d   : > { %v5482_v8 = vadd.f32 %v7527_v31, %v14477_v2  ;;  %v5476_v54 = vpop.f32.mrb[25].mxu1  ;;  %6021 = vrot.lane.b32.xlu0 %v5980_v36, %s8088_s19  ;;  %6019 = vrot.lane.b32.xlu1 %v5981_v14, %s8088_s19  ;;  %v5755_v31 = vpop.permute.xlu0 %5754  ;;  %v5987_v14 = vrot.slane %v14586_v0, 2 }
 0x83e   : > { %v5477_v13 = vadd.f32 %v14477_v2, %v5476_v54  ;;  %v5988_v54 = vrot.slane %v14582_v1, 2 }
 0x83f   : > { %v5701_v12 = vsel %vm14844_vm11, %v5482_v8, 0.0 }
 0x840   : > { %v5700_v25 = vsel %vm14859_vm9, %v5477_v13, 0.0  ;;  %v14878_v36 = vsel %vm2291_vm4, %v5701_v12, %v5757_v26  ;;  %v14894_v26 = vsel %vm815_vm1, %v5987_v14, %v5988_v54  ;;  %v14897_v13 = vrot.slane %v14610_v62, 2 }
 0x841   : > { %18147 = vst [vmem:[#allocation107_spill] sm:$0xff] %v14878_v36  ;;  %v6165_v8 = vrot.slane %v14878_v36, 1  ;;  %v6242_v11 = vrot.slane %v14878_v36, 2  ;;  %6025 = vrot.lane.b32.xlu0 %v14870_v9, %s8088_s19  ;;  %6023 = vrot.lane.b32.xlu1 %v14873_v46, %s8088_s19  ;;  %v14889_v20 = vsel %vm2291_vm4, %v5700_v25, %v5755_v31  ;;  %v14910_v25 = vrot.slane %v14634_v6, 2 }
 0x842   : > { %18148 = vst [vmem:[#allocation260_spill] sm:$0xff] %v14889_v20  ;;  %v6164_v19 = vrot.slane %v14889_v20, 1  ;;  %v6241_v48 = vrot.slane %v14889_v20, 2  ;;  %v14914_v31 = vsel %vm815_vm1, %v5988_v54, %v14897_v13  ;;  %v5515_v14 = vadd.s32 9, %v14468_v35 }
 0x844   : > { %v14900_v12 = vsel %vm526_vm0, %v6164_v19, %v6165_v8  ;;  %v14903_v36 = vsel %vm815_vm1, %v6241_v48, %v6242_v11  ;;  %v5993_v19 = vrot.slane %v14642_v30, 2  ;;  %v5992_v48 = vrot.slane %v14623_v23, 2 }
 0x845   : > { %18149 = vst [vmem:[#allocation261_spill] sm:$0xff] %v14900_v12  ;;  %18150 = vst [vmem:[#allocation109_spill] sm:$0xff] %v14903_v36  ;;  %6029 = vrot.lane.b32.xlu0 %v14894_v26, %s8088_s19  ;;  %6027 = vrot.lane.b32.xlu1 %v14849_v10, %s8088_s19  ;;  %vm5529_vm15 = vcmp.ge.s32.totalorder %v5515_v14, 0  ;;  %vm5539_vm6 = vcmp.lt.s32.totalorder %v5515_v14, 16  ;;  %v5759_v14 = vpop.permute.xlu0 %5758 }
 0x846   : > { %v14929_v35 = vsel %vm815_vm1, %v5993_v19, %v14910_v25  ;;  %v14932_v54 = vsel %vm815_vm1, %v5992_v48, %v5993_v19  ;;  %vm14939_vm3 = vmand %vm5529_vm15, %vm5539_vm6  ;;  %vm6717_vm15 = vcmask 785408   ;;  %vm18183_vm6 = vcmask 588800  }
 0x847   : > { %vm5580_vm11 = vmand %vm14939_vm3, %vm5550_vm13 }
 0x848   : > { %vm5615_vm9 = vmand %vm14939_vm3, %vm5585_vm10  ;;  %vm6692_vm10 = vcmask 687104  }
 0x849   : > { %6033 = vrot.lane.b32.xlu0 %v14897_v13, %s8088_s19  ;;  %6031 = vrot.lane.b32.xlu1 %v14914_v31, %s8088_s19  ;;  %v5763_v33 = vpop.permute.xlu0 %5762 }
 0x84b   : > { %v7530_v36 = vpop.f32.mrb[26].mxu1 }
 0x84c   : > { %v5486_v12 = vpop.f32.mrb[27].mxu1  ;;  %v5492_v19 = vadd.f32 %v7530_v36, %v14477_v2 }
 0x84d   : > { %v5487_v20 = vadd.f32 %v14477_v2, %v5486_v12  ;;  %6037 = vrot.lane.b32.xlu0 %v14929_v35, %s8088_s19  ;;  %6035 = vrot.lane.b32.xlu1 %v14932_v54, %s8088_s19 }
 0x84f   : > { %v5702_v58 = vsel %vm5612_vm7, %v5487_v20, 0.0  ;;  %vm18184_vm7 = vmmov %vm18183_vm6 }
 0x850   : > { %v14944_v16 = vsel %vm2291_vm4, %v5702_v58, %v5759_v14  ;;  %v5703_v14 = vsel %vm5580_vm11, %v5492_v19, 0.0  ;;  %vm18185_vm11 = vcmask 1044480  }
 0x851   : > { %18153 = vst [vmem:[#allocation334_spill] sm:$0xff] %v14944_v16  ;;  %6092 = vrot.lane.b32.xlu0 %v14540_v24, %s8096_s16  ;;  %6039 = vrot.lane.b32.xlu1 %v14910_v25, %s8088_s19  ;;  %v14952_v12 = vrot.slane %v14944_v16, 1  ;;  %v14955_v48 = vrot.slane %v14944_v16, 2  ;;  %v14980_v19 = vsel %vm2291_vm4, %v5703_v14, %v5761_v17 }
 0x852   : > { %18158 = vst [vmem:[#allocation427_spill] sm:$0xff] %v14980_v19 }
 0x853   : > { %18154 = vst [vmem:[#allocation18_spill] sm:$0xff] %v14952_v12  ;;  %18155 = vst [vmem:[#allocation335_spill] sm:$0xff] %v14955_v48  ;;  %v14963_v36 = vsel %vm526_vm0, %v6165_v8, %v14952_v12  ;;  %v14967_v20 = vsel %vm815_vm1, %v6242_v11, %v14955_v48  ;;  %v5765_v11 = vpop.permute.xlu1 %5764 }
 0x854   : > { %18156 = vst [vmem:[#allocation426_spill] sm:$0xff] %v14963_v36  ;;  %18157 = vst [vmem:[#allocation20_spill] sm:$0xff] %v14967_v20  ;;  %v7533_v58 = vpop.f32.mrb[28].mxu1 }
 0x855   : > { %6096 = vrot.lane.b32.xlu0 %v14546_v40, %s8096_s16  ;;  %6094 = vrot.lane.b32.xlu1 %v14552_v5, %s8096_s16  ;;  %v5502_v4 = vadd.f32 %v7533_v58, %v14477_v2  ;;  %v5496_v8 = vpop.f32.mrb[29].mxu1 }
 0x856   : > { %v5497_v12 = vadd.f32 %v14477_v2, %v5496_v8 }
 0x857   : > { %v5705_v48 = vsel %vm5615_vm9, %v5502_v4, 0.0  ;;  %vm18186_vm9 = vmmov %vm18183_vm6 }
 0x858   : > { %v5704_v20 = vsel %vm14939_vm3, %v5497_v12, 0.0  ;;  %v14989_v58 = vsel %vm2291_vm4, %v5705_v48, %v5765_v11  ;;  %v6393_v12 = vrot.slane %v14980_v19, 1  ;;  %vm6812_vm3 = vcmask 883712  }
 0x859   : > { %6171 = vrot.lane.b32.xlu0 %v14558_v56, %s8093_s18  ;;  %6169 = vrot.lane.b32.xlu1 %v14561_v59, %s8093_s18  ;;  %18159 = vst [vmem:[#allocation105_spill] sm:$0xff] %v14989_v58  ;;  %v14992_v2 = vsel %vm2291_vm4, %v5704_v20, %v5763_v33  ;;  %v16361_v4 = vrot.slane %v14989_v58, 1  ;;  %v16360_v17 = vrot.slane %v14989_v58, 2  ;;  %v6470_v56 = vrot.slane %v14980_v19, 2  ;;  %v5828_v33 = vld [vmem:[%s15952_s6 + $0x10] sm:$0xff] }
 0x85a   : > { %18160 = vst [vmem:[#allocation262_spill] sm:$0xff] %v14992_v2  ;;  %v6394_v14 = vrot.slane %v14992_v2, 1  ;;  %v6471_v45 = vrot.slane %v14992_v2, 2 }
 0x85c   : > { %v15005_v59 = vsel %vm526_vm0, %v6393_v12, %v6394_v14  ;;  %v15010_v48 = vsel %vm526_vm0, %v6394_v14, %v16361_v4  ;;  %v15015_v20 = vsel %vm815_vm1, %v6471_v45, %v16360_v17  ;;  %v15024_v8 = vsel %vm815_vm1, %v6470_v56, %v6471_v45  ;;  %v5829_v14 = vld [vmem:[%s15952_s6 + $0x18] sm:$0xff]  ;;  %v5832_v56 = vld [vmem:[%s15952_s6 + $0x30] sm:$0xff] }
 0x85d   : > { %6246 = vrot.lane.b32.xlu0 %v14873_v46, %s8097_s15  ;;  %6173 = vrot.lane.b32.xlu1 %v14549_v53, %s8093_s18  ;;  %18161 = vst [vmem:[#allocation112_spill] sm:$0xff] %v15005_v59  ;;  %18162 = vst [vmem:[#allocation263_spill] sm:$0xff] %v15010_v48  ;;  %v5826_v46 = vld [vmem:[%s15952_s6] sm:$0xff]  ;;  %v5827_v53 = vld [vmem:[%s15952_s6 + $0x8] sm:$0xff]  ;;  %v7614_v12 = vpack.c.bf16 %v5829_v14, %v5828_v33  ;;  %vm8100_vm0 = vmmov 1  }
 0x85e   : > { %18163 = vst [vmem:[#allocation338_spill] sm:$0xff] %v15015_v20  ;;  %18164 = vst [vmem:[#allocation21_spill] sm:$0xff] %v15024_v8  ;;  %v7610_v11 = vpack.c.bf16 %v5827_v53, %v5826_v46  ;;  %v5833_v46 = vld [vmem:[%s15952_s6 + $0x38] sm:$0xff]  ;;  %v5835_v33 = vld [vmem:[%s15952_s6 + $0x48] sm:$0xff] }
 0x85f   : > { %v7622_v53 = vpack.c.bf16 %v5833_v46, %v5832_v56  ;;  %v5838_v56 = vld [vmem:[%s15952_s6 + $0x60] sm:$0xff]  ;;  %v5839_v46 = vld [vmem:[%s15952_s6 + $0x68] sm:$0xf]  ;;  %vm7635_vm13 = vmpackc.low %vm2990_vm2, %vm8100_vm0  ;;  %vm6643_vm2 = vcmask 490496  }
 0x860   : > { %7611 = vmatprep.subr.bf16.mxu1 %v7610_v11  ;;  %vm18187_vm0 = vmmov %vm18185_vm11 }
 0x861   : > { %6250 = vrot.lane.b32.xlu0 %v14849_v10, %s8097_s15  ;;  %6248 = vrot.lane.b32.xlu1 %v14870_v9, %s8097_s15  ;;  %v5830_v10 = vld [vmem:[%s15952_s6 + $0x20] sm:$0xff]  ;;  %v5831_v9 = vld [vmem:[%s15952_s6 + $0x28] sm:$0xff] }
 0x862   : > { %7613 = vmatpush3.bf16.msra.mxu1 %v7610_v11  ;;  %v7618_v45 = vpack.c.bf16 %v5831_v9, %v5830_v10  ;;  %v5834_v11 = vld [vmem:[%s15952_s6 + $0x40] sm:$0xff]  ;;  %v5836_v10 = vld [vmem:[%s15952_s6 + $0x50] sm:$0xff]  ;;  %v5837_v9 = vld [vmem:[%s15952_s6 + $0x58] sm:$0xff] }
 0x863   : > { %7615 = vmatprep.subr.bf16.mxu1 %v7614_v12  ;;  %v7626_v14 = vpack.c.bf16 %v5835_v33, %v5834_v11 }
 0x865   : > { %6323 = vrot.lane.b32.xlu0 %v14582_v1, %s8098_s20  ;;  %6321 = vrot.lane.b32.xlu1 %v14586_v0, %s8098_s20 }
 0x866   : > { %7617 = vmatpush3.bf16.msra.mxu1 %v7614_v12  ;;  %v15070_v12 = vpop.permute.xlu1 %5907 }
 0x867   : > { %7619 = vmatprep.subr.bf16.mxu1 %v7618_v45 }
 0x869   : > { %6100 = vrot.lane.b32.xlu0 %v14582_v1, %s8096_s16  ;;  %6098 = vrot.lane.b32.xlu1 %v14586_v0, %s8096_s16 }
 0x86a   : > { %7621 = vmatpush3.bf16.msra.mxu1 %v7618_v45  ;;  %v7630_v45 = vpack.c.bf16 %v5837_v9, %v5836_v10  ;;  %v15088_v11 = vpop.permute.xlu1 %5911 }
 0x86b   : > { %7623 = vmatprep.subr.bf16.mxu1 %v7622_v53 }
 0x86d   : > { %6398 = vrot.lane.b32.xlu0 %v14591_v49, %s8099_s25  ;;  %6325 = vrot.lane.b32.xlu1 %v14610_v62, %s8098_s20 }
 0x86e   : > { %7625 = vmatpush3.bf16.msra.mxu1 %v7622_v53  ;;  %v7634_v53 = vpack.c.bf16 %v5839_v46, %v5838_v56 }
 0x86f   : > { %7627 = vmatprep.subr.bf16.mxu1 %v7626_v14 }
 0x871   : > { %6102 = vrot.lane.b32.xlu0 %v14610_v62, %s8096_s16  ;;  %6400 = vrot.lane.b32.xlu1 %v14629_v18, %s8099_s25 }
 0x872   : > { %7629 = vmatpush3.bf16.msra.mxu1 %v7626_v14 }
 0x873   : > { %7631 = vmatprep.subr.bf16.mxu1 %v7630_v45 }
 0x875   : > { %6177 = vrot.lane.b32.xlu0 %v14629_v18, %s8093_s18  ;;  %6175 = vrot.lane.b32.xlu1 %v14591_v49, %s8093_s18  ;;  %v15095_v49 = vpop.permute.xlu0 %5905  ;;  %v15101_v18 = vpop.permute.xlu1 %5915 }
 0x876   : > { %7633 = vmatpush3.bf16.msra.mxu1 %v7630_v45  ;;  %v6547_v16 = vsel %vm2352_vm5, %v14497_v57, %v15095_v49  ;;  %v6002_v49 = vrot.slane %v14713_v42, 2 }
 0x877   : > { %7636 = vmatprep.subr.msk.bf16.mxu1 %vm7635_vm13, %v7634_v53 }
 0x879   : > { %6475 = vrot.lane.b32.xlu0 %v14894_v26, %s8101_s21  ;;  %6402 = vrot.lane.b32.xlu1 %v14618_v21, %s8099_s25  ;;  %v15103_v33 = vpop.permute.xlu0 %5909  ;;  %v15109_v14 = vpop.permute.xlu1 %5919 }
 0x87a   : > { %7639 = vmatpush3.bf16.msk.msra.mxu1 %vm7635_vm13, %v7634_v53  ;;  %vm18188_vm13 = vmmov %vm18183_vm6 }
 0x87d   : > { %6179 = vrot.lane.b32.xlu0 %v14618_v21, %s8093_s18  ;;  %6477 = vrot.lane.b32.xlu1 %v14914_v31, %s8101_s21  ;;  %v15111_v10 = vpop.permute.xlu0 %5913  ;;  %v15119_v9 = vpop.permute.xlu1 %5923 }
 0x87e   : > { %18165 = vst [vmem:[#allocation339_spill] sm:$0xff] %v15119_v9 }
 0x881   : > { %6254 = vrot.lane.b32.xlu0 %v14914_v31, %s8097_s15  ;;  %6252 = vrot.lane.b32.xlu1 %v14894_v26, %s8097_s15  ;;  %v15117_v21 = vpop.permute.xlu0 %5917  ;;  %v15131_v31 = vpop.permute.xlu1 %5927 }
 0x882   : > { %18166 = vst [vmem:[#allocation428_spill] sm:$0xff] %v15131_v31 }
 0x885   : > { %6256 = vrot.lane.b32.xlu0 %v14897_v13, %s8097_s15  ;;  %6479 = vrot.lane.b32.xlu1 %v14897_v13, %s8101_s21  ;;  %v15125_v26 = vpop.permute.xlu0 %5921 }
 0x886   : > { %v15139_v45 = vpop.permute.xlu1 %5931 }
 0x887   : > { %18168 = vst [vmem:[#allocation429_spill] sm:$0xff] %v15139_v45 }
 0x889   : > { %6329 = vrot.lane.b32.xlu0 %v14642_v30, %s8098_s20  ;;  %6327 = vrot.lane.b32.xlu1 %v14623_v23, %s8098_s20  ;;  %v15133_v13 = vpop.permute.xlu0 %5925 }
 0x88a   : > { %18167 = vst [vmem:[#allocation19_spill] sm:$0xff] %v15133_v13 }
 0x88b   : > { %v15149_v53 = vpop.permute.xlu1 %5935 }
 0x88c   : > { %18171 = vst [vmem:[#allocation117_spill] sm:$0xff] %v15149_v53 }
 0x88d   : > { %6106 = vrot.lane.b32.xlu0 %v14642_v30, %s8096_s16  ;;  %6104 = vrot.lane.b32.xlu1 %v14623_v23, %s8096_s16  ;;  %v15141_v56 = vpop.permute.xlu0 %5929  ;;  %v6005_v23 = vrot.slane %v14724_v3, 2  ;;  %v6003_v30 = vrot.slane %v14732_v38, 2 }
 0x88e   : > { %18169 = vst [vmem:[#allocation114_spill] sm:$0xff] %v15141_v56  ;;  %v6000_v56 = vrot.slane %v14700_v44, 2 }
 0x88f   : > { %v15161_v4 = vpop.permute.xlu1 %5939 }
 0x890   : > { %18173 = vst [vmem:[#allocation342_spill] sm:$0xff] %v15161_v4 }
 0x891   : > { %6404 = vrot.lane.b32.xlu0 %v14651_v41, %s8099_s25  ;;  %6331 = vrot.lane.b32.xlu1 %v14634_v6, %s8098_s20  ;;  %v15147_v46 = vpop.permute.xlu0 %5933 }
 0x892   : > { %18170 = vst [vmem:[#allocation264_spill] sm:$0xff] %v15147_v46  ;;  %v5998_v46 = vrot.slane %v14672_v55, 2 }
 0x895   : > { %6108 = vrot.lane.b32.xlu0 %v14634_v6, %s8096_s16  ;;  %6406 = vrot.lane.b32.xlu1 %v14648_v32, %s8099_s25  ;;  %v15155_v17 = vpop.permute.xlu0 %5937 }
 0x896   : > { %18172 = vst [vmem:[#allocation265_spill] sm:$0xff] %v15155_v17  ;;  %v5997_v17 = vrot.slane %v14676_v34, 2 }
 0x898   : > { %v5999_v48 = vsel %vm815_vm1, %v5997_v17, %v5998_v46 }
 0x899   : > { %6183 = vrot.lane.b32.xlu0 %v14648_v32, %s8093_s18  ;;  %6181 = vrot.lane.b32.xlu1 %v14651_v41, %s8093_s18  ;;  %v15163_v8 = vpop.permute.xlu0 %5941 }
 0x89a   : > { %18174 = vst [vmem:[#allocation226_spill] sm:$0xff] %v15163_v8 }
 0x89d   : > { %6481 = vrot.lane.b32.xlu0 %v14932_v54, %s8101_s21  ;;  %6408 = vrot.lane.b32.xlu1 %v14639_v39, %s8099_s25 }
 0x8a1   : > { %6185 = vrot.lane.b32.xlu0 %v14639_v39, %s8093_s18  ;;  %6483 = vrot.lane.b32.xlu1 %v14929_v35, %s8101_s21  ;;  %v15171_v41 = vpop.permute.xlu0 %5945 }
 0x8a2   : > { %v15169_v32 = vpop.permute.xlu1 %5943  ;;  %18176 = vst [vmem:[#allocation430_spill] sm:$0xff] %v15171_v41 }
 0x8a3   : > { %18175 = vst [vmem:[#allocation343_spill] sm:$0xff] %v15169_v32 }
 0x8a5   : > { %6260 = vrot.lane.b32.xlu0 %v14929_v35, %s8097_s15  ;;  %6258 = vrot.lane.b32.xlu1 %v14932_v54, %s8097_s15 }
 0x8a7   : > { %v15177_v53 = vpop.permute.xlu0 %5949  ;;  %v15179_v4 = vpop.permute.xlu1 %5947 }
 0x8a8   : > { %18177 = vst [vmem:[#allocation227_spill] sm:$0xff] %v15177_v53  ;;  %18178 = vst [vmem:[#allocation163_spill] sm:$0xff] %v15179_v4 }
 0x8a9   : > { %6262 = vrot.lane.b32.xlu0 %v14910_v25, %s8097_s15  ;;  %6485 = vrot.lane.b32.xlu1 %v14910_v25, %s8101_s21 }
 0x8ab   : > { %v15185_v39 = vpop.permute.xlu0 %6017  ;;  %v15187_v32 = vpop.permute.xlu1 %5951 }
 0x8ac   : > { %18179 = vst [vmem:[#allocation22_spill] sm:$0xff] %v15187_v32  ;;  %v6571_v9 = vsel %vm2535_vm8, %v6547_v16, %v15185_v39 }
 0x8ad   : > { %6335 = vrot.lane.b32.xlu0 %v14672_v55, %s8098_s20  ;;  %6333 = vrot.lane.b32.xlu1 %v14676_v34, %s8098_s20 }
 0x8af   : > { %v15193_v35 = vpop.permute.xlu0 %6021  ;;  %v15195_v54 = vpop.permute.xlu1 %6019 }
 0x8b1   : > { %6112 = vrot.lane.b32.xlu0 %v14672_v55, %s8096_s16  ;;  %6110 = vrot.lane.b32.xlu1 %v14676_v34, %s8096_s16 }
 0x8b3   : > { %v15201_v25 = vpop.permute.xlu0 %6025  ;;  %v15203_v4 = vpop.permute.xlu1 %6023 }
 0x8b5   : > { %6410 = vrot.lane.b32.xlu0 %v14681_v7, %s8099_s25  ;;  %6337 = vrot.lane.b32.xlu1 %v14700_v44, %s8098_s20 }
 0x8b7   : > { %v15209_v32 = vpop.permute.xlu0 %6029  ;;  %v15211_v53 = vpop.permute.xlu1 %6027 }
 0x8b9   : > { %6114 = vrot.lane.b32.xlu0 %v14700_v44, %s8096_s16  ;;  %6412 = vrot.lane.b32.xlu1 %v14719_v51, %s8099_s25 }
 0x8bb   : > { %v15217_v41 = vpop.permute.xlu0 %6033  ;;  %v15219_v8 = vpop.permute.xlu1 %6031 }
 0x8bd   : > { %6189 = vrot.lane.b32.xlu0 %v14719_v51, %s8093_s18  ;;  %6187 = vrot.lane.b32.xlu1 %v14681_v7, %s8093_s18  ;;  %v6001_v51 = vsel %vm815_vm1, %v5998_v46, %v6000_v56 }
 0x8bf   : > { %v15227_v20 = vpop.permute.xlu0 %6037  ;;  %v15229_v45 = vpop.permute.xlu1 %6035 }
 0x8c0   : > { %18180 = vst [vmem:[#allocation431_spill] sm:$0xff] %v15227_v20  ;;  %18181 = vst [vmem:[#allocation119_spill] sm:$0xff] %v15229_v45 }
 0x8c1   : > { %6487 = vrot.lane.b32.xlu0 %v5999_v48, %s8101_s21  ;;  %6414 = vrot.lane.b32.xlu1 %v14708_v28, %s8099_s25 }
 0x8c3   : > { %v6093_v55 = vpop.permute.xlu0 %6092  ;;  %v15236_v34 = vpop.permute.xlu1 %6039 }
 0x8c4   : > { %18182 = vst [vmem:[#allocation266_spill] sm:$0xff] %v15236_v34  ;;  %v6595_v13 = vsel %vm2893_vm12, %v6571_v9, %v6093_v55 }
 0x8c5   : > { %6191 = vrot.lane.b32.xlu0 %v14708_v28, %s8093_s18  ;;  %6489 = vrot.lane.b32.xlu1 %v6001_v51, %s8101_s21 }
 0x8c7   : > { %v15242_v7 = vpop.permute.xlu0 %6096  ;;  %v6095_v44 = vpop.permute.xlu1 %6094 }
 0x8c9   : > { %6266 = vrot.lane.b32.xlu0 %v6001_v51, %s8097_s15  ;;  %6264 = vrot.lane.b32.xlu1 %v5999_v48, %s8097_s15 }
 0x8cb   : > { %v6172_v17 = vpop.permute.xlu0 %6171  ;;  %v6170_v58 = vpop.permute.xlu1 %6169 }
 0x8cc   : > { %v6619_v16 = vsel %vm4990_vm14, %v6595_v13, %v6170_v58 }
 0x8cd   : > { %6041 = vrot.lane.b32.xlu0 %v5999_v48, %s8088_s19  ;;  %6491 = vrot.lane.b32.xlu1 %v6000_v56, %s8101_s21 }
 0x8cf   : > { %v6247_v59 = vpop.permute.xlu0 %6246  ;;  %v15248_v46 = vpop.permute.xlu1 %6173 }
 0x8d1   : > { %6268 = vrot.lane.b32.xlu0 %v6000_v56, %s8097_s15  ;;  %6043 = vrot.lane.b32.xlu1 %v6001_v51, %s8088_s19 }
 0x8d3   : > { %v15252_v28 = vpop.permute.xlu0 %6250  ;;  %v6249_v19 = vpop.permute.xlu1 %6248 }
 0x8d5   : > { %6341 = vrot.lane.b32.xlu0 %v14732_v38, %s8098_s20  ;;  %6339 = vrot.lane.b32.xlu1 %v14713_v42, %s8098_s20 }
 0x8d7   : > { %v6324_v2 = vpop.permute.xlu0 %6323  ;;  %v6322_v48 = vpop.permute.xlu1 %6321 }
 0x8d9   : > { %6116 = vrot.lane.b32.xlu0 %v14713_v42, %s8096_s16  ;;  %6045 = vrot.lane.b32.xlu1 %v6000_v56, %s8088_s19 }
 0x8db   : > { %v15261_v34 = vpop.permute.xlu0 %6100  ;;  %v15263_v36 = vpop.permute.xlu1 %6098 }
 0x8dd   : > { %6343 = vrot.lane.b32.xlu0 %v14724_v3, %s8098_s20  ;;  %6118 = vrot.lane.b32.xlu1 %v14732_v38, %s8096_s16 }
 0x8df   : > { %v6399_v51 = vpop.permute.xlu0 %6398  ;;  %v6326_v6 = vpop.permute.xlu1 %6325 }
 0x8e1   : > { %6418 = vrot.lane.b32.xlu0 %v14738_v43, %s8099_s25  ;;  %6416 = vrot.lane.b32.xlu1 %v14741_v37, %s8099_s25 }
 0x8e3   : > { %v15273_v31 = vpop.permute.xlu0 %6102  ;;  %v6401_v56 = vpop.permute.xlu1 %6400 }
 0x8e5   : > { %6193 = vrot.lane.b32.xlu0 %v14741_v37, %s8093_s18  ;;  %6120 = vrot.lane.b32.xlu1 %v14724_v3, %s8096_s16  ;;  %v6548_v37 = vsel %vm2352_vm5, %v14493_v47, %v15070_v12  ;;  %v6644_v47 = vsel %vm6643_vm2, %v6619_v16, %v6247_v59 }
 0x8e6   : > { %v6572_v57 = vsel %vm2535_vm8, %v6548_v37, %v15195_v54  ;;  %v6668_v3 = vsel %vm18183_vm6, %v6644_v47, %v6322_v48  ;;  %v6004_v54 = vsel %vm815_vm1, %v6002_v49, %v6003_v30 }
 0x8e7   : > { %v15282_v45 = vpop.permute.xlu0 %6177  ;;  %v15284_v20 = vpop.permute.xlu1 %6175  ;;  %v6596_v39 = vsel %vm2893_vm12, %v6572_v57, %v6095_v44  ;;  %v6693_v13 = vsel %vm6692_vm10, %v6668_v3, %v6399_v51 }
 0x8e8   : > { %v6620_v9 = vsel %vm4990_vm14, %v6596_v39, %v6172_v17 }
 0x8e9   : > { %6420 = vrot.lane.b32.xlu0 %v14729_v52, %s8099_s25  ;;  %6195 = vrot.lane.b32.xlu1 %v14738_v43, %s8093_s18  ;;  %v6006_v43 = vsel %vm815_vm1, %v6003_v30, %v6005_v23  ;;  %v6645_v58 = vsel %vm6643_vm2, %v6620_v9, %v6249_v19  ;;  %v6549_v30 = vsel %vm2352_vm5, %v14525_v61, %v15103_v33 }
 0x8ea   : > { %v6669_v44 = vsel %vm18184_vm7, %v6645_v58, %v6324_v2  ;;  %v6573_v2 = vsel %vm2535_vm8, %v6549_v30, %v15193_v35  ;;  %vm18189_vm7 = vmmov %vm18187_vm0 }
 0x8eb   : > { %v6476_v55 = vpop.permute.xlu0 %6475  ;;  %v6403_v12 = vpop.permute.xlu1 %6402  ;;  %v6694_v17 = vsel %vm6692_vm10, %v6669_v44, %v6401_v56  ;;  %v6597_v51 = vsel %vm2893_vm12, %v6573_v2, %v15242_v7  ;;  %v6008_v2 = vrot.slane %v14762_v22, 2 }
 0x8ec   : > { %v6718_v59 = vsel %vm6717_vm15, %v6693_v13, %v6476_v55  ;;  %v6621_v61 = vsel %vm4990_vm14, %v6597_v51, %v15248_v46 }
 0x8ed   : > { %6495 = vrot.lane.b32.xlu0 %v6006_v43, %s8101_s21  ;;  %6493 = vrot.lane.b32.xlu1 %v6004_v54, %s8101_s21  ;;  %v6766_v3 = vrot.slane %v6718_v59, 3  ;;  %v6646_v33 = vsel %vm6643_vm2, %v6621_v61, %v15252_v28  ;;  %v6010_v61 = vrot.slane %v14790_v15, 2 }
 0x8ef   : > { %v15315_v37 = vpop.permute.xlu0 %6179  ;;  %v6478_v48 = vpop.permute.xlu1 %6477 }
 0x8f0   : > { %v6719_v57 = vsel %vm6717_vm15, %v6694_v17, %v6478_v48  ;;  %v6551_v48 = vsel %vm2352_vm5, %v14552_v5, %v15111_v10 }
 0x8f1   : > { %v6767_v19 = vrot.slane %v6719_v57, 3  ;;  %6270 = vrot.lane.b32.xlu0 %v6004_v54, %s8097_s15  ;;  %6197 = vrot.lane.b32.xlu1 %v14729_v52, %s8093_s18  ;;  %v6670_v52 = vsel %vm18186_vm9, %v6646_v33, %v6326_v6  ;;  %vm18191_vm9 = vmmov %vm18187_vm0 }
 0x8f2   : > { %v6695_v35 = vsel %vm6692_vm10, %v6670_v52, %v6403_v12 }
 0x8f3   : > { %v6255_v56 = vpop.permute.xlu0 %6254  ;;  %v6253_v16 = vpop.permute.xlu1 %6252  ;;  %v6768_v49 = vsel %vm18185_vm11, %v6766_v3, %v6767_v19  ;;  %vm18190_vm11 = vmmov %vm18183_vm6 }
 0x8f4   : > { %7562 = vmatprep.mubr.msk.f32.mxu1 %vm6812_vm3, %v6768_v49 }
 0x8f5   : > { %6497 = vrot.lane.b32.xlu0 %v6005_v23, %s8101_s21  ;;  %6272 = vrot.lane.b32.xlu1 %v6006_v43, %s8097_s15 }
 0x8f7   : > { %v15338_v7 = vpop.permute.xlu0 %6256  ;;  %v6480_v39 = vpop.permute.xlu1 %6479 }
 0x8f8   : > { %v6720_v47 = vsel %vm6717_vm15, %v6695_v35, %v6480_v39 }
 0x8f9   : > { %v6769_v55 = vrot.slane %v6720_v47, 3  ;;  %6049 = vrot.lane.b32.xlu0 %v6006_v43, %s8088_s19  ;;  %6047 = vrot.lane.b32.xlu1 %v6004_v54, %s8088_s19 }
 0x8fb   : > { %v6770_v46 = vsel %vm18187_vm0, %v6767_v19, %v6769_v55  ;;  %v6330_v28 = vpop.permute.xlu0 %6329  ;;  %v6328_v9 = vpop.permute.xlu1 %6327  ;;  %v6007_v19 = vrot.slane %v14766_v29, 2  ;;  %vm18194_vm0 = vmmov %vm18183_vm6 }
 0x8fc   : > { %7563 = vmatmul.mubr.msk.f32.vlgmr.msra.gmra.mrb[30].mxu1 %vm6812_vm3, %v6770_v46 }
 0x8fd   : > { %6345 = vrot.lane.b32.xlu0 %v14766_v29, %s8098_s20  ;;  %6274 = vrot.lane.b32.xlu1 %v6005_v23, %s8097_s15  ;;  %v6009_v33 = vsel %vm815_vm1, %v6007_v19, %v6008_v2 }
 0x8ff   : > { %v15348_v6 = vpop.permute.xlu0 %6106  ;;  %v15350_v12 = vpop.permute.xlu1 %6104 }
 0x901   : > { %6051 = vrot.lane.b32.xlu0 %v6005_v23, %s8088_s19  ;;  %6347 = vrot.lane.b32.xlu1 %v14762_v22, %s8098_s20  ;;  %v6550_v23 = vsel %vm2352_vm5, %v14540_v24, %v15088_v11  ;;  %v6575_v24 = vsel %vm2535_vm8, %v6551_v48, %v15201_v25 }
 0x902   : > { %v6574_v17 = vsel %vm2535_vm8, %v6550_v23, %v15203_v4  ;;  %v6599_v4 = vsel %vm2893_vm12, %v6575_v24, %v15261_v34  ;;  %v18192_v24 = vld [vmem:[#allocation14_spill] sm:$0xff] }
 0x903   : > { %v6405_v43 = vpop.permute.xlu0 %6404  ;;  %v6332_v54 = vpop.permute.xlu1 %6331  ;;  %v6598_v57 = vsel %vm2893_vm12, %v6574_v17, %v15263_v36  ;;  %v6623_v36 = vsel %vm4990_vm14, %v6599_v4, %v15282_v45 }
 0x904   : > { %v6622_v11 = vsel %vm4990_vm14, %v6598_v57, %v15284_v20  ;;  %v6648_v25 = vsel %vm6643_vm2, %v6623_v36, %v6255_v56 }
 0x905   : > { %6124 = vrot.lane.b32.xlu0 %v14762_v22, %s8096_s16  ;;  %6122 = vrot.lane.b32.xlu1 %v14766_v29, %s8096_s16  ;;  %v6647_v5 = vsel %vm6643_vm2, %v6622_v11, %v6253_v16  ;;  %v6672_v34 = vsel %vm18183_vm6, %v6648_v25, %v6330_v28  ;;  %vm18198_vm6 = vmmov %vm18189_vm7 }
 0x906   : > { %v6671_v3 = vsel %vm18188_vm13, %v6647_v5, %v6328_v9  ;;  %v6553_v5 = vsel %vm2352_vm5, %v14586_v0, %v15117_v21  ;;  %vm18197_vm13 = vmmov %vm18194_vm0 }
 0x907   : > { %v15359_v58 = vpop.permute.xlu0 %6108  ;;  %v6407_v13 = vpop.permute.xlu1 %6406  ;;  %v6696_v20 = vsel %vm6692_vm10, %v6671_v3, %v6405_v43  ;;  %v6577_v36 = vsel %vm2535_vm8, %v6553_v5, %v15209_v32  ;;  %v6554_v3 = vsel %vm2352_vm5, %v14582_v1, %v15109_v14 }
 0x908   : > { %v6697_v51 = vsel %vm6692_vm10, %v6672_v34, %v6407_v13  ;;  %v6601_v19 = vsel %vm2893_vm12, %v6577_v36, %v15350_v12  ;;  %v6578_v0 = vsel %vm2535_vm8, %v6554_v3, %v15219_v8  ;;  %v18195_v8 = vld [vmem:[#allocation17_spill] sm:$0xff]  ;;  %v18202_v3 = vld [vmem:[#allocation260_spill] sm:$0xff] }
 0x909   : > { %6422 = vrot.lane.b32.xlu0 %v14771_v27, %s8099_s25  ;;  %6349 = vrot.lane.b32.xlu1 %v14790_v15, %s8098_s20  ;;  %v6602_v32 = vsel %vm2893_vm12, %v6578_v0, %v15348_v6 }
 0x90b   : > { %v15368_v44 = vpop.permute.xlu0 %6183  ;;  %v15370_v59 = vpop.permute.xlu1 %6181 }
 0x90c   : > { %v6625_v21 = vsel %vm4990_vm14, %v6601_v19, %v15370_v59  ;;  %v6626_v12 = vsel %vm4990_vm14, %v6602_v32, %v15368_v44  ;;  %v18196_v59 = vld [vmem:[#allocation425_spill] sm:$0xff] }
 0x90d   : > { %6126 = vrot.lane.b32.xlu0 %v14790_v15, %s8096_s16  ;;  %6424 = vrot.lane.b32.xlu1 %v14808_v60, %s8099_s25 }
 0x90f   : > { %v6482_v10 = vpop.permute.xlu0 %6481  ;;  %v6409_v30 = vpop.permute.xlu1 %6408 }
 0x910   : > { %v6721_v45 = vsel %vm6717_vm15, %v6696_v20, %v6482_v10 }
 0x911   : > { %6201 = vrot.lane.b32.xlu0 %v14808_v60, %s8093_s18  ;;  %6199 = vrot.lane.b32.xlu1 %v14771_v27, %s8093_s18  ;;  %v6552_v60 = vsel %vm2352_vm5, %v14546_v40, %v15101_v18  ;;  %v6771_v27 = vrot.slane %v6721_v45, 3  ;;  %v6011_v18 = vsel %vm815_vm1, %v6008_v2, %v6010_v61  ;;  %v18193_v2 = vld [vmem:[#allocation331_spill] sm:$0xff] }
 0x912   : > { %v6576_v35 = vsel %vm2535_vm8, %v6552_v60, %v15211_v53 }
 0x913   : > { %v15404_v16 = vpop.permute.xlu0 %6185  ;;  %v6484_v49 = vpop.permute.xlu1 %6483  ;;  %v6600_v39 = vsel %vm2893_vm12, %v6576_v35, %v15273_v31 }
 0x914   : > { %v6722_v56 = vsel %vm6717_vm15, %v6697_v51, %v6484_v49  ;;  %v6624_v40 = vsel %vm4990_vm14, %v6600_v39, %v15315_v37 }
 0x915   : > { %v6772_v52 = vrot.slane %v6722_v56, 3  ;;  %6499 = vrot.lane.b32.xlu0 %v6009_v33, %s8101_s21  ;;  %6426 = vrot.lane.b32.xlu1 %v14798_v63, %s8099_s25  ;;  %v6649_v28 = vsel %vm6643_vm2, %v6624_v40, %v15338_v7 }
 0x916   : > { %v6673_v31 = vsel %vm18190_vm11, %v6649_v28, %v6332_v54  ;;  %vm18201_vm11 = vmmov %vm18198_vm6 }
 0x917   : > { %v6261_v47 = vpop.permute.xlu0 %6260  ;;  %v6259_v55 = vpop.permute.xlu1 %6258  ;;  %v6773_v46 = vsel %vm18189_vm7, %v6771_v27, %v6772_v52  ;;  %v6698_v53 = vsel %vm6692_vm10, %v6673_v31, %v6409_v30  ;;  %vm18200_vm7 = vmmov %vm18194_vm0 }
 0x918   : > { %7565 = vmatprep.mubr.msk.f32.mxu1 %vm6812_vm3, %v6773_v46  ;;  %v6650_v1 = vsel %vm6643_vm2, %v6625_v21, %v6259_v55  ;;  %v6651_v34 = vsel %vm6643_vm2, %v6626_v12, %v6261_v47  ;;  %v6013_v46 = vrot.slane %v14821_v50, 2  ;;  %v18203_v21 = vld [vmem:[#allocation107_spill] sm:$0xff] }
 0x919   : > { %6203 = vrot.lane.b32.xlu0 %v14798_v63, %s8093_s18  ;;  %6501 = vrot.lane.b32.xlu1 %v6011_v18, %s8101_s21 }
 0x91b   : > { %v15431_v9 = vpop.permute.xlu0 %6262  ;;  %v6486_v43 = vpop.permute.xlu1 %6485 }
 0x91c   : > { %v6723_v37 = vsel %vm6717_vm15, %v6698_v53, %v6486_v43 }
 0x91d   : > { %v6774_v13 = vrot.slane %v6723_v37, 3  ;;  %6278 = vrot.lane.b32.xlu0 %v6011_v18, %s8097_s15  ;;  %6276 = vrot.lane.b32.xlu1 %v6009_v33, %s8097_s15 }
 0x91f   : > { %v6336_v7 = vpop.permute.xlu0 %6335  ;;  %v6334_v23 = vpop.permute.xlu1 %6333  ;;  %v6775_v63 = vsel %vm18191_vm9, %v6772_v52, %v6774_v13  ;;  %vm18213_vm9 = vmmov %vm18194_vm0 }
 0x920   : > { %7566 = vmatmul.mubr.msk.f32.gmra.mrb[32].mxu1 %vm6812_vm3, %v6775_v63  ;;  %v6674_v20 = vsel %vm18194_vm0, %v6650_v1, %v6334_v23  ;;  %v6675_v6 = vsel %vm18197_vm13, %v6651_v34, %v6336_v7  ;;  %v18207_v34 = vld [vmem:[#allocation327_spill] sm:$0xff] }
 0x921   : > { %6053 = vrot.lane.b32.xlu0 %v6009_v33, %s8088_s19  ;;  %6503 = vrot.lane.b32.xlu1 %v6010_v61, %s8101_s21  ;;  %v6555_v33 = vsel %vm2352_vm5, %v14610_v62, %v15125_v26  ;;  %v6015_v62 = vrot.slane %v18193_v2, 2 }
 0x922   : > { %v6579_v52 = vsel %vm2535_vm8, %v6555_v33, %v15217_v41  ;;  %v18199_v41 = vld [vmem:[#allocation424_spill] sm:$0xff] }
 0x923   : > { %v15440_v54 = vpop.permute.xlu0 %6112  ;;  %v15442_v17 = vpop.permute.xlu1 %6110  ;;  %v6603_v35 = vsel %vm2893_vm12, %v6579_v52, %v15359_v58  ;;  %v6016_v43 = vsel %vm815_vm1, %v6013_v46, %v6015_v62 }
 0x924   : > { %v6627_v26 = vsel %vm4990_vm14, %v6603_v35, %v15404_v16 }
 0x925   : > { %6280 = vrot.lane.b32.xlu0 %v6010_v61, %s8097_s15  ;;  %6055 = vrot.lane.b32.xlu1 %v6011_v18, %s8088_s19  ;;  %v6652_v40 = vsel %vm6643_vm2, %v6627_v26, %v15431_v9  ;;  %v6012_v18 = vrot.slane %v18192_v24, 2 }
 0x927   : > { %v6411_v48 = vpop.permute.xlu0 %6410  ;;  %v6338_v57 = vpop.permute.xlu1 %6337  ;;  %v6014_v9 = vsel %vm815_vm1, %v6012_v18, %v6013_v46  ;;  %vm18212_vm1 = vmmov %vm18194_vm0 }
 0x928   : > { %v6699_v45 = vsel %vm6692_vm10, %v6674_v20, %v6411_v48  ;;  %v6676_v58 = vsel %vm18200_vm7, %v6652_v40, %v6338_v57  ;;  %v18206_v20 = vld [vmem:[#allocation339_spill] sm:$0xff]  ;;  %v18214_v40 = vld [vmem:[#allocation428_spill] sm:$0xff]  ;;  %vm18218_vm0 = vmmov %vm18198_vm6 }
 0x929   : > { %6353 = vrot.lane.b32.xlu0 %v14821_v50, %s8098_s20  ;;  %6351 = vrot.lane.b32.xlu1 %v18192_v24, %s8098_s20  ;;  %vm18219_vm13 = vmmov %vm18212_vm1 }
 0x92a   : > { %vm18237_vm7 = vmmov %vm18212_vm1 }
 0x92b   : > { %v15450_v11 = vpop.permute.xlu0 %6114  ;;  %v6413_v4 = vpop.permute.xlu1 %6412 }
 0x92c   : > { %v6700_v49 = vsel %vm6692_vm10, %v6675_v6, %v6413_v4  ;;  %v18209_v6 = vld [vmem:[#allocation119_spill] sm:$0xff] }
 0x92d   : > { %6128 = vrot.lane.b32.xlu0 %v18192_v24, %s8096_s16  ;;  %6057 = vrot.lane.b32.xlu1 %v6010_v61, %s8088_s19 }
 0x92f   : > { %v15458_v10 = vpop.permute.xlu0 %6189  ;;  %v15460_v30 = vpop.permute.xlu1 %6187 }
 0x931   : > { %6355 = vrot.lane.b32.xlu0 %v18193_v2, %s8098_s20  ;;  %6130 = vrot.lane.b32.xlu1 %v14821_v50, %s8096_s16 }
 0x933   : > { %v6488_v14 = vpop.permute.xlu0 %6487  ;;  %v6415_v25 = vpop.permute.xlu1 %6414 }
 0x934   : > { %v6724_v51 = vsel %vm6717_vm15, %v6699_v45, %v6488_v14  ;;  %v6701_v28 = vsel %vm6692_vm10, %v6676_v58, %v6415_v25  ;;  %v18204_v14 = vld [vmem:[#allocation19_spill] sm:$0xff]  ;;  %v18205_v25 = vld [vmem:[#allocation258_spill] sm:$0xff]  ;;  %v6556_v45 = vsel %vm2352_vm5, %v18207_v34, %v18206_v20 }
 0x935   : > { %6430 = vrot.lane.b32.xlu0 %v18195_v8, %s8099_s25  ;;  %6428 = vrot.lane.b32.xlu1 %v18196_v59, %s8099_s25  ;;  %v6776_v60 = vrot.slane %v6724_v51, 3  ;;  %v6557_v12 = vsel %vm2352_vm5, %v18205_v25, %v18204_v14  ;;  %v6580_v51 = vsel %vm2535_vm8, %v6556_v45, %v18209_v6 }
 0x937   : > { %v15492_v61 = vpop.permute.xlu0 %6191  ;;  %v6490_v44 = vpop.permute.xlu1 %6489 }
 0x938   : > { %v6725_v56 = vsel %vm6717_vm15, %v6700_v49, %v6490_v44  ;;  %v6604_v44 = vsel %vm2893_vm12, %v6580_v51, %v15442_v17  ;;  %v18224_v51 = vld [vmem:[#allocation335_spill] sm:$0xff] }
 0x939   : > { %v6777_v27 = vrot.slane %v6725_v56, 3  ;;  %6205 = vrot.lane.b32.xlu0 %v18196_v59, %s8093_s18  ;;  %6132 = vrot.lane.b32.xlu1 %v18193_v2, %s8096_s16 }
 0x93b   : > { %v6267_v39 = vpop.permute.xlu0 %6266  ;;  %v6265_v47 = vpop.permute.xlu1 %6264  ;;  %v6778_v55 = vsel %vm18198_vm6, %v6776_v60, %v6777_v27  ;;  %vm18222_vm6 = vmmov %vm18218_vm0 }
 0x93c   : > { %7568 = vmatprep.mubr.msk.f32.mxu1 %vm6812_vm3, %v6778_v55  ;;  %v18210_v55 = vld [vmem:[#allocation261_spill] sm:$0xff] }
 0x93d   : > { %6432 = vrot.lane.b32.xlu0 %v18199_v41, %s8099_s25  ;;  %6207 = vrot.lane.b32.xlu1 %v18195_v8, %s8093_s18  ;;  %v18208_v8 = vld [vmem:[#allocation431_spill] sm:$0xff] }
 0x93e   : > { %v6581_v59 = vsel %vm2535_vm8, %v6557_v12, %v18208_v8 }
 0x93f   : > { %v15521_v16 = vpop.permute.xlu0 %6041  ;;  %v6492_v31 = vpop.permute.xlu1 %6491  ;;  %v6605_v49 = vsel %vm2893_vm12, %v6581_v59, %v15440_v54  ;;  %v18211_v54 = vld [vmem:[#allocation334_spill] sm:$0xff] }
 0x940   : > { %v6726_v53 = vsel %vm6717_vm15, %v6701_v28, %v6492_v31  ;;  %v6629_v60 = vsel %vm4990_vm14, %v6605_v49, %v15458_v10  ;;  %v18216_v31 = vld [vmem:[#allocation426_spill] sm:$0xff] }
 0x941   : > { %v6779_v37 = vrot.slane %v6726_v53, 3  ;;  %6507 = vrot.lane.b32.xlu0 %v6016_v43, %s8101_s21  ;;  %6505 = vrot.lane.b32.xlu1 %v6014_v9, %s8101_s21  ;;  %v6654_v52 = vsel %vm6643_vm2, %v6629_v60, %v6267_v39  ;;  %v18217_v53 = vld [vmem:[#allocation266_spill] sm:$0xff]  ;;  %v18226_v60 = vld [vmem:[#allocation427_spill] sm:$0xff] }
 0x943   : > { %v6269_v13 = vpop.permute.xlu0 %6268  ;;  %v15528_v7 = vpop.permute.xlu1 %6043  ;;  %v6780_v23 = vsel %vm18201_vm11, %v6777_v27, %v6779_v37  ;;  %v6628_v27 = vsel %vm4990_vm14, %v6604_v44, %v15460_v30  ;;  %vm18239_vm11 = vmmov %vm18212_vm1 }
 0x944   : > { %7569 = vmatmul.mubr.msk.f32.gmra.mrb[34].mxu1 %vm6812_vm3, %v6780_v23  ;;  %v6653_v35 = vsel %vm6643_vm2, %v6628_v27, %v6265_v47 }
 0x945   : > { %6282 = vrot.lane.b32.xlu0 %v6014_v9, %s8097_s15  ;;  %6209 = vrot.lane.b32.xlu1 %v18199_v41, %s8093_s18  ;;  %v18215_v41 = vld [vmem:[#allocation102_spill] sm:$0xff] }
 0x946   : > { %v6558_v58 = vsel %vm2352_vm5, %v18215_v41, %v18214_v40  ;;  %v18233_v41 = vld [vmem:[#allocation429_spill] sm:$0xff] }
 0x947   : > { %v6342_v63 = vpop.permute.xlu0 %6341  ;;  %v6340_v48 = vpop.permute.xlu1 %6339 }
 0x948   : > { %v6678_v17 = vsel %vm18212_vm1, %v6654_v52, %v6342_v63  ;;  %vm18242_vm1 = vmmov %vm18218_vm0 }
 0x949   : > { %6509 = vrot.lane.b32.xlu0 %v6015_v62, %s8101_s21  ;;  %6284 = vrot.lane.b32.xlu1 %v6016_v43, %s8097_s15 }
 0x94b   : > { %v15537_v57 = vpop.permute.xlu0 %6116  ;;  %v15539_v4 = vpop.permute.xlu1 %6045 }
 0x94d   : > { %6061 = vrot.lane.b32.xlu0 %v6016_v43, %s8088_s19  ;;  %6059 = vrot.lane.b32.xlu1 %v6014_v9, %s8088_s19  ;;  %v6582_v43 = vsel %vm2535_vm8, %v6558_v58, %v18217_v53  ;;  %v18234_v58 = vld [vmem:[#allocation423_spill] sm:$0xff]  ;;  %v18236_v53 = vld [vmem:[#allocation21_spill] sm:$0xff] }
 0x94e   : > { %v6606_v9 = vsel %vm2893_vm12, %v6582_v43, %v15450_v11 }
 0x94f   : > { %v6344_v5 = vpop.permute.xlu0 %6343  ;;  %v15543_v36 = vpop.permute.xlu1 %6118 }
 0x951   : > { %6357 = vrot.lane.b32.xlu0 %v18202_v3, %s8098_s20  ;;  %6286 = vrot.lane.b32.xlu1 %v6015_v62, %s8097_s15 }
 0x953   : > { %v6419_v19 = vpop.permute.xlu0 %6418  ;;  %v6417_v0 = vpop.permute.xlu1 %6416 }
 0x954   : > { %v6703_v26 = vsel %vm6692_vm10, %v6678_v17, %v6419_v19 }
 0x955   : > { %6063 = vrot.lane.b32.xlu0 %v6015_v62, %s8088_s19  ;;  %6359 = vrot.lane.b32.xlu1 %v18203_v21, %s8098_s20  ;;  %v6677_v62 = vsel %vm18213_vm9, %v6653_v35, %v6340_v48  ;;  %v6630_v48 = vsel %vm4990_vm14, %v6606_v9, %v15492_v61  ;;  %v18220_v61 = vld [vmem:[#allocation109_spill] sm:$0xff]  ;;  %v18227_v35 = vld [vmem:[#allocation112_spill] sm:$0xff]  ;;  %vm18243_vm9 = vmmov %vm18237_vm7  ;;  %s7154_s19 = sshll.u32 %s8219_s22, 1 }
 0x956   : > { %v6702_v10 = vsel %vm6692_vm10, %v6677_v62, %v6417_v0 }
 0x957   : > { %v15551_v32 = vpop.permute.xlu0 %6193  ;;  %v15553_v1 = vpop.permute.xlu1 %6120 }
 0x959   : > { %6136 = vrot.lane.b32.xlu0 %v18203_v21, %s8096_s16  ;;  %6134 = vrot.lane.b32.xlu1 %v18202_v3, %s8096_s16  ;;  %v6655_v3 = vsel %vm6643_vm2, %v6630_v48, %v6269_v13  ;;  %v18221_v13 = vld [vmem:[#allocation18_spill] sm:$0xff] }
 0x95a   : > { %v6679_v11 = vsel %vm18219_vm13, %v6655_v3, %v6344_v5  ;;  %v18223_v5 = vld [vmem:[#allocation20_spill] sm:$0xff]  ;;  %vm18246_vm13 = vmmov %vm18237_vm7 }
 0x95b   : > { %v6421_v56 = vpop.permute.xlu0 %6420  ;;  %v15573_v33 = vpop.permute.xlu1 %6195 }
 0x95c   : > { %v6704_v19 = vsel %vm6692_vm10, %v6679_v11, %v6421_v56  ;;  %v18225_v56 = vld [vmem:[#allocation262_spill] sm:$0xff] }
 0x95d   : > { %6434 = vrot.lane.b32.xlu0 %v18210_v55, %s8099_s25  ;;  %6361 = vrot.lane.b32.xlu1 %v18211_v54, %s8098_s20 }
 0x95f   : > { %v6496_v46 = vpop.permute.xlu0 %6495  ;;  %v6494_v30 = vpop.permute.xlu1 %6493 }
 0x960   : > { %v6728_v39 = vsel %vm6717_vm15, %v6703_v26, %v6496_v46  ;;  %v6727_v47 = vsel %vm6717_vm15, %v6702_v10, %v6494_v30  ;;  %v18230_v26 = vld [vmem:[#allocation263_spill] sm:$0xff]  ;;  %v18231_v10 = vld [vmem:[#allocation114_spill] sm:$0xff] }
 0x961   : > { %v6782_v18 = vrot.slane %v6728_v39, 3  ;;  %v6781_v28 = vrot.slane %v6727_v47, 3  ;;  %6138 = vrot.lane.b32.xlu0 %v18211_v54, %s8096_s16  ;;  %6436 = vrot.lane.b32.xlu1 %v18216_v31, %s8099_s25  ;;  %v18232_v46 = vld [vmem:[#allocation259_spill] sm:$0xff] }
 0x962   : > { %v6559_v30 = vsel %vm2352_vm5, %v18232_v46, %v18231_v10 }
 0x963   : > { %v6271_v37 = vpop.permute.xlu0 %6270  ;;  %v15602_v23 = vpop.permute.xlu1 %6197  ;;  %v6783_v63 = vsel %vm18218_vm0, %v6781_v28, %v6782_v18  ;;  %v6583_v40 = vsel %vm2535_vm8, %v6559_v30, %v15521_v16 }
 0x964   : > { %7571 = vmatprep.mubr.msk.f32.mxu1 %vm6812_vm3, %v6783_v63  ;;  %v6607_v28 = vsel %vm2893_vm12, %v6583_v40, %v15537_v57 }
 0x965   : > { %6213 = vrot.lane.b32.xlu0 %v18216_v31, %s8093_s18  ;;  %6211 = vrot.lane.b32.xlu1 %v18210_v55, %s8093_s18  ;;  %v18228_v55 = vld [vmem:[#allocation105_spill] sm:$0xff]  ;;  %v18235_v31 = vld [vmem:[#allocation338_spill] sm:$0xff]  ;;  %v6631_v9 = vsel %vm4990_vm14, %v6607_v28, %v15551_v32 }
 0x966   : > { %v18229_v62 = vrot.slane %v18228_v55, 1  ;;  %v6656_v63 = vsel %vm6643_vm2, %v6631_v9, %v6271_v37 }
 0x967   : > { %v6498_v0 = vpop.permute.xlu0 %6497  ;;  %v6273_v21 = vpop.permute.xlu1 %6272 }
 0x968   : > { %v6729_v14 = vsel %vm6717_vm15, %v6704_v19, %v6498_v0 }
 0x969   : > { %v6784_v25 = vrot.slane %v6729_v14, 3  ;;  %6511 = vrot.lane.b32.xlu0 %v18220_v61, %s8101_s21  ;;  %6438 = vrot.lane.b32.xlu1 %v18221_v13, %s8099_s25 }
 0x96b   : > { %v15620_v12 = vpop.permute.xlu0 %6049  ;;  %v15622_v20 = vpop.permute.xlu1 %6047  ;;  %v6785_v34 = vsel %vm18222_vm6, %v6782_v18, %v6784_v25  ;;  %v6560_v18 = vsel %vm2352_vm5, %v18234_v58, %v18233_v41  ;;  %vm18247_vm6 = vmmov %vm18237_vm7 }
 0x96c   : > { %7572 = vmatmul.mubr.msk.f32.gmra.mrb[36].mxu1 %vm6812_vm3, %v6785_v34  ;;  %v6584_v43 = vsel %vm2535_vm8, %v6560_v18, %v15528_v7  ;;  %v18238_v7 = vrot.slane %v18228_v55, 2 }
 0x96d   : > { %6215 = vrot.lane.b32.xlu0 %v18221_v13, %s8093_s18  ;;  %6513 = vrot.lane.b32.xlu1 %v18223_v5, %s8101_s21  ;;  %v6608_v16 = vsel %vm2893_vm12, %v6584_v43, %v15543_v36  ;;  %v18241_v13 = vld [vmem:[#allocation330_spill] sm:$0xff]  ;;  %v18244_v43 = vld [vmem:[#allocation265_spill] sm:$0xff]  ;;  %s7155_s18 = sshll.u32 %s18280_s28, 5 }
 0x96e   : > { %v6632_v57 = vsel %vm4990_vm14, %v6608_v16, %v15573_v33  ;;  %v6563_v9 = vsel %vm2352_vm5, %v14732_v38, %v18244_v43  ;;  %v18245_v16 = vld [vmem:[#allocation117_spill] sm:$0xff]  ;;  %s385_s16 = sadd.s32 %s7155_s18, %s7154_s19 }
 0x96f   : > { %v6346_v45 = vpop.permute.xlu0 %6345  ;;  %v6275_v8 = vpop.permute.xlu1 %6274  ;;  %v6657_v19 = vsel %vm6643_vm2, %v6632_v57, %v6273_v21 }
 0x970   : > { %v6680_v11 = vsel %vm18237_vm7, %v6656_v63, %v6346_v45  ;;  %v6562_v63 = vsel %vm2352_vm5, %v14713_v42, %v18245_v16  ;;  %vm18250_vm7 = vmmov %vm18218_vm0 }
 0x971   : > { %6290 = vrot.lane.b32.xlu0 %v18223_v5, %s8097_s15  ;;  %6288 = vrot.lane.b32.xlu1 %v18220_v61, %s8097_s15  ;;  %v18240_v61 = vld [vmem:[#allocation264_spill] sm:$0xff] }
 0x972   : > { %v6561_v21 = vsel %vm2352_vm5, %v18241_v13, %v18240_v61 }
 0x973   : > { %v15634_v59 = vpop.permute.xlu0 %6051  ;;  %v6348_v6 = vpop.permute.xlu1 %6347  ;;  %v6585_v45 = vsel %vm2535_vm8, %v6561_v21, %v15539_v4 }
 0x974   : > { %v6681_v32 = vsel %vm18239_vm11, %v6657_v19, %v6348_v6  ;;  %v6609_v6 = vsel %vm2893_vm12, %v6585_v45, %v15553_v1  ;;  %vm18251_vm11 = vmmov %vm18247_vm6 }
 0x975   : > { %6292 = vrot.lane.b32.xlu0 %v18224_v51, %s8097_s15  ;;  %6515 = vrot.lane.b32.xlu1 %v18224_v51, %s8101_s21 }
 0x977   : > { %v15640_v49 = vpop.permute.xlu0 %6124  ;;  %v15642_v44 = vpop.permute.xlu1 %6122 }
 0x979   : > { %6365 = vrot.lane.b32.xlu0 %v18225_v56, %s8098_s20  ;;  %6363 = vrot.lane.b32.xlu1 %v18226_v60, %s8098_s20 }
 0x97b   : > { %v6423_v27 = vpop.permute.xlu0 %6422  ;;  %v6350_v52 = vpop.permute.xlu1 %6349 }
 0x97c   : > { %v6705_v0 = vsel %vm6692_vm10, %v6680_v11, %v6423_v27  ;;  %v6633_v27 = vsel %vm4990_vm14, %v6609_v6, %v15602_v23 }
 0x97d   : > { %6440 = vrot.lane.b32.xlu0 %v18227_v35, %s8099_s25  ;;  %6367 = vrot.lane.b32.xlu1 %v18228_v55, %s8098_s20  ;;  %v6658_v35 = vsel %vm6643_vm2, %v6633_v27, %v6275_v8 }
 0x97e   : > { %v6682_v55 = vsel %vm18243_vm9, %v6658_v35, %v6350_v52  ;;  %vm18255_vm9 = vmmov %vm18247_vm6 }
 0x97f   : > { %v15652_v54 = vpop.permute.xlu0 %6126  ;;  %v6425_v17 = vpop.permute.xlu1 %6424 }
 0x980   : > { %v6706_v37 = vsel %vm6692_vm10, %v6681_v32, %v6425_v17 }
 0x981   : > { %6444 = vrot.lane.b32.xlu0 %v18229_v62, %s8099_s25  ;;  %6442 = vrot.lane.b32.xlu1 %v18230_v26, %s8099_s25  ;;  %s7156_s25 = sshll.u32 %s385_s16, 3 }
 0x982   : > { %s15797_s28 = scalar_lea.vmem %s15954_s8, %s7156_s25 }
 0x983   : > { %v15662_v39 = vpop.permute.xlu0 %6201  ;;  %v15664_v47 = vpop.permute.xlu1 %6199 }
 0x985   : > { %6519 = vrot.lane.b32.xlu0 %v18235_v31, %s8101_s21  ;;  %6517 = vrot.lane.b32.xlu1 %v18236_v53, %s8101_s21 }
 0x987   : > { %v6500_v48 = vpop.permute.xlu0 %6499  ;;  %v6427_v3 = vpop.permute.xlu1 %6426 }
 0x988   : > { %v6730_v36 = vsel %vm6717_vm15, %v6705_v0, %v6500_v48  ;;  %v6707_v17 = vsel %vm6692_vm10, %v6682_v55, %v6427_v3  ;;  %v6587_v48 = vsel %vm2535_vm8, %v6563_v9, %v15620_v12  ;;  %v6586_v3 = vsel %vm2535_vm8, %v6562_v63, %v15622_v20 }
 0x989   : > { %6521 = vrot.lane.b32.xlu1 %v18238_v7, %s8101_s21  ;;  %v6786_v34 = vrot.slane %v6730_v36, 3  ;;  %v6611_v57 = vsel %vm2893_vm12, %v6587_v48, %v15640_v49  ;;  %v6610_v11 = vsel %vm2893_vm12, %v6586_v3, %v15642_v44 }
 0x98a   : > { %v6635_v38 = vsel %vm4990_vm14, %v6611_v57, %v15662_v39  ;;  %v6634_v42 = vsel %vm4990_vm14, %v6610_v11, %v15664_v47  ;;  %v18249_v47 = vld [vmem:[#allocation104_spill] sm:$0xff] }
 0x98b   : > { %v15695_v14 = vpop.permute.xlu0 %6203  ;;  %v6502_v25 = vpop.permute.xlu1 %6501 }
 0x98c   : > { %v6731_v33 = vsel %vm6717_vm15, %v6706_v37, %v6502_v25 }
 0x98d   : > { %v6787_v5 = vrot.slane %v6731_v33, 3  ;;  %v18248_v33 = vld [vmem:[#allocation342_spill] sm:$0xff] }
 0x98e   : > { %v6564_v61 = vsel %vm2352_vm5, %v18249_v47, %v18248_v33 }
 0x98f   : > { %v6279_v51 = vpop.permute.xlu0 %6278  ;;  %v6277_v56 = vpop.permute.xlu1 %6276  ;;  %v6788_v60 = vsel %vm18242_vm1, %v6786_v34, %v6787_v5  ;;  %v6588_v34 = vsel %vm2535_vm8, %v6564_v61, %v15634_v59  ;;  %vm18252_vm1 = vmmov %vm18218_vm0 }
 0x990   : > { %7574 = vmatprep.mubr.msk.f32.mxu1 %vm6812_vm3, %v6788_v60  ;;  %v6660_v12 = vsel %vm6643_vm2, %v6635_v38, %v6279_v51  ;;  %v6659_v7 = vsel %vm6643_vm2, %v6634_v42, %v6277_v56  ;;  %v18253_v42 = vld [vmem:[#allocation226_spill] sm:$0xff] }
 0x993   : > { %v15712_v62 = vpop.permute.xlu0 %6053  ;;  %v6504_v4 = vpop.permute.xlu1 %6503 }
 0x994   : > { %v6732_v1 = vsel %vm6717_vm15, %v6707_v17, %v6504_v4 }
 0x995   : > { %v6789_v26 = vrot.slane %v6732_v1, 3 }
 0x997   : > { %v6281_v10 = vpop.permute.xlu0 %6280  ;;  %v15715_v46 = vpop.permute.xlu1 %6055  ;;  %v6790_v30 = vsel %vm18218_vm0, %v6787_v5, %v6789_v26  ;;  %v6612_v5 = vsel %vm2893_vm12, %v6588_v34, %v15652_v54  ;;  %vm18256_vm0 = vmmov %vm18247_vm6  ;;  %v18257_v34 = vld [vmem:[#allocation430_spill] sm:$0xff] }
 0x998   : > { %7575 = vmatmul.mubr.msk.f32.gmra.mrb[38].mxu1 %vm6812_vm3, %v6790_v30  ;;  %v6636_v56 = vsel %vm4990_vm14, %v6612_v5, %v15695_v14 }
 0x999   : > { %v6661_v60 = vsel %vm6643_vm2, %v6636_v56, %v6281_v10 }
 0x99b   : > { %v6354_v23 = vpop.permute.xlu0 %6353  ;;  %v6352_v40 = vpop.permute.xlu1 %6351 }
 0x99c   : > { %v6684_v20 = vsel %vm18246_vm13, %v6660_v12, %v6354_v23  ;;  %v6683_v49 = vsel %vm18247_vm6, %v6659_v7, %v6352_v40  ;;  %v6565_v12 = vsel %vm2352_vm5, %v14766_v29, %v18253_v42  ;;  %vm18258_vm13 = vmmov %vm18252_vm1 }
 0x99d   : > { %vm18259_vm6 = vmmov %vm18256_vm0 }
 0x99f   : > { %v15719_v8 = vpop.permute.xlu0 %6128  ;;  %v15721_v52 = vpop.permute.xlu1 %6057 }
 0x9a3   : > { %v6356_v41 = vpop.permute.xlu0 %6355  ;;  %v15723_v58 = vpop.permute.xlu1 %6130 }
 0x9a4   : > { %v6685_v27 = vsel %vm18251_vm11, %v6661_v60, %v6356_v41  ;;  %vm18264_vm11 = vmmov %vm18256_vm0 }
 0x9a7   : > { %v6431_v18 = vpop.permute.xlu0 %6430  ;;  %v6429_v28 = vpop.permute.xlu1 %6428 }
 0x9a8   : > { %v6709_v32 = vsel %vm6692_vm10, %v6684_v20, %v6431_v18  ;;  %v6708_v44 = vsel %vm6692_vm10, %v6683_v49, %v6429_v28  ;;  %v15791_v18 = vld [vmem:[%s15953_s7] ss:$0 sm:$0xff]  ;;  %v6589_v20 = vsel %vm2535_vm8, %v6565_v12, %v15712_v62  ;;  %v18254_v49 = vld [vmem:[#allocation343_spill] sm:$0xff] }
 0x9ab   : > { %v15725_v31 = vpop.permute.xlu0 %6205  ;;  %v15727_v53 = vpop.permute.xlu1 %6132 }
 0x9af   : > { %v6433_v19 = vpop.permute.xlu0 %6432  ;;  %v15743_v0 = vpop.permute.xlu1 %6207 }
 0x9b0   : > { %v6710_v59 = vsel %vm6692_vm10, %v6685_v27, %v6433_v19 }
 0x9b3   : > { %v6508_v36 = vpop.permute.xlu0 %6507  ;;  %v6506_v37 = vpop.permute.xlu1 %6505 }
 0x9b4   : > { %v6734_v25 = vsel %vm6717_vm15, %v6709_v32, %v6508_v36  ;;  %v6733_v39 = vsel %vm6717_vm15, %v6708_v44, %v6506_v37  ;;  %v6566_v32 = vsel %vm2352_vm5, %v14762_v22, %v18254_v49  ;;  %v6613_v44 = vsel %vm2893_vm12, %v6589_v20, %v15719_v8 }
 0x9b5   : > { %v6792_v13 = vrot.slane %v6734_v25, 3  ;;  %v6791_v21 = vrot.slane %v6733_v39, 3  ;;  %v6590_v36 = vsel %vm2535_vm8, %v6566_v32, %v15715_v46  ;;  %v6637_v37 = vsel %vm4990_vm14, %v6613_v44, %v15725_v31  ;;  %v18263_v44 = vld [vmem:[#allocation22_spill] sm:$0xff] }
 0x9b6   : > { %v6614_v29 = vsel %vm2893_vm12, %v6590_v36, %v15723_v58 }
 0x9b7   : > { %v6283_v45 = vpop.permute.xlu0 %6282  ;;  %v15764_v6 = vpop.permute.xlu1 %6209  ;;  %v6793_v51 = vsel %vm18250_vm7, %v6791_v21, %v6792_v13  ;;  %v6638_v33 = vsel %vm4990_vm14, %v6614_v29, %v15743_v0  ;;  %v6567_v0 = vsel %vm2352_vm5, %v14790_v15, %v18257_v34  ;;  %vm18260_vm7 = vmmov %vm18252_vm1 }
 0x9b8   : > { %7577 = vmatprep.mubr.msk.f32.mxu1 %vm6812_vm3, %v6793_v51  ;;  %v6662_v39 = vsel %vm6643_vm2, %v6637_v37, %v6283_v45  ;;  %v6591_v51 = vsel %vm2535_vm8, %v6567_v0, %v15721_v52 }
 0x9b9   : > { %v6615_v60 = vsel %vm2893_vm12, %v6591_v51, %v15727_v53 }
 0x9bb   : > { %v6510_v35 = vpop.permute.xlu0 %6509  ;;  %v6285_v54 = vpop.permute.xlu1 %6284 }
 0x9bc   : > { %v6735_v55 = vsel %vm6717_vm15, %v6710_v59, %v6510_v35  ;;  %v6663_v8 = vsel %vm6643_vm2, %v6638_v33, %v6285_v54  ;;  %v6639_v35 = vsel %vm4990_vm14, %v6615_v60, %v15764_v6 }
 0x9bd   : > { %v6794_v17 = vrot.slane %v6735_v55, 3 }
 0x9bf   : > { %v15774_v4 = vpop.permute.xlu0 %6061  ;;  %v15776_v1 = vpop.permute.xlu1 %6059  ;;  %v6795_v14 = vsel %vm18252_vm1, %v6792_v13, %v6794_v17  ;;  %vm18265_vm1 = vmmov %vm18256_vm0 }
 0x9c0   : > { %7578 = vmatmul.mubr.msk.f32.gmra.mrb[40].mxu1 %vm6812_vm3, %v6795_v14 }
 0x9c3   : > { %v6358_v26 = vpop.permute.xlu0 %6357  ;;  %v6287_v10 = vpop.permute.xlu1 %6286 }
 0x9c4   : > { %v6686_v22 = vsel %vm18255_vm9, %v6662_v39, %v6358_v26  ;;  %v6664_v54 = vsel %vm6643_vm2, %v6639_v35, %v6287_v10 }
 0x9c7   : > { %v15780_v30 = vpop.permute.xlu0 %6063  ;;  %v6360_v23 = vpop.permute.xlu1 %6359 }
 0x9c8   : > { %v6687_v46 = vsel %vm18256_vm0, %v6663_v8, %v6360_v23 }
 0x9cb   : > { %v15784_v40 = vpop.permute.xlu0 %6136  ;;  %v15786_v41 = vpop.permute.xlu1 %6134 }
 0x9cf   : > { %v6435_v28 = vpop.permute.xlu0 %6434  ;;  %v7564_v43 = vpop.f32.mrb[30].mxu1 }
 0x9d0   : > { %v6920_v9 = vadd.f32 %v7564_v43, %v15791_v18  ;;  %v6362_v16 = vpop.permute.xlu1 %6361  ;;  %v6914_v63 = vpop.f32.mrb[31].mxu1  ;;  %v6711_v47 = vsel %vm6692_vm10, %v6686_v22, %v6435_v28 }
 0x9d1   : > { %v6915_v48 = vadd.f32 %v15791_v18, %v6914_v63  ;;  %v6688_v15 = vsel %vm18259_vm6, %v6664_v54, %v6362_v16  ;;  %v18262_v16 = vld [vmem:[#allocation163_spill] sm:$0xff] }
 0x9d2   : > { %v6994_v3 = vmax.f32 %v6920_v9, 0.0  ;;  %v18261_v9 = vld [vmem:[#allocation227_spill] sm:$0xff]  ;;  %v6568_v63 = vsel %vm2352_vm5, %v18192_v24, %v18262_v16 }
 0x9d3   : > { %v6993_v57 = vmax.f32 %v6915_v48, 0.0  ;;  %v15800_v11 = vpop.permute.xlu0 %6138  ;;  %v6569_v10 = vsel %vm2352_vm5, %v14821_v50, %v18261_v9 }
 0x9d4   : > { %7010 = vst.msk [vmem:[%s15797_s28 + $0x8] sm:$0xff] %vm2291_vm4, %v6994_v3  ;;  %v6437_v19 = vpop.permute.xlu1 %6436  ;;  %v6593_v48 = vsel %vm2535_vm8, %v6569_v10, %v15774_v4  ;;  %v6592_v3 = vsel %vm2535_vm8, %v6568_v63, %v15776_v1 }
 0x9d5   : > { %7009 = vst.msk [vmem:[%s15797_s28] sm:$0xff] %vm2291_vm4, %v6993_v57  ;;  %v6712_v13 = vsel %vm6692_vm10, %v6687_v46, %v6437_v19  ;;  %v6617_v57 = vsel %vm2893_vm12, %v6593_v48, %v15784_v40  ;;  %v6616_v12 = vsel %vm2893_vm12, %v6592_v3, %v15786_v41  ;;  %v6570_v40 = vsel %vm2352_vm5, %v18193_v2, %v18263_v44  ;;  %vm18266_vm5 = vmmov %vm18256_vm0 }
 0x9d6   : > { %v6594_v37 = vsel %vm2535_vm8, %v6570_v40, %v15780_v30  ;;  %vm18267_vm8 = vmmov %vm18260_vm7 }
 0x9d7   : > { %v6214_v38 = vpop.permute.xlu0 %6213 }
 0x9d8   : > { %v6212_v7 = vpop.permute.xlu1 %6211  ;;  %v6641_v50 = vsel %vm4990_vm14, %v6617_v57, %v6214_v38 }
 0x9d9   : > { %v6640_v4 = vsel %vm4990_vm14, %v6616_v12, %v6212_v7 }
 0x9db   : > { %v6512_v25 = vpop.permute.xlu0 %6511 }
 0x9dc   : > { %v6439_v62 = vpop.permute.xlu1 %6438  ;;  %v6736_v31 = vsel %vm6717_vm15, %v6711_v47, %v6512_v25 }
 0x9dd   : > { %v6796_v5 = vrot.slane %v6736_v31, 3  ;;  %v6713_v17 = vsel %vm6692_vm10, %v6688_v15, %v6439_v62  ;;  %v6618_v62 = vsel %vm2893_vm12, %v6594_v37, %v15800_v11  ;;  %vm18268_vm12 = vmmov %vm18260_vm7 }
 0x9df   : > { %v6216_v61 = vpop.permute.xlu0 %6215 }
 0x9e0   : > { %v6514_v58 = vpop.permute.xlu1 %6513  ;;  %v6642_v8 = vsel %vm4990_vm14, %v6618_v62, %v6216_v61 }
 0x9e1   : > { %v6737_v21 = vsel %vm6717_vm15, %v6712_v13, %v6514_v58 }
 0x9e2   : > { %v6797_v45 = vrot.slane %v6737_v21, 3 }
 0x9e3   : > { %v6291_v56 = vpop.permute.xlu0 %6290 }
 0x9e4   : > { %v6289_v27 = vpop.permute.xlu1 %6288  ;;  %v6798_v59 = vsel %vm18258_vm13, %v6796_v5, %v6797_v45  ;;  %v6666_v32 = vsel %vm6643_vm2, %v6641_v50, %v6291_v56 }
 0x9e5   : > { %7580 = vmatprep.mubr.msk.f32.mxu1 %vm6812_vm3, %v6798_v59  ;;  %v6665_v41 = vsel %vm6643_vm2, %v6640_v4, %v6289_v27 }
 0x9e7   : > { %v6293_v55 = vpop.permute.xlu0 %6292 }
 0x9e8   : > { %v6516_v52 = vpop.permute.xlu1 %6515  ;;  %v6667_v46 = vsel %vm6643_vm2, %v6642_v8, %v6293_v55 }
 0x9e9   : > { %v6738_v14 = vsel %vm6717_vm15, %v6713_v17, %v6516_v52 }
 0x9ea   : > { %v6799_v26 = vrot.slane %v6738_v14, 3 }
 0x9eb   : > { %v6366_v53 = vpop.permute.xlu0 %6365 }
 0x9ec   : > { %v6364_v23 = vpop.permute.xlu1 %6363  ;;  %v6800_v28 = vsel %vm18260_vm7, %v6797_v45, %v6799_v26  ;;  %v6690_v38 = vsel %vm18264_vm11, %v6666_v32, %v6366_v53 }
 0x9ed   : > { %7581 = vmatmul.mubr.msk.f32.gmra.mrb[42].mxu1 %vm6812_vm3, %v6800_v28  ;;  %v6689_v25 = vsel %vm18265_vm1, %v6665_v41, %v6364_v23 }
 0x9ef   : > { %v6441_v6 = vpop.permute.xlu0 %6440 }
 0x9f0   : > { %v6368_v43 = vpop.permute.xlu1 %6367  ;;  %v6714_v33 = vsel %vm6692_vm10, %v6689_v25, %v6441_v6 }
 0x9f1   : > { %v6691_v11 = vsel %vm18266_vm5, %v6667_v46, %v6368_v43 }
 0x9f3   : > { %v6445_v19 = vpop.permute.xlu0 %6444  ;;  %v7567_v42 = vpop.f32.mrb[32].mxu1 }
 0x9f4   : > { %v6930_v20 = vadd.f32 %v7567_v42, %v15791_v18  ;;  %v6443_v49 = vpop.permute.xlu1 %6442  ;;  %v6924_v24 = vpop.f32.mrb[33].mxu1  ;;  %v6716_v13 = vsel %vm6692_vm10, %v6691_v11, %v6445_v19 }
 0x9f5   : > { %v6925_v1 = vadd.f32 %v15791_v18, %v6924_v24  ;;  %v6715_v7 = vsel %vm6692_vm10, %v6690_v38, %v6443_v49 }
 0x9f6   : > { %v6996_v36 = vmax.f32 %v6930_v20, 0.0 }
 0x9f7   : > { %v6995_v29 = vmax.f32 %v6925_v1, 0.0  ;;  %v6520_v39 = vpop.permute.xlu0 %6519 }
 0x9f8   : > { %7012 = vst.msk [vmem:[%s15797_s28 + $0x18] sm:$0xff] %vm2291_vm4, %v6996_v36  ;;  %v6740_v2 = vsel %vm6717_vm15, %v6715_v7, %v6520_v39  ;;  %v6518_v22 = vpop.permute.xlu1 %6517 }
 0x9f9   : > { %7011 = vst.msk [vmem:[%s15797_s28 + $0x10] sm:$0xff] %vm2291_vm4, %v6995_v29  ;;  %v6802_v30 = vrot.slane %v6740_v2, 3  ;;  %v6739_v47 = vsel %vm6717_vm15, %v6714_v33, %v6518_v22 }
 0x9fa   : > { %v6801_v31 = vrot.slane %v6739_v47, 3 }
 0x9fc   : > { %v6522_v58 = vpop.permute.xlu1 %6521  ;;  %v6803_v21 = vsel %vm18267_vm8, %v6801_v31, %v6802_v30 }
 0x9fd   : > { %v6741_v34 = vsel %vm6717_vm15, %v6716_v13, %v6522_v58  ;;  %7583 = vmatprep.mubr.msk.f32.mxu1 %vm6812_vm3, %v6803_v21 }
 0x9fe   : > { %v6804_v61 = vrot.slane %v6741_v34, 3 }
 0xa00   : > { %v6805_v0 = vsel %vm18268_vm12, %v6802_v30, %v6804_v61 }
 0xa01   : > { %7584 = vmatmul.mubr.msk.f32.gmra.mrb[44].mxu1 %vm6812_vm3, %v6805_v0 }
 0xa17   : > { %v7570_v5 = vpop.f32.mrb[34].mxu1 }
 0xa18   : > { %v6940_v45 = vadd.f32 %v7570_v5, %v15791_v18  ;;  %v6934_v51 = vpop.f32.mrb[35].mxu1 }
 0xa19   : > { %v6935_v56 = vadd.f32 %v15791_v18, %v6934_v51 }
 0xa1a   : > { %v6998_v60 = vmax.f32 %v6940_v45, 0.0 }
 0xa1b   : > { %v6997_v27 = vmax.f32 %v6935_v56, 0.0 }
 0xa1c   : > { %7014 = vst.msk [vmem:[%s15797_s28 + $0x28] sm:$0xff] %vm2291_vm4, %v6998_v60 }
 0xa1d   : > { %7013 = vst.msk [vmem:[%s15797_s28 + $0x20] sm:$0xff] %vm2291_vm4, %v6997_v27 }
 0xa3f   : > { %v7573_v59 = vpop.f32.mrb[36].mxu1 }
 0xa40   : > { %v6950_v35 = vadd.f32 %v7573_v59, %v15791_v18  ;;  %v6944_v54 = vpop.f32.mrb[37].mxu1 }
 0xa41   : > { %v6945_v15 = vadd.f32 %v15791_v18, %v6944_v54 }
 0xa42   : > { %v7000_v55 = vmax.f32 %v6950_v35, 0.0 }
 0xa43   : > { %v6999_v17 = vmax.f32 %v6945_v15, 0.0 }
 0xa44   : > { %7016 = vst.msk [vmem:[%s15797_s28 + $0x38] sm:$0xff] %vm2291_vm4, %v7000_v55 }
 0xa45   : > { %7015 = vst.msk [vmem:[%s15797_s28 + $0x30] sm:$0xff] %vm2291_vm4, %v6999_v17 }
 0xa6b   : > { %v7576_v52 = vpop.f32.mrb[38].mxu1 }
 0xa6c   : > { %v6960_v14 = vadd.f32 %v7576_v52, %v15791_v18  ;;  %v6954_v26 = vpop.f32.mrb[39].mxu1 }
 0xa6d   : > { %v6955_v53 = vadd.f32 %v15791_v18, %v6954_v26 }
 0xa6e   : > { %v7002_v23 = vmax.f32 %v6960_v14, 0.0 }
 0xa6f   : > { %v7001_v28 = vmax.f32 %v6955_v53, 0.0 }
 0xa70   : > { %7018 = vst.msk [vmem:[%s15797_s28 + $0x48] sm:$0xff] %vm2291_vm4, %v7002_v23 }
 0xa71   : > { %7017 = vst.msk [vmem:[%s15797_s28 + $0x40] sm:$0xff] %vm2291_vm4, %v7001_v28 }
 0xa93   : > { %v7579_v6 = vpop.f32.mrb[40].mxu1 }
 0xa94   : > { %v6970_v43 = vadd.f32 %v7579_v6, %v15791_v18  ;;  %v6964_v9 = vpop.f32.mrb[41].mxu1 }
 0xa95   : > { %v6965_v10 = vadd.f32 %v15791_v18, %v6964_v9 }
 0xa96   : > { %v7004_v16 = vmax.f32 %v6970_v43, 0.0 }
 0xa97   : > { %v7003_v63 = vmax.f32 %v6965_v10, 0.0 }
 0xa98   : > { %7020 = vst.msk [vmem:[%s15797_s28 + $0x58] sm:$0xff] %vm2291_vm4, %v7004_v16 }
 0xa99   : > { %7019 = vst.msk [vmem:[%s15797_s28 + $0x50] sm:$0xff] %vm2291_vm4, %v7003_v63 }
 0xac0   : > { %v7582_v48 = vpop.f32.mrb[42].mxu1 }
 0xac1   : > { %v6980_v3 = vadd.f32 %v7582_v48, %v15791_v18  ;;  %v6974_v57 = vpop.f32.mrb[43].mxu1 }
 0xac2   : > { %v6975_v19 = vadd.f32 %v15791_v18, %v6974_v57 }
 0xac3   : > { %v7006_v42 = vmax.f32 %v6980_v3, 0.0 }
 0xac4   : > { %v7005_v12 = vmax.f32 %v6975_v19, 0.0 }
 0xac5   : > { %7022 = vst.msk [vmem:[%s15797_s28 + $0x68] sm:$0xff] %vm2291_vm4, %v7006_v42 }
 0xac6   : > { %7021 = vst.msk [vmem:[%s15797_s28 + $0x60] sm:$0xff] %vm2291_vm4, %v7005_v12 }
 0xad4   : > { %v7585_v50 = vpop.f32.mrb[44].mxu1 }
 0xad5   : > { %v6990_v20 = vadd.f32 %v7585_v50, %v15791_v18  ;;  %v6984_v49 = vpop.f32.mrb[45].mxu1 }
 0xad6   : > { %v6985_v24 = vadd.f32 %v15791_v18, %v6984_v49 }
 0xad7   : > { %v7008_v4 = vmax.f32 %v6990_v20, 0.0 }
 0xad8   : > { %v7007_v32 = vmax.f32 %v6985_v24, 0.0 }
 0xad9   : > { %7024 = vst.msk [vmem:[%s15797_s28 + $0x78] sm:$0xff] %vm2291_vm4, %v7008_v4 }
 0xada   : > { %7023 = vst.msk [vmem:[%s15797_s28 + $0x70] sm:$0xff] %vm2291_vm4, %v7007_v32 }
 0xadb PF: > { %s18_s9 = sadd.s32 1, %s8081_s9   ;;  %s18269_s27 = smov %s8073_s29 }
 0xadc   : > { %p15_p8 = scmp.ge.s32.totalorder %s18_s9, 6   ;;  %s18270_s28 = smov %s8077_s30 }
 0xadd   : > { %s18271_s29 = smov %s18274_s10  ;;  %s18272_s30 = smov %s18278_s11 }
 0xade   :  { %17 = sbr.rel (!%p15_p8) target bundleno = 3 (0x3), region = 85 }

</bundles_post_ra>
